<compile_context>
chip_gen: v5e
topology: v5e:2x2
jax: 0.10.0
libtpu: 0.0.40
codegen_flags: <defaults>
</compile_context>

<pallas_src>
import jax
import jax.numpy as jnp
from jax.experimental import pallas as pl
from jax.experimental.pallas import tpu as pltpu

INPUT_SIZE = 8 * 8 * 19   # 1216
HIDDEN_SIZE = 8 * 8 * 19  # 1216
OUTPUT_SIZE = 8 * 8       # 64

H_PAD = 1280   # hidden features padded to a lane multiple (128)
N_PAD = 128    # output features padded so the final store is lane-dense


def _round_up(x, m):
    return (x + m - 1) // m * m


def mlp_kernel(x_ref, w1_ref, b1_ref, w2_ref, b2_ref, o_ref):
    # One (tile_m, 1216) f32 batch tile: cast to bf16 in-kernel, two bf16 MXU
    # matmuls with f32 accumulation, biases added in f32, relu in f32,
    # lane-dense (128-wide) f32 store.  Zero-padded hidden/output columns stay
    # inert (relu(0) = 0, zero W2 rows/cols, zero bias padding).
    xb = x_ref[...].astype(jnp.bfloat16)
    h = jnp.dot(xb, w1_ref[...], preferred_element_type=jnp.float32)
    h = jnp.maximum(h + b1_ref[...], 0.0)
    o = jnp.dot(h.astype(jnp.bfloat16), w2_ref[...],
                preferred_element_type=jnp.float32)
    o_ref[...] = (o + b2_ref[...]).astype(o_ref.dtype)


def prepare_params(w1, b1, w2, b2):
    """One-time weight prep: pad hidden/output dims to lane multiples, cast
    weights to bf16 (biases stay f32 and are added in f32).

    w1: (INPUT_SIZE, HIDDEN_SIZE)   b1: (1, HIDDEN_SIZE)
    w2: (HIDDEN_SIZE, OUTPUT_SIZE)  b2: (1, OUTPUT_SIZE)
    (weights already stored transposed relative to PyTorch's (out, in) layout)
    """
    w1p = jnp.zeros((INPUT_SIZE, H_PAD), jnp.float32).at[:, :HIDDEN_SIZE].set(w1)
    b1p = jnp.zeros((1, H_PAD), jnp.float32).at[:, :HIDDEN_SIZE].set(b1)
    w2p = jnp.zeros((H_PAD, N_PAD), jnp.float32).at[:HIDDEN_SIZE, :OUTPUT_SIZE].set(w2)
    b2p = jnp.zeros((1, N_PAD), jnp.float32).at[:, :OUTPUT_SIZE].set(b2)
    return w1p.astype(jnp.bfloat16), b1p, w2p.astype(jnp.bfloat16), b2p


def _choose_tiling(B):
    """Static (Python-int) batch tiling.

    * tile_m is a multiple of 16 (fully packed bf16 sublanes).
    * B <= 32: single tile -> weights are fetched once (weight-DMA bound;
      splitting would just duplicate the ~3.3 MB weight DMA per TensorCore).
    * B  > 32: at least 2 tiles so the "parallel" batch axis can shard across
      v7x's two TensorCores; tiles capped near 512 rows so per-step overhead is
      amortized; padding slack is <= 15 rows per tile.
    """
    B16 = _round_up(max(B, 1), 16)
    if B <= 32:
        return B16, 1
    num_tiles = max(2, pl.cdiv(B16, 512))
    tile_m = _round_up(pl.cdiv(B16, num_tiles), 16)
    return tile_m, num_tiles


@jax.jit
def mymodel_forward(x, w1p, b1p, w2p, b2p):
    # torch: x.view(-1, input_size).  x stays f32/unpadded; the kernel block
    # covers the full 1216-wide feature axis, so no wrapper pad/cast op.
    x2d = x.reshape(-1, INPUT_SIZE)
    B = x2d.shape[0]
    tile_m, num_tiles = _choose_tiling(B)
    rows = tile_m * num_tiles   # rows of matmul work actually issued

    flops = 2 * rows * INPUT_SIZE * H_PAD + 2 * rows * H_PAD * N_PAD
    bytes_accessed = (
        x2d.size * 4 + w1p.size * 2 + w2p.size * 2
        + b1p.size * 4 + b2p.size * 4 + B * N_PAD * 4
    )

    # Weights/biases never change across the batch grid -> single VMEM buffer.
    const_buf = pl.Buffered(1)

    out = pl.pallas_call(
        mlp_kernel,
        out_shape=jax.ShapeDtypeStruct((B, N_PAD), jnp.float32),
        grid_spec=pltpu.PrefetchScalarGridSpec(
            num_scalar_prefetch=0,
            grid=(num_tiles,),
            in_specs=[
                # per-tile batch slab of x (double-buffered behind compute);
                # partial last block is handled by Pallas (masked read/write).
                pl.BlockSpec((tile_m, INPUT_SIZE), lambda i: (i, 0)),
                # VMEM-resident weights & biases (constant index_map).
                pl.BlockSpec((INPUT_SIZE, H_PAD), lambda i: (0, 0),
                             pipeline_mode=const_buf),
                pl.BlockSpec((1, H_PAD), lambda i: (0, 0),
                             pipeline_mode=const_buf),
                pl.BlockSpec((H_PAD, N_PAD), lambda i: (0, 0),
                             pipeline_mode=const_buf),
                pl.BlockSpec((1, N_PAD), lambda i: (0, 0),
                             pipeline_mode=const_buf),
            ],
            out_specs=pl.BlockSpec((tile_m, N_PAD), lambda i: (i, 0)),
        ),
        compiler_params=pltpu.CompilerParams(
            dimension_semantics=("parallel",),   # megacore-shardable batch axis
            vmem_limit_bytes=32 << 20,           # working set ~14 MiB at tile_m=512
        ),
        cost_estimate=pl.CostEstimate(
            flops=flops, transcendentals=0, bytes_accessed=bytes_accessed),
    )(x2d, w1p, b1p, w2p, b2p)

    # Strip the lane padding of the output features (rows already exact).
    return out[:, :OUTPUT_SIZE]


def init_params(key):
    # Deterministic init mimicking nn.Linear's U(-1/sqrt(fan_in), 1/sqrt(fan_in)).
    k1, k2, k3, k4 = jax.random.split(key, 4)
    bound1 = 1.0 / jnp.sqrt(jnp.float32(INPUT_SIZE))
    bound2 = 1.0 / jnp.sqrt(jnp.float32(HIDDEN_SIZE))
    w1 = jax.random.uniform(k1, (INPUT_SIZE, HIDDEN_SIZE), jnp.float32, -bound1, bound1)
    b1 = jax.random.uniform(k2, (1, HIDDEN_SIZE), jnp.float32, -bound1, bound1)
    w2 = jax.random.uniform(k3, (HIDDEN_SIZE, OUTPUT_SIZE), jnp.float32, -bound2, bound2)
    b2 = jax.random.uniform(k4, (1, OUTPUT_SIZE), jnp.float32, -bound2, bound2)
    return w1, b1, w2, b2


if __name__ == "__main__":
    key = jax.random.PRNGKey(0)
    kx, kp = jax.random.split(key)

    w1, b1, w2, b2 = init_params(kp)
    params = prepare_params(w1, b1, w2, b2)   # one-time weight prep (pad + bf16)

    def reference_bf16(x2d):
        # Reference with the same bf16 operand casts (f32 accumulation).
        xb = x2d.astype(jnp.bfloat16)
        h = jnp.dot(xb, w1.astype(jnp.bfloat16),
                    preferred_element_type=jnp.float32) + b1
        h = jnp.maximum(h, 0.0)
        return jnp.dot(h.astype(jnp.bfloat16), w2.astype(jnp.bfloat16),
                       preferred_element_type=jnp.float32) + b2

    # Tiny batch (latency path, grid=(1,)): 2 board tensors (2, 8, 8, 19).
    x_small = jax.random.normal(kx, (2, 8, 8, 19), jnp.float32)
    out_small = jax.block_until_ready(mymodel_forward(x_small, *params))
    assert out_small.shape == (2, OUTPUT_SIZE)
    ref_s = reference_bf16(x_small.reshape(-1, INPUT_SIZE))
    assert jnp.allclose(out_small, ref_s, atol=2e-2, rtol=2e-2), float(
        jnp.max(jnp.abs(out_small - ref_s)))
    ref_f32 = jnp.maximum(x_small.reshape(-1, INPUT_SIZE) @ w1 + b1, 0.0) @ w2 + b2
    assert float(jnp.max(jnp.abs(out_small - ref_f32))) < 0.1

    # Medium batch (grid=(2,), partial boundary tile): 40 board tensors.
    x_med = jax.random.normal(jax.random.fold_in(kx, 1), (40, 8, 8, 19), jnp.float32)
    out_med = jax.block_until_ready(mymodel_forward(x_med, *params))
    assert out_med.shape == (40, OUTPUT_SIZE)
    ref_m = reference_bf16(x_med.reshape(-1, INPUT_SIZE))
    assert jnp.allclose(out_med, ref_m, atol=2e-2, rtol=2e-2), float(
        jnp.max(jnp.abs(out_med - ref_m)))

    print("KERNEL_OK")
</pallas_src>

<mosaic_0001>
module attributes {stable_mosaic.version = 11 : i64} {
  func.func @mlp_kernel(%arg0: i32, %arg1: memref<16x1216xf32, #tpu.memory_space<vmem>>, %arg2: memref<1216x1280xbf16, #tpu.memory_space<vmem>>, %arg3: memref<1x1280xf32, #tpu.memory_space<vmem>>, %arg4: memref<1280x128xbf16, #tpu.memory_space<vmem>>, %arg5: memref<1x128xf32, #tpu.memory_space<vmem>>, %arg6: memref<16x128xf32, #tpu.memory_space<vmem>>) attributes {dimension_semantics = [#tpu.dimension_semantics<parallel>], iteration_bounds = array<i64: 1>, scalar_prefetch = 0 : i64, scratch_operands = 0 : i64, tpu.core_type = #tpu.core_type<tc>, window_params = [{transform_indices = @transform_0, window_bounds = array<i64: 16, 1216>}, {pipeline_mode = #tpu.pipeline_mode<synchronous>, transform_indices = @transform_1, window_bounds = array<i64: 1216, 1280>}, {pipeline_mode = #tpu.pipeline_mode<synchronous>, transform_indices = @transform_2, window_bounds = array<i64: 1, 1280>}, {pipeline_mode = #tpu.pipeline_mode<synchronous>, transform_indices = @transform_3, window_bounds = array<i64: 1280, 128>}, {pipeline_mode = #tpu.pipeline_mode<synchronous>, transform_indices = @transform_4, window_bounds = array<i64: 1, 128>}, {transform_indices = @transform_5, window_bounds = array<i64: 16, 128>}]} {
    %c0 = arith.constant 0 : index
    %c0_0 = arith.constant 0 : index
    %0 = vector.load %arg1[%c0, %c0_0] : memref<16x1216xf32, #tpu.memory_space<vmem>>, vector<16x1216xf32>
    %1 = arith.truncf %0 : vector<16x1216xf32> to vector<16x1216xbf16>
    %c0_1 = arith.constant 0 : index
    %c0_2 = arith.constant 0 : index
    %2 = vector.load %arg2[%c0_1, %c0_2] : memref<1216x1280xbf16, #tpu.memory_space<vmem>>, vector<1216x1280xbf16>
    %cst = arith.constant dense<0.000000e+00> : vector<16x1280xf32>
    %3 = tpu.matmul %1, %2, %cst {dimension_numbers = #tpu.dot_dimension_numbers<[1], [0], [0], [1], [0, 0, 1, 1], [], []>} : vector<16x1216xbf16>, vector<1216x1280xbf16>, vector<16x1280xf32> -> vector<16x1280xf32>
    %c0_3 = arith.constant 0 : index
    %c0_4 = arith.constant 0 : index
    %4 = vector.load %arg3[%c0_3, %c0_4] : memref<1x1280xf32, #tpu.memory_space<vmem>>, vector<1x1280xf32>
    %5 = vector.broadcast %4 : vector<1x1280xf32> to vector<16x1280xf32>
    %6 = arith.addf %3, %5 : vector<16x1280xf32>
    %cst_5 = arith.constant 0.000000e+00 : f32
    %7 = vector.broadcast %cst_5 : f32 to vector<16x1280xf32>
    %8 = arith.maximumf %6, %7 : vector<16x1280xf32>
    %9 = arith.truncf %8 : vector<16x1280xf32> to vector<16x1280xbf16>
    %c0_6 = arith.constant 0 : index
    %c0_7 = arith.constant 0 : index
    %10 = vector.load %arg4[%c0_6, %c0_7] : memref<1280x128xbf16, #tpu.memory_space<vmem>>, vector<1280x128xbf16>
    %cst_8 = arith.constant dense<0.000000e+00> : vector<16x128xf32>
    %11 = tpu.matmul %9, %10, %cst_8 {dimension_numbers = #tpu.dot_dimension_numbers<[1], [0], [0], [1], [0, 0, 1, 1], [], []>} : vector<16x1280xbf16>, vector<1280x128xbf16>, vector<16x128xf32> -> vector<16x128xf32>
    %c0_9 = arith.constant 0 : index
    %c0_10 = arith.constant 0 : index
    %12 = vector.load %arg5[%c0_9, %c0_10] : memref<1x128xf32, #tpu.memory_space<vmem>>, vector<1x128xf32>
    %13 = vector.broadcast %12 : vector<1x128xf32> to vector<16x128xf32>
    %14 = arith.addf %11, %13 : vector<16x128xf32>
    %c0_11 = arith.constant 0 : index
    %c0_12 = arith.constant 0 : index
    %15 = vector.load %arg6[%c0_11, %c0_12] : memref<16x128xf32, #tpu.memory_space<vmem>>, vector<16x128xf32>
    tpu.vector_store %arg6[%c0_11, %c0_12], %14 {strides = array<i32>} : memref<16x128xf32, #tpu.memory_space<vmem>>, vector<16x128xf32>,
    return
  }
  func.func @transform_0(%arg0: i32) -> (i32, i32) {
    %c0_i32 = arith.constant 0 : i32
    %c0_i32_0 = arith.constant 0 : i32
    return %arg0, %c0_i32 : i32, i32
  }
  func.func @transform_1(%arg0: i32) -> (i32, i32) {
    %c0_i32 = arith.constant 0 : i32
    %c0_i32_0 = arith.constant 0 : i32
    %c0_i32_1 = arith.constant 0 : i32
    return %c0_i32, %c0_i32_0 : i32, i32
  }
  func.func @transform_2(%arg0: i32) -> (i32, i32) {
    %c0_i32 = arith.constant 0 : i32
    %c0_i32_0 = arith.constant 0 : i32
    %c0_i32_1 = arith.constant 0 : i32
    return %c0_i32, %c0_i32_0 : i32, i32
  }
  func.func @transform_3(%arg0: i32) -> (i32, i32) {
    %c0_i32 = arith.constant 0 : i32
    %c0_i32_0 = arith.constant 0 : i32
    %c0_i32_1 = arith.constant 0 : i32
    return %c0_i32, %c0_i32_0 : i32, i32
  }
  func.func @transform_4(%arg0: i32) -> (i32, i32) {
    %c0_i32 = arith.constant 0 : i32
    %c0_i32_0 = arith.constant 0 : i32
    %c0_i32_1 = arith.constant 0 : i32
    return %c0_i32, %c0_i32_0 : i32, i32
  }
  func.func @transform_5(%arg0: i32) -> (i32, i32) {
    %c0_i32 = arith.constant 0 : i32
    %c0_i32_0 = arith.constant 0 : i32
    return %arg0, %c0_i32 : i32, i32
  }
}

</mosaic_0001>

<bundles_post_ra>
// kernel: mymodel_forward.1
= control target key start
LH: loop header
LB: loop body
LE: loop exit
PB: predicated region body
PF: predicated region fallthrough
CT: control target
= control target key end

     0   :  { %10 = vsyncpa [#allocation3], 0  ;;  %s12006_s0 = inlined_call_operand.vmem [shape: f32[2,1216], index: 0, kind: input, shape index: {}]   ;;  %s12007_s1 = inlined_call_operand.hbm [shape: bf16[1216,1280], index: 1, kind: input, shape index: {}]   ;;  %s12008_s2 = inlined_call_operand.hbm [shape: f32[1,1280], index: 2, kind: input, shape index: {}]   ;;  %s12009_s3 = inlined_call_operand.hbm [shape: bf16[1280,128], index: 3, kind: input, shape index: {}]   ;;  %s12010_s4 = inlined_call_operand.hbm [shape: f32[1,128], index: 4, kind: input, shape index: {}]   ;;  %s12011_s5 = inlined_call_operand.hbm [shape: f32[2,128], index: 5, kind: output, shape index: {}]  }
   0x1   :  { %11 = vsyncpa [#allocation6], 0 }
   0x2   :  { %12 = vsyncpa [#allocation9], 0  ;;  %s34_s20 = sshll.u32 %s12008_s2, 4  ;;  %s35_s20 = int_to_ptr.hbm [resolvable:$true] %s34_s20 }
   0x3   :  { %13 = vsyncpa [#allocation4], 0  ;;  %s11389_s21 = smov [#allocation5]   ;;  %s20_s25 = sshll.u32 %s12007_s1, 4  ;;  %s21_s25 = int_to_ptr.hbm [resolvable:$true] %s20_s25 }
   0x4   :  { %s36_s22 = sshll.u32 %s11389_s21, 4  ;;  %s11390_s26 = smov [#allocation2]   ;;  %s37_s22 = int_to_ptr.vmem [resolvable:$true] %s36_s22 }
   0x5   :  { %39 = dma.hbm_to_vmem [thread:$0]  %s35_s20, 160, %s37_s22, [#allocation6]  }
   0x6   :  { %s22_s27 = sshll.u32 %s11390_s26, 4  ;;  %s11391_s28 = smov 640   ;;  %s23_s27 = int_to_ptr.vmem [resolvable:$true] %s22_s27 }
   0x7   :  { %s11392_s29 = smov 40   ;;  %s44_s2 = sshll.u32 %s12009_s3, 4  ;;  %s45_s2 = int_to_ptr.hbm [resolvable:$true] %s44_s2 }
   0x8   :  { %28 = dma.hbm_to_vmem [thread:$0]  %s21_s25, 97280, %s23_s27, [#allocation3], %s11391_s28, %s11391_s28, %s11392_s29  }
   0x9   :  { %s11393_s7 = smov [#allocation7]   ;;  %s58_s1 = sshll.u32 %s12010_s4, 4  ;;  %s59_s1 = int_to_ptr.hbm [resolvable:$true] %s58_s1 }
   0xa   :  { %s46_s8 = sshll.u32 %s11393_s7, 4  ;;  %s11394_s11 = smov 64   ;;  %s47_s8 = int_to_ptr.vmem [resolvable:$true] %s46_s8 }
   0xb   :  { %s11395_s12 = smov 4   ;;  %s11396_s13 = smov [#allocation8]  }
   0xc   :  { %52 = dma.hbm_to_vmem [thread:$0]  %s45_s2, 10240, %s47_s8, [#allocation6], %s11394_s11, %s11394_s11, %s11395_s12  }
   0xd   :  { %s60_s14 = sshll.u32 %s11396_s13, 4  ;;  %s61_s14 = int_to_ptr.vmem [resolvable:$true] %s60_s14 }
   0xe   :  { %63 = dma.hbm_to_vmem [thread:$0]  %s59_s1, 16, %s61_s14, [#allocation9]  }
   0xf   :  { %11381 = dma.done.wait [#allocation3], 97280  }
  0x10   :  { %11382 = vsyncadd [#allocation3], 4294870016 }
  0x11   :  { %11383 = dma.done.wait [#allocation6], 10400  }
  0x12   :  { %11384 = vsyncadd [#allocation6], 4294956896 }
  0x13   :  { %11385 = dma.done.wait [#allocation9], 16  }
  0x14   :  { %11386 = vsyncadd [#allocation9], 4294967280  ;;  %v7317_v0 = vld [vmem:[#allocation2 + $0x230] sm:$0xf]  ;;  %v10480_v1 = vld [vmem:[#allocation2 + $0x254] sm:$0xf0] }
  0x15   :  { %v7637_v2 = vld [vmem:[#allocation2 + $0x4b0] sm:$0xf]  ;;  %v7318_v3 = vor.u32 %v10480_v1, %v7317_v0  ;;  %v10560_v4 = vld [vmem:[#allocation2 + $0x4d4] sm:$0xf0]  ;;  %v7277_v11 = vld [vmem:[#allocation2 + $0x1e0] sm:$0xf] }
  0x16   :  { %v7957_v5 = vld [vmem:[#allocation2 + $0x730] sm:$0xf]  ;;  %v10640_v6 = vld [vmem:[#allocation2 + $0x754] sm:$0xf0]  ;;  %v7638_v7 = vor.u32 %v10560_v4, %v7637_v2  ;;  %v10470_v13 = vld [vmem:[#allocation2 + $0x204] sm:$0xf0] }
  0x17   :  { %v7958_v8 = vor.u32 %v10640_v6, %v7957_v5  ;;  %v8277_v9 = vld [vmem:[#allocation2 + $0x9b0] sm:$0xf]  ;;  %v10720_v10 = vld [vmem:[#allocation2 + $0x9d4] sm:$0xf0]  ;;  %4798 = vmatpush.bf16.msra.mxu0 %v7318_v3  ;;  %v7597_v14 = vld [vmem:[#allocation2 + $0x460] sm:$0xf]  ;;  %v7278_v16 = vor.u32 %v10470_v13, %v7277_v11 }
  0x18   :  { %v8278_v12 = vor.u32 %v10720_v10, %v8277_v9  ;;  %v10550_v15 = vld [vmem:[#allocation2 + $0x484] sm:$0xf0]  ;;  %4812 = vmatpush.bf16.msra.mxu1 %v7638_v7  ;;  %v7917_v18 = vld [vmem:[#allocation2 + $0x6e0] sm:$0xf]  ;;  %v7237_v23 = vld [vmem:[#allocation2 + $0x190] sm:$0xf] }
  0x19   :  { %4826 = vmatpush.bf16.msra.mxu2 %v7958_v8  ;;  %v7598_v17 = vor.u32 %v10550_v15, %v7597_v14  ;;  %v10630_v19 = vld [vmem:[#allocation2 + $0x704] sm:$0xf0]  ;;  %v8237_v20 = vld [vmem:[#allocation2 + $0x960] sm:$0xf]  ;;  %v10460_v24 = vld [vmem:[#allocation2 + $0x1b4] sm:$0xf0] }
  0x1a   :  { %4840 = vmatpush.bf16.msra.mxu3 %v8278_v12  ;;  %v7918_v21 = vor.u32 %v10630_v19, %v7917_v18  ;;  %v10710_v22 = vld [vmem:[#allocation2 + $0x984] sm:$0xf0]  ;;  %v7557_v26 = vld [vmem:[#allocation2 + $0x410] sm:$0xf]  ;;  %v10540_v27 = vld [vmem:[#allocation2 + $0x434] sm:$0xf0]  ;;  %v7238_v29 = vor.u32 %v10460_v24, %v7237_v23 }
  0x1b   :  { %v8238_v25 = vor.u32 %v10710_v22, %v8237_v20  ;;  %v7877_v28 = vld [vmem:[#allocation2 + $0x690] sm:$0xf]  ;;  %4799 = vmatpush.bf16.msra.mxu0 %v7278_v16  ;;  %v10620_v30 = vld [vmem:[#allocation2 + $0x6b4] sm:$0xf0]  ;;  %v7558_v33 = vor.u32 %v10540_v27, %v7557_v26  ;;  %v7197_v35 = vld [vmem:[#allocation2 + $0x140] sm:$0xf] }
  0x1c   :  { %v8197_v31 = vld [vmem:[#allocation2 + $0x910] sm:$0xf]  ;;  %v10700_v32 = vld [vmem:[#allocation2 + $0x934] sm:$0xf0]  ;;  %4813 = vmatpush.bf16.msra.mxu1 %v7598_v17  ;;  %v7878_v34 = vor.u32 %v10620_v30, %v7877_v28  ;;  %v10450_v36 = vld [vmem:[#allocation2 + $0x164] sm:$0xf0] }
  0x1d   :  { %4827 = vmatpush.bf16.msra.mxu2 %v7918_v21  ;;  %v7517_v37 = vld [vmem:[#allocation2 + $0x3c0] sm:$0xf]  ;;  %v8198_v38 = vor.u32 %v10700_v32, %v8197_v31  ;;  %v10530_v39 = vld [vmem:[#allocation2 + $0x3e4] sm:$0xf0]  ;;  %v7198_v44 = vor.u32 %v10450_v36, %v7197_v35  ;;  %v7157_v47 = vld [vmem:[#allocation2 + $0xf0] sm:$0xf] }
  0x1e   :  { %4841 = vmatpush.bf16.msra.mxu3 %v8238_v25  ;;  %v7837_v40 = vld [vmem:[#allocation2 + $0x640] sm:$0xf]  ;;  %v10610_v41 = vld [vmem:[#allocation2 + $0x664] sm:$0xf0]  ;;  %v7518_v45 = vor.u32 %v10530_v39, %v7517_v37  ;;  %v10440_v48 = vld [vmem:[#allocation2 + $0x114] sm:$0xf0] }
  0x1f   :  { %v8157_v42 = vld [vmem:[#allocation2 + $0x8c0] sm:$0xf]  ;;  %v10690_v43 = vld [vmem:[#allocation2 + $0x8e4] sm:$0xf0]  ;;  %4800 = vmatpush.bf16.msra.mxu0 %v7238_v29  ;;  %v7838_v46 = vor.u32 %v10610_v41, %v7837_v40  ;;  %v7477_v49 = vld [vmem:[#allocation2 + $0x370] sm:$0xf]  ;;  %v7158_v56 = vor.u32 %v10440_v48, %v7157_v47 }
  0x20   :  { %4814 = vmatpush.bf16.msra.mxu1 %v7558_v33  ;;  %v8158_v50 = vor.u32 %v10690_v43, %v8157_v42  ;;  %v10520_v51 = vld [vmem:[#allocation2 + $0x394] sm:$0xf0]  ;;  %v7797_v52 = vld [vmem:[#allocation2 + $0x5f0] sm:$0xf]  ;;  %v7117_v59 = vld [vmem:[#allocation2 + $0xa0] sm:$0xf] }
  0x21   :  { %4828 = vmatpush.bf16.msra.mxu2 %v7878_v34  ;;  %v10600_v53 = vld [vmem:[#allocation2 + $0x614] sm:$0xf0]  ;;  %v8117_v54 = vld [vmem:[#allocation2 + $0x870] sm:$0xf]  ;;  %v7478_v57 = vor.u32 %v10520_v51, %v7477_v49  ;;  %v10430_v60 = vld [vmem:[#allocation2 + $0xc4] sm:$0xf0] }
  0x22   :  { %4842 = vmatpush.bf16.msra.mxu3 %v8198_v38  ;;  %v10680_v55 = vld [vmem:[#allocation2 + $0x894] sm:$0xf0]  ;;  %v7798_v58 = vor.u32 %v10600_v53, %v7797_v52  ;;  %v7437_v61 = vld [vmem:[#allocation2 + $0x320] sm:$0xf]  ;;  %v10510_v63 = vld [vmem:[#allocation2 + $0x344] sm:$0xf0]  ;;  %v7118_v4 = vor.u32 %v10430_v60, %v7117_v59 }
  0x23   :  { %4801 = vmatpush.bf16.msra.mxu0 %v7198_v44  ;;  %v8118_v62 = vor.u32 %v10680_v55, %v8117_v54  ;;  %v7757_v0 = vld [vmem:[#allocation2 + $0x5a0] sm:$0xf]  ;;  %v10590_v1 = vld [vmem:[#allocation2 + $0x5c4] sm:$0xf0]  ;;  %v7438_v5 = vor.u32 %v10510_v63, %v7437_v61  ;;  %v7077_v7 = vld [vmem:[#allocation2 + $0x50] sm:$0xf] }
  0x24   :  { %4815 = vmatpush.bf16.msra.mxu1 %v7518_v45  ;;  %v8077_v2 = vld [vmem:[#allocation2 + $0x820] sm:$0xf]  ;;  %v10670_v3 = vld [vmem:[#allocation2 + $0x844] sm:$0xf0]  ;;  %v7758_v6 = vor.u32 %v10590_v1, %v7757_v0  ;;  %v10420_v8 = vld [vmem:[#allocation2 + $0x74] sm:$0xf0] }
  0x25   :  { %4829 = vmatpush.bf16.msra.mxu2 %v7838_v46  ;;  %v7397_v9 = vld [vmem:[#allocation2 + $0x2d0] sm:$0xf]  ;;  %v8078_v10 = vor.u32 %v10670_v3, %v8077_v2  ;;  %v10500_v11 = vld [vmem:[#allocation2 + $0x2f4] sm:$0xf0]  ;;  %v7078_v16 = vor.u32 %v10420_v8, %v7077_v7  ;;  %v7037_v17 = vld [vmem:[#allocation2] sm:$0xf] }
  0x26   :  { %4843 = vmatpush.bf16.msra.mxu3 %v8158_v50  ;;  %v7717_v12 = vld [vmem:[#allocation2 + $0x550] sm:$0xf]  ;;  %v10580_v13 = vld [vmem:[#allocation2 + $0x574] sm:$0xf0]  ;;  %v10410_v18 = vld [vmem:[#allocation2 + $0x24] sm:$0xf0]  ;;  %v7398_v19 = vor.u32 %v10500_v11, %v7397_v9 }
  0x27   :  { %4802 = vmatpush.bf16.msra.mxu0 %v7158_v56  ;;  %v8037_v14 = vld [vmem:[#allocation2 + $0x7d0] sm:$0xf]  ;;  %v10660_v15 = vld [vmem:[#allocation2 + $0x7f4] sm:$0xf0]  ;;  %v7718_v20 = vor.u32 %v10580_v13, %v7717_v12  ;;  %v7357_v21 = vld [vmem:[#allocation2 + $0x280] sm:$0xf]  ;;  %v7038_v31 = vor.u32 %v10410_v18, %v7037_v17 }
  0x28   :  { %4816 = vmatpush.bf16.msra.mxu1 %v7478_v57  ;;  %v10490_v22 = vld [vmem:[#allocation2 + $0x2a4] sm:$0xf0]  ;;  %v7677_v23 = vld [vmem:[#allocation2 + $0x500] sm:$0xf]  ;;  %v8038_v24 = vor.u32 %v10660_v15, %v8037_v14  ;;  %v8597_v28 = vld [vmem:[#allocation2 + $0xc30] sm:$0xf] }
  0x29   :  { %4830 = vmatpush.bf16.msra.mxu2 %v7798_v58  ;;  %v10570_v25 = vld [vmem:[#allocation2 + $0x524] sm:$0xf0]  ;;  %v7997_v26 = vld [vmem:[#allocation2 + $0x780] sm:$0xf]  ;;  %v10800_v29 = vld [vmem:[#allocation2 + $0xc54] sm:$0xf0]  ;;  %v7358_v35 = vor.u32 %v10490_v22, %v7357_v21 }
  0x2a   :  { %4844 = vmatpush.bf16.msra.mxu3 %v8118_v62  ;;  %v10650_v27 = vld [vmem:[#allocation2 + $0x7a4] sm:$0xf0]  ;;  %v8917_v30 = vld [vmem:[#allocation2 + $0xeb0] sm:$0xf]  ;;  %v10880_v32 = vld [vmem:[#allocation2 + $0xed4] sm:$0xf0]  ;;  %v7678_v36 = vor.u32 %v10570_v25, %v7677_v23  ;;  %v8598_v40 = vor.u32 %v10800_v29, %v8597_v28 }
  0x2b   :  { %4803 = vmatpush.bf16.msra.mxu0 %v7118_v4  ;;  %v9237_v33 = vld [vmem:[#allocation2 + $0x1130] sm:$0xf]  ;;  %v10960_v34 = vld [vmem:[#allocation2 + $0x1154] sm:$0xf0]  ;;  %v7998_v39 = vor.u32 %v10650_v27, %v7997_v26  ;;  %v8557_v41 = vld [vmem:[#allocation2 + $0xbe0] sm:$0xf]  ;;  %v8918_v43 = vor.u32 %v10880_v32, %v8917_v30 }
  0x2c   :  { %4817 = vmatpush.bf16.msra.mxu1 %v7438_v5  ;;  %v9557_v37 = vld [vmem:[#allocation2 + $0x13b0] sm:$0xf]  ;;  %v11040_v38 = vld [vmem:[#allocation2 + $0x13d4] sm:$0xf0]  ;;  %v10790_v42 = vld [vmem:[#allocation2 + $0xc04] sm:$0xf0]  ;;  %v9238_v44 = vor.u32 %v10960_v34, %v9237_v33 }
  0x2d   :  { %4831 = vmatpush.bf16.msra.mxu2 %v7758_v6  ;;  %v8877_v45 = vld [vmem:[#allocation2 + $0xe60] sm:$0xf]  ;;  %v10870_v46 = vld [vmem:[#allocation2 + $0xe84] sm:$0xf0]  ;;  %v9558_v48 = vor.u32 %v11040_v38, %v9557_v37  ;;  %v8517_v52 = vld [vmem:[#allocation2 + $0xb90] sm:$0xf]  ;;  %v8558_v56 = vor.u32 %v10790_v42, %v8557_v41 }
  0x2e   :  { %4845 = vmatpush.bf16.msra.mxu3 %v8078_v10  ;;  %v9197_v47 = vld [vmem:[#allocation2 + $0x10e0] sm:$0xf]  ;;  %v10950_v49 = vld [vmem:[#allocation2 + $0x1104] sm:$0xf0]  ;;  %v10780_v53 = vld [vmem:[#allocation2 + $0xbb4] sm:$0xf0]  ;;  %v8878_v62 = vor.u32 %v10870_v46, %v8877_v45 }
  0x2f   :  { %4804 = vmatpush.bf16.msra.mxu0 %v7078_v16  ;;  %v9517_v50 = vld [vmem:[#allocation2 + $0x1360] sm:$0xf]  ;;  %v11030_v51 = vld [vmem:[#allocation2 + $0x1384] sm:$0xf0]  ;;  %v81_v54 = vld [vmem:[%s12006_s0] sm:$0xff]  ;;  %v9198_v63 = vor.u32 %v10950_v49, %v9197_v47  ;;  %v8518_v9 = vor.u32 %v10780_v53, %v8517_v52  ;;  %vm4794_vm0 = vcmask 523264  }
  0x30   :  { %4818 = vmatpush.bf16.msra.mxu1 %v7398_v19  ;;  %v84_v55 = vld [vmem:[%s12006_s0 + $0x14] sm:$0xff]  ;;  %v10860_v58 = vld [vmem:[#allocation2 + $0xe34] sm:$0xf0]  ;;  %v87_v61 = vld [vmem:[%s12006_s0 + $0x28] sm:$0xff]  ;;  %129 = vst [vmem:[#allocation1] ss:$4 sm:$0xff] %v81_v54  ;;  %v9518_v3 = vor.u32 %v11030_v51, %v9517_v50 }
  0x31   :  { %4832 = vmatpush.bf16.msra.mxu2 %v7718_v20  ;;  %v8837_v57 = vld [vmem:[#allocation2 + $0xe10] sm:$0xf]  ;;  %v10940_v60 = vld [vmem:[#allocation2 + $0x10b4] sm:$0xf0]  ;;  %v82_v1 = vld [vmem:[%s12006_s0 + $0x8] sm:$0xff] }
  0x32   :  { %4846 = vmatpush.bf16.msra.mxu3 %v8038_v24  ;;  %v9157_v59 = vld [vmem:[#allocation2 + $0x1090] sm:$0xf]  ;;  %v90_v2 = vld [vmem:[%s12006_s0 + $0x3c] sm:$0xff]  ;;  %131 = vst [vmem:[#allocation1 + $0x1] ss:$4 sm:$0xff] %v84_v55  ;;  %v88_v8 = vld [vmem:[%s12006_s0 + $0x30] sm:$0xff]  ;;  %v8838_v13 = vor.u32 %v10860_v58, %v8837_v57 }
  0x33   :  { %4805 = vmatpush.bf16.msra.mxu0 %v7038_v31  ;;  %v9477_v0 = vld [vmem:[#allocation2 + $0x1310] sm:$0xf]  ;;  %v11020_v4 = vld [vmem:[#allocation2 + $0x1334] sm:$0xf0]  ;;  %133 = vst [vmem:[#allocation1 + $0x2] ss:$4 sm:$0xff] %v87_v61  ;;  %v9158_v14 = vor.u32 %v10940_v60, %v9157_v59 }
  0x34   :  { %4819 = vmatpush.bf16.msra.mxu1 %v7358_v35  ;;  %v85_v5 = vld [vmem:[%s12006_s0 + $0x1c] sm:$0xff]  ;;  %v8477_v6 = vld [vmem:[#allocation2 + $0xb40] sm:$0xf]  ;;  %v10770_v7 = vld [vmem:[#allocation2 + $0xb64] sm:$0xf0]  ;;  %v9478_v17 = vor.u32 %v11020_v4, %v9477_v0 }
  0x35   :  { %4833 = vmatpush.bf16.msra.mxu2 %v7678_v36  ;;  %135 = vst [vmem:[#allocation1 + $0x3] ss:$4 sm:$0xff] %v90_v2  ;;  %v8797_v10 = vld [vmem:[#allocation2 + $0xdc0] sm:$0xf]  ;;  %v10850_v11 = vld [vmem:[#allocation2 + $0xde4] sm:$0xf0]  ;;  %v8478_v22 = vor.u32 %v10770_v7, %v8477_v6 }
  0x36   :  { %4847 = vmatpush.bf16.msra.mxu3 %v7998_v39  ;;  %v91_v12 = vld [vmem:[%s12006_s0 + $0x44] sm:$0xff]  ;;  %137 = vst [vmem:[#allocation1 + $0x20] ss:$4 sm:$0xff] %v82_v1  ;;  %v10930_v16 = vld [vmem:[#allocation2 + $0x1064] sm:$0xf0]  ;;  %v8798_v27 = vor.u32 %v10850_v11, %v8797_v10  ;;  %v99_v47 = vld [vmem:[%s12006_s0 + $0x78] sm:$0xff] }
  0x37   :  { %4854 = vmatpush.bf16.msrb.mxu0 %v8598_v40  ;;  %v9117_v15 = vld [vmem:[#allocation2 + $0x1040] sm:$0xf]  ;;  %139 = vst [vmem:[#allocation1 + $0x21] ss:$4 sm:$0xff] %v85_v5  ;;  %v11010_v19 = vld [vmem:[#allocation2 + $0x12e4] sm:$0xf0] }
  0x38   :  { %4868 = vmatpush.bf16.msrb.mxu1 %v8918_v43  ;;  %v9437_v18 = vld [vmem:[#allocation2 + $0x12c0] sm:$0xf]  ;;  %141 = vst [vmem:[#allocation1 + $0x22] ss:$4 sm:$0xff] %v88_v8  ;;  %v8437_v20 = vld [vmem:[#allocation2 + $0xaf0] sm:$0xf]  ;;  %v9118_v28 = vor.u32 %v10930_v16, %v9117_v15 }
  0x39   :  { %4882 = vmatpush.bf16.msrb.mxu2 %v9238_v44  ;;  %143 = vst [vmem:[#allocation1 + $0x23] ss:$4 sm:$0xff] %v91_v12  ;;  %v10760_v21 = vld [vmem:[#allocation2 + $0xb14] sm:$0xf0]  ;;  %v8757_v23 = vld [vmem:[#allocation2 + $0xd70] sm:$0xf]  ;;  %v9438_v33 = vor.u32 %v11010_v19, %v9437_v18 }
  0x3a   :  { %4896 = vmatpush.bf16.msrb.mxu3 %v9558_v48  ;;  %v10840_v24 = vld [vmem:[#allocation2 + $0xd94] sm:$0xf0]  ;;  %v9077_v25 = vld [vmem:[#allocation2 + $0xff0] sm:$0xf]  ;;  %v83_v31 = vld [vmem:[%s12006_s0 + $0x10] sm:$0xf]  ;;  %v8438_v42 = vor.u32 %v10760_v21, %v8437_v20 }
  0x3b   :  { %4855 = vmatpush.bf16.msrb.mxu0 %v8558_v56  ;;  %v10920_v26 = vld [vmem:[#allocation2 + $0x1014] sm:$0xf0]  ;;  %v9397_v29 = vld [vmem:[#allocation2 + $0x1270] sm:$0xf]  ;;  %v86_v32 = vld [vmem:[%s12006_s0 + $0x24] sm:$0xf]  ;;  %v8758_v48 = vor.u32 %v10840_v24, %v8757_v23 }
  0x3c   :  { %4869 = vmatpush.bf16.msrb.mxu1 %v8878_v62  ;;  %v11000_v30 = vld [vmem:[#allocation2 + $0x1294] sm:$0xf0]  ;;  %v11474_v35 = vld.sshfl [vmem:[#allocation1 + $0x10] sm:$0xff pattern:$0x73625140]  ;;  %v96_v41 = vld [vmem:[%s12006_s0 + $0x64] sm:$0xff]  ;;  %v9078_v49 = vor.u32 %v10920_v26, %v9077_v25 }
  0x3d   :  { %4883 = vmatpush.bf16.msrb.mxu2 %v9198_v63  ;;  %v11472_v34 = vld.sshfl [vmem:[#allocation1] sm:$0xff pattern:$0x73625140]  ;;  %v93_v36 = vld [vmem:[%s12006_s0 + $0x50] sm:$0xff]  ;;  %v8397_v39 = vld [vmem:[#allocation2 + $0xaa0] sm:$0xf]  ;;  %v9398_v55 = vor.u32 %v11000_v30, %v9397_v29 }
  0x3e   :  { %4897 = vmatpush.bf16.msrb.mxu3 %v9518_v3  ;;  %v11479_v37 = vld.sshfl [vmem:[#allocation1 + $0x8] sm:$0xff pattern:$0x73625140]  ;;  %v11481_v38 = vld.sshfl [vmem:[#allocation1 + $0x18] sm:$0xff pattern:$0x73625140] }
  0x3f   :  { %4856 = vmatpush.bf16.msrb.mxu0 %v8518_v9  ;;  %v10750_v40 = vld [vmem:[#allocation2 + $0xac4] sm:$0xf0]  ;;  %152 = vst [vmem:[#allocation1] ss:$4 sm:$0xff] %v83_v31  ;;  %v8717_v43 = vld [vmem:[#allocation2 + $0xd20] sm:$0xf] }
  0x40   :  { %4870 = vmatpush.bf16.msrb.mxu1 %v8838_v13  ;;  %v10830_v44 = vld [vmem:[#allocation2 + $0xd44] sm:$0xf0]  ;;  %v9037_v45 = vld [vmem:[#allocation2 + $0xfa0] sm:$0xf]  ;;  %153 = vst [vmem:[#allocation1 + $0x1] ss:$4 sm:$0xff] %v86_v32  ;;  %v8398_v60 = vor.u32 %v10750_v40, %v8397_v39 }
  0x41   :  { %4884 = vmatpush.bf16.msrb.mxu2 %v9158_v14  ;;  %v10910_v46 = vld [vmem:[#allocation2 + $0xfc4] sm:$0xf0]  ;;  %v9357_v50 = vld [vmem:[#allocation2 + $0x1220] sm:$0xf]  ;;  %v89_v58 = vld [vmem:[%s12006_s0 + $0x38] sm:$0xf]  ;;  %v8718_v63 = vor.u32 %v10830_v44, %v8717_v43 }
  0x42   :  { %4898 = vmatpush.bf16.msrb.mxu3 %v9478_v17  ;;  %v10990_v51 = vld [vmem:[#allocation2 + $0x1244] sm:$0xf0]  ;;  %v11492_v53 = vld.sshfl [vmem:[#allocation1 + $0x20] sm:$0xff pattern:$0x73625140]  ;;  %v9038_v0 = vor.u32 %v10910_v46, %v9037_v45 }
  0x43   :  { %4857 = vmatpush.bf16.msrb.mxu0 %v8478_v22  ;;  %v102_v52 = vld [vmem:[%s12006_s0 + $0x8c] sm:$0xff]  ;;  %v11498_v57 = vld.sshfl [vmem:[#allocation1 + $0x38] sm:$0xff pattern:$0x73625140]  ;;  %v10740_v62 = vld [vmem:[#allocation2 + $0xa74] sm:$0xf0]  ;;  %v9358_v3 = vor.u32 %v10990_v51, %v9357_v50 }
  0x44   :  { %4871 = vmatpush.bf16.msrb.mxu1 %v8798_v27  ;;  %v11494_v54 = vld.sshfl [vmem:[#allocation1 + $0x28] sm:$0xff pattern:$0x73625140]  ;;  %v11496_v56 = vld.sshfl [vmem:[#allocation1 + $0x30] sm:$0xff pattern:$0x73625140] }
  0x45   :  { %4885 = vmatpush.bf16.msrb.mxu2 %v9118_v28  ;;  %156 = vst [vmem:[#allocation1 + $0x20] ss:$4 sm:$0xff] %v93_v36  ;;  %v92_v59 = vld [vmem:[%s12006_s0 + $0x4c] sm:$0xf]  ;;  %v8357_v61 = vld [vmem:[#allocation2 + $0xa50] sm:$0xf] }
  0x46   :  { %4899 = vmatpush.bf16.msrb.mxu3 %v9438_v33  ;;  %157 = vst [vmem:[#allocation1 + $0x21] ss:$4 sm:$0xff] %v96_v41  ;;  %v8677_v1 = vld [vmem:[#allocation2 + $0xcd0] sm:$0xf]  ;;  %v10820_v2 = vld [vmem:[#allocation2 + $0xcf4] sm:$0xf0]  ;;  %v8358_v8 = vor.u32 %v10740_v62, %v8357_v61 }
  0x47   :  { %4858 = vmatpush.bf16.msrb.mxu0 %v8438_v42  ;;  %158 = vst [vmem:[#allocation1 + $0x22] ss:$4 sm:$0xff] %v99_v47  ;;  %v8997_v4 = vld [vmem:[#allocation2 + $0xf50] sm:$0xf]  ;;  %v10900_v5 = vld [vmem:[#allocation2 + $0xf74] sm:$0xf0]  ;;  %v8678_v9 = vor.u32 %v10820_v2, %v8677_v1 }
  0x48   :  { %4872 = vmatpush.bf16.msrb.mxu1 %v8758_v48  ;;  %159 = vst [vmem:[#allocation1 + $0x23] ss:$4 sm:$0xff] %v102_v52  ;;  %v9317_v6 = vld [vmem:[#allocation2 + $0x11d0] sm:$0xf]  ;;  %v10980_v7 = vld [vmem:[#allocation2 + $0x11f4] sm:$0xf0]  ;;  %v8998_v10 = vor.u32 %v10900_v5, %v8997_v4 }
  0x49   :  { %4886 = vmatpush.bf16.msrb.mxu2 %v9078_v49  ;;  %154 = vst [vmem:[#allocation1 + $0x2] ss:$4 sm:$0xff] %v89_v58  ;;  %v8317_v11 = vld [vmem:[#allocation2 + $0xa00] sm:$0xf]  ;;  %v10730_v12 = vld [vmem:[#allocation2 + $0xa24] sm:$0xf0]  ;;  %v9318_v13 = vor.u32 %v10980_v7, %v9317_v6 }
  0x4a   :  { %4900 = vmatpush.bf16.msrb.mxu3 %v9398_v55  ;;  %155 = vst [vmem:[#allocation1 + $0x3] ss:$4 sm:$0xff] %v92_v59  ;;  %v8637_v14 = vld [vmem:[#allocation2 + $0xc80] sm:$0xf]  ;;  %v10810_v15 = vld [vmem:[#allocation2 + $0xca4] sm:$0xf0]  ;;  %v8318_v22 = vor.u32 %v10730_v12, %v8317_v11 }
  0x4b   :  { %4859 = vmatpush.bf16.msrb.mxu0 %v8398_v60  ;;  %v8957_v16 = vld [vmem:[#allocation2 + $0xf00] sm:$0xf]  ;;  %v10890_v17 = vld [vmem:[#allocation2 + $0xf24] sm:$0xf0]  ;;  %v9877_v20 = vld [vmem:[#allocation2 + $0x1630] sm:$0xf]  ;;  %v8638_v39 = vor.u32 %v10810_v15, %v8637_v14 }
  0x4c   :  { %4873 = vmatpush.bf16.msrb.mxu1 %v8718_v63  ;;  %v9277_v18 = vld [vmem:[#allocation2 + $0x1180] sm:$0xf]  ;;  %v10970_v19 = vld [vmem:[#allocation2 + $0x11a4] sm:$0xf0]  ;;  %v11120_v21 = vld [vmem:[#allocation2 + $0x1654] sm:$0xf0]  ;;  %v8958_v40 = vor.u32 %v10890_v17, %v8957_v16 }
  0x4d   :  { %4887 = vmatpush.bf16.msrb.mxu2 %v9038_v0  ;;  %v10037_v23 = vld [vmem:[#allocation2 + $0x1770] sm:$0xf]  ;;  %v11160_v24 = vld [vmem:[#allocation2 + $0x1794] sm:$0xf0]  ;;  %v10475_v25 = vld [vmem:[#allocation2 + $0x234] sm:$0xf]  ;;  %v9278_v43 = vor.u32 %v10970_v19, %v9277_v18  ;;  %v9878_v44 = vor.u32 %v11120_v21, %v9877_v20 }
  0x4e   :  { %4901 = vmatpush.bf16.msrb.mxu3 %v9358_v3  ;;  %v7319_v26 = vld [vmem:[#allocation2 + $0x258] sm:$0xf0]  ;;  %v10555_v27 = vld [vmem:[#allocation2 + $0x4b4] sm:$0xf]  ;;  %v9837_v47 = vld [vmem:[#allocation2 + $0x15e0] sm:$0xf] }
  0x4f   :  { %4860 = vmatpush.bf16.msrb.mxu0 %v8358_v8  ;;  %v7639_v28 = vld [vmem:[#allocation2 + $0x4d8] sm:$0xf0]  ;;  %v164_v30 = vld.sshfl [vmem:[#allocation1 + $0x30] sm:$0xff pattern:$0x73625140]  ;;  %v7322_v45 = vor.u32 %v10475_v25, %v7319_v26 }
  0x50   :  { %4874 = vmatpush.bf16.msrb.mxu1 %v8678_v9  ;;  %v162_v29 = vld.sshfl [vmem:[#allocation1 + $0x20] sm:$0xff pattern:$0x73625140]  ;;  %v11510_v32 = vpack.c.bf16 %v164_v30, %v11474_v35  ;;  %v163_v33 = vld.sshfl [vmem:[#allocation1 + $0x28] sm:$0xff pattern:$0x73625140]  ;;  %v7642_v48 = vor.u32 %v10555_v27, %v7639_v28 }
  0x51   :  { %4888 = vmatpush.bf16.msrb.mxu2 %v8998_v10  ;;  %v11507_v31 = vpack.c.bf16 %v162_v29, %v11472_v34  ;;  %v165_v36 = vld.sshfl [vmem:[#allocation1 + $0x38] sm:$0xff pattern:$0x73625140]  ;;  %v11513_v41 = vpack.c.bf16 %v163_v33, %v11479_v37  ;;  %v97_v35 = vld [vmem:[%s12006_s0 + $0x6c] sm:$0xff]  ;;  %v10038_v37 = vor.u32 %v11160_v24, %v10037_v23  ;;  %v9997_v52 = vld [vmem:[#allocation2 + $0x1720] sm:$0xf] }
  0x52   :  { %4902 = vmatpush.bf16.msrb.mxu3 %v9318_v13  ;;  %v11516_v42 = vpack.c.bf16 %v165_v36, %v11481_v38  ;;  %v94_v34 = vld [vmem:[%s12006_s0 + $0x58] sm:$0xff]  ;;  %4834 = vmatmul.bf16.vlgmr.msra.gmra.mxu2 %v11510_v32  ;;  %v100_v38 = vld [vmem:[%s12006_s0 + $0x80] sm:$0xff]  ;;  %v11536_v50 = vld.sshfl [vmem:[#allocation1 + $0x8] sm:$0xff pattern:$0x73625140] }
  0x53   :  { %4861 = vmatpush.bf16.msrb.mxu0 %v8318_v22  ;;  %v11529_v46 = vld.sshfl [vmem:[#allocation1] sm:$0xff pattern:$0x73625140]  ;;  %4820 = vmatmul.bf16.vlgmr.msra.gmra.mxu1 %v11513_v41  ;;  %v103_v49 = vld [vmem:[%s12006_s0 + $0x94] sm:$0xff]  ;;  %v11110_v51 = vld [vmem:[#allocation2 + $0x1604] sm:$0xf0] }
  0x54   :  { %4806 = vmatmul.bf16.vlgmr.msra.gmra.mxu0 %v11507_v31  ;;  %4848 = vmatmul.bf16.vlgmr.msra.gmra.mxu3 %v11516_v42  ;;  %166 = vst [vmem:[#allocation1] ss:$4 sm:$0xff] %v94_v34  ;;  %v11150_v55 = vld [vmem:[#allocation2 + $0x1744] sm:$0xf0]  ;;  %v9838_v58 = vor.u32 %v11110_v51, %v9837_v47  ;;  %v10465_v59 = vld [vmem:[#allocation2 + $0x1e4] sm:$0xf] }
  0x55   :  { %4875 = vmatpush.bf16.msrb.mxu1 %v8638_v39  ;;  %4889 = vmatpush.bf16.msrb.mxu2 %v8958_v40  ;;  %167 = vst [vmem:[#allocation1 + $0x1] ss:$4 sm:$0xff] %v97_v35  ;;  %v7279_v60 = vld [vmem:[#allocation2 + $0x208] sm:$0xf0]  ;;  %v9998_v61 = vor.u32 %v11150_v55, %v9997_v52  ;;  %v10545_v63 = vld [vmem:[#allocation2 + $0x464] sm:$0xf] }
  0x56   :  { %4903 = vmatpush.bf16.msrb.mxu3 %v9278_v43  ;;  %168 = vst [vmem:[#allocation1 + $0x2] ss:$4 sm:$0xff] %v100_v38  ;;  %v7282_v62 = vor.u32 %v10465_v59, %v7279_v60  ;;  %v7599_v0 = vld [vmem:[#allocation2 + $0x488] sm:$0xf0]  ;;  %v9797_v2 = vld [vmem:[#allocation2 + $0x1590] sm:$0xf] }
  0x57   :  { %4910 = vmatpush.bf16.msra.mxu0 %v9878_v44  ;;  %169 = vst [vmem:[#allocation1 + $0x3] ss:$4 sm:$0xff] %v103_v49  ;;  %v7602_v1 = vor.u32 %v10545_v63, %v7599_v0  ;;  %v11100_v3 = vld [vmem:[#allocation2 + $0x15b4] sm:$0xf0]  ;;  %v9957_v4 = vld [vmem:[#allocation2 + $0x16d0] sm:$0xf] }
  0x58   :  { %v11140_v5 = vld [vmem:[#allocation2 + $0x16f4] sm:$0xf0]  ;;  %v10455_v6 = vld [vmem:[#allocation2 + $0x194] sm:$0xf]  ;;  %v9798_v7 = vor.u32 %v11100_v3, %v9797_v2  ;;  %v7239_v8 = vld [vmem:[#allocation2 + $0x1b8] sm:$0xf0] }
  0x59   :  { %4928 = vmatpush.bf16.msra.mxu1 %v10038_v37  ;;  %4938 = vmatpush.bf16.msra.mxu2 %v7322_v45  ;;  %v10535_v9 = vld [vmem:[#allocation2 + $0x414] sm:$0xf]  ;;  %v7559_v10 = vld [vmem:[#allocation2 + $0x438] sm:$0xf0]  ;;  %v9958_v11 = vor.u32 %v11140_v5, %v9957_v4  ;;  %v7242_v12 = vor.u32 %v10455_v6, %v7239_v8  ;;  %v9757_v13 = vld [vmem:[#allocation2 + $0x1540] sm:$0xf] }
  0x5a   :  { %4952 = vmatpush.bf16.msra.mxu3 %v7642_v48  ;;  %v11090_v14 = vld [vmem:[#allocation2 + $0x1564] sm:$0xf0]  ;;  %v7562_v15 = vor.u32 %v10535_v9, %v7559_v10  ;;  %v9917_v16 = vld [vmem:[#allocation2 + $0x1680] sm:$0xf]  ;;  %v10445_v18 = vld [vmem:[#allocation2 + $0x144] sm:$0xf] }
  0x5b   :  { %4911 = vmatpush.bf16.msra.mxu0 %v9838_v58  ;;  %v11130_v17 = vld [vmem:[#allocation2 + $0x16a4] sm:$0xf0]  ;;  %v7199_v19 = vld [vmem:[#allocation2 + $0x168] sm:$0xf0]  ;;  %v10525_v20 = vld [vmem:[#allocation2 + $0x3c4] sm:$0xf]  ;;  %v9758_v23 = vor.u32 %v11090_v14, %v9757_v13 }
  0x5c   :  { %v7519_v21 = vld [vmem:[#allocation2 + $0x3e8] sm:$0xf0]  ;;  %v10635_v22 = vld [vmem:[#allocation2 + $0x734] sm:$0xf]  ;;  %v7959_v24 = vld [vmem:[#allocation2 + $0x758] sm:$0xf0]  ;;  %v9918_v43 = vor.u32 %v11130_v17, %v9917_v16  ;;  %v7202_v44 = vor.u32 %v10445_v18, %v7199_v19 }
  0x5d   :  { %4929 = vmatpush.bf16.msra.mxu1 %v9998_v61  ;;  %4939 = vmatpush.bf16.msra.mxu2 %v7282_v62  ;;  %v9717_v25 = vld [vmem:[#allocation2 + $0x14f0] sm:$0xf]  ;;  %v11080_v26 = vld [vmem:[#allocation2 + $0x1514] sm:$0xf0]  ;;  %v7522_v34 = vor.u32 %v10525_v20, %v7519_v21  ;;  %v7962_v35 = vor.u32 %v10635_v22, %v7959_v24  ;;  %v10435_v37 = vld [vmem:[#allocation2 + $0xf4] sm:$0xf] }
  0x5e   :  { %4953 = vmatpush.bf16.msra.mxu3 %v7602_v1  ;;  %v174_v27 = vld.sshfl [vmem:[#allocation1] sm:$0xff pattern:$0x73625140]  ;;  %v176_v28 = vld.sshfl [vmem:[#allocation1 + $0x10] sm:$0xff pattern:$0x73625140] }
  0x5f   :  { %4912 = vmatpush.bf16.msra.mxu0 %v9798_v7  ;;  %v11539_v29 = vpack.c.bf16 %v174_v27, %v11492_v53  ;;  %v11542_v30 = vpack.c.bf16 %v176_v28, %v11496_v56  ;;  %v175_v33 = vld.sshfl [vmem:[#allocation1 + $0x8] sm:$0xff pattern:$0x73625140]  ;;  %v177_v36 = vld.sshfl [vmem:[#allocation1 + $0x18] sm:$0xff pattern:$0x73625140]  ;;  %v9718_v56 = vor.u32 %v11080_v26, %v9717_v25 }
  0x60   :  { %v11545_v39 = vpack.c.bf16 %v175_v33, %v11494_v54  ;;  %v11548_v40 = vpack.c.bf16 %v177_v36, %v11498_v57  ;;  %v7159_v53 = vld [vmem:[#allocation2 + $0x118] sm:$0xf0]  ;;  %v10515_v45 = vld [vmem:[#allocation2 + $0x374] sm:$0xf]  ;;  %v10625_v47 = vld [vmem:[#allocation2 + $0x6e4] sm:$0xf] }
  0x61   :  { %4930 = vmatpush.bf16.msra.mxu1 %v9958_v11  ;;  %4940 = vmatpush.bf16.msra.mxu2 %v7242_v12  ;;  %v7479_v38 = vld [vmem:[#allocation2 + $0x398] sm:$0xf0]  ;;  %v7919_v54 = vld [vmem:[#allocation2 + $0x708] sm:$0xf0]  ;;  %v9677_v57 = vld [vmem:[#allocation2 + $0x14a0] sm:$0xf]  ;;  %v7162_v49 = vor.u32 %v10435_v37, %v7159_v53 }
  0x62   :  { %4954 = vmatpush.bf16.msra.mxu3 %v7562_v15  ;;  %4890 = vmatmul.bf16.vlgmr.msrb.gmra.mxu2 %v11542_v30  ;;  %v11070_v48 = vld [vmem:[#allocation2 + $0x14c4] sm:$0xf0]  ;;  %v7482_v51 = vor.u32 %v10515_v45, %v7479_v38  ;;  %v7922_v52 = vor.u32 %v10625_v47, %v7919_v54  ;;  %v10425_v55 = vld [vmem:[#allocation2 + $0xa4] sm:$0xf]  ;;  %v7119_v58 = vld [vmem:[#allocation2 + $0xc8] sm:$0xf0] }
  0x63   :  { %4913 = vmatpush.bf16.msra.mxu0 %v9758_v23  ;;  %4876 = vmatmul.bf16.vlgmr.msrb.gmra.mxu1 %v11545_v39  ;;  %v10505_v59 = vld [vmem:[#allocation2 + $0x324] sm:$0xf]  ;;  %v9678_v60 = vor.u32 %v11070_v48, %v9677_v57  ;;  %v7439_v61 = vld [vmem:[#allocation2 + $0x348] sm:$0xf0]  ;;  %v10615_v62 = vld [vmem:[#allocation2 + $0x694] sm:$0xf]  ;;  %v7122_v2 = vor.u32 %v10425_v55, %v7119_v58 }
  0x64   :  { %4862 = vmatmul.bf16.vlgmr.msrb.gmra.mxu0 %v11539_v29  ;;  %4904 = vmatmul.bf16.vlgmr.msrb.gmra.mxu3 %v11548_v40  ;;  %v7879_v63 = vld [vmem:[#allocation2 + $0x6b8] sm:$0xf0]  ;;  %v9637_v0 = vld [vmem:[#allocation2 + $0x1450] sm:$0xf]  ;;  %v11060_v1 = vld [vmem:[#allocation2 + $0x1474] sm:$0xf0]  ;;  %v7442_v5 = vor.u32 %v10505_v59, %v7439_v61 }
  0x65   :  { %4931 = vmatpush.bf16.msra.mxu1 %v9918_v43  ;;  %4941 = vmatpush.bf16.msra.mxu2 %v7202_v44  ;;  %v10415_v3 = vld [vmem:[#allocation2 + $0x54] sm:$0xf]  ;;  %v7079_v4 = vld [vmem:[#allocation2 + $0x78] sm:$0xf0]  ;;  %v7882_v6 = vor.u32 %v10615_v62, %v7879_v63  ;;  %v10605_v9 = vld [vmem:[#allocation2 + $0x644] sm:$0xf]  ;;  %v9638_v10 = vor.u32 %v11060_v1, %v9637_v0 }
  0x66   :  { %4955 = vmatpush.bf16.msra.mxu3 %v7522_v34  ;;  %v10495_v7 = vld [vmem:[#allocation2 + $0x2d4] sm:$0xf]  ;;  %v7399_v8 = vld [vmem:[#allocation2 + $0x2f8] sm:$0xf0]  ;;  %v7839_v11 = vld [vmem:[#allocation2 + $0x668] sm:$0xf0]  ;;  %v7082_v18 = vor.u32 %v10415_v3, %v7079_v4 }
  0x67   :  { %4914 = vmatpush.bf16.msra.mxu0 %v9718_v56  ;;  %v9597_v12 = vld [vmem:[#allocation2 + $0x1400] sm:$0xf]  ;;  %v11050_v13 = vld [vmem:[#allocation2 + $0x1424] sm:$0xf0]  ;;  %v10405_v14 = vld [vmem:[#allocation2 + $0x4] sm:$0xf]  ;;  %v7402_v25 = vor.u32 %v10495_v7, %v7399_v8  ;;  %v7842_v26 = vor.u32 %v10605_v9, %v7839_v11 }
  0x68   :  { %v7039_v15 = vld [vmem:[#allocation2 + $0x28] sm:$0xf0]  ;;  %v10715_v16 = vld [vmem:[#allocation2 + $0x9b4] sm:$0xf]  ;;  %v8279_v17 = vld [vmem:[#allocation2 + $0x9d8] sm:$0xf0]  ;;  %v9598_v33 = vor.u32 %v11050_v13, %v9597_v12 }
  0x69   :  { %4966 = vmatpush.bf16.msrb.mxu1 %v7962_v35  ;;  %4942 = vmatpush.bf16.msra.mxu2 %v7162_v49  ;;  %v10485_v19 = vld [vmem:[#allocation2 + $0x284] sm:$0xf]  ;;  %v7359_v20 = vld [vmem:[#allocation2 + $0x2a8] sm:$0xf0]  ;;  %v10595_v21 = vld [vmem:[#allocation2 + $0x5f4] sm:$0xf]  ;;  %v8282_v44 = vor.u32 %v10715_v16, %v8279_v17  ;;  %v7042_v37 = vor.u32 %v10405_v14, %v7039_v15 }
  0x6a   :  { %4956 = vmatpush.bf16.msra.mxu3 %v7482_v51  ;;  %v95_v22 = vld [vmem:[%s12006_s0 + $0x60] sm:$0xf]  ;;  %v98_v23 = vld [vmem:[%s12006_s0 + $0x74] sm:$0xf]  ;;  %v101_v24 = vld [vmem:[%s12006_s0 + $0x88] sm:$0xf]  ;;  %v7362_v56 = vor.u32 %v10485_v19, %v7359_v20 }
  0x6b   :  { %4915 = vmatpush.bf16.msra.mxu0 %v9678_v60  ;;  %v7799_v27 = vld [vmem:[#allocation2 + $0x618] sm:$0xf0]  ;;  %v104_v28 = vld [vmem:[%s12006_s0 + $0x9c] sm:$0xf]  ;;  %170 = vst [vmem:[#allocation1 + $0x20] ss:$4 sm:$0xff] %v95_v22 }
  0x6c   :  { %v10795_v36 = vld [vmem:[#allocation2 + $0xc34] sm:$0xf]  ;;  %v8599_v43 = vld [vmem:[#allocation2 + $0xc58] sm:$0xf0]  ;;  %171 = vst [vmem:[#allocation1 + $0x21] ss:$4 sm:$0xff] %v98_v23  ;;  %v7802_v38 = vor.u32 %v10595_v21, %v7799_v27 }
  0x6d   :  { %4967 = vmatpush.bf16.msrb.mxu1 %v7922_v52  ;;  %4943 = vmatpush.bf16.msra.mxu2 %v7122_v2  ;;  %v10875_v34 = vld [vmem:[#allocation2 + $0xeb4] sm:$0xf]  ;;  %v8919_v35 = vld [vmem:[#allocation2 + $0xed8] sm:$0xf0]  ;;  %172 = vst [vmem:[#allocation1 + $0x22] ss:$4 sm:$0xff] %v101_v24  ;;  %v8602_v47 = vor.u32 %v10795_v36, %v8599_v43 }
  0x6e   :  { %4957 = vmatpush.bf16.msra.mxu3 %v7442_v5  ;;  %173 = vst [vmem:[#allocation1 + $0x23] ss:$4 sm:$0xff] %v104_v28  ;;  %v10705_v53 = vld [vmem:[#allocation2 + $0x964] sm:$0xf]  ;;  %v8239_v45 = vld [vmem:[#allocation2 + $0x988] sm:$0xf0]  ;;  %v8922_v54 = vor.u32 %v10875_v34, %v8919_v35 }
  0x6f   :  { %4916 = vmatpush.bf16.msra.mxu0 %v9638_v10  ;;  %v10585_v57 = vld [vmem:[#allocation2 + $0x5a4] sm:$0xf]  ;;  %v7759_v48 = vld [vmem:[#allocation2 + $0x5c8] sm:$0xf0]  ;;  %v8242_v49 = vor.u32 %v10705_v53, %v8239_v45  ;;  %v10695_v60 = vld [vmem:[#allocation2 + $0x914] sm:$0xf] }
  0x70   :  { %v10785_v51 = vld [vmem:[#allocation2 + $0xbe4] sm:$0xf]  ;;  %v8559_v52 = vld [vmem:[#allocation2 + $0xc08] sm:$0xf0]  ;;  %v7762_v59 = vor.u32 %v10585_v57, %v7759_v48  ;;  %v8199_v61 = vld [vmem:[#allocation2 + $0x938] sm:$0xf0] }
  0x71   :  { %4968 = vmatpush.bf16.msrb.mxu1 %v7882_v6  ;;  %4944 = vmatpush.bf16.msra.mxu2 %v7082_v18  ;;  %v10865_v55 = vld [vmem:[#allocation2 + $0xe64] sm:$0xf]  ;;  %v8879_v58 = vld [vmem:[#allocation2 + $0xe88] sm:$0xf0]  ;;  %v10575_v62 = vld [vmem:[#allocation2 + $0x554] sm:$0xf]  ;;  %v8562_v3 = vor.u32 %v10785_v51, %v8559_v52  ;;  %v8202_v7 = vor.u32 %v10695_v60, %v8199_v61 }
  0x72   :  { %4958 = vmatpush.bf16.msra.mxu3 %v7402_v25  ;;  %v7719_v63 = vld [vmem:[#allocation2 + $0x578] sm:$0xf0]  ;;  %v10775_v0 = vld [vmem:[#allocation2 + $0xb94] sm:$0xf]  ;;  %v8882_v4 = vor.u32 %v10865_v55, %v8879_v58  ;;  %v10685_v12 = vld [vmem:[#allocation2 + $0x8c4] sm:$0xf] }
  0x73   :  { %4917 = vmatpush.bf16.msra.mxu0 %v9598_v33  ;;  %v8519_v8 = vld [vmem:[#allocation2 + $0xbb8] sm:$0xf0]  ;;  %v10855_v9 = vld [vmem:[#allocation2 + $0xe14] sm:$0xf]  ;;  %v7722_v11 = vor.u32 %v10575_v62, %v7719_v63  ;;  %v8159_v13 = vld [vmem:[#allocation2 + $0x8e8] sm:$0xf0] }
  0x74   :  { %v8839_v10 = vld [vmem:[#allocation2 + $0xe38] sm:$0xf0]  ;;  %v7679_v14 = vld [vmem:[#allocation2 + $0x528] sm:$0xf0]  ;;  %v10765_v16 = vld [vmem:[#allocation2 + $0xb44] sm:$0xf]  ;;  %v8162_v19 = vor.u32 %v10685_v12, %v8159_v13 }
  0x75   :  { %4969 = vmatpush.bf16.msrb.mxu1 %v7842_v26  ;;  %4945 = vmatpush.bf16.msra.mxu2 %v7042_v37  ;;  %v178_v1 = vld.sshfl [vmem:[#allocation1 + $0x20] sm:$0xff pattern:$0x73625140]  ;;  %v179_v2 = vld.sshfl [vmem:[#allocation1 + $0x28] sm:$0xff pattern:$0x73625140]  ;;  %v8842_v15 = vor.u32 %v10855_v9, %v8839_v10 }
  0x76   :  { %4959 = vmatpush.bf16.msra.mxu3 %v7362_v56  ;;  %v11568_v5 = vpack.c.bf16 %v178_v1, %v11529_v46  ;;  %v11571_v6 = vpack.c.bf16 %v179_v2, %v11536_v50  ;;  %v10565_v46 = vld [vmem:[#allocation2 + $0x504] sm:$0xf]  ;;  %v8522_v50 = vor.u32 %v10775_v0, %v8519_v8  ;;  %v10955_v17 = vld [vmem:[#allocation2 + $0x1134] sm:$0xf]  ;;  %v9239_v18 = vld [vmem:[#allocation2 + $0x1158] sm:$0xf0] }
  0x77   :  { %4980 = vmatpush.bf16.msrb.mxu0 %v8282_v44  ;;  %v8479_v20 = vld [vmem:[#allocation2 + $0xb68] sm:$0xf0]  ;;  %v10845_v21 = vld [vmem:[#allocation2 + $0xdc4] sm:$0xf]  ;;  %v7682_v23 = vor.u32 %v10565_v46, %v7679_v14  ;;  %v10675_v24 = vld [vmem:[#allocation2 + $0x874] sm:$0xf]  ;;  %v9242_v26 = vor.u32 %v10955_v17, %v9239_v18 }
  0x78   :  { %4946 = vmatmul.bf16.vlgmr.msra.gmra.mxu2 %v11507_v31  ;;  %4918 = vmatmul.bf16.vlgmr.msra.gmra.mxu0 %v11568_v5  ;;  %v8799_v22 = vld [vmem:[#allocation2 + $0xde8] sm:$0xf0]  ;;  %v8119_v25 = vld [vmem:[#allocation2 + $0x898] sm:$0xf0]  ;;  %v8482_v27 = vor.u32 %v10765_v16, %v8479_v20  ;;  %v10755_v33 = vld [vmem:[#allocation2 + $0xaf4] sm:$0xf] }
  0x79   :  { %4970 = vmatpush.bf16.msrb.mxu1 %v7802_v38  ;;  %4994 = vmatpush.bf16.msrb.mxu2 %v8602_v47  ;;  %v8802_v28 = vor.u32 %v10845_v21, %v8799_v22  ;;  %v10945_v36 = vld [vmem:[#allocation2 + $0x10e4] sm:$0xf]  ;;  %v9199_v43 = vld [vmem:[#allocation2 + $0x1108] sm:$0xf0]  ;;  %v8122_v44 = vor.u32 %v10675_v24, %v8119_v25  ;;  %v8439_v34 = vld [vmem:[#allocation2 + $0xb18] sm:$0xf0] }
  0x7a   :  { %5008 = vmatpush.bf16.msrb.mxu3 %v8922_v54  ;;  %10075 = vmatmul.msk.bf16.vlgmr.msra.gmra.mxu1 %vm4794_vm0, %v11571_v6  ;;  %v10835_v35 = vld [vmem:[#allocation2 + $0xd74] sm:$0xf]  ;;  %v8759_v37 = vld [vmem:[#allocation2 + $0xd98] sm:$0xf0]  ;;  %v10665_v53 = vld [vmem:[#allocation2 + $0x824] sm:$0xf]  ;;  %v9202_v56 = vor.u32 %v10945_v36, %v9199_v43  ;;  %v8442_v38 = vor.u32 %v10755_v33, %v8439_v34 }
  0x7b   :  { %4981 = vmatpush.bf16.msrb.mxu0 %v8242_v49  ;;  %4960 = vmatmul.bf16.vlgmr.msra.gmra.mxu3 %v11513_v41  ;;  %v8079_v45 = vld [vmem:[#allocation2 + $0x848] sm:$0xf0]  ;;  %v8762_v47 = vor.u32 %v10835_v35, %v8759_v37  ;;  %v10745_v54 = vld [vmem:[#allocation2 + $0xaa4] sm:$0xf]  ;;  %v10935_v57 = vld [vmem:[#allocation2 + $0x1094] sm:$0xf] }
  0x7c   :  { %v9159_v48 = vld [vmem:[#allocation2 + $0x10b8] sm:$0xf0]  ;;  %v8082_v49 = vor.u32 %v10665_v53, %v8079_v45  ;;  %v8399_v51 = vld [vmem:[#allocation2 + $0xac8] sm:$0xf0]  ;;  %v10825_v52 = vld [vmem:[#allocation2 + $0xd24] sm:$0xf] }
  0x7d   :  { %4971 = vmatpush.bf16.msrb.mxu1 %v7762_v59  ;;  %4995 = vmatpush.bf16.msrb.mxu2 %v8562_v3  ;;  %v8719_v55 = vld [vmem:[#allocation2 + $0xd48] sm:$0xf0]  ;;  %v10655_v58 = vld [vmem:[#allocation2 + $0x7d4] sm:$0xf]  ;;  %v8039_v59 = vld [vmem:[#allocation2 + $0x7f8] sm:$0xf0]  ;;  %v9162_v60 = vor.u32 %v10935_v57, %v9159_v48  ;;  %v8402_v61 = vor.u32 %v10745_v54, %v8399_v51 }
  0x7e   :  { %5009 = vmatpush.bf16.msrb.mxu3 %v8882_v4  ;;  %v8722_v62 = vor.u32 %v10825_v52, %v8719_v55  ;;  %v10735_v63 = vld [vmem:[#allocation2 + $0xa54] sm:$0xf]  ;;  %v10925_v0 = vld [vmem:[#allocation2 + $0x1044] sm:$0xf]  ;;  %v9119_v1 = vld [vmem:[#allocation2 + $0x1068] sm:$0xf0]  ;;  %v8042_v2 = vor.u32 %v10655_v58, %v8039_v59 }
  0x7f   :  { %4982 = vmatpush.bf16.msrb.mxu0 %v8202_v7  ;;  %v8359_v3 = vld [vmem:[#allocation2 + $0xa78] sm:$0xf0]  ;;  %v10815_v4 = vld [vmem:[#allocation2 + $0xcd4] sm:$0xf]  ;;  %v10645_v8 = vld [vmem:[#allocation2 + $0x784] sm:$0xf]  ;;  %v9122_v10 = vor.u32 %v10925_v0, %v9119_v1 }
  0x80   :  { %v8679_v7 = vld [vmem:[#allocation2 + $0xcf8] sm:$0xf0]  ;;  %v7999_v9 = vld [vmem:[#allocation2 + $0x7a8] sm:$0xf0]  ;;  %v11035_v12 = vld [vmem:[#allocation2 + $0x13b4] sm:$0xf]  ;;  %v8362_v46 = vor.u32 %v10735_v63, %v8359_v3 }
  0x81   :  { %4972 = vmatpush.bf16.msrb.mxu1 %v7722_v11  ;;  %4996 = vmatpush.bf16.msrb.mxu2 %v8522_v50  ;;  %v10725_v11 = vld [vmem:[#allocation2 + $0xa04] sm:$0xf]  ;;  %v9559_v13 = vld [vmem:[#allocation2 + $0x13d8] sm:$0xf0]  ;;  %v8682_v14 = vor.u32 %v10815_v4, %v8679_v7  ;;  %v8319_v50 = vld [vmem:[#allocation2 + $0xa28] sm:$0xf0]  ;;  %v8002_v17 = vor.u32 %v10645_v8, %v7999_v9 }
  0x82   :  { %5010 = vmatpush.bf16.msrb.mxu3 %v8842_v15  ;;  %v10915_v15 = vld [vmem:[#allocation2 + $0xff4] sm:$0xf]  ;;  %v9079_v16 = vld [vmem:[#allocation2 + $0x1018] sm:$0xf0]  ;;  %v10805_v18 = vld [vmem:[#allocation2 + $0xc84] sm:$0xf]  ;;  %v9562_v21 = vor.u32 %v11035_v12, %v9559_v13 }
  0x83   :  { %4983 = vmatpush.bf16.msrb.mxu0 %v8162_v19  ;;  %v8639_v19 = vld [vmem:[#allocation2 + $0xca8] sm:$0xf0]  ;;  %v11115_v20 = vld [vmem:[#allocation2 + $0x1634] sm:$0xf]  ;;  %v9879_v22 = vld [vmem:[#allocation2 + $0x1658] sm:$0xf0]  ;;  %v9082_v25 = vor.u32 %v10915_v15, %v9079_v16 }
  0x84   :  { %v10039_v24 = vld [vmem:[#allocation2 + $0x1798] sm:$0xf0]  ;;  %v9039_v33 = vld [vmem:[#allocation2 + $0xfc8] sm:$0xf0]  ;;  %v9882_v36 = vor.u32 %v11115_v20, %v9879_v22  ;;  %v11105_v35 = vld [vmem:[#allocation2 + $0x15e4] sm:$0xf] }
  0x85   :  { %4973 = vmatpush.bf16.msrb.mxu1 %v7682_v23  ;;  %4997 = vmatpush.bf16.msrb.mxu2 %v8482_v27  ;;  %v11155_v23 = vld [vmem:[#allocation2 + $0x1774] sm:$0xf]  ;;  %v8642_v27 = vor.u32 %v10805_v18, %v8639_v19  ;;  %v9519_v34 = vld [vmem:[#allocation2 + $0x1388] sm:$0xf0]  ;;  %v11145_v53 = vld [vmem:[#allocation2 + $0x1724] sm:$0xf] }
  0x86   :  { %5011 = vmatpush.bf16.msrb.mxu3 %v8802_v28  ;;  %v10905_v28 = vld [vmem:[#allocation2 + $0xfa4] sm:$0xf]  ;;  %v10042_v43 = vor.u32 %v11155_v23, %v10039_v24  ;;  %v9839_v37 = vld [vmem:[#allocation2 + $0x1608] sm:$0xf0]  ;;  %v8999_v54 = vld [vmem:[#allocation2 + $0xf78] sm:$0xf0] }
  0x87   :  { %4984 = vmatpush.bf16.msrb.mxu0 %v8122_v44  ;;  %v11025_v44 = vld [vmem:[#allocation2 + $0x1364] sm:$0xf]  ;;  %v9999_v45 = vld [vmem:[#allocation2 + $0x1748] sm:$0xf0]  ;;  %v9842_v57 = vor.u32 %v11105_v35, %v9839_v37  ;;  %v9479_v51 = vld [vmem:[#allocation2 + $0x1338] sm:$0xf0] }
  0x88   :  { %v10002_v48 = vor.u32 %v11145_v53, %v9999_v45  ;;  %v11095_v52 = vld [vmem:[#allocation2 + $0x1594] sm:$0xf]  ;;  %v9799_v55 = vld [vmem:[#allocation2 + $0x15b8] sm:$0xf0]  ;;  %v8959_v63 = vld [vmem:[#allocation2 + $0xf28] sm:$0xf0] }
  0x89   :  { %5022 = vmatpush.bf16.msra.mxu1 %v9242_v26  ;;  %4998 = vmatpush.bf16.msrb.mxu2 %v8442_v38  ;;  %v8322_v26 = vor.u32 %v10725_v11, %v8319_v50  ;;  %v9522_v38 = vor.u32 %v11025_v44, %v9519_v34  ;;  %v11135_v58 = vld [vmem:[#allocation2 + $0x16d4] sm:$0xf]  ;;  %v9959_v59 = vld [vmem:[#allocation2 + $0x16f8] sm:$0xf0]  ;;  %v11005_v0 = vld [vmem:[#allocation2 + $0x12c4] sm:$0xf]  ;;  %v9802_v1 = vor.u32 %v11095_v52, %v9799_v55 }
  0x8a   :  { %5012 = vmatpush.bf16.msrb.mxu3 %v8762_v47  ;;  %4974 = vmatmul.bf16.vlgmr.msrb.gmra.mxu1 %v11510_v32  ;;  %v10895_v47 = vld [vmem:[#allocation2 + $0xf54] sm:$0xf]  ;;  %v9439_v3 = vld [vmem:[#allocation2 + $0x12e8] sm:$0xf0]  ;;  %v11085_v4 = vld [vmem:[#allocation2 + $0x1544] sm:$0xf] }
  0x8b   :  { %4985 = vmatpush.bf16.msrb.mxu0 %v8082_v49  ;;  %v11015_v49 = vld [vmem:[#allocation2 + $0x1314] sm:$0xf]  ;;  %v9759_v7 = vld [vmem:[#allocation2 + $0x1568] sm:$0xf0]  ;;  %v11125_v8 = vld [vmem:[#allocation2 + $0x1684] sm:$0xf] }
  0x8c   :  { %v9919_v9 = vld [vmem:[#allocation2 + $0x16a8] sm:$0xf0]  ;;  %v10481_v11 = vld [vmem:[#allocation2 + $0x25c] sm:$0xf0]  ;;  %v7645_v12 = vld [vmem:[#allocation2 + $0x4b8] sm:$0xf]  ;;  %v9762_v50 = vor.u32 %v11085_v4, %v9759_v7 }
  0x8d   :  { %5023 = vmatpush.bf16.msra.mxu1 %v9202_v56  ;;  %4999 = vmatpush.bf16.msrb.mxu2 %v8402_v61  ;;  %v9042_v56 = vor.u32 %v10905_v28, %v9039_v33  ;;  %v9482_v61 = vor.u32 %v11015_v49, %v9479_v51  ;;  %v10561_v13 = vld [vmem:[#allocation2 + $0x4dc] sm:$0xf0]  ;;  %v9922_v15 = vor.u32 %v11125_v8, %v9919_v9  ;;  %v10995_v16 = vld [vmem:[#allocation2 + $0x1274] sm:$0xf]  ;;  %v7285_v22 = vld [vmem:[#allocation2 + $0x1e8] sm:$0xf] }
  0x8e   :  { %5013 = vmatpush.bf16.msrb.mxu3 %v8722_v62  ;;  %v10885_v62 = vld [vmem:[#allocation2 + $0xf04] sm:$0xf]  ;;  %v7646_v19 = vor.u32 %v10561_v13, %v7645_v12  ;;  %v11075_v20 = vld [vmem:[#allocation2 + $0x14f4] sm:$0xf]  ;;  %v10471_v23 = vld [vmem:[#allocation2 + $0x20c] sm:$0xf0] }
  0x8f   :  { %4986 = vmatpush.bf16.msrb.mxu0 %v8042_v2  ;;  %v9962_v2 = vor.u32 %v11135_v58, %v9959_v59  ;;  %v7605_v24 = vld [vmem:[#allocation2 + $0x468] sm:$0xf]  ;;  %v10985_v28 = vld [vmem:[#allocation2 + $0x1224] sm:$0xf]  ;;  %v9359_v33 = vld [vmem:[#allocation2 + $0x1248] sm:$0xf0] }
  0x90   :  { %v11065_v44 = vld [vmem:[#allocation2 + $0x14a4] sm:$0xf]  ;;  %v9679_v34 = vld [vmem:[#allocation2 + $0x14c8] sm:$0xf0]  ;;  %v7245_v35 = vld [vmem:[#allocation2 + $0x198] sm:$0xf] }
  0x91   :  { %5024 = vmatpush.bf16.msra.mxu1 %v9162_v60  ;;  %5000 = vmatpush.bf16.msrb.mxu2 %v8362_v46  ;;  %v9002_v60 = vor.u32 %v10895_v47, %v8999_v54  ;;  %v8962_v46 = vor.u32 %v10885_v62, %v8959_v63  ;;  %v10461_v37 = vld [vmem:[#allocation2 + $0x1bc] sm:$0xf0]  ;;  %v7565_v53 = vld [vmem:[#allocation2 + $0x418] sm:$0xf]  ;;  %v10975_v47 = vld [vmem:[#allocation2 + $0x11d4] sm:$0xf] }
  0x92   :  { %5014 = vmatpush.bf16.msrb.mxu3 %v8682_v14  ;;  %v9442_v14 = vor.u32 %v11005_v0, %v9439_v3  ;;  %v10541_v45 = vld [vmem:[#allocation2 + $0x43c] sm:$0xf0]  ;;  %v9319_v54 = vld [vmem:[#allocation2 + $0x11f8] sm:$0xf0]  ;;  %v11055_v49 = vld [vmem:[#allocation2 + $0x1454] sm:$0xf] }
  0x93   :  { %4987 = vmatpush.bf16.msrb.mxu0 %v8002_v17  ;;  %v9399_v17 = vld [vmem:[#allocation2 + $0x1298] sm:$0xf0]  ;;  %v7205_v52 = vld [vmem:[#allocation2 + $0x148] sm:$0xf]  ;;  %v10451_v55 = vld [vmem:[#allocation2 + $0x16c] sm:$0xf0] }
  0x94   :  { %v9639_v51 = vld [vmem:[#allocation2 + $0x1478] sm:$0xf0]  ;;  %v7525_v58 = vld [vmem:[#allocation2 + $0x3c8] sm:$0xf]  ;;  %v10531_v59 = vld [vmem:[#allocation2 + $0x3ec] sm:$0xf0]  ;;  %v7206_v3 = vor.u32 %v10451_v55, %v7205_v52 }
  0x95   :  { %5025 = vmatpush.bf16.msra.mxu1 %v9122_v10  ;;  %5001 = vmatpush.bf16.msrb.mxu2 %v8322_v26  ;;  %v7325_v10 = vld [vmem:[#allocation2 + $0x238] sm:$0xf]  ;;  %v9402_v26 = vor.u32 %v10995_v16, %v9399_v17  ;;  %v9279_v62 = vld [vmem:[#allocation2 + $0x11a8] sm:$0xf0]  ;;  %v9642_v63 = vor.u32 %v11055_v49, %v9639_v51  ;;  %v11045_v0 = vld [vmem:[#allocation2 + $0x1404] sm:$0xf]  ;;  %v7526_v4 = vor.u32 %v10531_v59, %v7525_v58 }
  0x96   :  { %5015 = vmatpush.bf16.msrb.mxu3 %v8642_v27  ;;  %4988 = vmatmul.bf16.vlgmr.msrb.gmra.mxu0 %v11516_v42  ;;  %v7326_v18 = vor.u32 %v10481_v11, %v7325_v10  ;;  %v7965_v7 = vld [vmem:[#allocation2 + $0x738] sm:$0xf]  ;;  %v10641_v8 = vld [vmem:[#allocation2 + $0x75c] sm:$0xf0]  ;;  %v7125_v17 = vld [vmem:[#allocation2 + $0xa8] sm:$0xf] }
  0x97   :  { %5036 = vmatpush.bf16.msra.mxu0 %v9562_v21  ;;  %v9719_v21 = vld [vmem:[#allocation2 + $0x1518] sm:$0xf0]  ;;  %v10441_v9 = vld [vmem:[#allocation2 + $0x11c] sm:$0xf0]  ;;  %v7485_v10 = vld [vmem:[#allocation2 + $0x378] sm:$0xf] }
  0x98   :  { %5002 = vmatmul.bf16.vlgmr.msrb.gmra.mxu2 %v11539_v29  ;;  %v9722_v27 = vor.u32 %v11075_v20, %v9719_v21  ;;  %v10521_v11 = vld [vmem:[#allocation2 + $0x39c] sm:$0xf0]  ;;  %v8285_v13 = vld [vmem:[#allocation2 + $0x9b8] sm:$0xf]  ;;  %v10431_v21 = vld [vmem:[#allocation2 + $0xcc] sm:$0xf0] }
  0x99   :  { %5026 = vmatpush.bf16.msra.mxu1 %v9082_v25  ;;  %5050 = vmatpush.bf16.msra.mxu2 %v9882_v36  ;;  %v10551_v25 = vld [vmem:[#allocation2 + $0x48c] sm:$0xf0]  ;;  %v7286_v36 = vor.u32 %v10471_v23, %v7285_v22  ;;  %v7486_v16 = vor.u32 %v10521_v11, %v7485_v10  ;;  %v7445_v22 = vld [vmem:[#allocation2 + $0x328] sm:$0xf]  ;;  %v10681_v11 = vld [vmem:[#allocation2 + $0x89c] sm:$0xf0] }
  0x9a   :  { %5068 = vmatpush.bf16.msra.mxu3 %v10042_v43  ;;  %v7606_v43 = vor.u32 %v10551_v25, %v7605_v24  ;;  %v10511_v23 = vld [vmem:[#allocation2 + $0x34c] sm:$0xf0]  ;;  %v8245_v24 = vld [vmem:[#allocation2 + $0x968] sm:$0xf] }
  0x9b   :  { %5016 = vmatmul.bf16.vlgmr.msrb.gmra.mxu3 %v11545_v39  ;;  %5037 = vmatpush.bf16.msra.mxu0 %v9522_v38  ;;  %v9682_v38 = vor.u32 %v11065_v44, %v9679_v34  ;;  %v10711_v25 = vld [vmem:[#allocation2 + $0x98c] sm:$0xf0]  ;;  %v10421_v34 = vld [vmem:[#allocation2 + $0x7c] sm:$0xf0]  ;;  %v7365_v52 = vld [vmem:[#allocation2 + $0x288] sm:$0xf] }
  0x9c   :  { %v8246_v44 = vor.u32 %v10711_v25, %v8245_v24  ;;  %v10611_v49 = vld [vmem:[#allocation2 + $0x66c] sm:$0xf0]  ;;  %v8165_v58 = vld [vmem:[#allocation2 + $0x8c8] sm:$0xf]  ;;  %v8845_v25 = vld [vmem:[#allocation2 + $0xe18] sm:$0xf] }
  0x9d   :  { %5027 = vmatpush.bf16.msra.mxu1 %v9042_v56  ;;  %5051 = vmatpush.bf16.msra.mxu2 %v9842_v57  ;;  %v9362_v56 = vor.u32 %v10985_v28, %v9359_v33  ;;  %v7246_v57 = vor.u32 %v10461_v37, %v7245_v35  ;;  %v7446_v28 = vor.u32 %v10511_v23, %v7445_v22  ;;  %v7085_v33 = vld [vmem:[#allocation2 + $0x58] sm:$0xf]  ;;  %v10501_v37 = vld [vmem:[#allocation2 + $0x2fc] sm:$0xf0]  ;;  %v10491_v55 = vld [vmem:[#allocation2 + $0x2ac] sm:$0xf0] }
  0x9e   :  { %5069 = vmatpush.bf16.msra.mxu3 %v10002_v48  ;;  %v7566_v48 = vor.u32 %v10541_v45, %v7565_v53  ;;  %v7405_v35 = vld [vmem:[#allocation2 + $0x2d8] sm:$0xf]  ;;  %v10701_v45 = vld [vmem:[#allocation2 + $0x93c] sm:$0xf0]  ;;  %v10691_v59 = vld [vmem:[#allocation2 + $0x8ec] sm:$0xf0] }
  0x9f   :  { %5038 = vmatpush.bf16.msra.mxu0 %v9482_v61  ;;  %v10965_v61 = vld [vmem:[#allocation2 + $0x1184] sm:$0xf]  ;;  %v8205_v53 = vld [vmem:[#allocation2 + $0x918] sm:$0xf]  ;;  %v10781_v23 = vld [vmem:[#allocation2 + $0xbbc] sm:$0xf0] }
  0xa0   :  { %v9282_v12 = vor.u32 %v10965_v61, %v9279_v62  ;;  %v8206_v51 = vor.u32 %v10701_v45, %v8205_v53  ;;  %v10801_v61 = vld [vmem:[#allocation2 + $0xc5c] sm:$0xf0]  ;;  %v8525_v22 = vld [vmem:[#allocation2 + $0xb98] sm:$0xf]  ;;  %v8805_v45 = vld [vmem:[#allocation2 + $0xdc8] sm:$0xf] }
  0xa1   :  { %5028 = vmatpush.bf16.msra.mxu1 %v9002_v60  ;;  %5052 = vmatpush.bf16.msra.mxu2 %v9802_v1  ;;  %v9322_v60 = vor.u32 %v10975_v47, %v9319_v54  ;;  %v9599_v1 = vld [vmem:[#allocation2 + $0x1428] sm:$0xf0]  ;;  %v7086_v47 = vor.u32 %v10421_v34, %v7085_v33  ;;  %v7406_v54 = vor.u32 %v10501_v37, %v7405_v35  ;;  %v10661_v34 = vld [vmem:[#allocation2 + $0x7fc] sm:$0xf0]  ;;  %v8485_v35 = vld [vmem:[#allocation2 + $0xb48] sm:$0xf] }
  0xa2   :  { %5070 = vmatpush.bf16.msra.mxu3 %v9962_v2  ;;  %v7165_v2 = vld [vmem:[#allocation2 + $0xf8] sm:$0xf]  ;;  %v10771_v37 = vld [vmem:[#allocation2 + $0xb6c] sm:$0xf0] }
  0xa3   :  { %5039 = vmatpush.bf16.msra.mxu0 %v9442_v14  ;;  %v9602_v14 = vor.u32 %v11045_v0, %v9599_v1  ;;  %v10881_v0 = vld [vmem:[#allocation2 + $0xedc] sm:$0xf0] }
  0xa5   :  { %5029 = vmatpush.bf16.msra.mxu1 %v8962_v46  ;;  %5053 = vmatpush.bf16.msra.mxu2 %v9762_v50  ;;  %v10721_v46 = vld [vmem:[#allocation2 + $0x9dc] sm:$0xf0]  ;;  %v7966_v50 = vor.u32 %v10641_v8, %v7965_v7  ;;  %v8166_v7 = vor.u32 %v10691_v59, %v8165_v58  ;;  %v8445_v59 = vld [vmem:[#allocation2 + $0xaf8] sm:$0xf] }
  0xa6   :  { %5071 = vmatpush.bf16.msra.mxu3 %v9922_v15  ;;  %v7166_v15 = vor.u32 %v10441_v9, %v7165_v2  ;;  %v8286_v20 = vor.u32 %v10721_v46, %v8285_v13  ;;  %v7366_v2 = vor.u32 %v10491_v55, %v7365_v52  ;;  %v8125_v9 = vld [vmem:[#allocation2 + $0x878] sm:$0xf]  ;;  %v10791_v13 = vld [vmem:[#allocation2 + $0xc0c] sm:$0xf0]  ;;  %v10961_v55 = vld [vmem:[#allocation2 + $0x115c] sm:$0xf0] }
  0xa7   :  { %5040 = vmatpush.bf16.msra.mxu0 %v9402_v26  ;;  %v9245_v52 = vld [vmem:[#allocation2 + $0x1138] sm:$0xf] }
  0xa8   :  { %5030 = vmatmul.bf16.vlgmr.msra.gmra.mxu1 %v11542_v30 }
  0xa9   :  { %5078 = vmatpush.bf16.msrb.mxu1 %v7326_v18  ;;  %5054 = vmatpush.bf16.msra.mxu2 %v9722_v27  ;;  %v7925_v18 = vld [vmem:[#allocation2 + $0x6e8] sm:$0xf]  ;;  %v7126_v27 = vor.u32 %v10431_v21, %v7125_v17  ;;  %v8126_v17 = vor.u32 %v10681_v11, %v8125_v9  ;;  %v10671_v21 = vld [vmem:[#allocation2 + $0x84c] sm:$0xf0] }
  0xaa   :  { %5092 = vmatpush.bf16.msrb.mxu3 %v7646_v19  ;;  %v10631_v19 = vld [vmem:[#allocation2 + $0x70c] sm:$0xf0] }
  0xab   :  { %10076 = vmatmul.msk.bf16.vlgmr.msra.gmra.mxu3 %vm4794_vm0, %v11571_v6  ;;  %5041 = vmatpush.bf16.msra.mxu0 %v9362_v56  ;;  %v7926_v26 = vor.u32 %v10631_v19, %v7925_v18  ;;  %v8085_v19 = vld [vmem:[#allocation2 + $0x828] sm:$0xf]  ;;  %v10951_v9 = vld [vmem:[#allocation2 + $0x110c] sm:$0xf0] }
  0xac   :  { %v8086_v33 = vor.u32 %v10671_v21, %v8085_v19  ;;  %v10941_v19 = vld [vmem:[#allocation2 + $0x10bc] sm:$0xf0] }
  0xad   :  { %5079 = vmatpush.bf16.msrb.mxu1 %v7286_v36  ;;  %5055 = vmatpush.bf16.msra.mxu2 %v9682_v38  ;;  %v7885_v36 = vld [vmem:[#allocation2 + $0x698] sm:$0xf]  ;;  %v7045_v38 = vld [vmem:[#allocation2 + $0x8] sm:$0xf] }
  0xae   :  { %5093 = vmatpush.bf16.msrb.mxu3 %v7606_v43  ;;  %v10621_v43 = vld [vmem:[#allocation2 + $0x6bc] sm:$0xf0] }
  0xaf   :  { %5042 = vmatpush.bf16.msra.mxu0 %v9322_v60  ;;  %v7886_v56 = vor.u32 %v10621_v43, %v7885_v36  ;;  %v8605_v60 = vld [vmem:[#allocation2 + $0xc38] sm:$0xf]  ;;  %v8526_v36 = vor.u32 %v10781_v23, %v8525_v22 }
  0xb0   :  { %v8606_v8 = vor.u32 %v10801_v61, %v8605_v60  ;;  %v8045_v43 = vld [vmem:[#allocation2 + $0x7d8] sm:$0xf]  ;;  %v10761_v60 = vld [vmem:[#allocation2 + $0xb1c] sm:$0xf0] }
  0xb1   :  { %5080 = vmatpush.bf16.msrb.mxu1 %v7246_v57  ;;  %5056 = vmatpush.bf16.msra.mxu2 %v9642_v63  ;;  %v10411_v57 = vld [vmem:[#allocation2 + $0x2c] sm:$0xf0]  ;;  %v8925_v63 = vld [vmem:[#allocation2 + $0xeb8] sm:$0xf] }
  0xb2   :  { %5094 = vmatpush.bf16.msrb.mxu3 %v7566_v48  ;;  %v7845_v48 = vld [vmem:[#allocation2 + $0x648] sm:$0xf]  ;;  %v7046_v1 = vor.u32 %v10411_v57, %v7045_v38  ;;  %v8926_v10 = vor.u32 %v10881_v0, %v8925_v63  ;;  %v11588_v38 = vld [vmem:[#allocation5] sm:$0xff]  ;;  %v8765_v61 = vld [vmem:[#allocation2 + $0xd78] sm:$0xf] }
  0xb3   :  { %5043 = vmatpush.bf16.msra.mxu0 %v9282_v12  ;;  %v7846_v62 = vor.u32 %v10611_v49, %v7845_v48  ;;  %v8565_v12 = vld [vmem:[#allocation2 + $0xbe8] sm:$0xf]  ;;  %v8046_v48 = vor.u32 %v10661_v34, %v8045_v43  ;;  %v8486_v49 = vor.u32 %v10771_v37, %v8485_v35  ;;  %v10841_v63 = vld [vmem:[#allocation2 + $0xd9c] sm:$0xf0]  ;;  %v9565_v0 = vld [vmem:[#allocation2 + $0x13b8] sm:$0xf] }
  0xb4   :  { %v8566_v18 = vor.u32 %v10791_v13, %v8565_v12  ;;  %v8005_v57 = vld [vmem:[#allocation2 + $0x788] sm:$0xf]  ;;  %v10751_v13 = vld [vmem:[#allocation2 + $0xacc] sm:$0xf0]  ;;  %v8365_v23 = vld [vmem:[#allocation2 + $0xa58] sm:$0xf] }
  0xb5   :  { %5081 = vmatpush.bf16.msrb.mxu1 %v7206_v3  ;;  %5057 = vmatpush.bf16.msra.mxu2 %v9602_v14  ;;  %v7805_v3 = vld [vmem:[#allocation2 + $0x5f8] sm:$0xf]  ;;  %v8885_v14 = vld [vmem:[#allocation2 + $0xe68] sm:$0xf] }
  0xb6   :  { %5095 = vmatpush.bf16.msrb.mxu3 %v7526_v4  ;;  %5044 = vmatmul.bf16.vlgmr.msra.gmra.mxu0 %v11548_v40  ;;  %v10601_v4 = vld [vmem:[#allocation2 + $0x61c] sm:$0xf0]  ;;  %v8405_v12 = vld [vmem:[#allocation2 + $0xaa8] sm:$0xf] }
  0xb7   :  { %5106 = vmatpush.bf16.msrb.mxu0 %v7966_v50  ;;  %v7806_v46 = vor.u32 %v10601_v4, %v7805_v3  ;;  %v10871_v50 = vld [vmem:[#allocation2 + $0xe8c] sm:$0xf0]  ;;  %v12014_v3 = vperm.slane %v11588_v38, 0  ;;  %v8325_v35 = vld [vmem:[#allocation2 + $0xa08] sm:$0xf] }
  0xb8   :  { %5058 = vmatmul.bf16.vlgmr.msra.gmra.mxu2 %v11568_v5  ;;  %v9125_v37 = vld [vmem:[#allocation2 + $0x1048] sm:$0xf] }
  0xb9   :  { %5082 = vmatpush.bf16.msrb.mxu1 %v7166_v15  ;;  %5120 = vmatpush.bf16.msrb.mxu2 %v8286_v20  ;;  %v7765_v15 = vld [vmem:[#allocation2 + $0x5a8] sm:$0xf]  ;;  %v8886_v20 = vor.u32 %v10871_v50, %v8885_v14  ;;  %v10831_v14 = vld [vmem:[#allocation2 + $0xd4c] sm:$0xf0] }
  0xba   :  { %5096 = vmatpush.bf16.msrb.mxu3 %v7486_v16  ;;  %v10591_v16 = vld [vmem:[#allocation2 + $0x5cc] sm:$0xf0]  ;;  %v9525_v50 = vld [vmem:[#allocation2 + $0x1368] sm:$0xf] }
  0xbb   :  { %5107 = vmatpush.bf16.msrb.mxu0 %v7926_v26  ;;  %v7766_v24 = vor.u32 %v10591_v16, %v7765_v15  ;;  %v10861_v26 = vld [vmem:[#allocation2 + $0xe3c] sm:$0xf0]  ;;  %v11031_v15 = vld [vmem:[#allocation2 + $0x138c] sm:$0xf0] }
  0xbc   :  { %v9526_v22 = vor.u32 %v11031_v15, %v9525_v50  ;;  %v11111_v50 = vld [vmem:[#allocation2 + $0x160c] sm:$0xf0]  ;;  %v10005_v15 = vld [vmem:[#allocation2 + $0x1728] sm:$0xf] }
  0xbd   :  { %5083 = vmatpush.bf16.msrb.mxu1 %v7126_v27  ;;  %5121 = vmatpush.bf16.msrb.mxu2 %v8246_v44  ;;  %v7725_v27 = vld [vmem:[#allocation2 + $0x558] sm:$0xf]  ;;  %v8846_v44 = vor.u32 %v10861_v26, %v8845_v25 }
  0xbe   :  { %5097 = vmatpush.bf16.msrb.mxu3 %v7446_v28  ;;  %v10581_v28 = vld [vmem:[#allocation2 + $0x57c] sm:$0xf0]  ;;  %v8685_v25 = vld [vmem:[#allocation2 + $0xcd8] sm:$0xf] }
  0xbf   :  { %5108 = vmatpush.bf16.msrb.mxu0 %v7886_v56  ;;  %v7726_v53 = vor.u32 %v10581_v28, %v7725_v27  ;;  %v10851_v56 = vld [vmem:[#allocation2 + $0xdec] sm:$0xf0]  ;;  %v10821_v28 = vld [vmem:[#allocation2 + $0xcfc] sm:$0xf0] }
  0xc0   :  { %v8806_v58 = vor.u32 %v10851_v56, %v8805_v45  ;;  %v8686_v45 = vor.u32 %v10821_v28, %v8685_v25  ;;  %v9965_v28 = vld [vmem:[#allocation2 + $0x16d8] sm:$0xf] }
  0xc1   :  { %5084 = vmatpush.bf16.msrb.mxu1 %v7086_v47  ;;  %5122 = vmatpush.bf16.msrb.mxu2 %v8206_v51  ;;  %v7685_v47 = vld [vmem:[#allocation2 + $0x508] sm:$0xf]  ;;  %v10651_v51 = vld [vmem:[#allocation2 + $0x7ac] sm:$0xf0] }
  0xc2   :  { %5098 = vmatpush.bf16.msrb.mxu3 %v7406_v54  ;;  %v10571_v54 = vld [vmem:[#allocation2 + $0x52c] sm:$0xf0]  ;;  %v8006_v4 = vor.u32 %v10651_v51, %v8005_v57  ;;  %v9885_v51 = vld [vmem:[#allocation2 + $0x1638] sm:$0xf] }
  0xc3   :  { %5109 = vmatpush.bf16.msrb.mxu0 %v7846_v62  ;;  %v7686_v62 = vor.u32 %v10571_v54, %v7685_v47  ;;  %v10731_v47 = vld [vmem:[#allocation2 + $0xa2c] sm:$0xf0]  ;;  %v8645_v54 = vld [vmem:[#allocation2 + $0xc88] sm:$0xf] }
  0xc4   :  { %v10811_v57 = vld [vmem:[#allocation2 + $0xcac] sm:$0xf0] }
  0xc5   :  { %5085 = vmatpush.bf16.msrb.mxu1 %v7046_v1  ;;  %5123 = vmatpush.bf16.msrb.mxu2 %v8166_v7  ;;  %v11041_v1 = vld [vmem:[#allocation2 + $0x13dc] sm:$0xf0]  ;;  %v8446_v7 = vor.u32 %v10761_v60, %v8445_v59  ;;  %v10045_v59 = vld [vmem:[#allocation2 + $0x1778] sm:$0xf] }
  0xc6   :  { %5099 = vmatpush.bf16.msrb.mxu3 %v7366_v2  ;;  %v9246_v2 = vor.u32 %v10961_v55, %v9245_v52  ;;  %v9566_v11 = vor.u32 %v11041_v1, %v9565_v0  ;;  %v11161_v60 = vld [vmem:[#allocation2 + $0x179c] sm:$0xf0]  ;;  %v9085_v0 = vld [vmem:[#allocation2 + $0xff8] sm:$0xf] }
  0xc7   :  { %5110 = vmatpush.bf16.msrb.mxu0 %v7806_v46  ;;  %v8725_v46 = vld [vmem:[#allocation2 + $0xd28] sm:$0xf]  ;;  %v10921_v1 = vld [vmem:[#allocation2 + $0x101c] sm:$0xf0] }
  0xc8   :  { %5086 = vmatmul.bf16.vlgmr.msrb.gmra.mxu1 %v11507_v31  ;;  %v8726_v21 = vor.u32 %v10831_v14, %v8725_v46  ;;  %v9845_v46 = vld [vmem:[#allocation2 + $0x15e8] sm:$0xf]  ;;  %v9086_v14 = vor.u32 %v10921_v1, %v9085_v0  ;;  %v7327_v0 = vld [vmem:[#allocation2 + $0x260] sm:$0xf0] }
  0xc9   :  { %5134 = vmatpush.bf16.msra.mxu1 %v8606_v8  ;;  %5100 = vmatmul.bf16.vlgmr.msrb.gmra.mxu3 %v11513_v41  ;;  %v9205_v8 = vld [vmem:[#allocation2 + $0x10e8] sm:$0xf] }
  0xca   :  { %5148 = vmatpush.bf16.msra.mxu3 %v8926_v10  ;;  %5124 = vmatpush.bf16.msrb.mxu2 %v8126_v17  ;;  %v8766_v10 = vor.u32 %v10841_v63, %v8765_v61  ;;  %v9206_v16 = vor.u32 %v10951_v9, %v9205_v8  ;;  %v8406_v17 = vor.u32 %v10751_v13, %v8405_v12  ;;  %v9405_v12 = vld [vmem:[#allocation2 + $0x1278] sm:$0xf]  ;;  %v11001_v13 = vld [vmem:[#allocation2 + $0x129c] sm:$0xf0] }
  0xcb   :  { %5111 = vmatpush.bf16.msrb.mxu0 %v7766_v24  ;;  %v10741_v24 = vld [vmem:[#allocation2 + $0xa7c] sm:$0xf0]  ;;  %v8326_v63 = vor.u32 %v10731_v47, %v8325_v35 }
  0xcc   :  { %v8366_v34 = vor.u32 %v10741_v24, %v8365_v23  ;;  %v10991_v23 = vld [vmem:[#allocation2 + $0x124c] sm:$0xf0]  ;;  %v9805_v24 = vld [vmem:[#allocation2 + $0x1598] sm:$0xf]  ;;  %v10981_v47 = vld [vmem:[#allocation2 + $0x11fc] sm:$0xf0] }
  0xcd   :  { %5135 = vmatpush.bf16.msra.mxu1 %v8566_v18  ;;  %v9165_v18 = vld [vmem:[#allocation2 + $0x1098] sm:$0xf] }
  0xce   :  { %5149 = vmatpush.bf16.msra.mxu3 %v8886_v20  ;;  %5125 = vmatpush.bf16.msrb.mxu2 %v8086_v33  ;;  %v9485_v33 = vld [vmem:[#allocation2 + $0x1318] sm:$0xf]  ;;  %v9166_v43 = vor.u32 %v10941_v19, %v9165_v18  ;;  %v10911_v18 = vld [vmem:[#allocation2 + $0xfcc] sm:$0xf0]  ;;  %v9406_v19 = vor.u32 %v11001_v13, %v9405_v12 }
  0xcf   :  { %5112 = vmatpush.bf16.msrb.mxu0 %v7726_v53  ;;  %v10931_v53 = vld [vmem:[#allocation2 + $0x106c] sm:$0xf0] }
  0xd0   :  { %v4821_v27 = vpop.f32.mrf.mxu1  ;;  %v9126_v55 = vor.u32 %v10931_v53, %v9125_v37  ;;  %v9325_v37 = vld [vmem:[#allocation2 + $0x11d8] sm:$0xf] }
  0xd1   :  { %5136 = vmatpush.bf16.msra.mxu1 %v8526_v36  ;;  %v4807_v20 = vpop.f32.mrf.mxu0  ;;  %v11021_v36 = vld [vmem:[#allocation2 + $0x133c] sm:$0xf0] }
  0xd2   :  { %5150 = vmatpush.bf16.msra.mxu3 %v8846_v44  ;;  %5126 = vmatpush.bf16.msrb.mxu2 %v8046_v48  ;;  %v4808_v26 = vadd.f32 %v4807_v20, %v12014_v3  ;;  %v9486_v56 = vor.u32 %v11021_v36, %v9485_v33  ;;  %v9445_v48 = vld [vmem:[#allocation2 + $0x12c8] sm:$0xf]  ;;  %v9846_v20 = vor.u32 %v11111_v50, %v9845_v46  ;;  %v11141_v33 = vld [vmem:[#allocation2 + $0x16fc] sm:$0xf0]  ;;  %v7647_v50 = vld [vmem:[#allocation2 + $0x4e0] sm:$0xf0] }
  0xd3   :  { %5113 = vmatpush.bf16.msrb.mxu0 %v7686_v62  ;;  %v11081_v46 = vld [vmem:[#allocation2 + $0x151c] sm:$0xf0]  ;;  %v10672_v3 = vld [vmem:[#allocation2 + $0x854] sm:$0xf0] }
  0xd4   :  { %v4822_v44 = vadd.f32 %v4821_v27, %v4808_v26  ;;  %v11101_v27 = vld [vmem:[#allocation2 + $0x15bc] sm:$0xf0] }
  0xd5   :  { %5137 = vmatpush.bf16.msra.mxu1 %v8486_v49  ;;  %v11011_v49 = vld [vmem:[#allocation2 + $0x12ec] sm:$0xf0]  ;;  %v4835_v52 = vpop.f32.mrf.mxu2 }
  0xd6   :  { %5151 = vmatpush.bf16.msra.mxu3 %v8806_v58  ;;  %5127 = vmatpush.bf16.msrb.mxu2 %v8006_v4  ;;  %v11121_v58 = vld [vmem:[#allocation2 + $0x165c] sm:$0xf0]  ;;  %v4836_v61 = vadd.f32 %v4835_v52, %v4822_v44  ;;  %v8646_v4 = vor.u32 %v10811_v57, %v8645_v54  ;;  %v9765_v54 = vld [vmem:[#allocation2 + $0x1548] sm:$0xf]  ;;  %v11091_v57 = vld [vmem:[#allocation2 + $0x156c] sm:$0xf0] }
  0xd7   :  { %5162 = vmatpush.bf16.msra.mxu0 %v9246_v2  ;;  %v4849_v62 = vpop.f32.mrf.mxu3  ;;  %v10901_v44 = vld [vmem:[#allocation2 + $0xf7c] sm:$0xf0]  ;;  %v11131_v52 = vld [vmem:[#allocation2 + $0x16ac] sm:$0xf0]  ;;  %v9766_v1 = vor.u32 %v11091_v57, %v9765_v54  ;;  %v9645_v54 = vld [vmem:[#allocation2 + $0x1458] sm:$0xf] }
  0xd8   :  { %5114 = vmatmul.bf16.vlgmr.msrb.gmra.mxu0 %v11510_v32  ;;  %v4850_v8 = vadd.f32 %v4849_v62, %v4836_v61  ;;  %v11597_v9 = vpop.f32.mrf.mxu1  ;;  %v10891_v61 = vld [vmem:[#allocation2 + $0xf2c] sm:$0xf0]  ;;  %v9326_v62 = vor.u32 %v10981_v47, %v9325_v37  ;;  %v7887_v37 = vld [vmem:[#allocation2 + $0x6c0] sm:$0xf0] }
  0xd9   :  { %5138 = vmatpush.bf16.msra.mxu1 %v8446_v7  ;;  %5128 = vmatmul.bf16.vlgmr.msrb.gmra.mxu2 %v11516_v42  ;;  %v11595_v2 = vpop.f32.mrf.mxu0  ;;  %v9446_v7 = vor.u32 %v11011_v49, %v9445_v48 }
  0xda   :  { %5152 = vmatpush.bf16.msra.mxu3 %v8766_v10  ;;  %5176 = vmatpush.bf16.msra.mxu2 %v9566_v11  ;;  %v9886_v10 = vor.u32 %v11121_v58, %v9885_v51  ;;  %v10046_v11 = vor.u32 %v11161_v60, %v10045_v59  ;;  %v9925_v51 = vld [vmem:[#allocation2 + $0x1688] sm:$0xf]  ;;  %v7967_v59 = vld [vmem:[#allocation2 + $0x760] sm:$0xf0] }
  0xdb   :  { %5163 = vmatpush.bf16.msra.mxu0 %v9206_v16  ;;  %v11151_v16 = vld [vmem:[#allocation2 + $0x174c] sm:$0xf0]  ;;  %v8965_v60 = vld [vmem:[#allocation2 + $0xf08] sm:$0xf] }
  0xdc   :  { %v8966_v13 = vor.u32 %v10891_v61, %v8965_v60  ;;  %v10446_v61 = vld [vmem:[#allocation2 + $0x14c] sm:$0xf] }
  0xdd   :  { %5139 = vmatpush.bf16.msra.mxu1 %v8406_v17  ;;  %v9045_v17 = vld [vmem:[#allocation2 + $0xfa8] sm:$0xf]  ;;  %v11599_v25 = vpop.f32.mrf.mxu2 }
  0xde   :  { %5153 = vmatpush.bf16.msra.mxu3 %v8726_v21  ;;  %5177 = vmatpush.bf16.msra.mxu2 %v9526_v22  ;;  %v10006_v21 = vor.u32 %v11151_v16, %v10005_v15  ;;  %v9365_v22 = vld [vmem:[#allocation2 + $0x1228] sm:$0xf]  ;;  %v9046_v26 = vor.u32 %v10911_v18, %v9045_v17  ;;  %v10626_v17 = vld [vmem:[#allocation2 + $0x6ec] sm:$0xf]  ;;  %v7927_v18 = vld [vmem:[#allocation2 + $0x710] sm:$0xf0] }
  0xdf   :  { %5164 = vmatpush.bf16.msra.mxu0 %v9166_v43  ;;  %v11602_v36 = vpop.f32.mrf.mxu3  ;;  %v9005_v43 = vld [vmem:[#allocation2 + $0xf58] sm:$0xf]  ;;  %v9366_v35 = vor.u32 %v10991_v23, %v9365_v22  ;;  %v7287_v22 = vld [vmem:[#allocation2 + $0x210] sm:$0xf0] }
  0xe0   :  { %v4877_v48 = vpop.f32.mrf.mxu1  ;;  %v9006_v49 = vor.u32 %v10901_v44, %v9005_v43  ;;  %v10546_v43 = vld [vmem:[#allocation2 + $0x46c] sm:$0xf]  ;;  %v7607_v44 = vld [vmem:[#allocation2 + $0x490] sm:$0xf0] }
  0xe1   :  { %5140 = vmatpush.bf16.msra.mxu1 %v8366_v34  ;;  %v4863_v34 = vpop.f32.mrf.mxu0  ;;  %v7610_v47 = vor.u32 %v10546_v43, %v7607_v44  ;;  %v8247_v43 = vld [vmem:[#allocation2 + $0x990] sm:$0xf0] }
  0xe2   :  { %5154 = vmatpush.bf16.msra.mxu3 %v8686_v45  ;;  %5178 = vmatpush.bf16.msra.mxu2 %v9486_v56  ;;  %v4864_v53 = vadd.f32 %v4863_v34, %v4850_v8  ;;  %v9806_v45 = vor.u32 %v11101_v27, %v9805_v24  ;;  %v9966_v56 = vor.u32 %v11141_v33, %v9965_v28  ;;  %v10971_v8 = vld [vmem:[#allocation2 + $0x11ac] sm:$0xf0]  ;;  %v9685_v27 = vld [vmem:[#allocation2 + $0x14a8] sm:$0xf] }
  0xe3   :  { %5165 = vmatpush.bf16.msra.mxu0 %v9126_v55  ;;  %v10636_v55 = vld [vmem:[#allocation2 + $0x73c] sm:$0xf]  ;;  %v7930_v28 = vor.u32 %v10626_v17, %v7927_v18  ;;  %v11071_v33 = vld [vmem:[#allocation2 + $0x14cc] sm:$0xf0] }
  0xe4   :  { %v4878_v58 = vadd.f32 %v4877_v48, %v4864_v53  ;;  %v7970_v12 = vor.u32 %v10636_v55, %v7967_v59  ;;  %v10456_v53 = vld [vmem:[#allocation2 + $0x19c] sm:$0xf]  ;;  %v11061_v48 = vld [vmem:[#allocation2 + $0x147c] sm:$0xf0]  ;;  %v10606_v55 = vld [vmem:[#allocation2 + $0x64c] sm:$0xf] }
  0xe5   :  { %5141 = vmatpush.bf16.msra.mxu1 %v8326_v63  ;;  %v10476_v63 = vld [vmem:[#allocation2 + $0x23c] sm:$0xf] }
  0xe6   :  { %5155 = vmatpush.bf16.msra.mxu3 %v8646_v4  ;;  %5179 = vmatpush.bf16.msra.mxu2 %v9446_v7  ;;  %v9926_v4 = vor.u32 %v11131_v52, %v9925_v51  ;;  %v9285_v7 = vld [vmem:[#allocation2 + $0x1188] sm:$0xf]  ;;  %v7330_v16 = vor.u32 %v10476_v63, %v7327_v0  ;;  %v7567_v51 = vld [vmem:[#allocation2 + $0x440] sm:$0xf0]  ;;  %v9646_v63 = vor.u32 %v11061_v48, %v9645_v54  ;;  %v7447_v48 = vld [vmem:[#allocation2 + $0x350] sm:$0xf0] }
  0xe7   :  { %5166 = vmatpush.bf16.msra.mxu0 %v9086_v14  ;;  %v10556_v14 = vld [vmem:[#allocation2 + $0x4bc] sm:$0xf] }
  0xe8   :  { %5142 = vmatmul.bf16.vlgmr.msra.gmra.mxu1 %v11539_v29  ;;  %v11611_v60 = vpop.f32.mrf.mxu1 }
  0xe9   :  { %5190 = vmatpush.bf16.msrb.mxu1 %v9886_v10  ;;  %5156 = vmatmul.bf16.vlgmr.msra.gmra.mxu3 %v11545_v39  ;;  %v9725_v10 = vld [vmem:[#allocation2 + $0x14f8] sm:$0xf]  ;;  %v11609_v59 = vpop.f32.mrf.mxu0 }
  0xea   :  { %5208 = vmatpush.bf16.msrb.mxu3 %v10046_v11  ;;  %5180 = vmatpush.bf16.msra.mxu2 %v9406_v19  ;;  %v4891_v11 = vpop.f32.mrf.mxu2  ;;  %v4905_v19 = vpop.f32.mrf.mxu3  ;;  %v9726_v24 = vor.u32 %v11081_v46, %v9725_v10  ;;  %v7527_v10 = vld [vmem:[#allocation2 + $0x3f0] sm:$0xf0]  ;;  %v7807_v46 = vld [vmem:[#allocation2 + $0x620] sm:$0xf0] }
  0xeb   :  { %5167 = vmatpush.bf16.msra.mxu0 %v9046_v26  ;;  %v4892_v15 = vadd.f32 %v4891_v11, %v4878_v58  ;;  %v7650_v26 = vor.u32 %v10556_v14, %v7647_v50  ;;  %v7847_v58 = vld [vmem:[#allocation2 + $0x670] sm:$0xf0]  ;;  %v10596_v11 = vld [vmem:[#allocation2 + $0x5fc] sm:$0xf]  ;;  %v8287_v50 = vld [vmem:[#allocation2 + $0x9e0] sm:$0xf0] }
  0xec   :  { %v10716_v14 = vld [vmem:[#allocation2 + $0x9bc] sm:$0xf] }
  0xed   :  { %5191 = vmatpush.bf16.msrb.mxu1 %v9846_v20  ;;  %v9286_v20 = vor.u32 %v10971_v8, %v9285_v7  ;;  %v11605_v23 = vadd.f32 %v4905_v19, %v4892_v15  ;;  %v7850_v7 = vor.u32 %v10606_v55, %v7847_v58  ;;  %v10526_v8 = vld [vmem:[#allocation2 + $0x3cc] sm:$0xf]  ;;  %v10436_v15 = vld [vmem:[#allocation2 + $0xfc] sm:$0xf]  ;;  %v7727_v55 = vld [vmem:[#allocation2 + $0x580] sm:$0xf0] }
  0xee   :  { %5209 = vmatpush.bf16.msrb.mxu3 %v10006_v21  ;;  %5181 = vmatpush.bf16.msra.mxu2 %v9366_v35  ;;  %v10466_v21 = vld [vmem:[#allocation2 + $0x1ec] sm:$0xf]  ;;  %v10616_v35 = vld [vmem:[#allocation2 + $0x69c] sm:$0xf]  ;;  %v7530_v19 = vor.u32 %v10526_v8, %v7527_v10 }
  0xef   :  { %5168 = vmatpush.bf16.msra.mxu0 %v9006_v49  ;;  %v7290_v34 = vor.u32 %v10466_v21, %v7287_v22  ;;  %v7890_v57 = vor.u32 %v10616_v35, %v7887_v37  ;;  %v10536_v49 = vld [vmem:[#allocation2 + $0x41c] sm:$0xf]  ;;  %v8290_v21 = vor.u32 %v10716_v14, %v8287_v50  ;;  %v10426_v35 = vld [vmem:[#allocation2 + $0xac] sm:$0xf]  ;;  %v7127_v37 = vld [vmem:[#allocation2 + $0xd0] sm:$0xf0] }
  0xf0   :  { %v7570_v0 = vor.u32 %v10536_v49, %v7567_v51  ;;  %v10516_v22 = vld [vmem:[#allocation2 + $0x37c] sm:$0xf] }
  0xf1   :  { %5192 = vmatpush.bf16.msrb.mxu1 %v9806_v45  ;;  %v7247_v45 = vld [vmem:[#allocation2 + $0x1c0] sm:$0xf0]  ;;  %v10576_v49 = vld [vmem:[#allocation2 + $0x55c] sm:$0xf] }
  0xf2   :  { %5210 = vmatpush.bf16.msrb.mxu3 %v9966_v56  ;;  %5182 = vmatpush.bf16.msra.mxu2 %v9326_v62  ;;  %v9686_v56 = vor.u32 %v11071_v33, %v9685_v27  ;;  %v7250_v52 = vor.u32 %v10456_v53, %v7247_v45  ;;  %v7207_v62 = vld [vmem:[#allocation2 + $0x170] sm:$0xf0]  ;;  %v11617_v17 = vpop.f32.mrf.mxu3  ;;  %v10706_v33 = vld [vmem:[#allocation2 + $0x96c] sm:$0xf]  ;;  %v12013_v53 = vperm.slane %v11588_v38, 1  ;;  %v7730_v8 = vor.u32 %v10576_v49, %v7727_v55 }
  0xf3   :  { %5169 = vmatpush.bf16.msra.mxu0 %v8966_v13  ;;  %v7210_v13 = vor.u32 %v10446_v61, %v7207_v62  ;;  %12018 = vst [vmem:[#allocation15_spill] sm:$0xff] %v11617_v17  ;;  %v8250_v54 = vor.u32 %v10706_v33, %v8247_v43  ;;  %v10696_v58 = vld [vmem:[#allocation2 + $0x91c] sm:$0xf]  ;;  %v8207_v61 = vld [vmem:[#allocation2 + $0x940] sm:$0xf0] }
  0xf4   :  { %v8210_v10 = vor.u32 %v10696_v58, %v8207_v61  ;;  %v10486_v43 = vld [vmem:[#allocation2 + $0x28c] sm:$0xf]  ;;  %v8567_v55 = vld [vmem:[#allocation2 + $0xc10] sm:$0xf0]  ;;  %v9061_v17 = vld [vmem:[#allocation2 + $0xfb8] sm:$0xf] }
  0xf5   :  { %5193 = vmatpush.bf16.msrb.mxu1 %v9766_v1  ;;  %v9605_v1 = vld [vmem:[#allocation2 + $0x1408] sm:$0xf]  ;;  %v4919_v44 = vpop.f32.mrf.mxu0 }
  0xf6   :  { %5211 = vmatpush.bf16.msrb.mxu3 %v9926_v4  ;;  %5183 = vmatpush.bf16.msra.mxu2 %v9286_v20  ;;  %v11051_v4 = vld [vmem:[#allocation2 + $0x142c] sm:$0xf0]  ;;  %v7810_v20 = vor.u32 %v10596_v11, %v7807_v46  ;;  %v4920_v45 = vadd.f32 %v4919_v44, %v11605_v23  ;;  %v10416_v23 = vld [vmem:[#allocation2 + $0x5c] sm:$0xf]  ;;  %v7407_v11 = vld [vmem:[#allocation2 + $0x300] sm:$0xf0] }
  0xf7   :  { %5218 = vmatpush.bf16.msrb.mxu0 %v7330_v16  ;;  %v7167_v16 = vld [vmem:[#allocation2 + $0x120] sm:$0xf0]  ;;  %v9606_v18 = vor.u32 %v11051_v4, %v9605_v1  ;;  %v10496_v4 = vld [vmem:[#allocation2 + $0x2dc] sm:$0xf]  ;;  %v7687_v46 = vld [vmem:[#allocation2 + $0x530] sm:$0xf0] }
  0xf8   :  { %5170 = vmatmul.bf16.vlgmr.msra.gmra.mxu0 %v11542_v30  ;;  %v7170_v27 = vor.u32 %v10436_v15, %v7167_v16  ;;  %v10686_v15 = vld [vmem:[#allocation2 + $0x8cc] sm:$0xf]  ;;  %v8167_v16 = vld [vmem:[#allocation2 + $0x8f0] sm:$0xf0] }
  0xf9   :  { %5194 = vmatpush.bf16.msrb.mxu1 %v9726_v24  ;;  %5184 = vmatmul.bf16.vlgmr.msra.gmra.mxu2 %v11548_v40  ;;  %v7487_v24 = vld [vmem:[#allocation2 + $0x3a0] sm:$0xf0]  ;;  %v8170_v33 = vor.u32 %v10686_v15, %v8167_v16  ;;  %v7367_v44 = vld [vmem:[#allocation2 + $0x2b0] sm:$0xf0]  ;;  %v10656_v15 = vld [vmem:[#allocation2 + $0x7dc] sm:$0xf] }
  0xfa   :  { %5246 = vmatpush.bf16.msra.mxu3 %v7970_v12  ;;  %5232 = vmatpush.bf16.msrb.mxu2 %v7650_v26  ;;  %v11615_v12 = vpop.f32.mrf.mxu2  ;;  %v10586_v26 = vld [vmem:[#allocation2 + $0x5ac] sm:$0xf]  ;;  %v7370_v49 = vor.u32 %v10486_v43, %v7367_v44  ;;  %v8487_v43 = vld [vmem:[#allocation2 + $0xb70] sm:$0xf0] }
  0xfb   :  { %5219 = vmatpush.bf16.msrb.mxu0 %v7290_v34  ;;  %10077 = vmatmul.msk.bf16.vlgmr.msrb.gmra.mxu3 %vm4794_vm0, %v11571_v6  ;;  %v4933_v34 = vpop.f32.mrf.mxu1 }
  0xfc   :  { %v11621_v51 = vadd.f32 %v4933_v34, %v4920_v45  ;;  %v10676_v34 = vld [vmem:[#allocation2 + $0x87c] sm:$0xf]  ;;  %v8127_v45 = vld [vmem:[#allocation2 + $0x8a0] sm:$0xf0] }
  0xfd   :  { %5195 = vmatpush.bf16.msrb.mxu1 %v9686_v56  ;;  %v7490_v56 = vor.u32 %v10516_v22, %v7487_v24  ;;  %v7410_v22 = vor.u32 %v10496_v4, %v7407_v11  ;;  %v10796_v24 = vld [vmem:[#allocation2 + $0xc3c] sm:$0xf]  ;;  %v8130_v58 = vor.u32 %v10676_v34, %v8127_v45  ;;  %v8527_v11 = vld [vmem:[#allocation2 + $0xbc0] sm:$0xf0]  ;;  %v11629_v16 = vpop.f32.mrf.mxu0  ;;  %v10846_v45 = vld [vmem:[#allocation2 + $0xdcc] sm:$0xf] }
  0xfe   :  { %5247 = vmatpush.bf16.msra.mxu3 %v7930_v28  ;;  %5233 = vmatpush.bf16.msrb.mxu2 %v7610_v47  ;;  %v7767_v28 = vld [vmem:[#allocation2 + $0x5d0] sm:$0xf0]  ;;  %12019 = vst [vmem:[#allocation16_spill] sm:$0xff] %v11621_v51  ;;  %v11112_v51 = vld [vmem:[#allocation2 + $0x1614] sm:$0xf0] }
  0xff   :  { %5220 = vmatpush.bf16.msrb.mxu0 %v7250_v52  ;;  %v7770_v47 = vor.u32 %v10586_v26, %v7767_v28  ;;  %v7130_v52 = vor.u32 %v10426_v35, %v7127_v37  ;;  %v8607_v26 = vld [vmem:[#allocation2 + $0xc60] sm:$0xf0]  ;;  %12021 = vst [vmem:[#allocation18_spill] sm:$0xff] %v11629_v16  ;;  %v10992_v16 = vld [vmem:[#allocation2 + $0x1254] sm:$0xf0] }
 0x101   :  { %5196 = vmatpush.bf16.msrb.mxu1 %v9646_v63  ;;  %v7087_v63 = vld [vmem:[#allocation2 + $0x80] sm:$0xf0] }
 0x102   :  { %5248 = vmatpush.bf16.msra.mxu3 %v7890_v57  ;;  %5234 = vmatpush.bf16.msrb.mxu2 %v7570_v0  ;;  %v10506_v57 = vld [vmem:[#allocation2 + $0x32c] sm:$0xf]  ;;  %v4947_v62 = vpop.f32.mrf.mxu2  ;;  %v7090_v50 = vor.u32 %v10416_v23, %v7087_v63  ;;  %v8087_v63 = vld [vmem:[#allocation2 + $0x850] sm:$0xf0] }
 0x103   :  { %5221 = vmatpush.bf16.msrb.mxu0 %v7210_v13  ;;  %v4948_v0 = vadd.f32 %v4947_v62, %v12013_v53  ;;  %v7450_v1 = vor.u32 %v10506_v57, %v7447_v48  ;;  %v10566_v13 = vld [vmem:[#allocation2 + $0x50c] sm:$0xf]  ;;  %v9207_v48 = vld [vmem:[#allocation2 + $0x1110] sm:$0xf0]  ;;  %v9213_v53 = vld [vmem:[#allocation2 + $0x10f0] sm:$0xf] }
 0x104   :  { %v7690_v28 = vor.u32 %v10566_v13, %v7687_v46  ;;  %v10946_v57 = vld [vmem:[#allocation2 + $0x10ec] sm:$0xf] }
 0x105   :  { %5197 = vmatpush.bf16.msrb.mxu1 %v9606_v18  ;;  %v10956_v18 = vld [vmem:[#allocation2 + $0x113c] sm:$0xf]  ;;  %v10666_v62 = vld [vmem:[#allocation2 + $0x82c] sm:$0xf]  ;;  %v9210_v23 = vor.u32 %v10946_v57, %v9207_v48  ;;  %v9087_v48 = vld [vmem:[#allocation2 + $0x1020] sm:$0xf0] }
 0x106   :  { %5249 = vmatpush.bf16.msra.mxu3 %v7850_v7  ;;  %5235 = vmatpush.bf16.msrb.mxu2 %v7530_v19  ;;  %v4961_v7 = vpop.f32.mrf.mxu3  ;;  %v9247_v19 = vld [vmem:[#allocation2 + $0x1160] sm:$0xf0]  ;;  %v8090_v13 = vor.u32 %v10666_v62, %v8087_v63 }
 0x107   :  { %5222 = vmatpush.bf16.msrb.mxu0 %v7170_v27  ;;  %v4962_v14 = vadd.f32 %v4961_v7, %v4948_v0  ;;  %v11626_v27 = vpop.f32.mrf.mxu1  ;;  %v9250_v35 = vor.u32 %v10956_v18, %v9247_v19  ;;  %v10866_v0 = vld [vmem:[#allocation2 + $0xe6c] sm:$0xf]  ;;  %v10936_v7 = vld [vmem:[#allocation2 + $0x109c] sm:$0xf] }
 0x108   :  { %5198 = vmatmul.bf16.vlgmr.msrb.gmra.mxu1 %v11568_v5  ;;  %12020 = vst [vmem:[#allocation17_spill] sm:$0xff] %v11626_v27  ;;  %v10467_v27 = vld [vmem:[#allocation2 + $0x1f4] sm:$0xf] }
 0x109   :  { %5260 = vmatpush.bf16.msra.mxu1 %v8290_v21  ;;  %v7047_v21 = vld [vmem:[#allocation2 + $0x30] sm:$0xf0] }
 0x10a   :  { %5250 = vmatpush.bf16.msra.mxu3 %v7810_v20  ;;  %5236 = vmatpush.bf16.msrb.mxu2 %v7490_v56  ;;  %v10406_v20 = vld [vmem:[#allocation2 + $0xc] sm:$0xf]  ;;  %v10876_v56 = vld [vmem:[#allocation2 + $0xebc] sm:$0xf] }
 0x10b   :  { %5223 = vmatpush.bf16.msrb.mxu0 %v7130_v52  ;;  %v7050_v37 = vor.u32 %v10406_v20, %v7047_v21  ;;  %v10786_v52 = vld [vmem:[#allocation2 + $0xbec] sm:$0xf]  ;;  %v8047_v20 = vld [vmem:[#allocation2 + $0x800] sm:$0xf0]  ;;  %v10856_v21 = vld [vmem:[#allocation2 + $0xe1c] sm:$0xf] }
 0x10c   :  { %v8570_v4 = vor.u32 %v10786_v52, %v8567_v55  ;;  %v8050_v44 = vor.u32 %v10656_v15, %v8047_v20  ;;  %v9567_v52 = vld [vmem:[#allocation2 + $0x13e0] sm:$0xf0]  ;;  %v10756_v55 = vld [vmem:[#allocation2 + $0xafc] sm:$0xf]  ;;  %v10746_v15 = vld [vmem:[#allocation2 + $0xaac] sm:$0xf] }
 0x10d   :  { %5261 = vmatpush.bf16.msra.mxu1 %v8250_v54  ;;  %v8610_v54 = vor.u32 %v10796_v24, %v8607_v26  ;;  %v10926_v26 = vld [vmem:[#allocation2 + $0x104c] sm:$0xf] }
 0x10e   :  { %5251 = vmatpush.bf16.msra.mxu3 %v7770_v47  ;;  %5237 = vmatpush.bf16.msrb.mxu2 %v7450_v1  ;;  %v8927_v47 = vld [vmem:[#allocation2 + $0xee0] sm:$0xf0]  ;;  %v8887_v1 = vld [vmem:[#allocation2 + $0xe90] sm:$0xf0] }
 0x10f   :  { %5224 = vmatpush.bf16.msrb.mxu0 %v7090_v50  ;;  %v8930_v61 = vor.u32 %v10876_v56, %v8927_v47  ;;  %v8890_v46 = vor.u32 %v10866_v0, %v8887_v1  ;;  %v4975_v50 = vpop.f32.mrf.mxu1  ;;  %v8807_v56 = vld [vmem:[#allocation2 + $0xdf0] sm:$0xf0]  ;;  %v10916_v47 = vld [vmem:[#allocation2 + $0xffc] sm:$0xf] }
 0x110   :  { %v4976_v19 = vadd.f32 %v4975_v50, %v4962_v14  ;;  %v9090_v0 = vor.u32 %v10916_v47, %v9087_v48  ;;  %v9527_v50 = vld [vmem:[#allocation2 + $0x1390] sm:$0xf0] }
 0x111   :  { %5262 = vmatpush.bf16.msra.mxu1 %v8210_v10  ;;  %v10776_v10 = vld [vmem:[#allocation2 + $0xb9c] sm:$0xf] }
 0x112   :  { %5252 = vmatpush.bf16.msra.mxu3 %v7730_v8  ;;  %5238 = vmatpush.bf16.msrb.mxu2 %v7410_v22  ;;  %v9167_v8 = vld [vmem:[#allocation2 + $0x10c0] sm:$0xf0]  ;;  %v8530_v24 = vor.u32 %v10776_v10, %v8527_v11 }
 0x113   :  { %5225 = vmatpush.bf16.msrb.mxu0 %v7050_v37  ;;  %v9170_v18 = vor.u32 %v10936_v7, %v9167_v8  ;;  %v8847_v22 = vld [vmem:[#allocation2 + $0xe40] sm:$0xf0]  ;;  %v8007_v37 = vld [vmem:[#allocation2 + $0x7b0] sm:$0xf0]  ;;  %v4989_v63 = vpop.f32.mrf.mxu0  ;;  %v10906_v8 = vld [vmem:[#allocation2 + $0xfac] sm:$0xf] }
 0x114   :  { %v8850_v34 = vor.u32 %v10856_v21, %v8847_v22  ;;  %v8767_v7 = vld [vmem:[#allocation2 + $0xda0] sm:$0xf0]  ;;  %v4990_v10 = vadd.f32 %v4989_v63, %v4976_v19  ;;  %v9447_v63 = vld [vmem:[#allocation2 + $0x12f0] sm:$0xf0] }
 0x115   :  { %5263 = vmatpush.bf16.msra.mxu1 %v8170_v33  ;;  %v10766_v33 = vld [vmem:[#allocation2 + $0xb4c] sm:$0xf] }
 0x116   :  { %5253 = vmatpush.bf16.msra.mxu3 %v7690_v28  ;;  %5239 = vmatpush.bf16.msrb.mxu2 %v7370_v49  ;;  %v9127_v28 = vld [vmem:[#allocation2 + $0x1070] sm:$0xf0]  ;;  %v8490_v57 = vor.u32 %v10766_v33, %v8487_v43  ;;  %v11036_v49 = vld [vmem:[#allocation2 + $0x13bc] sm:$0xf]  ;;  %v9007_v43 = vld [vmem:[#allocation2 + $0xf80] sm:$0xf0] }
 0x117   :  { %5274 = vmatpush.bf16.msra.mxu0 %v8610_v54  ;;  %v9130_v14 = vor.u32 %v10926_v26, %v9127_v28  ;;  %v11633_v54 = vpop.f32.mrf.mxu2  ;;  %v9570_v1 = vor.u32 %v11036_v49, %v9567_v52  ;;  %v11637_v20 = vpop.f32.mrf.mxu1  ;;  %v10826_v26 = vld [vmem:[#allocation2 + $0xd2c] sm:$0xf]  ;;  %v8727_v28 = vld [vmem:[#allocation2 + $0xd50] sm:$0xf0]  ;;  %v10896_v33 = vld [vmem:[#allocation2 + $0xf5c] sm:$0xf] }
 0x118   :  { %5226 = vmatmul.bf16.vlgmr.msrb.gmra.mxu0 %v11507_v31  ;;  %v8687_v49 = vld [vmem:[#allocation2 + $0xd00] sm:$0xf0]  ;;  %v10886_v52 = vld [vmem:[#allocation2 + $0xf0c] sm:$0xf] }
 0x119   :  { %5254 = vmatmul.bf16.vlgmr.msra.gmra.mxu3 %v11510_v32  ;;  %5264 = vmatpush.bf16.msra.mxu1 %v8130_v58  ;;  %v8447_v58 = vld [vmem:[#allocation2 + $0xb20] sm:$0xf0] }
 0x11a   :  { %5302 = vmatpush.bf16.msrb.mxu3 %v9250_v35  ;;  %5288 = vmatpush.bf16.msra.mxu2 %v8930_v61  ;;  %v10646_v35 = vld [vmem:[#allocation2 + $0x78c] sm:$0xf]  ;;  %v11635_v61 = vpop.f32.mrf.mxu3  ;;  %v8450_v11 = vor.u32 %v10756_v55, %v8447_v58  ;;  %v8967_v55 = vld [vmem:[#allocation2 + $0xf30] sm:$0xf0] }
 0x11b   :  { %5275 = vmatpush.bf16.msra.mxu0 %v8570_v4  ;;  %5240 = vmatmul.bf16.vlgmr.msrb.gmra.mxu2 %v11513_v41  ;;  %v8010_v62 = vor.u32 %v10646_v35, %v8007_v37  ;;  %v10836_v4 = vld [vmem:[#allocation2 + $0xd7c] sm:$0xf]  ;;  %v8367_v37 = vld [vmem:[#allocation2 + $0xa80] sm:$0xf0] }
 0x11c   :  { %v8770_v21 = vor.u32 %v10836_v4, %v8767_v7  ;;  %v10736_v35 = vld [vmem:[#allocation2 + $0xa5c] sm:$0xf]  ;;  %v10482_v4 = vld [vmem:[#allocation2 + $0x264] sm:$0xf0]  ;;  %v10726_v7 = vld [vmem:[#allocation2 + $0xa0c] sm:$0xf] }
 0x11d   :  { %5265 = vmatpush.bf16.msra.mxu1 %v8090_v13  ;;  %v9047_v13 = vld [vmem:[#allocation2 + $0xfd0] sm:$0xf0] }
 0x11e   :  { %5303 = vmatpush.bf16.msrb.mxu3 %v9210_v23  ;;  %5289 = vmatpush.bf16.msra.mxu2 %v8890_v46  ;;  %v8810_v23 = vor.u32 %v10846_v45, %v8807_v56  ;;  %v11026_v46 = vld [vmem:[#allocation2 + $0x136c] sm:$0xf]  ;;  %v9050_v22 = vor.u32 %v10906_v8, %v9047_v13  ;;  %v8730_v45 = vor.u32 %v10826_v26, %v8727_v28  ;;  %v10816_v56 = vld [vmem:[#allocation2 + $0xcdc] sm:$0xf]  ;;  %v8327_v8 = vld [vmem:[#allocation2 + $0xa30] sm:$0xf0] }
 0x11f   :  { %5276 = vmatpush.bf16.msra.mxu0 %v8530_v24  ;;  %v9530_v24 = vor.u32 %v11026_v46, %v9527_v50  ;;  %v9887_v13 = vld [vmem:[#allocation2 + $0x1660] sm:$0xf0]  ;;  %v8970_v46 = vor.u32 %v10886_v52, %v8967_v55  ;;  %v8330_v26 = vor.u32 %v10726_v7, %v8327_v8  ;;  %v11146_v52 = vld [vmem:[#allocation2 + $0x172c] sm:$0xf]  ;;  %v10007_v55 = vld [vmem:[#allocation2 + $0x1750] sm:$0xf0]  ;;  %v11643_v8 = vpop.f32.mrf.mxu0 }
 0x120   :  { %v9407_v28 = vld [vmem:[#allocation2 + $0x12a0] sm:$0xf0]  ;;  %v10976_v7 = vld [vmem:[#allocation2 + $0x11dc] sm:$0xf] }
 0x121   :  { %5266 = vmatpush.bf16.msra.mxu1 %v8050_v44  ;;  %v11016_v44 = vld [vmem:[#allocation2 + $0x131c] sm:$0xf] }
 0x122   :  { %5304 = vmatpush.bf16.msrb.mxu3 %v9170_v18  ;;  %5290 = vmatpush.bf16.msra.mxu2 %v8850_v34  ;;  %v8407_v18 = vld [vmem:[#allocation2 + $0xad0] sm:$0xf0]  ;;  %v9487_v34 = vld [vmem:[#allocation2 + $0x1340] sm:$0xf0]  ;;  %v5017_v58 = vpop.f32.mrf.mxu3 }
 0x123   :  { %5277 = vmatpush.bf16.msra.mxu0 %v8490_v57  ;;  %v8410_v19 = vor.u32 %v10746_v15, %v8407_v18  ;;  %v9010_v57 = vor.u32 %v10896_v33, %v9007_v43  ;;  %v9490_v48 = vor.u32 %v11016_v44, %v9487_v34  ;;  %v10806_v15 = vld [vmem:[#allocation2 + $0xc8c] sm:$0xf]  ;;  %v8647_v18 = vld [vmem:[#allocation2 + $0xcb0] sm:$0xf0]  ;;  %v11156_v33 = vld [vmem:[#allocation2 + $0x177c] sm:$0xf] }
 0x124   :  { %v7293_v34 = vld [vmem:[#allocation2 + $0x1f0] sm:$0xf] }
 0x125   :  { %5267 = vmatpush.bf16.msra.mxu1 %v8010_v62  ;;  %v8370_v62 = vor.u32 %v10736_v35, %v8367_v37  ;;  %v10472_v35 = vld [vmem:[#allocation2 + $0x214] sm:$0xf0]  ;;  %v8650_v37 = vor.u32 %v10806_v15, %v8647_v18  ;;  %v7213_v15 = vld [vmem:[#allocation2 + $0x150] sm:$0xf] }
 0x126   :  { %5305 = vmatpush.bf16.msrb.mxu3 %v9130_v14  ;;  %5291 = vmatpush.bf16.msra.mxu2 %v8810_v23  ;;  %v5003_v14 = vpop.f32.mrf.mxu2  ;;  %v11006_v23 = vld [vmem:[#allocation2 + $0x12cc] sm:$0xf]  ;;  %v10452_v18 = vld [vmem:[#allocation2 + $0x174] sm:$0xf0] }
 0x127   :  { %5278 = vmatpush.bf16.msra.mxu0 %v8450_v11  ;;  %v5004_v47 = vadd.f32 %v5003_v14, %v4990_v10  ;;  %v8690_v11 = vor.u32 %v10816_v56, %v8687_v49  ;;  %v11116_v10 = vld [vmem:[#allocation2 + $0x163c] sm:$0xf]  ;;  %v9450_v50 = vor.u32 %v11006_v23, %v9447_v63  ;;  %v11106_v14 = vld [vmem:[#allocation2 + $0x15ec] sm:$0xf]  ;;  %v9367_v49 = vld [vmem:[#allocation2 + $0x1250] sm:$0xf0] }
 0x128   :  { %5268 = vmatmul.bf16.vlgmr.msra.gmra.mxu1 %v11516_v42  ;;  %v9890_v44 = vor.u32 %v11116_v10, %v9887_v13  ;;  %v10462_v23 = vld [vmem:[#allocation2 + $0x1c4] sm:$0xf0]  ;;  %v11096_v63 = vld [vmem:[#allocation2 + $0x159c] sm:$0xf]  ;;  %v9327_v10 = vld [vmem:[#allocation2 + $0x1200] sm:$0xf0] }
 0x129   :  { %5316 = vmatpush.bf16.msrb.mxu1 %v9570_v1  ;;  %v5018_v1 = vadd.f32 %v5017_v58, %v5004_v47  ;;  %v11136_v13 = vld [vmem:[#allocation2 + $0x16dc] sm:$0xf] }
 0x12a   :  { %5306 = vmatpush.bf16.msrb.mxu3 %v9090_v0  ;;  %5292 = vmatpush.bf16.msra.mxu2 %v8770_v21  ;;  %v7333_v0 = vld [vmem:[#allocation2 + $0x240] sm:$0xf]  ;;  %v10996_v21 = vld [vmem:[#allocation2 + $0x127c] sm:$0xf] }
 0x12b   :  { %5279 = vmatpush.bf16.msra.mxu0 %v8410_v19  ;;  %v10047_v19 = vld [vmem:[#allocation2 + $0x17a0] sm:$0xf0]  ;;  %v9410_v56 = vor.u32 %v10996_v21, %v9407_v28  ;;  %v11647_v21 = vpop.f32.mrf.mxu3 }
 0x12c   :  { %v10050_v47 = vor.u32 %v11156_v33, %v10047_v19  ;;  %v10966_v33 = vld [vmem:[#allocation2 + $0x118c] sm:$0xf]  ;;  %v9287_v19 = vld [vmem:[#allocation2 + $0x11b0] sm:$0xf0] }
 0x12d   :  { %5317 = vmatpush.bf16.msrb.mxu1 %v9530_v24  ;;  %v7334_v24 = vor.u32 %v10482_v4, %v7333_v0  ;;  %v9807_v0 = vld [vmem:[#allocation2 + $0x15c0] sm:$0xf0]  ;;  %v10010_v4 = vor.u32 %v11146_v52, %v10007_v55 }
 0x12e   :  { %5307 = vmatpush.bf16.msrb.mxu3 %v9050_v22  ;;  %5293 = vmatpush.bf16.msra.mxu2 %v8730_v45  ;;  %v5031_v22 = vpop.f32.mrf.mxu1  ;;  %v9847_v45 = vld [vmem:[#allocation2 + $0x1610] sm:$0xf0]  ;;  %v9727_v52 = vld [vmem:[#allocation2 + $0x1520] sm:$0xf0]  ;;  %v11649_v55 = vpop.f32.mrf.mxu2 }
 0x12f   :  { %5280 = vmatpush.bf16.msra.mxu0 %v8370_v62  ;;  %v11640_v43 = vadd.f32 %v5031_v22, %v5018_v1  ;;  %v9850_v58 = vor.u32 %v11106_v14, %v9847_v45  ;;  %v7253_v62 = vld [vmem:[#allocation2 + $0x1a0] sm:$0xf]  ;;  %v11086_v22 = vld [vmem:[#allocation2 + $0x154c] sm:$0xf]  ;;  %v10442_v14 = vld [vmem:[#allocation2 + $0x124] sm:$0xf0] }
 0x131   :  { %5318 = vmatpush.bf16.msrb.mxu1 %v9490_v48  ;;  %v7294_v48 = vor.u32 %v10472_v35, %v7293_v34  ;;  %v7214_v34 = vor.u32 %v10452_v18, %v7213_v15  ;;  %v9927_v35 = vld [vmem:[#allocation2 + $0x16b0] sm:$0xf0]  ;;  %v10632_v15 = vld [vmem:[#allocation2 + $0x714] sm:$0xf0] }
 0x132   :  { %5308 = vmatpush.bf16.msrb.mxu3 %v9010_v57  ;;  %5294 = vmatpush.bf16.msra.mxu2 %v8690_v11  ;;  %v10986_v57 = vld [vmem:[#allocation2 + $0x122c] sm:$0xf]  ;;  %v7254_v11 = vor.u32 %v10462_v23, %v7253_v62 }
 0x133   :  { %5281 = vmatpush.bf16.msra.mxu0 %v8330_v26  ;;  %v9370_v1 = vor.u32 %v10986_v57, %v9367_v49  ;;  %v9330_v26 = vor.u32 %v10976_v7, %v9327_v10  ;;  %v7973_v57 = vld [vmem:[#allocation2 + $0x740] sm:$0xf]  ;;  %v11076_v49 = vld [vmem:[#allocation2 + $0x14fc] sm:$0xf]  ;;  %v5045_v23 = vpop.f32.mrf.mxu0  ;;  %v5073_v18 = vpop.f32.mrf.mxu3 }
 0x134   :  { %v5046_v7 = vadd.f32 %v5045_v23, %v11640_v43  ;;  %v9730_v10 = vor.u32 %v11076_v49, %v9727_v52 }
 0x135   :  { %5319 = vmatpush.bf16.msrb.mxu1 %v9450_v50  ;;  %v9810_v50 = vor.u32 %v11096_v63, %v9807_v0 }
 0x136   :  { %5309 = vmatpush.bf16.msrb.mxu3 %v8970_v46  ;;  %5295 = vmatpush.bf16.msra.mxu2 %v8650_v37  ;;  %v9967_v46 = vld [vmem:[#allocation2 + $0x1700] sm:$0xf0]  ;;  %v7173_v37 = vld [vmem:[#allocation2 + $0x100] sm:$0xf] }
 0x137   :  { %5330 = vmatpush.bf16.msrb.mxu0 %v9890_v44  ;;  %v9970_v28 = vor.u32 %v11136_v13, %v9967_v46  ;;  %v11126_v44 = vld [vmem:[#allocation2 + $0x168c] sm:$0xf]  ;;  %v7174_v63 = vor.u32 %v10442_v14, %v7173_v37  ;;  %v7613_v13 = vld [vmem:[#allocation2 + $0x470] sm:$0xf]  ;;  %v10552_v46 = vld [vmem:[#allocation2 + $0x494] sm:$0xf0] }
 0x138   :  { %5282 = vmatmul.bf16.vlgmr.msra.gmra.mxu0 %v11539_v29  ;;  %v9930_v62 = vor.u32 %v11126_v44, %v9927_v35  ;;  %v10542_v35 = vld [vmem:[#allocation2 + $0x444] sm:$0xf0]  ;;  %v7893_v37 = vld [vmem:[#allocation2 + $0x6a0] sm:$0xf] }
 0x139   :  { %5310 = vmatmul.bf16.vlgmr.msrb.gmra.mxu3 %v11542_v30  ;;  %5320 = vmatpush.bf16.msrb.mxu1 %v9410_v56  ;;  %v7653_v56 = vld [vmem:[#allocation2 + $0x4c0] sm:$0xf]  ;;  %v10622_v14 = vld [vmem:[#allocation2 + $0x6c4] sm:$0xf0] }
 0x13a   :  { %5358 = vmatpush.bf16.msra.mxu3 %v7334_v24  ;;  %5348 = vmatpush.bf16.msrb.mxu2 %v10050_v47  ;;  %v9767_v24 = vld [vmem:[#allocation2 + $0x1570] sm:$0xf0]  ;;  %v10562_v47 = vld [vmem:[#allocation2 + $0x4e4] sm:$0xf0]  ;;  %v7894_v23 = vor.u32 %v10622_v14, %v7893_v37 }
 0x13b   :  { %5296 = vmatmul.bf16.vlgmr.msra.gmra.mxu2 %v11545_v39  ;;  %5331 = vmatpush.bf16.msrb.mxu0 %v9850_v58  ;;  %v9770_v45 = vor.u32 %v11086_v22, %v9767_v24  ;;  %v9290_v58 = vor.u32 %v10966_v33, %v9287_v19  ;;  %v7654_v0 = vor.u32 %v10562_v47, %v7653_v56  ;;  %v11066_v22 = vld [vmem:[#allocation2 + $0x14ac] sm:$0xf]  ;;  %v9687_v24 = vld [vmem:[#allocation2 + $0x14d0] sm:$0xf0]  ;;  %v7093_v33 = vld [vmem:[#allocation2 + $0x60] sm:$0xf]  ;;  %v5059_v47 = vpop.f32.mrf.mxu2 }
 0x13c   :  { %v10422_v19 = vld [vmem:[#allocation2 + $0x84] sm:$0xf0]  ;;  %v9690_v44 = vor.u32 %v11066_v22, %v9687_v24  ;;  %v9647_v56 = vld [vmem:[#allocation2 + $0x1480] sm:$0xf0]  ;;  %v11659_v24 = vpop.f32.mrf.mxu3 }
 0x13d   :  { %5321 = vmatpush.bf16.msrb.mxu1 %v9370_v1  ;;  %v7133_v1 = vld [vmem:[#allocation2 + $0xb0] sm:$0xf]  ;;  %v7094_v49 = vor.u32 %v10422_v19, %v7093_v33  ;;  %12023 = vst [vmem:[#allocation20_spill] sm:$0xff] %v11659_v24  ;;  %v10722_v33 = vld [vmem:[#allocation2 + $0x9e4] sm:$0xf0] }
 0x13e   :  { %5359 = vmatpush.bf16.msra.mxu3 %v7294_v48  ;;  %5349 = vmatpush.bf16.msrb.mxu2 %v10010_v4  ;;  %v10642_v48 = vld [vmem:[#allocation2 + $0x764] sm:$0xf0]  ;;  %v10432_v4 = vld [vmem:[#allocation2 + $0xd4] sm:$0xf0] }
 0x13f   :  { %5332 = vmatpush.bf16.msrb.mxu0 %v9810_v50  ;;  %v7933_v50 = vld [vmem:[#allocation2 + $0x6f0] sm:$0xf]  ;;  %v10602_v14 = vld [vmem:[#allocation2 + $0x624] sm:$0xf0] }
 0x140   :  { %v7934_v43 = vor.u32 %v10632_v15, %v7933_v50  ;;  %v9607_v50 = vld [vmem:[#allocation2 + $0x1430] sm:$0xf0] }
 0x141   :  { %5322 = vmatpush.bf16.msrb.mxu1 %v9330_v26  ;;  %v7134_v26 = vor.u32 %v10432_v4, %v7133_v1  ;;  %v10532_v1 = vld [vmem:[#allocation2 + $0x3f4] sm:$0xf0]  ;;  %v7853_v4 = vld [vmem:[#allocation2 + $0x650] sm:$0xf] }
 0x142   :  { %5360 = vmatpush.bf16.msra.mxu3 %v7254_v11  ;;  %5350 = vmatpush.bf16.msrb.mxu2 %v9970_v28  ;;  %v7974_v11 = vor.u32 %v10642_v48, %v7973_v57  ;;  %v7614_v28 = vor.u32 %v10552_v46, %v7613_v13  ;;  %v11653_v57 = vpop.f32.mrf.mxu1  ;;  %v5060_v48 = vadd.f32 %v5059_v47, %v5046_v7  ;;  %v8613_v13 = vld [vmem:[#allocation2 + $0xc40] sm:$0xf]  ;;  %v10802_v46 = vld [vmem:[#allocation2 + $0xc64] sm:$0xf0]  ;;  %v11046_v7 = vld [vmem:[#allocation2 + $0x140c] sm:$0xf] }
 0x143   :  { %5333 = vmatpush.bf16.msrb.mxu0 %v9770_v45  ;;  %v11056_v45 = vld [vmem:[#allocation2 + $0x145c] sm:$0xf]  ;;  %v8614_v19 = vor.u32 %v10802_v46, %v8613_v13  ;;  %v9610_v37 = vor.u32 %v11046_v7, %v9607_v50  ;;  %v8533_v13 = vld [vmem:[#allocation2 + $0xba0] sm:$0xf]  ;;  %v10782_v46 = vld [vmem:[#allocation2 + $0xbc4] sm:$0xf0] }
 0x145   :  { %5323 = vmatpush.bf16.msrb.mxu1 %v9290_v58  ;;  %v7053_v58 = vld [vmem:[#allocation2 + $0x10] sm:$0xf] }
 0x146   :  { %5361 = vmatpush.bf16.msra.mxu3 %v7214_v34  ;;  %5351 = vmatpush.bf16.msrb.mxu2 %v9930_v62  ;;  %v7573_v34 = vld [vmem:[#allocation2 + $0x420] sm:$0xf]  ;;  %v10412_v62 = vld [vmem:[#allocation2 + $0x34] sm:$0xf0] }
 0x147   :  { %5334 = vmatpush.bf16.msrb.mxu0 %v9730_v10  ;;  %v7574_v52 = vor.u32 %v10542_v35, %v7573_v34  ;;  %v10612_v10 = vld [vmem:[#allocation2 + $0x674] sm:$0xf0]  ;;  %v7054_v15 = vor.u32 %v10412_v62, %v7053_v58  ;;  %v11661_v34 = vld [vmem:[#allocation5] sm:$0xff] }
 0x148   :  { %5324 = vmatmul.bf16.vlgmr.msrb.gmra.mxu1 %v11548_v40  ;;  %v12012_v35 = vperm.slane %v11661_v34, 2 }
 0x149   :  { %5372 = vmatpush.bf16.msra.mxu1 %v7654_v0  ;;  %v7533_v0 = vld [vmem:[#allocation2 + $0x3d0] sm:$0xf] }
 0x14a   :  { %5362 = vmatpush.bf16.msra.mxu3 %v7174_v63  ;;  %5386 = vmatpush.bf16.msra.mxu2 %v7974_v11  ;;  %v9650_v63 = vor.u32 %v11056_v45, %v9647_v56  ;;  %v11655_v11 = vadd.f32 %v5073_v18, %v5060_v48  ;;  %v7534_v22 = vor.u32 %v10532_v1, %v7533_v0  ;;  %v8573_v45 = vld [vmem:[#allocation2 + $0xbf0] sm:$0xf]  ;;  %v10792_v56 = vld [vmem:[#allocation2 + $0xc14] sm:$0xf0]  ;;  %v5087_v58 = vpop.f32.mrf.mxu1 }
 0x14b   :  { %5335 = vmatpush.bf16.msrb.mxu0 %v9690_v44  ;;  %10078 = vmatmul.msk.bf16.vlgmr.msrb.gmra.mxu2 %vm4794_vm0, %v11571_v6  ;;  %v7854_v18 = vor.u32 %v10612_v10, %v7853_v4  ;;  %v7813_v44 = vld [vmem:[#allocation2 + $0x600] sm:$0xf]  ;;  %v10512_v0 = vld [vmem:[#allocation2 + $0x354] sm:$0xf0]  ;;  %v7773_v1 = vld [vmem:[#allocation2 + $0x5b0] sm:$0xf]  ;;  %v5088_v4 = vadd.f32 %v5087_v58, %v12012_v35 }
 0x14c   :  { %12022 = vst [vmem:[#allocation19_spill] sm:$0xff] %v11655_v11  ;;  %v7814_v62 = vor.u32 %v10602_v14, %v7813_v44  ;;  %v10592_v10 = vld [vmem:[#allocation2 + $0x5d4] sm:$0xf0]  ;;  %v10582_v14 = vld [vmem:[#allocation2 + $0x584] sm:$0xf0] }
 0x14d   :  { %5373 = vmatpush.bf16.msra.mxu1 %v7614_v28  ;;  %v8293_v28 = vld [vmem:[#allocation2 + $0x9c0] sm:$0xf]  ;;  %v10692_v58 = vld [vmem:[#allocation2 + $0x8f4] sm:$0xf0]  ;;  %v8893_v35 = vld [vmem:[#allocation2 + $0xe70] sm:$0xf] }
 0x14e   :  { %5363 = vmatpush.bf16.msra.mxu3 %v7134_v26  ;;  %5387 = vmatpush.bf16.msra.mxu2 %v7934_v43  ;;  %v7493_v26 = vld [vmem:[#allocation2 + $0x380] sm:$0xf]  ;;  %v10522_v43 = vld [vmem:[#allocation2 + $0x3a4] sm:$0xf0]  ;;  %v8294_v47 = vor.u32 %v10722_v33, %v8293_v28  ;;  %v7774_v28 = vor.u32 %v10592_v10, %v7773_v1  ;;  %v8534_v33 = vor.u32 %v10782_v46, %v8533_v13  ;;  %v10572_v1 = vld [vmem:[#allocation2 + $0x534] sm:$0xf0] }
 0x14f   :  { %5336 = vmatpush.bf16.msrb.mxu0 %v9650_v63  ;;  %v7494_v48 = vor.u32 %v10522_v43, %v7493_v26  ;;  %v7453_v63 = vld [vmem:[#allocation2 + $0x330] sm:$0xf]  ;;  %v5101_v26 = vpop.f32.mrf.mxu3  ;;  %v7733_v43 = vld [vmem:[#allocation2 + $0x560] sm:$0xf]  ;;  %v10762_v10 = vld [vmem:[#allocation2 + $0xb24] sm:$0xf0] }
 0x150   :  { %v7454_v50 = vor.u32 %v10512_v0, %v7453_v63  ;;  %v5102_v44 = vadd.f32 %v5101_v26, %v5088_v4  ;;  %v10492_v63 = vld [vmem:[#allocation2 + $0x2b4] sm:$0xf0]  ;;  %v7693_v0 = vld [vmem:[#allocation2 + $0x510] sm:$0xf]  ;;  %v8453_v4 = vld [vmem:[#allocation2 + $0xb00] sm:$0xf] }
 0x151   :  { %5374 = vmatpush.bf16.msra.mxu1 %v7574_v52  ;;  %v10712_v52 = vld [vmem:[#allocation2 + $0x994] sm:$0xf0]  ;;  %v8933_v13 = vld [vmem:[#allocation2 + $0xec0] sm:$0xf]  ;;  %v10882_v26 = vld [vmem:[#allocation2 + $0xee4] sm:$0xf0] }
 0x152   :  { %5364 = vmatpush.bf16.msra.mxu3 %v7094_v49  ;;  %5388 = vmatpush.bf16.msra.mxu2 %v7894_v23  ;;  %v8253_v49 = vld [vmem:[#allocation2 + $0x970] sm:$0xf]  ;;  %v8574_v23 = vor.u32 %v10792_v56, %v8573_v45  ;;  %v10772_v56 = vld [vmem:[#allocation2 + $0xb74] sm:$0xf0] }
 0x153   :  { %5337 = vmatpush.bf16.msrb.mxu0 %v9610_v37  ;;  %v8254_v7 = vor.u32 %v10712_v52, %v8253_v49  ;;  %v11667_v37 = vpop.f32.mrf.mxu0  ;;  %v8493_v45 = vld [vmem:[#allocation2 + $0xb50] sm:$0xf] }
 0x154   :  { %12024 = vst [vmem:[#allocation21_spill] sm:$0xff] %v11667_v37  ;;  %v7373_v49 = vld [vmem:[#allocation2 + $0x290] sm:$0xf] }
 0x155   :  { %5375 = vmatpush.bf16.msra.mxu1 %v7534_v22  ;;  %v10702_v22 = vld [vmem:[#allocation2 + $0x944] sm:$0xf0]  ;;  %v8173_v52 = vld [vmem:[#allocation2 + $0x8d0] sm:$0xf] }
 0x156   :  { %5365 = vmatpush.bf16.msra.mxu3 %v7054_v15  ;;  %5389 = vmatpush.bf16.msra.mxu2 %v7854_v18  ;;  %v8213_v15 = vld [vmem:[#allocation2 + $0x920] sm:$0xf]  ;;  %v8174_v46 = vor.u32 %v10692_v58, %v8173_v52  ;;  %v10872_v58 = vld [vmem:[#allocation2 + $0xe94] sm:$0xf0]  ;;  %v9853_v11 = vld [vmem:[#allocation2 + $0x15f0] sm:$0xf] }
 0x157   :  { %5400 = vmatpush.bf16.msra.mxu0 %v8294_v47  ;;  %v7413_v18 = vld [vmem:[#allocation2 + $0x2e0] sm:$0xf]  ;;  %v8214_v47 = vor.u32 %v10702_v22, %v8213_v15  ;;  %v10962_v15 = vld [vmem:[#allocation2 + $0x1164] sm:$0xf0] }
 0x158   :  { %5338 = vmatmul.bf16.vlgmr.msrb.gmra.mxu0 %v11568_v5  ;;  %v8133_v22 = vld [vmem:[#allocation2 + $0x880] sm:$0xf] }
 0x159   :  { %5366 = vmatmul.bf16.vlgmr.msra.gmra.mxu3 %v11507_v31  ;;  %5376 = vmatpush.bf16.msra.mxu1 %v7494_v48 }
 0x15a   :  { %5414 = vmatpush.bf16.msrb.mxu3 %v8614_v19  ;;  %5390 = vmatpush.bf16.msra.mxu2 %v7814_v62  ;;  %v10502_v19 = vld [vmem:[#allocation2 + $0x304] sm:$0xf0]  ;;  %v7734_v62 = vor.u32 %v10582_v14, %v7733_v43  ;;  %v8934_v43 = vor.u32 %v10882_v26, %v8933_v13  ;;  %v8853_v13 = vld [vmem:[#allocation2 + $0xe20] sm:$0xf] }
 0x15b   :  { %5401 = vmatpush.bf16.msra.mxu0 %v8254_v7  ;;  %v7414_v48 = vor.u32 %v10502_v19, %v7413_v18  ;;  %v9253_v7 = vld [vmem:[#allocation2 + $0x1140] sm:$0xf]  ;;  %v10682_v18 = vld [vmem:[#allocation2 + $0x8a4] sm:$0xf0]  ;;  %v11670_v19 = vpop.f32.mrf.mxu2 }
 0x15c   :  { %12025 = vst [vmem:[#allocation22_spill] sm:$0xff] %v11670_v19  ;;  %v9254_v14 = vor.u32 %v10962_v15, %v9253_v7  ;;  %v8134_v52 = vor.u32 %v10682_v18, %v8133_v22  ;;  %v10862_v26 = vld [vmem:[#allocation2 + $0xe44] sm:$0xf0]  ;;  %v9173_v7 = vld [vmem:[#allocation2 + $0x10a0] sm:$0xf] }
 0x15d   :  { %5377 = vmatpush.bf16.msra.mxu1 %v7454_v50  ;;  %v7374_v50 = vor.u32 %v10492_v63, %v7373_v49  ;;  %v8093_v63 = vld [vmem:[#allocation2 + $0x830] sm:$0xf]  ;;  %v8053_v15 = vld [vmem:[#allocation2 + $0x7e0] sm:$0xf] }
 0x15e   :  { %5415 = vmatpush.bf16.msrb.mxu3 %v8574_v23  ;;  %5391 = vmatpush.bf16.msra.mxu2 %v7774_v28  ;;  %v8494_v23 = vor.u32 %v10772_v56, %v8493_v45  ;;  %v7694_v28 = vor.u32 %v10572_v1, %v7693_v0  ;;  %v8413_v45 = vld [vmem:[#allocation2 + $0xab0] sm:$0xf]  ;;  %v10752_v56 = vld [vmem:[#allocation2 + $0xad4] sm:$0xf0]  ;;  %v8894_v0 = vor.u32 %v10872_v58, %v8893_v35  ;;  %v11122_v58 = vld [vmem:[#allocation2 + $0x1664] sm:$0xf0] }
 0x15f   :  { %5402 = vmatpush.bf16.msra.mxu0 %v8214_v47  ;;  %v5115_v47 = vpop.f32.mrf.mxu0  ;;  %v8333_v18 = vld [vmem:[#allocation2 + $0xa10] sm:$0xf] }
 0x160   :  { %v5116_v49 = vadd.f32 %v5115_v47, %v5102_v44  ;;  %v10942_v44 = vld [vmem:[#allocation2 + $0x10c4] sm:$0xf0]  ;;  %v10932_v47 = vld [vmem:[#allocation2 + $0x1074] sm:$0xf0]  ;;  %v9373_v19 = vld [vmem:[#allocation2 + $0x1230] sm:$0xf] }
 0x161   :  { %5378 = vmatpush.bf16.msra.mxu1 %v7414_v48  ;;  %v10952_v48 = vld [vmem:[#allocation2 + $0x1114] sm:$0xf0]  ;;  %v9174_v35 = vor.u32 %v10942_v44, %v9173_v7  ;;  %v10842_v7 = vld [vmem:[#allocation2 + $0xda4] sm:$0xf0]  ;;  %v9093_v44 = vld [vmem:[#allocation2 + $0x1000] sm:$0xf] }
 0x162   :  { %5416 = vmatpush.bf16.msrb.mxu3 %v8534_v33  ;;  %5392 = vmatpush.bf16.msra.mxu2 %v7734_v62  ;;  %v8454_v33 = vor.u32 %v10762_v10, %v8453_v4  ;;  %v8414_v62 = vor.u32 %v10752_v56, %v8413_v45  ;;  %v9214_v1 = vor.u32 %v10952_v48, %v9213_v53  ;;  %v8373_v4 = vld [vmem:[#allocation2 + $0xa60] sm:$0xf]  ;;  %v10742_v10 = vld [vmem:[#allocation2 + $0xa84] sm:$0xf0]  ;;  %v9133_v56 = vld [vmem:[#allocation2 + $0x1050] sm:$0xf] }
 0x163   :  { %5403 = vmatpush.bf16.msra.mxu0 %v8174_v46  ;;  %v8094_v46 = vor.u32 %v10672_v3, %v8093_v63  ;;  %v8374_v22 = vor.u32 %v10742_v10, %v8373_v4  ;;  %v8854_v53 = vor.u32 %v10862_v26, %v8853_v13  ;;  %v10852_v3 = vld [vmem:[#allocation2 + $0xdf4] sm:$0xf0]  ;;  %v8013_v48 = vld [vmem:[#allocation2 + $0x790] sm:$0xf]  ;;  %v9134_v13 = vor.u32 %v10932_v47, %v9133_v56  ;;  %v8773_v26 = vld [vmem:[#allocation2 + $0xd80] sm:$0xf] }
 0x164   :  { %v10652_v63 = vld [vmem:[#allocation2 + $0x7b4] sm:$0xf0] }
 0x165   :  { %5379 = vmatpush.bf16.msra.mxu1 %v7374_v50  ;;  %v10662_v50 = vld [vmem:[#allocation2 + $0x804] sm:$0xf0]  ;;  %v10912_v56 = vld [vmem:[#allocation2 + $0xfd4] sm:$0xf0] }
 0x166   :  { %5417 = vmatpush.bf16.msrb.mxu3 %v8494_v23  ;;  %5393 = vmatpush.bf16.msra.mxu2 %v7694_v28  ;;  %v11672_v23 = vpop.f32.mrf.mxu1  ;;  %v5129_v28 = vpop.f32.mrf.mxu2  ;;  %v8054_v45 = vor.u32 %v10662_v50, %v8053_v15  ;;  %v10922_v15 = vld [vmem:[#allocation2 + $0x1024] sm:$0xf0] }
 0x167   :  { %5404 = vmatpush.bf16.msra.mxu0 %v8134_v52  ;;  %v9893_v52 = vld [vmem:[#allocation2 + $0x1640] sm:$0xf] }
 0x168   :  { %5380 = vmatmul.bf16.vlgmr.msra.gmra.mxu1 %v11513_v41 }
 0x169   :  { %5428 = vmatpush.bf16.msrb.mxu1 %v8934_v43  ;;  %5394 = vmatmul.bf16.vlgmr.msra.gmra.mxu2 %v11510_v32  ;;  %v8813_v43 = vld [vmem:[#allocation2 + $0xdd0] sm:$0xf] }
 0x16a   :  { %5418 = vmatpush.bf16.msrb.mxu3 %v8454_v33  ;;  %5442 = vmatpush.bf16.msrb.mxu2 %v9254_v14  ;;  %v10732_v33 = vld [vmem:[#allocation2 + $0xa34] sm:$0xf0]  ;;  %v5130_v14 = vadd.f32 %v5129_v28, %v5116_v49  ;;  %v8814_v10 = vor.u32 %v10852_v3, %v8813_v43  ;;  %v9894_v49 = vor.u32 %v11122_v58, %v9893_v52  ;;  %v9813_v52 = vld [vmem:[#allocation2 + $0x15a0] sm:$0xf]  ;;  %v11102_v58 = vld [vmem:[#allocation2 + $0x15c4] sm:$0xf0] }
 0x16b   :  { %5405 = vmatpush.bf16.msra.mxu0 %v8094_v46  ;;  %v8334_v4 = vor.u32 %v10732_v33, %v8333_v18  ;;  %v8014_v46 = vor.u32 %v10652_v63, %v8013_v48  ;;  %v11032_v18 = vld [vmem:[#allocation2 + $0x1394] sm:$0xf0]  ;;  %v8733_v33 = vld [vmem:[#allocation2 + $0xd30] sm:$0xf]  ;;  %v9854_v43 = vor.u32 %v11112_v51, %v9853_v11  ;;  %v9493_v48 = vld [vmem:[#allocation2 + $0x1320] sm:$0xf]  ;;  %v9814_v51 = vor.u32 %v11102_v58, %v9813_v52 }
 0x16c   :  { %v10832_v3 = vld [vmem:[#allocation2 + $0xd54] sm:$0xf0]  ;;  %v11022_v63 = vld [vmem:[#allocation2 + $0x1344] sm:$0xf0]  ;;  %v10477_v58 = vld [vmem:[#allocation2 + $0x244] sm:$0xf] }
 0x16d   :  { %5429 = vmatpush.bf16.msrb.mxu1 %v8894_v0  ;;  %v9573_v0 = vld [vmem:[#allocation2 + $0x13c0] sm:$0xf]  ;;  %v10822_v11 = vld [vmem:[#allocation2 + $0xd04] sm:$0xf0] }
 0x16e   :  { %5419 = vmatpush.bf16.msrb.mxu3 %v8414_v62  ;;  %5443 = vmatpush.bf16.msrb.mxu2 %v9214_v1  ;;  %v11676_v62 = vpop.f32.mrf.mxu3  ;;  %v11042_v1 = vld [vmem:[#allocation2 + $0x13e4] sm:$0xf0]  ;;  %v5143_v50 = vpop.f32.mrf.mxu1 }
 0x16f   :  { %5406 = vmatpush.bf16.msra.mxu0 %v8054_v45  ;;  %v9574_v28 = vor.u32 %v11042_v1, %v9573_v0  ;;  %v5144_v24 = vadd.f32 %v5143_v50, %v5130_v14  ;;  %v9053_v45 = vld [vmem:[#allocation2 + $0xfb0] sm:$0xf]  ;;  %v11679_v14 = vpop.f32.mrf.mxu0  ;;  %v8693_v1 = vld [vmem:[#allocation2 + $0xce0] sm:$0xf]  ;;  %v11012_v50 = vld [vmem:[#allocation2 + $0x12f4] sm:$0xf0] }
 0x170   :  { %12026 = vst [vmem:[#allocation23_spill] sm:$0xff] %v11679_v14  ;;  %v9054_v0 = vor.u32 %v10912_v56, %v9053_v45  ;;  %v11682_v45 = vpop.f32.mrf.mxu2  ;;  %v11162_v52 = vld [vmem:[#allocation2 + $0x17a4] sm:$0xf0]  ;;  %v10913_v14 = vld [vmem:[#allocation2 + $0xfdc] sm:$0xf0] }
 0x171   :  { %5430 = vmatpush.bf16.msrb.mxu1 %v8854_v53  ;;  %v8774_v53 = vor.u32 %v10842_v7, %v8773_v26  ;;  %v10902_v26 = vld [vmem:[#allocation2 + $0xf84] sm:$0xf0]  ;;  %v9773_v7 = vld [vmem:[#allocation2 + $0x1550] sm:$0xf]  ;;  %12027 = vst [vmem:[#allocation24_spill] sm:$0xff] %v11682_v45 }
 0x172   :  { %5420 = vmatpush.bf16.msrb.mxu3 %v8374_v22  ;;  %5444 = vmatpush.bf16.msrb.mxu2 %v9174_v35  ;;  %v9533_v22 = vld [vmem:[#allocation2 + $0x1370] sm:$0xf]  ;;  %v9094_v35 = vor.u32 %v10922_v15, %v9093_v44  ;;  %v11092_v44 = vld [vmem:[#allocation2 + $0x1574] sm:$0xf0]  ;;  %v7295_v45 = vld [vmem:[#allocation2 + $0x218] sm:$0xf0] }
 0x173   :  { %5407 = vmatpush.bf16.msra.mxu0 %v8014_v46  ;;  %v9534_v47 = vor.u32 %v11032_v18, %v9533_v22  ;;  %v9494_v46 = vor.u32 %v11022_v63, %v9493_v48  ;;  %v9453_v15 = vld [vmem:[#allocation2 + $0x12d0] sm:$0xf]  ;;  %v7335_v48 = vld [vmem:[#allocation2 + $0x268] sm:$0xf0]  ;;  %v9413_v63 = vld [vmem:[#allocation2 + $0x1280] sm:$0xf] }
 0x174   :  { %v8653_v18 = vld [vmem:[#allocation2 + $0xc90] sm:$0xf]  ;;  %v9454_v56 = vor.u32 %v11012_v50, %v9453_v15  ;;  %v11152_v50 = vld [vmem:[#allocation2 + $0x1754] sm:$0xf0] }
 0x175   :  { %5431 = vmatpush.bf16.msrb.mxu1 %v8814_v10  ;;  %v10013_v15 = vld [vmem:[#allocation2 + $0x1730] sm:$0xf] }
 0x176   :  { %5421 = vmatpush.bf16.msrb.mxu3 %v8334_v4  ;;  %5445 = vmatpush.bf16.msrb.mxu2 %v9134_v13  ;;  %v8734_v4 = vor.u32 %v10832_v3, %v8733_v33  ;;  %v5157_v10 = vpop.f32.mrf.mxu3  ;;  %v9013_v13 = vld [vmem:[#allocation2 + $0xf60] sm:$0xf]  ;;  %v9774_v33 = vor.u32 %v11092_v44, %v9773_v7  ;;  %v7338_v7 = vor.u32 %v10477_v58, %v7335_v48  ;;  %v10982_v58 = vld [vmem:[#allocation2 + $0x1204] sm:$0xf0] }
 0x177   :  { %5456 = vmatpush.bf16.msrb.mxu0 %v9574_v28  ;;  %v8694_v28 = vor.u32 %v10822_v11, %v8693_v1  ;;  %v9014_v22 = vor.u32 %v10902_v26, %v9013_v13  ;;  %v9733_v3 = vld [vmem:[#allocation2 + $0x1500] sm:$0xf]  ;;  %v9693_v13 = vld [vmem:[#allocation2 + $0x14b0] sm:$0xf]  ;;  %v11072_v26 = vld [vmem:[#allocation2 + $0x14d4] sm:$0xf0] }
 0x178   :  { %5408 = vmatmul.bf16.vlgmr.msra.gmra.mxu0 %v11516_v42 }
 0x179   :  { %5422 = vmatmul.bf16.vlgmr.msrb.gmra.mxu3 %v11539_v29  ;;  %5432 = vmatpush.bf16.msrb.mxu1 %v8774_v53  ;;  %v10812_v53 = vld [vmem:[#allocation2 + $0xcb4] sm:$0xf0] }
 0x17a   :  { %5470 = vmatpush.bf16.msra.mxu3 %v9894_v49  ;;  %5446 = vmatpush.bf16.msrb.mxu2 %v9094_v35  ;;  %v5158_v49 = vadd.f32 %v5157_v10, %v5144_v24  ;;  %v8973_v35 = vld [vmem:[#allocation2 + $0xf10] sm:$0xf]  ;;  %v11082_v24 = vld [vmem:[#allocation2 + $0x1524] sm:$0xf0]  ;;  %v5171_v10 = vpop.f32.mrf.mxu0 }
 0x17b   :  { %5457 = vmatpush.bf16.msrb.mxu0 %v9534_v47  ;;  %v10053_v47 = vld [vmem:[#allocation2 + $0x1780] sm:$0xf] }
 0x17c   :  { %v10054_v11 = vor.u32 %v11162_v52, %v10053_v47  ;;  %v7255_v47 = vld [vmem:[#allocation2 + $0x1c8] sm:$0xf0]  ;;  %v9333_v52 = vld [vmem:[#allocation2 + $0x11e0] sm:$0xf]  ;;  %v5185_v48 = vpop.f32.mrf.mxu2 }
 0x17d   :  { %5433 = vmatpush.bf16.msrb.mxu1 %v8734_v4  ;;  %v11002_v4 = vld [vmem:[#allocation2 + $0x12a4] sm:$0xf0] }
 0x17e   :  { %5471 = vmatpush.bf16.msra.mxu3 %v9854_v43  ;;  %5447 = vmatpush.bf16.msrb.mxu2 %v9054_v0  ;;  %v10892_v43 = vld [vmem:[#allocation2 + $0xf34] sm:$0xf0]  ;;  %v8654_v0 = vor.u32 %v10812_v53, %v8653_v18  ;;  %v9414_v44 = vor.u32 %v11002_v4, %v9413_v63  ;;  %v10014_v18 = vor.u32 %v11152_v50, %v10013_v15  ;;  %v11686_v53 = vpop.f32.mrf.mxu3  ;;  %v9293_v15 = vld [vmem:[#allocation2 + $0x1190] sm:$0xf] }
 0x17f   :  { %5458 = vmatpush.bf16.msrb.mxu0 %v9494_v46  ;;  %v8974_v1 = vor.u32 %v10892_v43, %v8973_v35  ;;  %v5172_v46 = vadd.f32 %v5171_v10, %v5158_v49  ;;  %12029 = vst [vmem:[#allocation26_spill] sm:$0xff] %v11686_v53  ;;  %v9653_v49 = vld [vmem:[#allocation2 + $0x1460] sm:$0xf]  ;;  %v11062_v35 = vld [vmem:[#allocation2 + $0x1484] sm:$0xf0]  ;;  %v9374_v43 = vor.u32 %v10992_v16, %v9373_v19 }
 0x180   :  { %v9654_v4 = vor.u32 %v11062_v35, %v9653_v49  ;;  %v11052_v10 = vld [vmem:[#allocation2 + $0x1434] sm:$0xf0]  ;;  %v9334_v19 = vor.u32 %v10982_v58, %v9333_v52  ;;  %v7655_v49 = vld [vmem:[#allocation2 + $0x4e8] sm:$0xf0]  ;;  %v10627_v58 = vld [vmem:[#allocation2 + $0x6f4] sm:$0xf] }
 0x181   :  { %5434 = vmatpush.bf16.msrb.mxu1 %v8694_v28  ;;  %v11684_v28 = vpop.f32.mrf.mxu1  ;;  %v5186_v63 = vadd.f32 %v5185_v48, %v5172_v46  ;;  %v10972_v46 = vld [vmem:[#allocation2 + $0x11b4] sm:$0xf0]  ;;  %v7175_v52 = vld [vmem:[#allocation2 + $0x128] sm:$0xf0]  ;;  %v7935_v48 = vld [vmem:[#allocation2 + $0x718] sm:$0xf0] }
 0x182   :  { %5472 = vmatpush.bf16.msra.mxu3 %v9814_v51  ;;  %5448 = vmatpush.bf16.msrb.mxu2 %v9014_v22  ;;  %v9734_v51 = vor.u32 %v11082_v24, %v9733_v3  ;;  %12028 = vst [vmem:[#allocation25_spill] sm:$0xff] %v11684_v28  ;;  %v9694_v22 = vor.u32 %v11072_v26, %v9693_v13  ;;  %v9973_v3 = vld [vmem:[#allocation2 + $0x16e0] sm:$0xf]  ;;  %v11142_v24 = vld [vmem:[#allocation2 + $0x1704] sm:$0xf0] }
 0x183   :  { %5459 = vmatpush.bf16.msrb.mxu0 %v9454_v56  ;;  %v10457_v56 = vld [vmem:[#allocation2 + $0x1a4] sm:$0xf]  ;;  %v7975_v26 = vld [vmem:[#allocation2 + $0x768] sm:$0xf0] }
 0x184   :  { %v7258_v16 = vor.u32 %v10457_v56, %v7255_v47  ;;  %v10637_v13 = vld [vmem:[#allocation2 + $0x744] sm:$0xf]  ;;  %v9294_v47 = vor.u32 %v10972_v46, %v9293_v15  ;;  %v7575_v46 = vld [vmem:[#allocation2 + $0x448] sm:$0xf0] }
 0x185   :  { %5435 = vmatpush.bf16.msrb.mxu1 %v8654_v0  ;;  %v9974_v0 = vor.u32 %v11142_v24, %v9973_v3  ;;  %v10537_v15 = vld [vmem:[#allocation2 + $0x424] sm:$0xf] }
 0x186   :  { %5473 = vmatpush.bf16.msra.mxu3 %v9774_v33  ;;  %5449 = vmatpush.bf16.msrb.mxu2 %v8974_v1  ;;  %v7298_v33 = vor.u32 %v10467_v27, %v7295_v45  ;;  %v9613_v1 = vld [vmem:[#allocation2 + $0x1410] sm:$0xf]  ;;  %v11132_v45 = vld [vmem:[#allocation2 + $0x16b4] sm:$0xf0]  ;;  %v5213_v24 = vpop.f32.mrf.mxu3 }
 0x187   :  { %5460 = vmatpush.bf16.msrb.mxu0 %v9414_v44  ;;  %v9933_v27 = vld [vmem:[#allocation2 + $0x1690] sm:$0xf]  ;;  %v8295_v44 = vld [vmem:[#allocation2 + $0x9e8] sm:$0xf0]  ;;  %v9614_v50 = vor.u32 %v11052_v10, %v9613_v1  ;;  %v10547_v1 = vld [vmem:[#allocation2 + $0x474] sm:$0xf] }
 0x188   :  { %5436 = vmatmul.bf16.vlgmr.msrb.gmra.mxu1 %v11545_v39  ;;  %v7615_v10 = vld [vmem:[#allocation2 + $0x498] sm:$0xf0] }
 0x189   :  { %5488 = vmatpush.bf16.msra.mxu1 %v10054_v11  ;;  %5450 = vmatmul.bf16.vlgmr.msrb.gmra.mxu2 %v11542_v30  ;;  %v7215_v11 = vld [vmem:[#allocation2 + $0x178] sm:$0xf0]  ;;  %v5199_v3 = vpop.f32.mrf.mxu1 }
 0x18a   :  { %5474 = vmatpush.bf16.msra.mxu3 %v9734_v51  ;;  %5498 = vmatpush.bf16.msra.mxu2 %v7338_v7  ;;  %v10447_v51 = vld [vmem:[#allocation2 + $0x154] sm:$0xf]  ;;  %v10717_v7 = vld [vmem:[#allocation2 + $0x9c4] sm:$0xf]  ;;  %v5200_v53 = vadd.f32 %v5199_v3, %v5186_v63  ;;  %v7895_v63 = vld [vmem:[#allocation2 + $0x6c8] sm:$0xf0] }
 0x18b   :  { %5461 = vmatpush.bf16.msrb.mxu0 %v9374_v43  ;;  %v7218_v35 = vor.u32 %v10447_v51, %v7215_v11  ;;  %v10437_v43 = vld [vmem:[#allocation2 + $0x104] sm:$0xf]  ;;  %v8298_v56 = vor.u32 %v10717_v7, %v8295_v44  ;;  %v7135_v11 = vld [vmem:[#allocation2 + $0xd8] sm:$0xf0]  ;;  %v8215_v44 = vld [vmem:[#allocation2 + $0x948] sm:$0xf0] }
 0x18c   :  { %v10697_v7 = vld [vmem:[#allocation2 + $0x924] sm:$0xf]  ;;  %v8175_v3 = vld [vmem:[#allocation2 + $0x8f8] sm:$0xf0] }
 0x18d   :  { %5489 = vmatpush.bf16.msra.mxu1 %v10014_v18  ;;  %v10557_v18 = vld [vmem:[#allocation2 + $0x4c4] sm:$0xf] }
 0x18e   :  { %5475 = vmatpush.bf16.msra.mxu3 %v9694_v22  ;;  %5499 = vmatpush.bf16.msra.mxu2 %v7298_v33  ;;  %v9934_v22 = vor.u32 %v11132_v45, %v9933_v27  ;;  %v7978_v33 = vor.u32 %v10637_v13, %v7975_v26  ;;  %v7658_v28 = vor.u32 %v10557_v18, %v7655_v49  ;;  %v10427_v45 = vld [vmem:[#allocation2 + $0xb4] sm:$0xf]  ;;  %v10617_v13 = vld [vmem:[#allocation2 + $0x6a4] sm:$0xf]  ;;  %v7095_v49 = vld [vmem:[#allocation2 + $0x88] sm:$0xf0] }
 0x18f   :  { %5462 = vmatpush.bf16.msrb.mxu0 %v9334_v19  ;;  %v11690_v27 = vadd.f32 %v5213_v24, %v5200_v53  ;;  %v7938_v19 = vor.u32 %v10627_v58, %v7935_v48  ;;  %v7618_v26 = vor.u32 %v10547_v1, %v7615_v10  ;;  %v7138_v53 = vor.u32 %v10427_v45, %v7135_v11  ;;  %v11696_v24 = vpop.f32.mrf.mxu0  ;;  %v10407_v48 = vld [vmem:[#allocation2 + $0x14] sm:$0xf]  ;;  %v10597_v1 = vld [vmem:[#allocation2 + $0x604] sm:$0xf]  ;;  %v7815_v10 = vld [vmem:[#allocation2 + $0x628] sm:$0xf0] }
 0x190   :  { %v8218_v18 = vor.u32 %v10697_v7, %v8215_v44  ;;  %12031 = vst [vmem:[#allocation28_spill] sm:$0xff] %v11696_v24  ;;  %v8135_v45 = vld [vmem:[#allocation2 + $0x8a8] sm:$0xf0]  ;;  %v7818_v44 = vor.u32 %v10597_v1, %v7815_v10  ;;  %v10657_v10 = vld [vmem:[#allocation2 + $0x7e4] sm:$0xf] }
 0x191   :  { %5490 = vmatpush.bf16.msra.mxu1 %v9974_v0  ;;  %v8255_v0 = vld [vmem:[#allocation2 + $0x998] sm:$0xf0]  ;;  %12030 = vst [vmem:[#allocation27_spill] sm:$0xff] %v11690_v27  ;;  %v8615_v11 = vld [vmem:[#allocation2 + $0xc68] sm:$0xf0] }
 0x192   :  { %5476 = vmatpush.bf16.msra.mxu3 %v9654_v4  ;;  %5500 = vmatpush.bf16.msra.mxu2 %v7258_v16  ;;  %v10707_v4 = vld [vmem:[#allocation2 + $0x974] sm:$0xf]  ;;  %v7178_v16 = vor.u32 %v10437_v43, %v7175_v52  ;;  %v7735_v1 = vld [vmem:[#allocation2 + $0x588] sm:$0xf0]  ;;  %v10563_v24 = vld [vmem:[#allocation2 + $0x4ec] sm:$0xf0] }
 0x193   :  { %5463 = vmatpush.bf16.msrb.mxu0 %v9294_v47  ;;  %v8258_v51 = vor.u32 %v10707_v4, %v8255_v0  ;;  %v10687_v43 = vld [vmem:[#allocation2 + $0x8d4] sm:$0xf]  ;;  %v7535_v47 = vld [vmem:[#allocation2 + $0x3f8] sm:$0xf0]  ;;  %v9255_v27 = vld [vmem:[#allocation2 + $0x1168] sm:$0xf0] }
 0x194   :  { %v7055_v4 = vld [vmem:[#allocation2 + $0x38] sm:$0xf0]  ;;  %v8178_v0 = vor.u32 %v10687_v43, %v8175_v3  ;;  %v10507_v3 = vld [vmem:[#allocation2 + $0x334] sm:$0xf] }
 0x195   :  { %5491 = vmatpush.bf16.msra.mxu1 %v9934_v22  ;;  %v10417_v22 = vld [vmem:[#allocation2 + $0x64] sm:$0xf]  ;;  %v7058_v7 = vor.u32 %v10407_v48, %v7055_v4  ;;  %v8575_v43 = vld [vmem:[#allocation2 + $0xc18] sm:$0xf0] }
 0x196   :  { %5477 = vmatpush.bf16.msra.mxu3 %v9614_v50  ;;  %5501 = vmatpush.bf16.msra.mxu2 %v7218_v35  ;;  %v7898_v50 = vor.u32 %v10617_v13, %v7895_v63  ;;  %v10607_v35 = vld [vmem:[#allocation2 + $0x654] sm:$0xf]  ;;  %v7098_v52 = vor.u32 %v10417_v22, %v7095_v49  ;;  %v11698_v13 = vpop.f32.mrf.mxu2  ;;  %v10517_v63 = vld [vmem:[#allocation2 + $0x384] sm:$0xf] }
 0x197   :  { %5512 = vmatpush.bf16.msra.mxu0 %v7658_v28  ;;  %v7578_v28 = vor.u32 %v10537_v15, %v7575_v46  ;;  %12032 = vst [vmem:[#allocation29_spill] sm:$0xff] %v11698_v13  ;;  %v12015_v15 = vperm.slane %v11661_v34, 3  ;;  %v11701_v46 = vpop.f32.mrf.mxu3  ;;  %v10587_v22 = vld [vmem:[#allocation2 + $0x5b4] sm:$0xf]  ;;  %v9775_v13 = vld [vmem:[#allocation2 + $0x1578] sm:$0xf0] }
 0x198   :  { %5464 = vmatmul.bf16.vlgmr.msrb.gmra.mxu0 %v11548_v40  ;;  %10079 = vmatmul.msk.bf16.vlgmr.msra.gmra.mxu1 %vm4794_vm0, %v11571_v6  ;;  %12033 = vst [vmem:[#allocation30_spill] sm:$0xff] %v11701_v46  ;;  %v10667_v49 = vld [vmem:[#allocation2 + $0x834] sm:$0xf]  ;;  %v11037_v46 = vld [vmem:[#allocation2 + $0x13c4] sm:$0xf] }
 0x199   :  { %5526 = vmatpush.bf16.msrb.mxu1 %v7978_v33  ;;  %5478 = vmatmul.bf16.vlgmr.msra.gmra.mxu3 %v11568_v5  ;;  %v7855_v33 = vld [vmem:[#allocation2 + $0x678] sm:$0xf0] }
 0x19a   :  { %5540 = vmatpush.bf16.msrb.mxu3 %v8298_v56  ;;  %5502 = vmatpush.bf16.msra.mxu2 %v7178_v16  ;;  %v10527_v56 = vld [vmem:[#allocation2 + $0x3d4] sm:$0xf]  ;;  %v7858_v58 = vor.u32 %v10607_v35, %v7855_v33  ;;  %v10677_v16 = vld [vmem:[#allocation2 + $0x884] sm:$0xf]  ;;  %v8095_v33 = vld [vmem:[#allocation2 + $0x858] sm:$0xf0] }
 0x19b   :  { %5513 = vmatpush.bf16.msra.mxu0 %v7618_v26  ;;  %v7495_v26 = vld [vmem:[#allocation2 + $0x3a8] sm:$0xf0]  ;;  %v8098_v48 = vor.u32 %v10667_v49, %v8095_v33  ;;  %v7695_v49 = vld [vmem:[#allocation2 + $0x538] sm:$0xf0]  ;;  %v10647_v33 = vld [vmem:[#allocation2 + $0x794] sm:$0xf] }
 0x19c   :  { %v7498_v35 = vor.u32 %v10517_v63, %v7495_v26  ;;  %v10497_v63 = vld [vmem:[#allocation2 + $0x2e4] sm:$0xf]  ;;  %v7415_v26 = vld [vmem:[#allocation2 + $0x308] sm:$0xf0] }
 0x19d   :  { %5527 = vmatpush.bf16.msrb.mxu1 %v7938_v19  ;;  %v7538_v19 = vor.u32 %v10527_v56, %v7535_v47  ;;  %v7455_v56 = vld [vmem:[#allocation2 + $0x358] sm:$0xf0]  ;;  %v5227_v47 = vpop.f32.mrf.mxu0 }
 0x19e   :  { %5541 = vmatpush.bf16.msrb.mxu3 %v8258_v51  ;;  %5503 = vmatpush.bf16.msra.mxu2 %v7138_v53  ;;  %v10797_v51 = vld [vmem:[#allocation2 + $0xc44] sm:$0xf]  ;;  %v8138_v53 = vor.u32 %v10677_v16, %v8135_v45  ;;  %v11705_v16 = vpop.f32.mrf.mxu1  ;;  %v8055_v45 = vld [vmem:[#allocation2 + $0x808] sm:$0xf0] }
 0x19f   :  { %5514 = vmatpush.bf16.msra.mxu0 %v7578_v28  ;;  %v10787_v28 = vld [vmem:[#allocation2 + $0xbf4] sm:$0xf]  ;;  %12034 = vst [vmem:[#allocation31_spill] sm:$0xff] %v11705_v16 }
 0x1a0   :  { %v8578_v4 = vor.u32 %v10787_v28, %v8575_v43  ;;  %v5255_v28 = vpop.f32.mrf.mxu3  ;;  %v7418_v43 = vor.u32 %v10497_v63, %v7415_v26  ;;  %v8455_v63 = vld [vmem:[#allocation2 + $0xb28] sm:$0xf0]  ;;  %v10947_v26 = vld [vmem:[#allocation2 + $0x10f4] sm:$0xf] }
 0x1a1   :  { %5528 = vmatpush.bf16.msrb.mxu1 %v7898_v50  ;;  %v8618_v50 = vor.u32 %v10797_v51, %v8615_v11  ;;  %v10777_v51 = vld [vmem:[#allocation2 + $0xba4] sm:$0xf]  ;;  %v8535_v11 = vld [vmem:[#allocation2 + $0xbc8] sm:$0xf0]  ;;  %v11027_v16 = vld [vmem:[#allocation2 + $0x1374] sm:$0xf] }
 0x1a2   :  { %5542 = vmatpush.bf16.msrb.mxu3 %v8218_v18  ;;  %5504 = vmatpush.bf16.msra.mxu2 %v7098_v52  ;;  %v7775_v18 = vld [vmem:[#allocation2 + $0x5d8] sm:$0xf0] }
 0x1a3   :  { %5515 = vmatpush.bf16.msra.mxu0 %v7538_v19  ;;  %v7778_v52 = vor.u32 %v10587_v22, %v7775_v18  ;;  %v7458_v19 = vor.u32 %v10507_v3, %v7455_v56  ;;  %v8058_v22 = vor.u32 %v10657_v10, %v8055_v45  ;;  %v8538_v18 = vor.u32 %v10777_v51, %v8535_v11  ;;  %v10767_v3 = vld [vmem:[#allocation2 + $0xb54] sm:$0xf]  ;;  %v8495_v56 = vld [vmem:[#allocation2 + $0xb78] sm:$0xf0]  ;;  %v10877_v10 = vld [vmem:[#allocation2 + $0xec4] sm:$0xf] }
 0x1a4   :  { %v8935_v45 = vld [vmem:[#allocation2 + $0xee8] sm:$0xf0]  ;;  %v10757_v11 = vld [vmem:[#allocation2 + $0xb04] sm:$0xf] }
 0x1a5   :  { %5529 = vmatpush.bf16.msrb.mxu1 %v7858_v58  ;;  %v5228_v58 = vadd.f32 %v5227_v47, %v12015_v15  ;;  %v10957_v47 = vld [vmem:[#allocation2 + $0x1144] sm:$0xf] }
 0x1a6   :  { %5543 = vmatpush.bf16.msrb.mxu3 %v8178_v0  ;;  %5505 = vmatpush.bf16.msra.mxu2 %v7058_v7  ;;  %v10577_v0 = vld [vmem:[#allocation2 + $0x564] sm:$0xf]  ;;  %v5241_v7 = vpop.f32.mrf.mxu2 }
 0x1a7   :  { %5516 = vmatpush.bf16.msra.mxu0 %v7498_v35  ;;  %v8015_v35 = vld [vmem:[#allocation2 + $0x7b8] sm:$0xf0] }
 0x1a9   :  { %5530 = vmatpush.bf16.msrb.mxu1 %v7818_v44  ;;  %5506 = vmatmul.bf16.vlgmr.msra.gmra.mxu2 %v11507_v31  ;;  %v7738_v44 = vor.u32 %v10577_v0, %v7735_v1  ;;  %v8498_v1 = vor.u32 %v10767_v3, %v8495_v56  ;;  %v10937_v3 = vld [vmem:[#allocation2 + $0x10a4] sm:$0xf]  ;;  %v11710_v56 = vpop.f32.mrf.mxu0 }
 0x1aa   :  { %5544 = vmatpush.bf16.msrb.mxu3 %v8138_v53  ;;  %5554 = vmatpush.bf16.msrb.mxu2 %v8618_v50  ;;  %v10567_v53 = vld [vmem:[#allocation2 + $0x514] sm:$0xf]  ;;  %v5242_v50 = vadd.f32 %v5241_v7, %v5228_v58  ;;  %v5269_v7 = vpop.f32.mrf.mxu1 }
 0x1ab   :  { %5517 = vmatpush.bf16.msra.mxu0 %v7458_v19  ;;  %v7698_v0 = vor.u32 %v10567_v53, %v7695_v49  ;;  %v10487_v58 = vld [vmem:[#allocation2 + $0x294] sm:$0xf]  ;;  %v9258_v19 = vor.u32 %v10957_v47, %v9255_v27  ;;  %v9175_v47 = vld [vmem:[#allocation2 + $0x10c8] sm:$0xf0] }
 0x1ac   :  { %v5256_v15 = vadd.f32 %v5255_v28, %v5242_v50  ;;  %v9215_v28 = vld [vmem:[#allocation2 + $0x1118] sm:$0xf0]  ;;  %v10867_v49 = vld [vmem:[#allocation2 + $0xe74] sm:$0xf] }
 0x1ad   :  { %5531 = vmatpush.bf16.msrb.mxu1 %v7778_v52  ;;  %v9575_v52 = vld [vmem:[#allocation2 + $0x13e8] sm:$0xf0]  ;;  %v9218_v27 = vor.u32 %v10947_v26, %v9215_v28  ;;  %v8815_v28 = vld [vmem:[#allocation2 + $0xdf8] sm:$0xf0] }
 0x1ae   :  { %5545 = vmatpush.bf16.msrb.mxu3 %v8098_v48  ;;  %5555 = vmatpush.bf16.msrb.mxu2 %v8578_v4  ;;  %v7375_v48 = vld [vmem:[#allocation2 + $0x2b8] sm:$0xf0]  ;;  %v8018_v4 = vor.u32 %v10647_v33, %v8015_v35  ;;  %v9578_v51 = vor.u32 %v11037_v46, %v9575_v52  ;;  %v11708_v53 = vadd.f32 %v5269_v7, %v5256_v15  ;;  %v10747_v35 = vld [vmem:[#allocation2 + $0xab4] sm:$0xf]  ;;  %v11017_v15 = vld [vmem:[#allocation2 + $0x1324] sm:$0xf] }
 0x1af   :  { %5518 = vmatpush.bf16.msra.mxu0 %v7418_v43  ;;  %v7378_v50 = vor.u32 %v10487_v58, %v7375_v48  ;;  %v8895_v33 = vld [vmem:[#allocation2 + $0xe98] sm:$0xf0]  ;;  %v9495_v52 = vld [vmem:[#allocation2 + $0x1348] sm:$0xf0]  ;;  %v10857_v48 = vld [vmem:[#allocation2 + $0xe24] sm:$0xf] }
 0x1b0   :  { %v8415_v43 = vld [vmem:[#allocation2 + $0xad8] sm:$0xf0] }
 0x1b1   :  { %5532 = vmatpush.bf16.msrb.mxu1 %v7738_v44  ;;  %v9535_v44 = vld [vmem:[#allocation2 + $0x1398] sm:$0xf0]  ;;  %v8418_v58 = vor.u32 %v10747_v35, %v8415_v43  ;;  %v10997_v35 = vld [vmem:[#allocation2 + $0x1284] sm:$0xf]  ;;  %v9415_v43 = vld [vmem:[#allocation2 + $0x12a8] sm:$0xf0] }
 0x1b2   :  { %5546 = vmatpush.bf16.msrb.mxu3 %v8058_v22  ;;  %5556 = vmatpush.bf16.msrb.mxu2 %v8538_v18  ;;  %v8938_v22 = vor.u32 %v10877_v10, %v8935_v45  ;;  %v8458_v18 = vor.u32 %v10757_v11, %v8455_v63  ;;  %v9538_v46 = vor.u32 %v11027_v16, %v9535_v44  ;;  %v10737_v10 = vld [vmem:[#allocation2 + $0xa64] sm:$0xf]  ;;  %v8375_v45 = vld [vmem:[#allocation2 + $0xa88] sm:$0xf0]  ;;  %v11007_v11 = vld [vmem:[#allocation2 + $0x12d4] sm:$0xf]  ;;  %v11715_v44 = vpop.f32.mrf.mxu2 }
 0x1b3   :  { %5519 = vmatpush.bf16.msra.mxu0 %v7378_v50  ;;  %v9178_v16 = vor.u32 %v10937_v3, %v9175_v47  ;;  %v9455_v63 = vld [vmem:[#allocation2 + $0x12f8] sm:$0xf0]  ;;  %v8378_v7 = vor.u32 %v10737_v10, %v8375_v45  ;;  %v10847_v50 = vld [vmem:[#allocation2 + $0xdd4] sm:$0xf]  ;;  %v11717_v3 = vpop.f32.mrf.mxu3  ;;  %v9418_v10 = vor.u32 %v10997_v35, %v9415_v43  ;;  %v10977_v35 = vld [vmem:[#allocation2 + $0x11e4] sm:$0xf] }
 0x1b4   :  { %12035 = vst [vmem:[#allocation32_spill] sm:$0xff] %v11717_v3  ;;  %v8818_v47 = vor.u32 %v10847_v50, %v8815_v28  ;;  %v10907_v45 = vld [vmem:[#allocation2 + $0xfb4] sm:$0xf]  ;;  %v9855_v28 = vld [vmem:[#allocation2 + $0x1618] sm:$0xf0] }
 0x1b5   :  { %5533 = vmatpush.bf16.msrb.mxu1 %v7698_v0  ;;  %v8898_v0 = vor.u32 %v10867_v49, %v8895_v33  ;;  %v10727_v49 = vld [vmem:[#allocation2 + $0xa14] sm:$0xf]  ;;  %v8335_v33 = vld [vmem:[#allocation2 + $0xa38] sm:$0xf0]  ;;  %v9335_v43 = vld [vmem:[#allocation2 + $0x1208] sm:$0xf0] }
 0x1b6   :  { %5547 = vmatpush.bf16.msrb.mxu3 %v8018_v4  ;;  %5557 = vmatpush.bf16.msrb.mxu2 %v8498_v1  ;;  %v8855_v4 = vld [vmem:[#allocation2 + $0xe48] sm:$0xf0]  ;;  %v9498_v1 = vor.u32 %v11017_v15, %v9495_v52  ;;  %v11117_v15 = vld [vmem:[#allocation2 + $0x1644] sm:$0xf]  ;;  %v11107_v50 = vld [vmem:[#allocation2 + $0x15f4] sm:$0xf] }
 0x1b7   :  { %5568 = vmatpush.bf16.msrb.mxu0 %v8938_v22  ;;  %v8858_v26 = vor.u32 %v10857_v48, %v8855_v4  ;;  %v9895_v52 = vld [vmem:[#allocation2 + $0x1668] sm:$0xf0]  ;;  %v10837_v48 = vld [vmem:[#allocation2 + $0xd84] sm:$0xf]  ;;  %v10473_v3 = vld [vmem:[#allocation2 + $0x21c] sm:$0xf0] }
 0x1b8   :  { %5534 = vmatmul.bf16.vlgmr.msrb.gmra.mxu1 %v11510_v32  ;;  %5520 = vmatmul.bf16.vlgmr.msra.gmra.mxu0 %v11513_v41  ;;  %v8775_v4 = vld [vmem:[#allocation2 + $0xda8] sm:$0xf0] }
 0x1b9   :  { %5582 = vmatpush.bf16.msra.mxu1 %v9258_v19  ;;  %5548 = vmatmul.bf16.vlgmr.msrb.gmra.mxu3 %v11516_v42  ;;  %v10927_v19 = vld [vmem:[#allocation2 + $0x1054] sm:$0xf] }
 0x1ba   :  { %5596 = vmatpush.bf16.msra.mxu3 %v9578_v51  ;;  %5558 = vmatpush.bf16.msrb.mxu2 %v8458_v18  ;;  %v9135_v51 = vld [vmem:[#allocation2 + $0x1078] sm:$0xf0]  ;;  %v9458_v18 = vor.u32 %v11007_v11, %v9455_v63  ;;  %v10987_v11 = vld [vmem:[#allocation2 + $0x1234] sm:$0xf] }
 0x1bb   :  { %5569 = vmatpush.bf16.msrb.mxu0 %v8898_v0  ;;  %v9138_v22 = vor.u32 %v10927_v19, %v9135_v51  ;;  %v5283_v0 = vpop.f32.mrf.mxu0  ;;  %v9898_v19 = vor.u32 %v11117_v15, %v9895_v52  ;;  %v9055_v51 = vld [vmem:[#allocation2 + $0xfd8] sm:$0xf0]  ;;  %v11097_v52 = vld [vmem:[#allocation2 + $0x15a4] sm:$0xf] }
 0x1bc   :  { %v9375_v63 = vld [vmem:[#allocation2 + $0x1258] sm:$0xf0] }
 0x1bd   :  { %5583 = vmatpush.bf16.msra.mxu1 %v9218_v27  ;;  %v10917_v27 = vld [vmem:[#allocation2 + $0x1004] sm:$0xf] }
 0x1be   :  { %5597 = vmatpush.bf16.msra.mxu3 %v9538_v46  ;;  %5559 = vmatpush.bf16.msrb.mxu2 %v8418_v58  ;;  %v9095_v46 = vld [vmem:[#allocation2 + $0x1028] sm:$0xf0]  ;;  %v8338_v58 = vor.u32 %v10727_v49, %v8335_v33  ;;  %v10827_v49 = vld [vmem:[#allocation2 + $0xd34] sm:$0xf]  ;;  %v8735_v33 = vld [vmem:[#allocation2 + $0xd58] sm:$0xf0] }
 0x1bf   :  { %5570 = vmatpush.bf16.msrb.mxu0 %v8858_v26  ;;  %v8778_v26 = vor.u32 %v10837_v48, %v8775_v4  ;;  %v8738_v15 = vor.u32 %v10827_v49, %v8735_v33  ;;  %v10817_v48 = vld [vmem:[#allocation2 + $0xce4] sm:$0xf]  ;;  %v8695_v4 = vld [vmem:[#allocation2 + $0xd08] sm:$0xf0]  ;;  %v7341_v33 = vld [vmem:[#allocation2 + $0x248] sm:$0xf] }
 0x1c0   :  { %v8698_v49 = vor.u32 %v10817_v48, %v8695_v4  ;;  %v9735_v4 = vld [vmem:[#allocation2 + $0x1528] sm:$0xf0] }
 0x1c1   :  { %5584 = vmatpush.bf16.msra.mxu1 %v9178_v16  ;;  %v5284_v16 = vadd.f32 %v5283_v0, %v11708_v53  ;;  %v9378_v53 = vor.u32 %v10987_v11, %v9375_v63  ;;  %v9815_v0 = vld [vmem:[#allocation2 + $0x15c8] sm:$0xf0]  ;;  %v10967_v11 = vld [vmem:[#allocation2 + $0x1194] sm:$0xf] }
 0x1c2   :  { %5598 = vmatpush.bf16.msra.mxu3 %v9498_v1  ;;  %5560 = vmatpush.bf16.msrb.mxu2 %v8378_v7  ;;  %v9098_v1 = vor.u32 %v10917_v27, %v9095_v46  ;;  %v11720_v7 = vpop.f32.mrf.mxu1  ;;  %v9858_v27 = vor.u32 %v11107_v50, %v9855_v28  ;;  %v9015_v46 = vld [vmem:[#allocation2 + $0xf88] sm:$0xf0]  ;;  %v9818_v50 = vor.u32 %v11097_v52, %v9815_v0  ;;  %v9295_v28 = vld [vmem:[#allocation2 + $0x11b8] sm:$0xf0] }
 0x1c3   :  { %5571 = vmatpush.bf16.msrb.mxu0 %v8818_v47  ;;  %12036 = vst [vmem:[#allocation33_spill] sm:$0xff] %v11720_v7  ;;  %v5297_v47 = vpop.f32.mrf.mxu2  ;;  %v7301_v7 = vld [vmem:[#allocation2 + $0x1f8] sm:$0xf] }
 0x1c5   :  { %5585 = vmatpush.bf16.msra.mxu1 %v9138_v22  ;;  %v9058_v22 = vor.u32 %v10907_v45, %v9055_v51  ;;  %v9338_v45 = vor.u32 %v10977_v35, %v9335_v43  ;;  %v8975_v51 = vld [vmem:[#allocation2 + $0xf38] sm:$0xf0]  ;;  %v11157_v35 = vld [vmem:[#allocation2 + $0x1784] sm:$0xf]  ;;  %v10055_v43 = vld [vmem:[#allocation2 + $0x17a8] sm:$0xf0] }
 0x1c6   :  { %5599 = vmatpush.bf16.msra.mxu3 %v9458_v18  ;;  %5561 = vmatpush.bf16.msrb.mxu2 %v8338_v58  ;;  %v10897_v18 = vld [vmem:[#allocation2 + $0xf64] sm:$0xf]  ;;  %v5298_v58 = vadd.f32 %v5297_v47, %v5284_v16  ;;  %v10483_v16 = vld [vmem:[#allocation2 + $0x26c] sm:$0xf0]  ;;  %v7661_v47 = vld [vmem:[#allocation2 + $0x4c8] sm:$0xf]  ;;  %v10058_v37 = vor.u32 %v11157_v35, %v10055_v43 }
 0x1c7   :  { %5572 = vmatpush.bf16.msrb.mxu0 %v8778_v26  ;;  %v11087_v26 = vld [vmem:[#allocation2 + $0x1554] sm:$0xf]  ;;  %v7342_v0 = vor.u32 %v10483_v16, %v7341_v33  ;;  %v7581_v33 = vld [vmem:[#allocation2 + $0x428] sm:$0xf]  ;;  %v10543_v16 = vld [vmem:[#allocation2 + $0x44c] sm:$0xf0] }
 0x1c8   :  { %v9778_v52 = vor.u32 %v11087_v26, %v9775_v13  ;;  %v10463_v26 = vld [vmem:[#allocation2 + $0x1cc] sm:$0xf0]  ;;  %v9655_v35 = vld [vmem:[#allocation2 + $0x1488] sm:$0xf0]  ;;  %v7221_v43 = vld [vmem:[#allocation2 + $0x158] sm:$0xf] }
 0x1c9   :  { %5586 = vmatpush.bf16.msra.mxu1 %v9098_v1  ;;  %5562 = vmatmul.bf16.vlgmr.msrb.gmra.mxu2 %v11539_v29  ;;  %v5311_v1 = vpop.f32.mrf.mxu3 }
 0x1ca   :  { %5600 = vmatpush.bf16.msra.mxu3 %v9418_v10  ;;  %5610 = vmatpush.bf16.msra.mxu2 %v9898_v19  ;;  %v9018_v10 = vor.u32 %v10897_v18, %v9015_v46  ;;  %v10887_v19 = vld [vmem:[#allocation2 + $0xf14] sm:$0xf]  ;;  %v5312_v63 = vadd.f32 %v5311_v1, %v5298_v58  ;;  %v9298_v46 = vor.u32 %v10967_v11, %v9295_v28  ;;  %v11077_v58 = vld [vmem:[#allocation2 + $0x1504] sm:$0xf]  ;;  %v7261_v28 = vld [vmem:[#allocation2 + $0x1a8] sm:$0xf] }
 0x1cb   :  { %5573 = vmatpush.bf16.msrb.mxu0 %v8738_v15  ;;  %v8978_v18 = vor.u32 %v10887_v19, %v8975_v51  ;;  %v7662_v15 = vor.u32 %v10563_v24, %v7661_v47  ;;  %v11147_v19 = vld [vmem:[#allocation2 + $0x1734] sm:$0xf]  ;;  %v10015_v51 = vld [vmem:[#allocation2 + $0x1758] sm:$0xf0]  ;;  %v9738_v13 = vor.u32 %v11077_v58, %v9735_v4  ;;  %v7302_v11 = vor.u32 %v10473_v3, %v7301_v7  ;;  %v11137_v47 = vld [vmem:[#allocation2 + $0x16e4] sm:$0xf]  ;;  %v11729_v3 = vpop.f32.mrf.mxu2 }
 0x1cc   :  { %v9695_v24 = vld [vmem:[#allocation2 + $0x14d8] sm:$0xf0]  ;;  %12038 = vst [vmem:[#allocation35_spill] sm:$0xff] %v11729_v3  ;;  %v10533_v58 = vld [vmem:[#allocation2 + $0x3fc] sm:$0xf0] }
 0x1cd   :  { %5587 = vmatpush.bf16.msra.mxu1 %v9058_v22  ;;  %v10807_v22 = vld [vmem:[#allocation2 + $0xc94] sm:$0xf]  ;;  %v9935_v4 = vld [vmem:[#allocation2 + $0x16b8] sm:$0xf0]  ;;  %v8141_v3 = vld [vmem:[#allocation2 + $0x888] sm:$0xf] }
 0x1ce   :  { %5601 = vmatpush.bf16.msra.mxu3 %v9378_v53  ;;  %5611 = vmatpush.bf16.msra.mxu2 %v9858_v27  ;;  %v8655_v53 = vld [vmem:[#allocation2 + $0xcb8] sm:$0xf0]  ;;  %v5325_v27 = vpop.f32.mrf.mxu1 }
 0x1cf   :  { %v11723_v1 = vadd.f32 %v5325_v27, %v5312_v63  ;;  %5574 = vmatpush.bf16.msrb.mxu0 %v8698_v49  ;;  %v8658_v48 = vor.u32 %v10807_v22, %v8655_v53  ;;  %v10018_v49 = vor.u32 %v11147_v19, %v10015_v51  ;;  %v9975_v22 = vld [vmem:[#allocation2 + $0x1708] sm:$0xf0]  ;;  %v11727_v53 = vpop.f32.mrf.mxu0  ;;  %v10453_v27 = vld [vmem:[#allocation2 + $0x17c] sm:$0xf0]  ;;  %v9615_v19 = vld [vmem:[#allocation2 + $0x1438] sm:$0xf0] }
 0x1d0   :  { %12037 = vst [vmem:[#allocation34_spill] sm:$0xff] %v11727_v53  ;;  %v7981_v51 = vld [vmem:[#allocation2 + $0x748] sm:$0xf]  ;;  %v8901_v53 = vld [vmem:[#allocation2 + $0xe78] sm:$0xf] }
 0x1d1   :  { %5588 = vmatpush.bf16.msra.mxu1 %v9018_v10  ;;  %v7621_v10 = vld [vmem:[#allocation2 + $0x478] sm:$0xf] }
 0x1d2   :  { %5602 = vmatpush.bf16.msra.mxu3 %v9338_v45  ;;  %5612 = vmatpush.bf16.msra.mxu2 %v9818_v50  ;;  %v10553_v45 = vld [vmem:[#allocation2 + $0x49c] sm:$0xf0]  ;;  %v11067_v50 = vld [vmem:[#allocation2 + $0x14b4] sm:$0xf] }
 0x1d3   :  { %5575 = vmatpush.bf16.msrb.mxu0 %v8658_v48  ;;  %v7622_v63 = vor.u32 %v10553_v45, %v7621_v10  ;;  %v9698_v7 = vor.u32 %v11067_v50, %v9695_v24  ;;  %v11127_v48 = vld [vmem:[#allocation2 + $0x1694] sm:$0xf]  ;;  %v7222_v45 = vor.u32 %v10453_v27, %v7221_v43  ;;  %v7181_v50 = vld [vmem:[#allocation2 + $0x108] sm:$0xf]  ;;  %v11732_v43 = vpop.f32.mrf.mxu3 }
 0x1d4   :  { %v7501_v24 = vld [vmem:[#allocation2 + $0x388] sm:$0xf]  ;;  %12039 = vst [vmem:[#allocation36_spill] sm:$0xff] %v11732_v43 }
 0x1d5   :  { %5589 = vmatpush.bf16.msra.mxu1 %v8978_v18  ;;  %v7262_v18 = vor.u32 %v10463_v26, %v7261_v28  ;;  %v9938_v28 = vor.u32 %v11127_v48, %v9935_v4  ;;  %v10523_v26 = vld [vmem:[#allocation2 + $0x3ac] sm:$0xf0]  ;;  %v7461_v48 = vld [vmem:[#allocation2 + $0x338] sm:$0xf]  ;;  %v10513_v4 = vld [vmem:[#allocation2 + $0x35c] sm:$0xf0] }
 0x1d6   :  { %5603 = vmatpush.bf16.msra.mxu3 %v9298_v46  ;;  %5613 = vmatpush.bf16.msra.mxu2 %v9778_v52  ;;  %v11057_v46 = vld [vmem:[#allocation2 + $0x1464] sm:$0xf]  ;;  %v9978_v52 = vor.u32 %v11137_v47, %v9975_v22  ;;  %v7502_v27 = vor.u32 %v10523_v26, %v7501_v24  ;;  %v7421_v26 = vld [vmem:[#allocation2 + $0x2e8] sm:$0xf] }
 0x1d7   :  { %5628 = vmatpush.bf16.msra.mxu0 %v10058_v37  ;;  %v7582_v37 = vor.u32 %v10543_v16, %v7581_v33  ;;  %v9658_v10 = vor.u32 %v11057_v46, %v9655_v35  ;;  %v10723_v33 = vld [vmem:[#allocation2 + $0x9ec] sm:$0xf0]  ;;  %v5339_v47 = vpop.f32.mrf.mxu0  ;;  %v7941_v46 = vld [vmem:[#allocation2 + $0x6f8] sm:$0xf]  ;;  %v10633_v35 = vld [vmem:[#allocation2 + $0x71c] sm:$0xf0] }
 0x1d8   :  { %5590 = vmatmul.bf16.vlgmr.msra.gmra.mxu1 %v11542_v30  ;;  %5576 = vmatmul.bf16.vlgmr.msrb.gmra.mxu0 %v11545_v39 }
 0x1d9   :  { %5638 = vmatpush.bf16.msrb.mxu1 %v7342_v0  ;;  %5604 = vmatmul.bf16.vlgmr.msra.gmra.mxu3 %v11548_v40  ;;  %v7541_v0 = vld [vmem:[#allocation2 + $0x3d8] sm:$0xf] }
 0x1da   :  { %5652 = vmatpush.bf16.msrb.mxu3 %v7662_v15  ;;  %5614 = vmatpush.bf16.msra.mxu2 %v9738_v13  ;;  %v11047_v15 = vld [vmem:[#allocation2 + $0x1414] sm:$0xf]  ;;  %v10643_v13 = vld [vmem:[#allocation2 + $0x76c] sm:$0xf0] }
 0x1db   :  { %5629 = vmatpush.bf16.msra.mxu0 %v10018_v49  ;;  %v8301_v49 = vld [vmem:[#allocation2 + $0x9c8] sm:$0xf]  ;;  %v7982_v16 = vor.u32 %v10643_v13, %v7981_v51  ;;  %v9618_v22 = vor.u32 %v11047_v15, %v9615_v19  ;;  %v7942_v15 = vor.u32 %v10633_v35, %v7941_v46  ;;  %v7061_v46 = vld [vmem:[#allocation2 + $0x18] sm:$0xf] }
 0x1dc   :  { %v7101_v13 = vld [vmem:[#allocation2 + $0x68] sm:$0xf]  ;;  %v7861_v35 = vld [vmem:[#allocation2 + $0x658] sm:$0xf] }
 0x1dd   :  { %5639 = vmatpush.bf16.msrb.mxu1 %v7302_v11  ;;  %v7542_v11 = vor.u32 %v10533_v58, %v7541_v0  ;;  %v7141_v0 = vld [vmem:[#allocation2 + $0xb8] sm:$0xf]  ;;  %v10433_v58 = vld [vmem:[#allocation2 + $0xdc] sm:$0xf0] }
 0x1de   :  { %5653 = vmatpush.bf16.msrb.mxu3 %v7622_v63  ;;  %5615 = vmatpush.bf16.msra.mxu2 %v9698_v7  ;;  %v10443_v63 = vld [vmem:[#allocation2 + $0x12c] sm:$0xf0]  ;;  %v5353_v7 = vpop.f32.mrf.mxu2  ;;  %v7142_v19 = vor.u32 %v10433_v58, %v7141_v0  ;;  %v10413_v0 = vld [vmem:[#allocation2 + $0x3c] sm:$0xf0]  ;;  %v7381_v58 = vld [vmem:[#allocation2 + $0x298] sm:$0xf] }
 0x1df   :  { %5630 = vmatpush.bf16.msra.mxu0 %v9978_v52  ;;  %v8302_v52 = vor.u32 %v10723_v33, %v8301_v49  ;;  %v10503_v49 = vld [vmem:[#allocation2 + $0x30c] sm:$0xf0]  ;;  %v8221_v33 = vld [vmem:[#allocation2 + $0x928] sm:$0xf] }
 0x1e1   :  { %5640 = vmatpush.bf16.msrb.mxu1 %v7262_v18  ;;  %v7182_v18 = vor.u32 %v10443_v63, %v7181_v50  ;;  %v10623_v50 = vld [vmem:[#allocation2 + $0x6cc] sm:$0xf0]  ;;  %v7462_v63 = vor.u32 %v10513_v4, %v7461_v48  ;;  %v10493_v48 = vld [vmem:[#allocation2 + $0x2bc] sm:$0xf0]  ;;  %v5367_v4 = vpop.f32.mrf.mxu3 }
 0x1e2   :  { %5654 = vmatpush.bf16.msrb.mxu3 %v7582_v37  ;;  %5616 = vmatpush.bf16.msra.mxu2 %v9658_v10  ;;  %v5340_v37 = vadd.f32 %v5339_v47, %v11723_v1  ;;  %v8261_v10 = vld [vmem:[#allocation2 + $0x978] sm:$0xf]  ;;  %v11737_v1 = vpop.f32.mrf.mxu1  ;;  %v10703_v47 = vld [vmem:[#allocation2 + $0x94c] sm:$0xf0] }
 0x1e3   :  { %5631 = vmatpush.bf16.msra.mxu0 %v9938_v28  ;;  %12041 = vst [vmem:[#allocation38_spill] sm:$0xff] %v11737_v1  ;;  %v10423_v28 = vld [vmem:[#allocation2 + $0x8c] sm:$0xf0] }
 0x1e4   :  { %v11735_v51 = vadd.f32 %v5353_v7, %v5340_v37  ;;  %v11739_v7 = vld [vmem:[#allocation5] sm:$0xff] }
 0x1e5   :  { %5641 = vmatpush.bf16.msrb.mxu1 %v7222_v45  ;;  %v10713_v45 = vld [vmem:[#allocation2 + $0x99c] sm:$0xf0] }
 0x1e6   :  { %5655 = vmatpush.bf16.msrb.mxu3 %v7542_v11  ;;  %12040 = vst [vmem:[#allocation37_spill] sm:$0xff] %v11735_v51  ;;  %5617 = vmatpush.bf16.msra.mxu2 %v9618_v22  ;;  %v7901_v11 = vld [vmem:[#allocation2 + $0x6a8] sm:$0xf]  ;;  %v8262_v24 = vor.u32 %v10713_v45, %v8261_v10  ;;  %v10613_v37 = vld [vmem:[#allocation2 + $0x67c] sm:$0xf0] }
 0x1e7   :  { %5666 = vmatpush.bf16.msrb.mxu0 %v7982_v16  ;;  %v12016_v16 = vperm.slane %v11739_v7, 4  ;;  %v7902_v22 = vor.u32 %v10623_v50, %v7901_v11  ;;  %v8181_v10 = vld [vmem:[#allocation2 + $0x8d8] sm:$0xf]  ;;  %v10693_v45 = vld [vmem:[#allocation2 + $0x8fc] sm:$0xf0] }
 0x1e8   :  { %10080 = vmatmul.msk.bf16.vlgmr.msra.gmra.mxu0 %vm4794_vm0, %v11571_v6  ;;  %v10803_v11 = vld [vmem:[#allocation2 + $0xc6c] sm:$0xf0]  ;;  %v8941_v50 = vld [vmem:[#allocation2 + $0xec8] sm:$0xf] }
 0x1e9   :  { %5642 = vmatpush.bf16.msrb.mxu1 %v7182_v18  ;;  %5618 = vmatmul.bf16.vlgmr.msra.gmra.mxu2 %v11568_v5  ;;  %v7102_v18 = vor.u32 %v10423_v28, %v7101_v13  ;;  %v7862_v13 = vor.u32 %v10613_v37, %v7861_v35  ;;  %v7062_v28 = vor.u32 %v10413_v0, %v7061_v46  ;;  %v10593_v46 = vld [vmem:[#allocation2 + $0x5dc] sm:$0xf0] }
 0x1ea   :  { %5656 = vmatpush.bf16.msrb.mxu3 %v7502_v27  ;;  %5680 = vmatpush.bf16.msrb.mxu2 %v8302_v52  ;;  %v7422_v27 = vor.u32 %v10503_v49, %v7421_v26  ;;  %v8222_v52 = vor.u32 %v10703_v47, %v8221_v33  ;;  %v7821_v26 = vld [vmem:[#allocation2 + $0x608] sm:$0xf]  ;;  %v10603_v49 = vld [vmem:[#allocation2 + $0x62c] sm:$0xf0]  ;;  %v7382_v33 = vor.u32 %v10493_v48, %v7381_v58  ;;  %v5381_v51 = vpop.f32.mrf.mxu1  ;;  %v8101_v58 = vld [vmem:[#allocation2 + $0x838] sm:$0xf] }
 0x1eb   :  { %5667 = vmatpush.bf16.msrb.mxu0 %v7942_v15  ;;  %v8621_v15 = vld [vmem:[#allocation2 + $0xc48] sm:$0xf]  ;;  %v8182_v47 = vor.u32 %v10693_v45, %v8181_v10  ;;  %v7822_v37 = vor.u32 %v10603_v49, %v7821_v26  ;;  %v10673_v48 = vld [vmem:[#allocation2 + $0x85c] sm:$0xf0]  ;;  %v10783_v45 = vld [vmem:[#allocation2 + $0xbcc] sm:$0xf0]  ;;  %v11753_v26 = vpop.f32.mrf.mxu3 }
 0x1ec   :  { %v8622_v1 = vor.u32 %v10803_v11, %v8621_v15  ;;  %v8541_v10 = vld [vmem:[#allocation2 + $0xba8] sm:$0xf]  ;;  %v10583_v11 = vld [vmem:[#allocation2 + $0x58c] sm:$0xf0]  ;;  %12044 = vst [vmem:[#allocation41_spill] sm:$0xff] %v11753_v26 }
 0x1ed   :  { %5643 = vmatpush.bf16.msrb.mxu1 %v7142_v19  ;;  %v5368_v19 = vadd.f32 %v5367_v4, %v12016_v16  ;;  %v10683_v4 = vld [vmem:[#allocation2 + $0x8ac] sm:$0xf0]  ;;  %v10793_v16 = vld [vmem:[#allocation2 + $0xc1c] sm:$0xf0]  ;;  %v8861_v15 = vld [vmem:[#allocation2 + $0xe28] sm:$0xf] }
 0x1ee   :  { %5657 = vmatpush.bf16.msrb.mxu3 %v7462_v63  ;;  %5681 = vmatpush.bf16.msrb.mxu2 %v8262_v24  ;;  %v10883_v63 = vld [vmem:[#allocation2 + $0xeec] sm:$0xf0]  ;;  %v11747_v24 = vpop.f32.mrf.mxu2  ;;  %v11153_v26 = vld [vmem:[#allocation2 + $0x175c] sm:$0xf0] }
 0x1ef   :  { %5668 = vmatpush.bf16.msrb.mxu0 %v7902_v22  ;;  %12042 = vst [vmem:[#allocation39_spill] sm:$0xff] %v11747_v24  ;;  %v8942_v43 = vor.u32 %v10883_v63, %v8941_v50  ;;  %v8581_v22 = vld [vmem:[#allocation2 + $0xbf8] sm:$0xf]  ;;  %v5382_v35 = vadd.f32 %v5381_v51, %v5368_v19  ;;  %v10873_v24 = vld [vmem:[#allocation2 + $0xe9c] sm:$0xf0] }
 0x1f0   :  { %v8902_v0 = vor.u32 %v10873_v24, %v8901_v53  ;;  %v10863_v19 = vld [vmem:[#allocation2 + $0xe4c] sm:$0xf0]  ;;  %v8061_v63 = vld [vmem:[#allocation2 + $0x7e8] sm:$0xf] }
 0x1f1   :  { %5644 = vmatpush.bf16.msrb.mxu1 %v7102_v18  ;;  %v7781_v18 = vld [vmem:[#allocation2 + $0x5b8] sm:$0xf]  ;;  %v10663_v24 = vld [vmem:[#allocation2 + $0x80c] sm:$0xf0] }
 0x1f2   :  { %5658 = vmatpush.bf16.msrb.mxu3 %v7422_v27  ;;  %5682 = vmatpush.bf16.msrb.mxu2 %v8222_v52  ;;  %v8142_v27 = vor.u32 %v10683_v4, %v8141_v3  ;;  %v8582_v52 = vor.u32 %v10793_v16, %v8581_v22  ;;  %v7782_v51 = vor.u32 %v10593_v46, %v7781_v18  ;;  %v11751_v3 = vpop.f32.mrf.mxu0  ;;  %v10853_v4 = vld [vmem:[#allocation2 + $0xdfc] sm:$0xf0]  ;;  %v7701_v22 = vld [vmem:[#allocation2 + $0x518] sm:$0xf]  ;;  %v9261_v46 = vld [vmem:[#allocation2 + $0x1148] sm:$0xf] }
 0x1f3   :  { %5669 = vmatpush.bf16.msrb.mxu0 %v7862_v13  ;;  %v7741_v13 = vld [vmem:[#allocation2 + $0x568] sm:$0xf]  ;;  %12043 = vst [vmem:[#allocation40_spill] sm:$0xff] %v11751_v3  ;;  %v8862_v16 = vor.u32 %v10863_v19, %v8861_v15  ;;  %v8062_v18 = vor.u32 %v10663_v24, %v8061_v63  ;;  %v10843_v15 = vld [vmem:[#allocation2 + $0xdac] sm:$0xf0] }
 0x1f4   :  { %v7742_v49 = vor.u32 %v10583_v11, %v7741_v13  ;;  %v9581_v13 = vld [vmem:[#allocation2 + $0x13c8] sm:$0xf]  ;;  %v11043_v11 = vld [vmem:[#allocation2 + $0x13ec] sm:$0xf0]  ;;  %v10953_v63 = vld [vmem:[#allocation2 + $0x111c] sm:$0xf0] }
 0x1f5   :  { %5645 = vmatpush.bf16.msrb.mxu1 %v7062_v28  ;;  %v8501_v28 = vld [vmem:[#allocation2 + $0xb58] sm:$0xf] }
 0x1f6   :  { %5659 = vmatpush.bf16.msrb.mxu3 %v7382_v33  ;;  %5683 = vmatpush.bf16.msrb.mxu2 %v8182_v47  ;;  %v5395_v50 = vpop.f32.mrf.mxu2  ;;  %v10773_v33 = vld [vmem:[#allocation2 + $0xb7c] sm:$0xf0]  ;;  %v8821_v47 = vld [vmem:[#allocation2 + $0xdd8] sm:$0xf] }
 0x1f7   :  { %5670 = vmatpush.bf16.msrb.mxu0 %v7822_v37  ;;  %v5396_v53 = vadd.f32 %v5395_v50, %v5382_v35  ;;  %v10573_v37 = vld [vmem:[#allocation2 + $0x53c] sm:$0xf0]  ;;  %v10963_v35 = vld [vmem:[#allocation2 + $0x116c] sm:$0xf0] }
 0x1f8   :  { %5646 = vmatmul.bf16.vlgmr.msrb.gmra.mxu1 %v11507_v31  ;;  %v9262_v19 = vor.u32 %v10963_v35, %v9261_v46  ;;  %v9541_v46 = vld [vmem:[#allocation2 + $0x1378] sm:$0xf]  ;;  %v11033_v35 = vld [vmem:[#allocation2 + $0x139c] sm:$0xf0] }
 0x1f9   :  { %5694 = vmatpush.bf16.msra.mxu1 %v8622_v1  ;;  %5660 = vmatmul.bf16.vlgmr.msrb.gmra.mxu3 %v11513_v41  ;;  %v8542_v1 = vor.u32 %v10783_v45, %v8541_v10  ;;  %v7702_v10 = vor.u32 %v10573_v37, %v7701_v22  ;;  %v8781_v45 = vld [vmem:[#allocation2 + $0xd88] sm:$0xf]  ;;  %v10833_v22 = vld [vmem:[#allocation2 + $0xd5c] sm:$0xf0] }
 0x1fa   :  { %5708 = vmatpush.bf16.msra.mxu3 %v8942_v43  ;;  %5684 = vmatpush.bf16.msrb.mxu2 %v8142_v27  ;;  %v8102_v43 = vor.u32 %v10673_v48, %v8101_v58  ;;  %v8502_v27 = vor.u32 %v10773_v33, %v8501_v28  ;;  %v10653_v58 = vld [vmem:[#allocation2 + $0x7bc] sm:$0xf0]  ;;  %v8461_v48 = vld [vmem:[#allocation2 + $0xb08] sm:$0xf]  ;;  %v5409_v24 = vpop.f32.mrf.mxu0  ;;  %v8421_v28 = vld [vmem:[#allocation2 + $0xab8] sm:$0xf] }
 0x1fb   :  { %5671 = vmatpush.bf16.msrb.mxu0 %v7782_v51  ;;  %v10763_v51 = vld [vmem:[#allocation2 + $0xb2c] sm:$0xf0]  ;;  %v5410_v33 = vadd.f32 %v5409_v24, %v5396_v53 }
 0x1fd   :  { %5695 = vmatpush.bf16.msra.mxu1 %v8582_v52  ;;  %v8822_v52 = vor.u32 %v10853_v4, %v8821_v47  ;;  %v10753_v47 = vld [vmem:[#allocation2 + $0xadc] sm:$0xf0]  ;;  %v8741_v4 = vld [vmem:[#allocation2 + $0xd38] sm:$0xf] }
 0x1fe   :  { %5709 = vmatpush.bf16.msra.mxu3 %v8902_v0  ;;  %5685 = vmatpush.bf16.msrb.mxu2 %v8102_v43  ;;  %v8021_v0 = vld [vmem:[#allocation2 + $0x798] sm:$0xf]  ;;  %v8742_v53 = vor.u32 %v10833_v22, %v8741_v4  ;;  %v10813_v4 = vld [vmem:[#allocation2 + $0xcbc] sm:$0xf0] }
 0x1ff   :  { %5672 = vmatpush.bf16.msrb.mxu0 %v7742_v49  ;;  %v8022_v50 = vor.u32 %v10653_v58, %v8021_v0  ;;  %v9221_v43 = vld [vmem:[#allocation2 + $0x10f8] sm:$0xf]  ;;  %v9582_v49 = vor.u32 %v11043_v11, %v9581_v13  ;;  %v11755_v0 = vpop.f32.mrf.mxu1  ;;  %v9181_v58 = vld [vmem:[#allocation2 + $0x10a8] sm:$0xf] }
 0x200   :  { %v9222_v37 = vor.u32 %v10953_v63, %v9221_v43  ;;  %12045 = vst [vmem:[#allocation42_spill] sm:$0xff] %v11755_v0  ;;  %v9501_v11 = vld [vmem:[#allocation2 + $0x1328] sm:$0xf]  ;;  %v9141_v43 = vld [vmem:[#allocation2 + $0x1058] sm:$0xf] }
 0x201   :  { %5696 = vmatpush.bf16.msra.mxu1 %v8542_v1  ;;  %v8462_v1 = vor.u32 %v10763_v51, %v8461_v48  ;;  %v8422_v48 = vor.u32 %v10753_v47, %v8421_v28  ;;  %v9542_v51 = vor.u32 %v11033_v35, %v9541_v46  ;;  %v10933_v63 = vld [vmem:[#allocation2 + $0x107c] sm:$0xf0]  ;;  %v11759_v47 = vpop.f32.mrf.mxu2  ;;  %v9461_v22 = vld [vmem:[#allocation2 + $0x12d8] sm:$0xf]  ;;  %v9901_v35 = vld [vmem:[#allocation2 + $0x1648] sm:$0xf] }
 0x202   :  { %5710 = vmatpush.bf16.msra.mxu3 %v8862_v16  ;;  %5686 = vmatpush.bf16.msrb.mxu2 %v8062_v18  ;;  %v8782_v16 = vor.u32 %v10843_v15, %v8781_v45  ;;  %v5423_v18 = vpop.f32.mrf.mxu3  ;;  %v10743_v45 = vld [vmem:[#allocation2 + $0xa8c] sm:$0xf0]  ;;  %v8701_v15 = vld [vmem:[#allocation2 + $0xce8] sm:$0xf]  ;;  %v10733_v28 = vld [vmem:[#allocation2 + $0xa3c] sm:$0xf0]  ;;  %v9142_v46 = vor.u32 %v10933_v63, %v9141_v43 }
 0x203   :  { %5673 = vmatpush.bf16.msrb.mxu0 %v7702_v10  ;;  %v8381_v10 = vld [vmem:[#allocation2 + $0xa68] sm:$0xf]  ;;  %12046 = vst [vmem:[#allocation43_spill] sm:$0xff] %v11759_v47  ;;  %v9861_v63 = vld [vmem:[#allocation2 + $0x15f8] sm:$0xf] }
 0x204   :  { %v8382_v24 = vor.u32 %v10743_v45, %v8381_v10  ;;  %v11113_v47 = vld [vmem:[#allocation2 + $0x161c] sm:$0xf0]  ;;  %v10021_v0 = vld [vmem:[#allocation2 + $0x1738] sm:$0xf] }
 0x205   :  { %5697 = vmatpush.bf16.msra.mxu1 %v8502_v27  ;;  %v10943_v27 = vld [vmem:[#allocation2 + $0x10cc] sm:$0xf0] }
 0x206   :  { %5711 = vmatpush.bf16.msra.mxu3 %v8822_v52  ;;  %5687 = vmatpush.bf16.msrb.mxu2 %v8022_v50  ;;  %v5424_v52 = vadd.f32 %v5423_v18, %v5410_v33  ;;  %v9182_v13 = vor.u32 %v10943_v27, %v9181_v58  ;;  %v11023_v50 = vld [vmem:[#allocation2 + $0x134c] sm:$0xf0]  ;;  %v8661_v33 = vld [vmem:[#allocation2 + $0xc98] sm:$0xf]  ;;  %v10061_v58 = vld [vmem:[#allocation2 + $0x1788] sm:$0xf] }
 0x207   :  { %5722 = vmatpush.bf16.msra.mxu0 %v9262_v19  ;;  %v10823_v19 = vld [vmem:[#allocation2 + $0xd0c] sm:$0xf0]  ;;  %v8662_v45 = vor.u32 %v10813_v4, %v8661_v33  ;;  %v10022_v33 = vor.u32 %v11153_v26, %v10021_v0  ;;  %v9341_v26 = vld [vmem:[#allocation2 + $0x11e8] sm:$0xf] }
 0x208   :  { %5674 = vmatmul.bf16.vlgmr.msrb.gmra.mxu0 %v11510_v32  ;;  %v11123_v18 = vld [vmem:[#allocation2 + $0x166c] sm:$0xf0] }
 0x209   :  { %5698 = vmatpush.bf16.msra.mxu1 %v8462_v1  ;;  %5688 = vmatmul.bf16.vlgmr.msrb.gmra.mxu2 %v11516_v42  ;;  %v8702_v1 = vor.u32 %v10823_v19, %v8701_v15  ;;  %v11163_v27 = vld [vmem:[#allocation2 + $0x17ac] sm:$0xf0]  ;;  %v5437_v15 = vpop.f32.mrf.mxu1  ;;  %v9902_v19 = vor.u32 %v11123_v18, %v9901_v35  ;;  %v9021_v35 = vld [vmem:[#allocation2 + $0xf68] sm:$0xf] }
 0x20a   :  { %5712 = vmatpush.bf16.msra.mxu3 %v8782_v16  ;;  %5736 = vmatpush.bf16.msra.mxu2 %v9582_v49  ;;  %v8341_v16 = vld [vmem:[#allocation2 + $0xa18] sm:$0xf]  ;;  %v9502_v49 = vor.u32 %v11023_v50, %v9501_v11  ;;  %v9421_v11 = vld [vmem:[#allocation2 + $0x1288] sm:$0xf]  ;;  %v11003_v50 = vld [vmem:[#allocation2 + $0x12ac] sm:$0xf0]  ;;  %v5438_v3 = vadd.f32 %v5437_v15, %v5424_v52  ;;  %v9062_v52 = vor.u32 %v10913_v14, %v9061_v17 }
 0x20b   :  { %5723 = vmatpush.bf16.msra.mxu0 %v9222_v37  ;;  %v11013_v37 = vld [vmem:[#allocation2 + $0x12fc] sm:$0xf0]  ;;  %v8342_v10 = vor.u32 %v10733_v28, %v8341_v16  ;;  %v9381_v16 = vld [vmem:[#allocation2 + $0x1238] sm:$0xf]  ;;  %v11103_v4 = vld [vmem:[#allocation2 + $0x15cc] sm:$0xf0] }
 0x20c   :  { %v10993_v28 = vld [vmem:[#allocation2 + $0x125c] sm:$0xf0]  ;;  %v10903_v18 = vld [vmem:[#allocation2 + $0xf8c] sm:$0xf0]  ;;  %v9781_v14 = vld [vmem:[#allocation2 + $0x1558] sm:$0xf] }
 0x20d   :  { %5699 = vmatpush.bf16.msra.mxu1 %v8422_v48  ;;  %v9101_v48 = vld [vmem:[#allocation2 + $0x1008] sm:$0xf]  ;;  %v10983_v17 = vld [vmem:[#allocation2 + $0x120c] sm:$0xf0]  ;;  %v10638_v15 = vld [vmem:[#allocation2 + $0x74c] sm:$0xf] }
 0x20e   :  { %5713 = vmatpush.bf16.msra.mxu3 %v8742_v53  ;;  %5737 = vmatpush.bf16.msra.mxu2 %v9542_v51  ;;  %v10923_v53 = vld [vmem:[#allocation2 + $0x102c] sm:$0xf0]  ;;  %v9462_v51 = vor.u32 %v11013_v37, %v9461_v22  ;;  %v9981_v22 = vld [vmem:[#allocation2 + $0x16e8] sm:$0xf]  ;;  %v5451_v37 = vpop.f32.mrf.mxu2 }
 0x20f   :  { %5724 = vmatpush.bf16.msra.mxu0 %v9182_v13  ;;  %v10062_v13 = vor.u32 %v11163_v27, %v10061_v58  ;;  %v9102_v43 = vor.u32 %v10923_v53, %v9101_v48  ;;  %v5452_v58 = vadd.f32 %v5451_v37, %v5438_v3  ;;  %v9382_v27 = vor.u32 %v10993_v28, %v9381_v16  ;;  %v11765_v3 = vpop.f32.mrf.mxu3  ;;  %v9301_v16 = vld [vmem:[#allocation2 + $0x1198] sm:$0xf] }
 0x210   :  { %v9022_v53 = vor.u32 %v10903_v18, %v9021_v35  ;;  %12048 = vst [vmem:[#allocation45_spill] sm:$0xff] %v11765_v3  ;;  %v7663_v35 = vld [vmem:[#allocation2 + $0x4f0] sm:$0xf0]  ;;  %v10628_v18 = vld [vmem:[#allocation2 + $0x6fc] sm:$0xf] }
 0x211   :  { %5700 = vmatpush.bf16.msra.mxu1 %v8382_v24  ;;  %v9422_v24 = vor.u32 %v11003_v50, %v9421_v11  ;;  %v10893_v11 = vld [vmem:[#allocation2 + $0xf3c] sm:$0xf0]  ;;  %v11767_v50 = vpop.f32.mrf.mxu1  ;;  %v10468_v3 = vld [vmem:[#allocation2 + $0x1fc] sm:$0xf] }
 0x212   :  { %5714 = vmatpush.bf16.msra.mxu3 %v8702_v1  ;;  %5738 = vmatpush.bf16.msra.mxu2 %v9502_v49  ;;  %v9862_v1 = vor.u32 %v11113_v47, %v9861_v63  ;;  %v9821_v49 = vld [vmem:[#allocation2 + $0x15a8] sm:$0xf]  ;;  %v11763_v47 = vpop.f32.mrf.mxu0  ;;  %12049 = vst [vmem:[#allocation46_spill] sm:$0xff] %v11767_v50  ;;  %v7343_v63 = vld [vmem:[#allocation2 + $0x270] sm:$0xf0] }
 0x213   :  { %5725 = vmatpush.bf16.msra.mxu0 %v9142_v46  ;;  %v11143_v46 = vld [vmem:[#allocation2 + $0x170c] sm:$0xf0]  ;;  %12047 = vst [vmem:[#allocation44_spill] sm:$0xff] %v11763_v47  ;;  %v9822_v48 = vor.u32 %v11103_v4, %v9821_v49  ;;  %v9741_v49 = vld [vmem:[#allocation2 + $0x1508] sm:$0xf] }
 0x214   :  { %v9982_v0 = vor.u32 %v11143_v46, %v9981_v22  ;;  %v11083_v4 = vld [vmem:[#allocation2 + $0x152c] sm:$0xf0]  ;;  %v10558_v46 = vld [vmem:[#allocation2 + $0x4cc] sm:$0xf]  ;;  %v7943_v50 = vld [vmem:[#allocation2 + $0x720] sm:$0xf0] }
 0x215   :  { %5701 = vmatpush.bf16.msra.mxu1 %v8342_v10  ;;  %v11093_v10 = vld [vmem:[#allocation2 + $0x157c] sm:$0xf0]  ;;  %v7303_v47 = vld [vmem:[#allocation2 + $0x220] sm:$0xf0] }
 0x216   :  { %5715 = vmatpush.bf16.msra.mxu3 %v8662_v45  ;;  %5739 = vmatpush.bf16.msra.mxu2 %v9462_v51  ;;  %v9941_v45 = vld [vmem:[#allocation2 + $0x1698] sm:$0xf]  ;;  %v11133_v51 = vld [vmem:[#allocation2 + $0x16bc] sm:$0xf0] }
 0x217   :  { %5726 = vmatpush.bf16.msra.mxu0 %v9102_v43  ;;  %v10478_v43 = vld [vmem:[#allocation2 + $0x24c] sm:$0xf]  ;;  %v9942_v28 = vor.u32 %v11133_v51, %v9941_v45  ;;  %v7306_v45 = vor.u32 %v10468_v3, %v7303_v47  ;;  %v10548_v51 = vld [vmem:[#allocation2 + $0x47c] sm:$0xf] }
 0x218   :  { %5702 = vmatmul.bf16.vlgmr.msra.gmra.mxu1 %v11539_v29  ;;  %v7346_v37 = vor.u32 %v10478_v43, %v7343_v63  ;;  %v7903_v43 = vld [vmem:[#allocation2 + $0x6d0] sm:$0xf0]  ;;  %v10458_v63 = vld [vmem:[#allocation2 + $0x1ac] sm:$0xf] }
 0x219   :  { %5750 = vmatpush.bf16.msrb.mxu1 %v9902_v19  ;;  %5716 = vmatmul.bf16.vlgmr.msra.gmra.mxu3 %v11545_v39  ;;  %v8981_v19 = vld [vmem:[#allocation2 + $0xf18] sm:$0xf] }
 0x21a   :  { %5768 = vmatpush.bf16.msrb.mxu3 %v10062_v13  ;;  %5740 = vmatpush.bf16.msra.mxu2 %v9422_v24  ;;  %v7983_v13 = vld [vmem:[#allocation2 + $0x770] sm:$0xf0]  ;;  %v9342_v24 = vor.u32 %v10983_v17, %v9341_v26  ;;  %v9742_v26 = vor.u32 %v11083_v4, %v9741_v49  ;;  %v10608_v4 = vld [vmem:[#allocation2 + $0x65c] sm:$0xf] }
 0x21b   :  { %5727 = vmatpush.bf16.msra.mxu0 %v9062_v52  ;;  %v10973_v52 = vld [vmem:[#allocation2 + $0x11bc] sm:$0xf0]  ;;  %v7986_v22 = vor.u32 %v10638_v15, %v7983_v13  ;;  %v7623_v15 = vld [vmem:[#allocation2 + $0x4a0] sm:$0xf0]  ;;  %v5493_v13 = vpop.f32.mrf.mxu1  ;;  %v7583_v49 = vld [vmem:[#allocation2 + $0x450] sm:$0xf0] }
 0x21d   :  { %5751 = vmatpush.bf16.msrb.mxu1 %v9862_v1  ;;  %v9782_v1 = vor.u32 %v11093_v10, %v9781_v14  ;;  %v7666_v14 = vor.u32 %v10558_v46, %v7663_v35  ;;  %v7946_v10 = vor.u32 %v10628_v18, %v7943_v50  ;;  %v7223_v46 = vld [vmem:[#allocation2 + $0x180] sm:$0xf0]  ;;  %v9621_v18 = vld [vmem:[#allocation2 + $0x1418] sm:$0xf] }
 0x21e   :  { %5769 = vmatpush.bf16.msrb.mxu3 %v10022_v33  ;;  %5741 = vmatpush.bf16.msra.mxu2 %v9382_v27  ;;  %v8982_v33 = vor.u32 %v10893_v11, %v8981_v19  ;;  %v5465_v27 = vpop.f32.mrf.mxu0  ;;  %v10618_v19 = vld [vmem:[#allocation2 + $0x6ac] sm:$0xf]  ;;  %v5479_v11 = vpop.f32.mrf.mxu3 }
 0x21f   :  { %5728 = vmatpush.bf16.msra.mxu0 %v9022_v53  ;;  %v5466_v17 = vadd.f32 %v5465_v27, %v5452_v58  ;;  %v11073_v53 = vld [vmem:[#allocation2 + $0x14dc] sm:$0xf0]  ;;  %v7906_v3 = vor.u32 %v10618_v19, %v7903_v43  ;;  %v7183_v19 = vld [vmem:[#allocation2 + $0x130] sm:$0xf0] }
 0x221   :  { %5752 = vmatpush.bf16.msrb.mxu1 %v9822_v48  ;;  %v9302_v48 = vor.u32 %v10973_v52, %v9301_v16  ;;  %v7626_v16 = vor.u32 %v10548_v51, %v7623_v15  ;;  %v10538_v52 = vld [vmem:[#allocation2 + $0x42c] sm:$0xf]  ;;  %v7823_v51 = vld [vmem:[#allocation2 + $0x630] sm:$0xf0] }
 0x222   :  { %5770 = vmatpush.bf16.msrb.mxu3 %v9982_v0  ;;  %5742 = vmatpush.bf16.msra.mxu2 %v9342_v24  ;;  %v9701_v0 = vld [vmem:[#allocation2 + $0x14b8] sm:$0xf]  ;;  %v7263_v24 = vld [vmem:[#allocation2 + $0x1d0] sm:$0xf0]  ;;  %v7586_v27 = vor.u32 %v10538_v52, %v7583_v49  ;;  %v10438_v15 = vld [vmem:[#allocation2 + $0x10c] sm:$0xf] }
 0x223   :  { %5729 = vmatpush.bf16.msra.mxu0 %v8982_v33  ;;  %v9702_v58 = vor.u32 %v11073_v53, %v9701_v0  ;;  %v11063_v33 = vld [vmem:[#allocation2 + $0x148c] sm:$0xf0]  ;;  %v7266_v50 = vor.u32 %v10458_v63, %v7263_v24  ;;  %v10598_v53 = vld [vmem:[#allocation2 + $0x60c] sm:$0xf]  ;;  %v7503_v24 = vld [vmem:[#allocation2 + $0x3b0] sm:$0xf0] }
 0x224   :  { %v10518_v63 = vld [vmem:[#allocation2 + $0x38c] sm:$0xf]  ;;  %v7143_v52 = vld [vmem:[#allocation2 + $0xe0] sm:$0xf0] }
 0x225   :  { %5753 = vmatpush.bf16.msrb.mxu1 %v9782_v1  ;;  %v5480_v1 = vadd.f32 %v5479_v11, %v5466_v17  ;;  %v7543_v17 = vld [vmem:[#allocation2 + $0x400] sm:$0xf0]  ;;  %v7506_v49 = vor.u32 %v10518_v63, %v7503_v24  ;;  %v10688_v63 = vld [vmem:[#allocation2 + $0x8dc] sm:$0xf] }
 0x226   :  { %5771 = vmatpush.bf16.msrb.mxu3 %v9942_v28  ;;  %5743 = vmatpush.bf16.msra.mxu2 %v9302_v48  ;;  %v9661_v28 = vld [vmem:[#allocation2 + $0x1468] sm:$0xf]  ;;  %v11053_v48 = vld [vmem:[#allocation2 + $0x143c] sm:$0xf0]  ;;  %v8183_v24 = vld [vmem:[#allocation2 + $0x900] sm:$0xf0] }
 0x227   :  { %5778 = vmatpush.bf16.msrb.mxu0 %v7346_v37  ;;  %v11770_v47 = vadd.f32 %v5493_v13, %v5480_v1  ;;  %v10448_v37 = vld [vmem:[#allocation2 + $0x15c] sm:$0xf]  ;;  %v9662_v35 = vor.u32 %v11063_v33, %v9661_v28  ;;  %v9622_v11 = vor.u32 %v11053_v48, %v9621_v18  ;;  %v7826_v1 = vor.u32 %v10598_v53, %v7823_v51  ;;  %v8263_v33 = vld [vmem:[#allocation2 + $0x9a0] sm:$0xf0]  ;;  %v10698_v48 = vld [vmem:[#allocation2 + $0x92c] sm:$0xf] }
 0x228   :  { %5730 = vmatmul.bf16.vlgmr.msra.gmra.mxu0 %v11542_v30  ;;  %v7226_v0 = vor.u32 %v10448_v37, %v7223_v46  ;;  %v10708_v28 = vld [vmem:[#allocation2 + $0x97c] sm:$0xf]  ;;  %v7463_v37 = vld [vmem:[#allocation2 + $0x360] sm:$0xf0]  ;;  %v11775_v46 = vpop.f32.mrf.mxu2  ;;  %v10498_v53 = vld [vmem:[#allocation2 + $0x2ec] sm:$0xf] }
 0x229   :  { %5754 = vmatpush.bf16.msrb.mxu1 %v9742_v26  ;;  %12050 = vst [vmem:[#allocation47_spill] sm:$0xff] %v11770_v47  ;;  %5744 = vmatmul.bf16.vlgmr.msra.gmra.mxu2 %v11548_v40  ;;  %v10528_v26 = vld [vmem:[#allocation2 + $0x3dc] sm:$0xf]  ;;  %v7423_v51 = vld [vmem:[#allocation2 + $0x310] sm:$0xf0] }
 0x22a   :  { %5806 = vmatpush.bf16.msra.mxu3 %v7986_v22  ;;  %5792 = vmatpush.bf16.msrb.mxu2 %v7666_v14  ;;  %v7863_v22 = vld [vmem:[#allocation2 + $0x680] sm:$0xf0]  ;;  %v7546_v13 = vor.u32 %v10528_v26, %v7543_v17  ;;  %12051 = vst [vmem:[#allocation48_spill] sm:$0xff] %v11775_v46  ;;  %v8223_v26 = vld [vmem:[#allocation2 + $0x950] sm:$0xf0] }
 0x22b   :  { %5779 = vmatpush.bf16.msrb.mxu0 %v7306_v45  ;;  %10081 = vmatmul.msk.bf16.vlgmr.msrb.gmra.mxu3 %vm4794_vm0, %v11571_v6  ;;  %v7866_v14 = vor.u32 %v10608_v4, %v7863_v22  ;;  %v8303_v45 = vld [vmem:[#allocation2 + $0x9f0] sm:$0xf0]  ;;  %v8266_v4 = vor.u32 %v10708_v28, %v8263_v33  ;;  %v10508_v22 = vld [vmem:[#allocation2 + $0x33c] sm:$0xf]  ;;  %v11781_v33 = vpop.f32.mrf.mxu1  ;;  %v10878_v28 = vld [vmem:[#allocation2 + $0xecc] sm:$0xf] }
 0x22c   :  { %v7743_v17 = vld [vmem:[#allocation2 + $0x590] sm:$0xf0]  ;;  %12053 = vst [vmem:[#allocation50_spill] sm:$0xff] %v11781_v33 }
 0x22d   :  { %5755 = vmatpush.bf16.msrb.mxu1 %v9702_v58  ;;  %v7186_v58 = vor.u32 %v10438_v15, %v7183_v19  ;;  %v10568_v15 = vld [vmem:[#allocation2 + $0x51c] sm:$0xf]  ;;  %v7703_v19 = vld [vmem:[#allocation2 + $0x540] sm:$0xf0]  ;;  %v8943_v47 = vld [vmem:[#allocation2 + $0xef0] sm:$0xf0] }
 0x22e   :  { %5807 = vmatpush.bf16.msra.mxu3 %v7946_v10  ;;  %5793 = vmatpush.bf16.msrb.mxu2 %v7626_v16  ;;  %v10718_v10 = vld [vmem:[#allocation2 + $0x9cc] sm:$0xf]  ;;  %v10588_v16 = vld [vmem:[#allocation2 + $0x5bc] sm:$0xf]  ;;  %v9183_v33 = vld [vmem:[#allocation2 + $0x10d0] sm:$0xf0] }
 0x22f   :  { %5780 = vmatpush.bf16.msrb.mxu0 %v7266_v50  ;;  %v8306_v43 = vor.u32 %v10718_v10, %v8303_v45  ;;  %v10428_v50 = vld [vmem:[#allocation2 + $0xbc] sm:$0xf]  ;;  %v7466_v10 = vor.u32 %v10508_v22, %v7463_v37  ;;  %v8226_v45 = vor.u32 %v10698_v48, %v8223_v26  ;;  %v11783_v37 = vpop.f32.mrf.mxu3  ;;  %v10678_v48 = vld [vmem:[#allocation2 + $0x88c] sm:$0xf]  ;;  %v8143_v26 = vld [vmem:[#allocation2 + $0x8b0] sm:$0xf0] }
 0x230   :  { %v7146_v18 = vor.u32 %v10428_v50, %v7143_v52  ;;  %v10798_v50 = vld [vmem:[#allocation2 + $0xc4c] sm:$0xf]  ;;  %v8623_v52 = vld [vmem:[#allocation2 + $0xc70] sm:$0xf0]  ;;  %v10488_v22 = vld [vmem:[#allocation2 + $0x29c] sm:$0xf] }
 0x231   :  { %5756 = vmatpush.bf16.msrb.mxu1 %v9662_v35  ;;  %12054 = vst [vmem:[#allocation51_spill] sm:$0xff] %v11783_v37  ;;  %v10778_v37 = vld [vmem:[#allocation2 + $0xbac] sm:$0xf]  ;;  %v10063_v46 = vld [vmem:[#allocation2 + $0x17b0] sm:$0xf0] }
 0x232   :  { %5808 = vmatpush.bf16.msra.mxu3 %v7906_v3  ;;  %5794 = vmatpush.bf16.msrb.mxu2 %v7586_v27  ;;  %v7783_v3 = vld [vmem:[#allocation2 + $0x5e0] sm:$0xf0]  ;;  %v10578_v27 = vld [vmem:[#allocation2 + $0x56c] sm:$0xf] }
 0x233   :  { %5781 = vmatpush.bf16.msrb.mxu0 %v7226_v0  ;;  %v7786_v35 = vor.u32 %v10588_v16, %v7783_v3  ;;  %v7103_v0 = vld [vmem:[#allocation2 + $0x90] sm:$0xf0]  ;;  %v7063_v16 = vld [vmem:[#allocation2 + $0x40] sm:$0xf0] }
 0x234   :  { %v9263_v3 = vld [vmem:[#allocation2 + $0x1170] sm:$0xf0] }
 0x235   :  { %5757 = vmatpush.bf16.msrb.mxu1 %v9622_v11  ;;  %v11778_v11 = vpop.f32.mrf.mxu0 }
 0x236   :  { %5809 = vmatpush.bf16.msra.mxu3 %v7866_v14  ;;  %5795 = vmatpush.bf16.msrb.mxu2 %v7546_v13  ;;  %v10418_v14 = vld [vmem:[#allocation2 + $0x6c] sm:$0xf]  ;;  %12052 = vst [vmem:[#allocation49_spill] sm:$0xff] %v11778_v11  ;;  %v7746_v13 = vor.u32 %v10578_v27, %v7743_v17  ;;  %v7383_v27 = vld [vmem:[#allocation2 + $0x2c0] sm:$0xf0]  ;;  %v5507_v17 = vpop.f32.mrf.mxu2 }
 0x237   :  { %5782 = vmatpush.bf16.msrb.mxu0 %v7186_v58  ;;  %v10408_v58 = vld [vmem:[#allocation2 + $0x1c] sm:$0xf]  ;;  %v11158_v11 = vld [vmem:[#allocation2 + $0x178c] sm:$0xf] }
 0x238   :  { %5758 = vmatmul.bf16.vlgmr.msrb.gmra.mxu1 %v11568_v5 }
 0x239   :  { %5820 = vmatpush.bf16.msra.mxu1 %v8306_v43  ;;  %v7106_v43 = vor.u32 %v10418_v14, %v7103_v0  ;;  %v8626_v0 = vor.u32 %v10798_v50, %v8623_v52  ;;  %v10868_v50 = vld [vmem:[#allocation2 + $0xe7c] sm:$0xf]  ;;  %v8903_v52 = vld [vmem:[#allocation2 + $0xea0] sm:$0xf0] }
 0x23a   :  { %5810 = vmatpush.bf16.msra.mxu3 %v7826_v1  ;;  %5796 = vmatpush.bf16.msrb.mxu2 %v7506_v49  ;;  %v10958_v1 = vld [vmem:[#allocation2 + $0x114c] sm:$0xf]  ;;  %v7426_v49 = vor.u32 %v10498_v53, %v7423_v51  ;;  %v10948_v53 = vld [vmem:[#allocation2 + $0x10fc] sm:$0xf]  ;;  %v9223_v51 = vld [vmem:[#allocation2 + $0x1120] sm:$0xf0] }
 0x23b   :  { %5783 = vmatpush.bf16.msrb.mxu0 %v7146_v18  ;;  %v7066_v18 = vor.u32 %v10408_v58, %v7063_v16  ;;  %v9266_v14 = vor.u32 %v10958_v1, %v9263_v3  ;;  %v8103_v58 = vld [vmem:[#allocation2 + $0x860] sm:$0xf0]  ;;  %v9226_v16 = vor.u32 %v10948_v53, %v9223_v51 }
 0x23c   :  { %v9143_v51 = vld [vmem:[#allocation2 + $0x1080] sm:$0xf0] }
 0x23d   :  { %5821 = vmatpush.bf16.msra.mxu1 %v8266_v4  ;;  %v8186_v4 = vor.u32 %v10688_v63, %v8183_v24  ;;  %v10788_v63 = vld [vmem:[#allocation2 + $0xbfc] sm:$0xf]  ;;  %v8583_v24 = vld [vmem:[#allocation2 + $0xc20] sm:$0xf0]  ;;  %v5521_v1 = vpop.f32.mrf.mxu0 }
 0x23e   :  { %5811 = vmatpush.bf16.msra.mxu3 %v7786_v35  ;;  %5797 = vmatpush.bf16.msrb.mxu2 %v7466_v10  ;;  %v7706_v35 = vor.u32 %v10568_v15, %v7703_v19  ;;  %v12055_v10 = vperm.slane %v11739_v7, 5  ;;  %v8146_v15 = vor.u32 %v10678_v48, %v8143_v26  ;;  %v8946_v19 = vor.u32 %v10878_v28, %v8943_v47  ;;  %v10658_v28 = vld [vmem:[#allocation2 + $0x7ec] sm:$0xf] }
 0x23f   :  { %5784 = vmatpush.bf16.msrb.mxu0 %v7106_v43  ;;  %v10668_v43 = vld [vmem:[#allocation2 + $0x83c] sm:$0xf]  ;;  %v8586_v3 = vor.u32 %v10788_v63, %v8583_v24  ;;  %v8906_v47 = vor.u32 %v10868_v50, %v8903_v52  ;;  %v8503_v24 = vld [vmem:[#allocation2 + $0xb80] sm:$0xf0]  ;;  %v11038_v50 = vld [vmem:[#allocation2 + $0x13cc] sm:$0xf] }
 0x240   :  { %v10768_v63 = vld [vmem:[#allocation2 + $0xb5c] sm:$0xf]  ;;  %v9583_v52 = vld [vmem:[#allocation2 + $0x13f0] sm:$0xf0] }
 0x241   :  { %5822 = vmatpush.bf16.msra.mxu1 %v8226_v45  ;;  %v5508_v45 = vadd.f32 %v5507_v17, %v12055_v10  ;;  %v10938_v17 = vld [vmem:[#allocation2 + $0x10ac] sm:$0xf] }
 0x242   :  { %5812 = vmatpush.bf16.msra.mxu3 %v7746_v13  ;;  %5798 = vmatpush.bf16.msrb.mxu2 %v7426_v49  ;;  %v7386_v13 = vor.u32 %v10488_v22, %v7383_v27  ;;  %v8543_v49 = vld [vmem:[#allocation2 + $0xbd0] sm:$0xf0]  ;;  %v8106_v22 = vor.u32 %v10668_v43, %v8103_v58  ;;  %v5549_v27 = vpop.f32.mrf.mxu3  ;;  %v9186_v48 = vor.u32 %v10938_v17, %v9183_v33  ;;  %v8023_v43 = vld [vmem:[#allocation2 + $0x7c0] sm:$0xf0]  ;;  %v10848_v58 = vld [vmem:[#allocation2 + $0xddc] sm:$0xf] }
 0x243   :  { %5785 = vmatpush.bf16.msrb.mxu0 %v7066_v18  ;;  %v5522_v10 = vadd.f32 %v5521_v1, %v5508_v45  ;;  %v8063_v18 = vld [vmem:[#allocation2 + $0x810] sm:$0xf0]  ;;  %v8546_v26 = vor.u32 %v10778_v37, %v8543_v49  ;;  %v10928_v45 = vld [vmem:[#allocation2 + $0x105c] sm:$0xf]  ;;  %v8823_v33 = vld [vmem:[#allocation2 + $0xe00] sm:$0xf0]  ;;  %v11790_v37 = vpop.f32.mrf.mxu2 }
 0x244   :  { %12056 = vst [vmem:[#allocation52_spill] sm:$0xff] %v11790_v37  ;;  %v9146_v1 = vor.u32 %v10928_v45, %v9143_v51  ;;  %v9103_v17 = vld [vmem:[#allocation2 + $0x1030] sm:$0xf0]  ;;  %v10748_v45 = vld [vmem:[#allocation2 + $0xabc] sm:$0xf] }
 0x245   :  { %5823 = vmatpush.bf16.msra.mxu1 %v8186_v4  ;;  %v5535_v4 = vpop.f32.mrf.mxu1  ;;  %v8463_v49 = vld [vmem:[#allocation2 + $0xb30] sm:$0xf0]  ;;  %v8423_v51 = vld [vmem:[#allocation2 + $0xae0] sm:$0xf0] }
 0x246   :  { %5813 = vmatpush.bf16.msra.mxu3 %v7706_v35  ;;  %5799 = vmatpush.bf16.msrb.mxu2 %v7386_v13  ;;  %v5536_v35 = vadd.f32 %v5535_v4, %v5522_v10  ;;  %v8066_v13 = vor.u32 %v10658_v28, %v8063_v18  ;;  %v10758_v10 = vld [vmem:[#allocation2 + $0xb0c] sm:$0xf]  ;;  %v8783_v28 = vld [vmem:[#allocation2 + $0xdb0] sm:$0xf0]  ;;  %v9863_v37 = vld [vmem:[#allocation2 + $0x1620] sm:$0xf0] }
 0x247   :  { %5834 = vmatpush.bf16.msra.mxu0 %v8626_v0  ;;  %v8863_v0 = vld [vmem:[#allocation2 + $0xe50] sm:$0xf0] }
 0x248   :  { %5786 = vmatmul.bf16.vlgmr.msrb.gmra.mxu0 %v11507_v31  ;;  %v5550_v53 = vadd.f32 %v5549_v27, %v5536_v35  ;;  %v9586_v35 = vor.u32 %v11038_v50, %v9583_v52  ;;  %v8466_v27 = vor.u32 %v10758_v10, %v8463_v49  ;;  %v8383_v50 = vld [vmem:[#allocation2 + $0xa90] sm:$0xf0] }
 0x249   :  { %5824 = vmatpush.bf16.msra.mxu1 %v8146_v15  ;;  %5800 = vmatmul.bf16.vlgmr.msrb.gmra.mxu2 %v11513_v41  ;;  %v10648_v15 = vld [vmem:[#allocation2 + $0x79c] sm:$0xf] }
 0x24a   :  { %5862 = vmatpush.bf16.msrb.mxu3 %v9266_v14  ;;  %5848 = vmatpush.bf16.msra.mxu2 %v8946_v19  ;;  %v10858_v14 = vld [vmem:[#allocation2 + $0xe2c] sm:$0xf]  ;;  %v8026_v4 = vor.u32 %v10648_v15, %v8023_v43  ;;  %v8743_v15 = vld [vmem:[#allocation2 + $0xd60] sm:$0xf0]  ;;  %v8426_v43 = vor.u32 %v10748_v45, %v8423_v51  ;;  %v10728_v45 = vld [vmem:[#allocation2 + $0xa1c] sm:$0xf] }
 0x24b   :  { %5835 = vmatpush.bf16.msra.mxu0 %v8586_v3  ;;  %5814 = vmatmul.bf16.vlgmr.msra.gmra.mxu3 %v11510_v32  ;;  %v8866_v19 = vor.u32 %v10858_v14, %v8863_v0  ;;  %v10918_v3 = vld [vmem:[#allocation2 + $0x100c] sm:$0xf]  ;;  %v9543_v14 = vld [vmem:[#allocation2 + $0x13a0] sm:$0xf0]  ;;  %v10484_v51 = vld [vmem:[#allocation2 + $0x274] sm:$0xf0] }
 0x24c   :  { %v9106_v18 = vor.u32 %v10918_v3, %v9103_v17  ;;  %v9063_v0 = vld [vmem:[#allocation2 + $0xfe0] sm:$0xf0]  ;;  %v10738_v3 = vld [vmem:[#allocation2 + $0xa6c] sm:$0xf]  ;;  %v5563_v52 = vpop.f32.mrf.mxu2 }
 0x24d   :  { %5825 = vmatpush.bf16.msra.mxu1 %v8106_v22  ;;  %v8826_v22 = vor.u32 %v10848_v58, %v8823_v33  ;;  %v10898_v58 = vld [vmem:[#allocation2 + $0xf6c] sm:$0xf]  ;;  %v5564_v17 = vadd.f32 %v5563_v52, %v5550_v53  ;;  %v8343_v53 = vld [vmem:[#allocation2 + $0xa40] sm:$0xf0] }
 0x24e   :  { %5863 = vmatpush.bf16.msrb.mxu3 %v9226_v16  ;;  %5849 = vmatpush.bf16.msra.mxu2 %v8906_v47  ;;  %v8506_v16 = vor.u32 %v10768_v63, %v8503_v24  ;;  %v10838_v47 = vld [vmem:[#allocation2 + $0xd8c] sm:$0xf] }
 0x24f   :  { %5836 = vmatpush.bf16.msra.mxu0 %v8546_v26  ;;  %v11028_v26 = vld [vmem:[#allocation2 + $0x137c] sm:$0xf]  ;;  %v8786_v63 = vor.u32 %v10838_v47, %v8783_v28  ;;  %v11018_v33 = vld [vmem:[#allocation2 + $0x132c] sm:$0xf]  ;;  %v11793_v47 = vpop.f32.mrf.mxu0  ;;  %v11795_v28 = vpop.f32.mrf.mxu1 }
 0x250   :  { %v9546_v24 = vor.u32 %v11028_v26, %v9543_v14  ;;  %12057 = vst [vmem:[#allocation53_spill] sm:$0xff] %v11793_v47  ;;  %v11008_v26 = vld [vmem:[#allocation2 + $0x12dc] sm:$0xf]  ;;  %v9463_v14 = vld [vmem:[#allocation2 + $0x1300] sm:$0xf0] }
 0x251   :  { %5826 = vmatpush.bf16.msra.mxu1 %v8066_v13  ;;  %v10828_v13 = vld [vmem:[#allocation2 + $0xd3c] sm:$0xf]  ;;  %12058 = vst [vmem:[#allocation54_spill] sm:$0xff] %v11795_v28  ;;  %v7309_v28 = vld [vmem:[#allocation2 + $0x200] sm:$0xf] }
 0x252   :  { %5864 = vmatpush.bf16.msrb.mxu3 %v9186_v48  ;;  %5850 = vmatpush.bf16.msra.mxu2 %v8866_v19  ;;  %v10908_v48 = vld [vmem:[#allocation2 + $0xfbc] sm:$0xf]  ;;  %v8746_v10 = vor.u32 %v10828_v13, %v8743_v15  ;;  %v11797_v13 = vpop.f32.mrf.mxu3  ;;  %v10474_v47 = vld [vmem:[#allocation2 + $0x224] sm:$0xf0] }
 0x253   :  { %5837 = vmatpush.bf16.msra.mxu0 %v8506_v16  ;;  %v9066_v19 = vor.u32 %v10908_v48, %v9063_v0  ;;  %v9023_v16 = vld [vmem:[#allocation2 + $0xf90] sm:$0xf0]  ;;  %v8983_v48 = vld [vmem:[#allocation2 + $0xf40] sm:$0xf0]  ;;  %v7349_v0 = vld [vmem:[#allocation2 + $0x250] sm:$0xf] }
 0x254   :  { %12059 = vst [vmem:[#allocation55_spill] sm:$0xff] %v11797_v13  ;;  %v11034_v13 = vld [vmem:[#allocation2 + $0x13a4] sm:$0xf0] }
 0x255   :  { %5827 = vmatpush.bf16.msra.mxu1 %v8026_v4  ;;  %v10818_v4 = vld [vmem:[#allocation2 + $0xcec] sm:$0xf] }
 0x256   :  { %5865 = vmatpush.bf16.msrb.mxu3 %v9146_v1  ;;  %5851 = vmatpush.bf16.msra.mxu2 %v8826_v22  ;;  %v9503_v1 = vld [vmem:[#allocation2 + $0x1350] sm:$0xf0] }
 0x257   :  { %5838 = vmatpush.bf16.msra.mxu0 %v8466_v27  ;;  %v9506_v49 = vor.u32 %v11018_v33, %v9503_v1  ;;  %v8703_v22 = vld [vmem:[#allocation2 + $0xd10] sm:$0xf0]  ;;  %v8386_v27 = vor.u32 %v10738_v3, %v8383_v50  ;;  %v10808_v33 = vld [vmem:[#allocation2 + $0xc9c] sm:$0xf]  ;;  %v8663_v1 = vld [vmem:[#allocation2 + $0xcc0] sm:$0xf0]  ;;  %v7350_v50 = vor.u32 %v10484_v51, %v7349_v0 }
 0x258   :  { %5828 = vmatmul.bf16.vlgmr.msra.gmra.mxu1 %v11516_v42  ;;  %v8706_v15 = vor.u32 %v10818_v4, %v8703_v22  ;;  %v9423_v3 = vld [vmem:[#allocation2 + $0x12b0] sm:$0xf0]  ;;  %v5577_v22 = vpop.f32.mrf.mxu0  ;;  %v7269_v51 = vld [vmem:[#allocation2 + $0x1b0] sm:$0xf] }
 0x259   :  { %5876 = vmatpush.bf16.msrb.mxu1 %v9586_v35  ;;  %v10888_v35 = vld [vmem:[#allocation2 + $0xf1c] sm:$0xf] }
 0x25a   :  { %5866 = vmatpush.bf16.msrb.mxu3 %v9106_v18  ;;  %5852 = vmatpush.bf16.msra.mxu2 %v8786_v63  ;;  %v9026_v18 = vor.u32 %v10898_v58, %v9023_v16  ;;  %v11118_v63 = vld [vmem:[#allocation2 + $0x164c] sm:$0xf]  ;;  %v8346_v58 = vor.u32 %v10728_v45, %v8343_v53  ;;  %v11148_v45 = vld [vmem:[#allocation2 + $0x173c] sm:$0xf]  ;;  %v10023_v53 = vld [vmem:[#allocation2 + $0x1760] sm:$0xf0] }
 0x25b   :  { %5839 = vmatpush.bf16.msra.mxu0 %v8426_v43  ;;  %v8986_v43 = vor.u32 %v10888_v35, %v8983_v48  ;;  %v10998_v16 = vld [vmem:[#allocation2 + $0x128c] sm:$0xf]  ;;  %v5591_v35 = vpop.f32.mrf.mxu1  ;;  %v9383_v48 = vld [vmem:[#allocation2 + $0x1260] sm:$0xf0] }
 0x25c   :  { %v9426_v4 = vor.u32 %v10998_v16, %v9423_v3  ;;  %v7229_v16 = vld [vmem:[#allocation2 + $0x160] sm:$0xf]  ;;  %v10454_v3 = vld [vmem:[#allocation2 + $0x184] sm:$0xf0] }
 0x25d   :  { %5877 = vmatpush.bf16.msrb.mxu1 %v9546_v24  ;;  %v9903_v24 = vld [vmem:[#allocation2 + $0x1670] sm:$0xf0] }
 0x25e   :  { %5867 = vmatpush.bf16.msrb.mxu3 %v9066_v19  ;;  %5853 = vmatpush.bf16.msra.mxu2 %v8746_v10  ;;  %v9466_v19 = vor.u32 %v11008_v26, %v9463_v14  ;;  %v9906_v52 = vor.u32 %v11118_v63, %v9903_v24  ;;  %v11108_v10 = vld [vmem:[#allocation2 + $0x15fc] sm:$0xf]  ;;  %v5578_v26 = vadd.f32 %v5577_v22, %v5564_v17  ;;  %v10464_v63 = vld [vmem:[#allocation2 + $0x1d4] sm:$0xf0]  ;;  %v11098_v24 = vld [vmem:[#allocation2 + $0x15ac] sm:$0xf] }
 0x25f   :  { %5840 = vmatpush.bf16.msra.mxu0 %v8386_v27  ;;  %v10988_v27 = vld [vmem:[#allocation2 + $0x123c] sm:$0xf]  ;;  %v7310_v14 = vor.u32 %v10474_v47, %v7309_v28  ;;  %v9866_v0 = vor.u32 %v11108_v10, %v9863_v37  ;;  %v9343_v17 = vld [vmem:[#allocation2 + $0x1210] sm:$0xf0]  ;;  %v7270_v37 = vor.u32 %v10464_v63, %v7269_v51  ;;  %v9303_v22 = vld [vmem:[#allocation2 + $0x11c0] sm:$0xf0] }
 0x260   :  { %v10644_v51 = vld [vmem:[#allocation2 + $0x774] sm:$0xf0] }
 0x261   :  { %5878 = vmatpush.bf16.msrb.mxu1 %v9506_v49  ;;  %v8666_v49 = vor.u32 %v10808_v33, %v8663_v1  ;;  %v5605_v33 = vpop.f32.mrf.mxu3  ;;  %v9983_v1 = vld [vmem:[#allocation2 + $0x1710] sm:$0xf0] }
 0x262   :  { %5868 = vmatpush.bf16.msrb.mxu3 %v9026_v18  ;;  %5854 = vmatpush.bf16.msra.mxu2 %v8706_v15  ;;  %v10066_v18 = vor.u32 %v11158_v11, %v10063_v46  ;;  %v9823_v15 = vld [vmem:[#allocation2 + $0x15d0] sm:$0xf0]  ;;  %v10026_v46 = vor.u32 %v11148_v45, %v10023_v53  ;;  %v10978_v11 = vld [vmem:[#allocation2 + $0x11ec] sm:$0xf]  ;;  %v10444_v45 = vld [vmem:[#allocation2 + $0x134] sm:$0xf0] }
 0x263   :  { %5841 = vmatpush.bf16.msra.mxu0 %v8346_v58  ;;  %v9826_v28 = vor.u32 %v11098_v24, %v9823_v15  ;;  %v11138_v58 = vld [vmem:[#allocation2 + $0x16ec] sm:$0xf]  ;;  %v9346_v10 = vor.u32 %v10978_v11, %v9343_v17  ;;  %v7989_v53 = vld [vmem:[#allocation2 + $0x750] sm:$0xf]  ;;  %v9743_v15 = vld [vmem:[#allocation2 + $0x1530] sm:$0xf0] }
 0x264   :  { %v11078_v24 = vld [vmem:[#allocation2 + $0x150c] sm:$0xf]  ;;  %v7990_v17 = vor.u32 %v10644_v51, %v7989_v53  ;;  %v9663_v53 = vld [vmem:[#allocation2 + $0x1490] sm:$0xf0] }
 0x265   :  { %5879 = vmatpush.bf16.msrb.mxu1 %v9466_v19  ;;  %v5592_v19 = vadd.f32 %v5591_v35, %v5578_v26  ;;  %v11128_v35 = vld [vmem:[#allocation2 + $0x169c] sm:$0xf]  ;;  %v7189_v26 = vld [vmem:[#allocation2 + $0x110] sm:$0xf] }
 0x266   :  { %5869 = vmatpush.bf16.msrb.mxu3 %v8986_v43  ;;  %5855 = vmatpush.bf16.msra.mxu2 %v8666_v49  ;;  %v9386_v43 = vor.u32 %v10988_v27, %v9383_v48  ;;  %v10968_v49 = vld [vmem:[#allocation2 + $0x119c] sm:$0xf]  ;;  %v7230_v27 = vor.u32 %v10454_v3, %v7229_v16  ;;  %v7190_v11 = vor.u32 %v10444_v45, %v7189_v26  ;;  %v10434_v16 = vld [vmem:[#allocation2 + $0xe4] sm:$0xf0]  ;;  %v7949_v3 = vld [vmem:[#allocation2 + $0x700] sm:$0xf] }
 0x267   :  { %5890 = vmatpush.bf16.msrb.mxu0 %v9906_v52  ;;  %v11800_v47 = vadd.f32 %v5605_v33, %v5592_v19  ;;  %v9783_v52 = vld [vmem:[#allocation2 + $0x1580] sm:$0xf0]  ;;  %v9306_v63 = vor.u32 %v10968_v49, %v9303_v22  ;;  %v11804_v19 = vpop.f32.mrf.mxu2  ;;  %v11806_v33 = vpop.f32.mrf.mxu0  ;;  %v10424_v26 = vld [vmem:[#allocation2 + $0x94] sm:$0xf0]  ;;  %v11058_v45 = vld [vmem:[#allocation2 + $0x146c] sm:$0xf] }
 0x268   :  { %5842 = vmatmul.bf16.vlgmr.msra.gmra.mxu0 %v11539_v29  ;;  %12060 = vst [vmem:[#allocation56_spill] sm:$0xff] %v11804_v19  ;;  %v10674_v19 = vld [vmem:[#allocation2 + $0x864] sm:$0xf0] }
 0x269   :  { %5880 = vmatpush.bf16.msrb.mxu1 %v9426_v4  ;;  %5856 = vmatmul.bf16.vlgmr.msra.gmra.mxu2 %v11545_v39  ;;  %v9986_v4 = vor.u32 %v11138_v58, %v9983_v1  ;;  %12061 = vst [vmem:[#allocation57_spill] sm:$0xff] %v11806_v33  ;;  %v10554_v58 = vld [vmem:[#allocation2 + $0x4a4] sm:$0xf0]  ;;  %v9746_v1 = vor.u32 %v11078_v24, %v9743_v15  ;;  %v7069_v15 = vld [vmem:[#allocation2 + $0x20] sm:$0xf] }
 0x26a   :  { %5918 = vmatpush.bf16.msra.mxu3 %v7350_v50  ;;  %5908 = vmatpush.bf16.msrb.mxu2 %v10066_v18  ;;  %v11088_v50 = vld [vmem:[#allocation2 + $0x155c] sm:$0xf]  ;;  %v9943_v18 = vld [vmem:[#allocation2 + $0x16c0] sm:$0xf0]  ;;  %v9229_v33 = vld [vmem:[#allocation2 + $0x1100] sm:$0xf] }
 0x26b   :  { %5891 = vmatpush.bf16.msrb.mxu0 %v9866_v0  ;;  %5870 = vmatmul.bf16.vlgmr.msrb.gmra.mxu3 %v11542_v30  ;;  %v9786_v48 = vor.u32 %v11088_v50, %v9783_v52  ;;  %v10564_v0 = vld [vmem:[#allocation2 + $0x4f4] sm:$0xf0]  ;;  %v10634_v50 = vld [vmem:[#allocation2 + $0x724] sm:$0xf0]  ;;  %v11068_v52 = vld [vmem:[#allocation2 + $0x14bc] sm:$0xf] }
 0x26c   :  { %v7950_v22 = vor.u32 %v10634_v50, %v7949_v3  ;;  %v10614_v3 = vld [vmem:[#allocation2 + $0x684] sm:$0xf0]  ;;  %v8629_v50 = vld [vmem:[#allocation2 + $0xc50] sm:$0xf] }
 0x26d   :  { %5881 = vmatpush.bf16.msrb.mxu1 %v9386_v43  ;;  %v9946_v43 = vor.u32 %v11128_v35, %v9943_v18  ;;  %v7109_v35 = vld [vmem:[#allocation2 + $0x70] sm:$0xf] }
 0x26e   :  { %5919 = vmatpush.bf16.msra.mxu3 %v7310_v14  ;;  %5909 = vmatpush.bf16.msrb.mxu2 %v10026_v46  ;;  %v7669_v14 = vld [vmem:[#allocation2 + $0x4d0] sm:$0xf] }
 0x26f   :  { %5892 = vmatpush.bf16.msrb.mxu0 %v9826_v28  ;;  %v7670_v46 = vor.u32 %v10564_v0, %v7669_v14  ;;  %v7629_v28 = vld [vmem:[#allocation2 + $0x480] sm:$0xf]  ;;  %v7589_v18 = vld [vmem:[#allocation2 + $0x430] sm:$0xf]  ;;  %v10624_v0 = vld [vmem:[#allocation2 + $0x6d4] sm:$0xf0]  ;;  %v5619_v51 = vpop.f32.mrf.mxu2 }
 0x270   :  { %v7630_v49 = vor.u32 %v10554_v58, %v7629_v28  ;;  %v7909_v14 = vld [vmem:[#allocation2 + $0x6b0] sm:$0xf]  ;;  %v7549_v28 = vld [vmem:[#allocation2 + $0x3e0] sm:$0xf]  ;;  %v10534_v58 = vld [vmem:[#allocation2 + $0x404] sm:$0xf0] }
 0x271   :  { %5882 = vmatpush.bf16.msrb.mxu1 %v9346_v10  ;;  %v9703_v10 = vld [vmem:[#allocation2 + $0x14e0] sm:$0xf0] }
 0x272   :  { %5920 = vmatpush.bf16.msra.mxu3 %v7270_v37  ;;  %5910 = vmatpush.bf16.msrb.mxu2 %v9986_v4  ;;  %v7149_v37 = vld [vmem:[#allocation2 + $0xc0] sm:$0xf] }
 0x273   :  { %5893 = vmatpush.bf16.msrb.mxu0 %v9786_v48  ;;  %v7150_v4 = vor.u32 %v10434_v16, %v7149_v37  ;;  %v9706_v48 = vor.u32 %v11068_v52, %v9703_v10  ;;  %v10414_v37 = vld [vmem:[#allocation2 + $0x44] sm:$0xf0]  ;;  %v7869_v16 = vld [vmem:[#allocation2 + $0x660] sm:$0xf]  ;;  %v10804_v10 = vld [vmem:[#allocation2 + $0xc74] sm:$0xf0] }
 0x275   :  { %5883 = vmatpush.bf16.msrb.mxu1 %v9306_v63  ;;  %v5633_v63 = vpop.f32.mrf.mxu0 }
 0x276   :  { %5921 = vmatpush.bf16.msra.mxu3 %v7230_v27  ;;  %5911 = vmatpush.bf16.msrb.mxu2 %v9946_v43  ;;  %v10544_v27 = vld [vmem:[#allocation2 + $0x454] sm:$0xf0]  ;;  %v11809_v43 = vpop.f32.mrf.mxu1 }
 0x277   :  { %5894 = vmatpush.bf16.msrb.mxu0 %v9746_v1  ;;  %v7590_v24 = vor.u32 %v10544_v27, %v7589_v18  ;;  %12062 = vst [vmem:[#allocation58_spill] sm:$0xff] %v11809_v43  ;;  %v9666_v1 = vor.u32 %v11058_v45, %v9663_v53  ;;  %v11816_v18 = vpop.f32.mrf.mxu3  ;;  %v7070_v27 = vor.u32 %v10414_v37, %v7069_v15  ;;  %v7829_v53 = vld [vmem:[#allocation2 + $0x610] sm:$0xf]  ;;  %v7469_v37 = vld [vmem:[#allocation2 + $0x340] sm:$0xf] }
 0x278   :  { %5884 = vmatmul.bf16.vlgmr.msrb.gmra.mxu1 %v11548_v40  ;;  %12064 = vst [vmem:[#allocation60_spill] sm:$0xff] %v11816_v18  ;;  %v10574_v18 = vld [vmem:[#allocation2 + $0x544] sm:$0xf0] }
 0x279   :  { %5932 = vmatpush.bf16.msra.mxu1 %v7670_v46  ;;  %v5620_v46 = vadd.f32 %v5619_v51, %v11800_v47  ;;  %10082 = vmatmul.msk.bf16.vlgmr.msrb.gmra.mxu2 %vm4794_vm0, %v11571_v6  ;;  %v9623_v47 = vld [vmem:[#allocation2 + $0x1440] sm:$0xf0]  ;;  %v10604_v51 = vld [vmem:[#allocation2 + $0x634] sm:$0xf0]  ;;  %v10874_v43 = vld [vmem:[#allocation2 + $0xea4] sm:$0xf0] }
 0x27a   :  { %5922 = vmatpush.bf16.msra.mxu3 %v7190_v11  ;;  %5946 = vmatpush.bf16.msra.mxu2 %v7990_v17  ;;  %v7110_v11 = vor.u32 %v10424_v26, %v7109_v35  ;;  %v7910_v17 = vor.u32 %v10624_v0, %v7909_v14  ;;  %v10724_v35 = vld [vmem:[#allocation2 + $0x9f4] sm:$0xf0]  ;;  %v7509_v26 = vld [vmem:[#allocation2 + $0x390] sm:$0xf]  ;;  %v8630_v0 = vor.u32 %v10804_v10, %v8629_v50  ;;  %v7789_v50 = vld [vmem:[#allocation2 + $0x5c0] sm:$0xf] }
 0x27b   :  { %5895 = vmatpush.bf16.msrb.mxu0 %v9706_v48  ;;  %v11814_v52 = vadd.f32 %v5633_v63, %v5620_v46  ;;  %v7870_v48 = vor.u32 %v10614_v3, %v7869_v16  ;;  %v10524_v14 = vld [vmem:[#allocation2 + $0x3b4] sm:$0xf0]  ;;  %v11818_v63 = vld [vmem:[#allocation5] sm:$0xff]  ;;  %v7830_v15 = vor.u32 %v10604_v51, %v7829_v53  ;;  %v10594_v10 = vld [vmem:[#allocation2 + $0x5e4] sm:$0xf0] }
 0x27d   :  { %5933 = vmatpush.bf16.msra.mxu1 %v7630_v49  ;;  %12063 = vst [vmem:[#allocation59_spill] sm:$0xff] %v11814_v52  ;;  %v11048_v49 = vld [vmem:[#allocation2 + $0x141c] sm:$0xf]  ;;  %v7510_v52 = vor.u32 %v10524_v14, %v7509_v26  ;;  %v7790_v26 = vor.u32 %v10594_v10, %v7789_v50  ;;  %v7429_v14 = vld [vmem:[#allocation2 + $0x2f0] sm:$0xf]  ;;  %v11825_v53 = vpop.f32.mrf.mxu0 }
 0x27e   :  { %5923 = vmatpush.bf16.msra.mxu3 %v7150_v4  ;;  %5947 = vmatpush.bf16.msra.mxu2 %v7950_v22  ;;  %v7550_v4 = vor.u32 %v10534_v58, %v7549_v28  ;;  %v8309_v22 = vld [vmem:[#allocation2 + $0x9d0] sm:$0xf]  ;;  %v9626_v45 = vor.u32 %v11048_v49, %v9623_v47  ;;  %v8589_v28 = vld [vmem:[#allocation2 + $0xc00] sm:$0xf]  ;;  %v10794_v58 = vld [vmem:[#allocation2 + $0xc24] sm:$0xf0]  ;;  %v5647_v16 = vpop.f32.mrf.mxu1 }
 0x27f   :  { %5896 = vmatpush.bf16.msrb.mxu0 %v9666_v1  ;;  %v8310_v46 = vor.u32 %v10724_v35, %v8309_v22  ;;  %v10514_v1 = vld [vmem:[#allocation2 + $0x364] sm:$0xf0]  ;;  %v8590_v3 = vor.u32 %v10794_v58, %v8589_v28  ;;  %v10784_v22 = vld [vmem:[#allocation2 + $0xbd4] sm:$0xf0]  ;;  %12065 = vst [vmem:[#allocation61_spill] sm:$0xff] %v11825_v53 }
 0x280   :  { %v7470_v35 = vor.u32 %v10514_v1, %v7469_v37  ;;  %v10584_v28 = vld [vmem:[#allocation2 + $0x594] sm:$0xf0]  ;;  %v8189_v1 = vld [vmem:[#allocation2 + $0x8e0] sm:$0xf]  ;;  %v10494_v10 = vld [vmem:[#allocation2 + $0x2c4] sm:$0xf0] }
 0x281   :  { %5934 = vmatpush.bf16.msra.mxu1 %v7590_v24  ;;  %v12017_v24 = vperm.slane %v11818_v63, 6  ;;  %v10884_v53 = vld [vmem:[#allocation2 + $0xef4] sm:$0xf0] }
 0x282   :  { %5924 = vmatpush.bf16.msra.mxu3 %v7110_v11  ;;  %5948 = vmatpush.bf16.msra.mxu2 %v7910_v17  ;;  %v8269_v11 = vld [vmem:[#allocation2 + $0x980] sm:$0xf]  ;;  %v10714_v17 = vld [vmem:[#allocation2 + $0x9a4] sm:$0xf0] }
 0x283   :  { %5897 = vmatpush.bf16.msrb.mxu0 %v9626_v45  ;;  %v5648_v49 = vadd.f32 %v5647_v16, %v12017_v24  ;;  %v8270_v47 = vor.u32 %v10714_v17, %v8269_v11  ;;  %v5661_v45 = vpop.f32.mrf.mxu3  ;;  %v8509_v11 = vld [vmem:[#allocation2 + $0xb60] sm:$0xf]  ;;  %v10774_v17 = vld [vmem:[#allocation2 + $0xb84] sm:$0xf0] }
 0x284   :  { %v10694_v16 = vld [vmem:[#allocation2 + $0x904] sm:$0xf0]  ;;  %v7709_v24 = vld [vmem:[#allocation2 + $0x520] sm:$0xf] }
 0x285   :  { %5935 = vmatpush.bf16.msra.mxu1 %v7550_v4  ;;  %v8549_v4 = vld [vmem:[#allocation2 + $0xbb0] sm:$0xf]  ;;  %v5662_v58 = vadd.f32 %v5661_v45, %v5648_v49  ;;  %v8190_v49 = vor.u32 %v10694_v16, %v8189_v1  ;;  %v11827_v45 = vpop.f32.mrf.mxu2  ;;  %v10754_v16 = vld [vmem:[#allocation2 + $0xae4] sm:$0xf0] }
 0x286   :  { %5925 = vmatpush.bf16.msra.mxu3 %v7070_v27  ;;  %5949 = vmatpush.bf16.msra.mxu2 %v7870_v48  ;;  %v8229_v27 = vld [vmem:[#allocation2 + $0x930] sm:$0xf]  ;;  %v10704_v48 = vld [vmem:[#allocation2 + $0x954] sm:$0xf0]  ;;  %v8550_v51 = vor.u32 %v10784_v22, %v8549_v4  ;;  %12066 = vst [vmem:[#allocation62_spill] sm:$0xff] %v11827_v45 }
 0x287   :  { %5960 = vmatpush.bf16.msra.mxu0 %v8310_v46  ;;  %v7749_v46 = vld [vmem:[#allocation2 + $0x570] sm:$0xf]  ;;  %v11114_v45 = vld [vmem:[#allocation2 + $0x1624] sm:$0xf0] }
 0x288   :  { %5898 = vmatmul.bf16.vlgmr.msrb.gmra.mxu0 %v11568_v5  ;;  %v7750_v50 = vor.u32 %v10584_v28, %v7749_v46  ;;  %v8469_v4 = vld [vmem:[#allocation2 + $0xb10] sm:$0xf] }
 0x289   :  { %5936 = vmatpush.bf16.msra.mxu1 %v7510_v52  ;;  %5926 = vmatmul.bf16.vlgmr.msra.gmra.mxu3 %v11507_v31  ;;  %v8230_v52 = vor.u32 %v10704_v48, %v8229_v27  ;;  %v8949_v22 = vld [vmem:[#allocation2 + $0xed0] sm:$0xf]  ;;  %v10964_v48 = vld [vmem:[#allocation2 + $0x1174] sm:$0xf0] }
 0x28a   :  { %5974 = vmatpush.bf16.msrb.mxu3 %v8630_v0  ;;  %5950 = vmatpush.bf16.msra.mxu2 %v7830_v15  ;;  %v10504_v0 = vld [vmem:[#allocation2 + $0x314] sm:$0xf0]  ;;  %v7389_v15 = vld [vmem:[#allocation2 + $0x2a0] sm:$0xf]  ;;  %v9269_v27 = vld [vmem:[#allocation2 + $0x1150] sm:$0xf]  ;;  %v8950_v46 = vor.u32 %v10884_v53, %v8949_v22  ;;  %v5649_v53 = vpop.f32.mrf.mxu1 }
 0x28b   :  { %5961 = vmatpush.bf16.msra.mxu0 %v8270_v47  ;;  %v7430_v37 = vor.u32 %v10504_v0, %v7429_v14  ;;  %v10764_v47 = vld [vmem:[#allocation2 + $0xb34] sm:$0xf0]  ;;  %v8149_v14 = vld [vmem:[#allocation2 + $0x890] sm:$0xf]  ;;  %v9270_v28 = vor.u32 %v10964_v48, %v9269_v27 }
 0x28c   :  { %v10684_v0 = vld [vmem:[#allocation2 + $0x8b4] sm:$0xf0]  ;;  %v8869_v22 = vld [vmem:[#allocation2 + $0xe30] sm:$0xf] }
 0x28d   :  { %5937 = vmatpush.bf16.msra.mxu1 %v7470_v35  ;;  %v7390_v35 = vor.u32 %v10494_v10, %v7389_v15  ;;  %v8150_v1 = vor.u32 %v10684_v0, %v8149_v14  ;;  %v8109_v10 = vld [vmem:[#allocation2 + $0x840] sm:$0xf]  ;;  %v9189_v48 = vld [vmem:[#allocation2 + $0x10b0] sm:$0xf] }
 0x28e   :  { %5975 = vmatpush.bf16.msrb.mxu3 %v8590_v3  ;;  %5951 = vmatpush.bf16.msra.mxu2 %v7790_v26  ;;  %v8510_v3 = vor.u32 %v10774_v17, %v8509_v11  ;;  %v7710_v26 = vor.u32 %v10574_v18, %v7709_v24  ;;  %v8429_v11 = vld [vmem:[#allocation2 + $0xac0] sm:$0xf]  ;;  %v8389_v24 = vld [vmem:[#allocation2 + $0xa70] sm:$0xf] }
 0x28f   :  { %5962 = vmatpush.bf16.msra.mxu0 %v8230_v52  ;;  %v8909_v17 = vld [vmem:[#allocation2 + $0xe80] sm:$0xf]  ;;  %v5675_v52 = vpop.f32.mrf.mxu0  ;;  %v8069_v14 = vld [vmem:[#allocation2 + $0x7f0] sm:$0xf] }
 0x290   :  { %v5676_v15 = vadd.f32 %v5675_v52, %v5662_v58  ;;  %v8910_v18 = vor.u32 %v10874_v43, %v8909_v17  ;;  %v8110_v58 = vor.u32 %v10674_v19, %v8109_v10  ;;  %v10664_v43 = vld [vmem:[#allocation2 + $0x814] sm:$0xf0]  ;;  %v10854_v19 = vld [vmem:[#allocation2 + $0xe04] sm:$0xf0]  ;;  %v9909_v10 = vld [vmem:[#allocation2 + $0x1650] sm:$0xf] }
 0x291   :  { %5938 = vmatpush.bf16.msra.mxu1 %v7430_v37  ;;  %v10954_v37 = vld [vmem:[#allocation2 + $0x1124] sm:$0xf0] }
 0x292   :  { %5976 = vmatpush.bf16.msrb.mxu3 %v8550_v51  ;;  %5952 = vmatpush.bf16.msra.mxu2 %v7750_v50  ;;  %v8470_v51 = vor.u32 %v10764_v47, %v8469_v4  ;;  %v8430_v50 = vor.u32 %v10754_v16, %v8429_v11  ;;  %v10744_v4 = vld [vmem:[#allocation2 + $0xa94] sm:$0xf0]  ;;  %v12067_v47 = vperm.slane %v11818_v63, 6  ;;  %v8829_v11 = vld [vmem:[#allocation2 + $0xde0] sm:$0xf] }
 0x293   :  { %5963 = vmatpush.bf16.msra.mxu0 %v8190_v49  ;;  %v10864_v49 = vld [vmem:[#allocation2 + $0xe54] sm:$0xf0]  ;;  %v8390_v0 = vor.u32 %v10744_v4, %v8389_v24  ;;  %v9149_v16 = vld [vmem:[#allocation2 + $0x1060] sm:$0xf]  ;;  %v10654_v24 = vld [vmem:[#allocation2 + $0x7c4] sm:$0xf0]  ;;  %v8830_v4 = vor.u32 %v10854_v19, %v8829_v11 }
 0x294   :  { %v5650_v27 = vadd.f32 %v5649_v53, %v12067_v47  ;;  %v11124_v53 = vld [vmem:[#allocation2 + $0x1674] sm:$0xf0]  ;;  %v9549_v19 = vld [vmem:[#allocation2 + $0x1380] sm:$0xf] }
 0x295   :  { %5939 = vmatpush.bf16.msra.mxu1 %v7390_v35  ;;  %v10944_v35 = vld [vmem:[#allocation2 + $0x10d4] sm:$0xf0] }
 0x296   :  { %5977 = vmatpush.bf16.msrb.mxu3 %v8510_v3  ;;  %5953 = vmatpush.bf16.msra.mxu2 %v7710_v26  ;;  %v9230_v3 = vor.u32 %v10954_v37, %v9229_v33  ;;  %v8870_v26 = vor.u32 %v10864_v49, %v8869_v22  ;;  %v8349_v33 = vld [vmem:[#allocation2 + $0xa20] sm:$0xf]  ;;  %v9190_v63 = vor.u32 %v10944_v35, %v9189_v48  ;;  %v10934_v37 = vld [vmem:[#allocation2 + $0x1084] sm:$0xf0]  ;;  %v9589_v22 = vld [vmem:[#allocation2 + $0x13d0] sm:$0xf] }
 0x297   :  { %5964 = vmatpush.bf16.msra.mxu0 %v8150_v1  ;;  %v8070_v1 = vor.u32 %v10664_v43, %v8069_v14  ;;  %v11044_v49 = vld [vmem:[#allocation2 + $0x13f4] sm:$0xf0]  ;;  %v9150_v47 = vor.u32 %v10934_v37, %v9149_v16  ;;  %v8789_v48 = vld [vmem:[#allocation2 + $0xd90] sm:$0xf]  ;;  %v9069_v37 = vld [vmem:[#allocation2 + $0xfc0] sm:$0xf] }
 0x298   :  { %5940 = vmatmul.bf16.vlgmr.msra.gmra.mxu1 %v11513_v41  ;;  %v9109_v14 = vld [vmem:[#allocation2 + $0x1010] sm:$0xf]  ;;  %v10924_v43 = vld [vmem:[#allocation2 + $0x1034] sm:$0xf0] }
 0x299   :  { %5988 = vmatpush.bf16.msrb.mxu1 %v8950_v46  ;;  %5954 = vmatmul.bf16.vlgmr.msra.gmra.mxu2 %v11510_v32  ;;  %v5689_v46 = vpop.f32.mrf.mxu2 }
 0x29a   :  { %5978 = vmatpush.bf16.msrb.mxu3 %v8470_v51  ;;  %6002 = vmatpush.bf16.msrb.mxu2 %v9270_v28  ;;  %v5663_v51 = vpop.f32.mrf.mxu3  ;;  %v10734_v28 = vld [vmem:[#allocation2 + $0xa44] sm:$0xf0]  ;;  %v5690_v17 = vadd.f32 %v5689_v46, %v5676_v15  ;;  %v10844_v15 = vld [vmem:[#allocation2 + $0xdb4] sm:$0xf0]  ;;  %v9590_v46 = vor.u32 %v11044_v49, %v9589_v22  ;;  %v9509_v22 = vld [vmem:[#allocation2 + $0x1330] sm:$0xf] }
 0x29b   :  { %v5664_v52 = vadd.f32 %v5663_v51, %v5650_v27  ;;  %5965 = vmatpush.bf16.msra.mxu0 %v8110_v58  ;;  %v9910_v58 = vor.u32 %v11124_v53, %v9909_v10  ;;  %v9869_v51 = vld [vmem:[#allocation2 + $0x1600] sm:$0xf]  ;;  %v8790_v11 = vor.u32 %v10844_v15, %v8789_v48  ;;  %v10914_v10 = vld [vmem:[#allocation2 + $0xfe4] sm:$0xf0]  ;;  %v9550_v53 = vor.u32 %v11034_v13, %v9549_v19  ;;  %v9029_v48 = vld [vmem:[#allocation2 + $0xf70] sm:$0xf] }
 0x29c   :  { %v9870_v16 = vor.u32 %v11114_v45, %v9869_v51  ;;  %v9070_v49 = vor.u32 %v10914_v10, %v9069_v37  ;;  %v10904_v15 = vld [vmem:[#allocation2 + $0xf94] sm:$0xf0]  ;;  %v9469_v51 = vld [vmem:[#allocation2 + $0x12e0] sm:$0xf] }
 0x29d   :  { %5989 = vmatpush.bf16.msrb.mxu1 %v8910_v18  ;;  %v8029_v18 = vld [vmem:[#allocation2 + $0x7a0] sm:$0xf]  ;;  %v9030_v19 = vor.u32 %v10904_v15, %v9029_v48  ;;  %v11164_v37 = vld [vmem:[#allocation2 + $0x17b4] sm:$0xf0] }
 0x29e   :  { %5979 = vmatpush.bf16.msrb.mxu3 %v8430_v50  ;;  %6003 = vmatpush.bf16.msrb.mxu2 %v9230_v3  ;;  %v5677_v50 = vpop.f32.mrf.mxu0  ;;  %v8350_v3 = vor.u32 %v10734_v28, %v8349_v33  ;;  %v8030_v35 = vor.u32 %v10654_v24, %v8029_v18  ;;  %v9110_v33 = vor.u32 %v10924_v43, %v9109_v14  ;;  %v8749_v28 = vld [vmem:[#allocation2 + $0xd40] sm:$0xf]  ;;  %v9829_v18 = vld [vmem:[#allocation2 + $0x15b0] sm:$0xf]  ;;  %v11104_v24 = vld [vmem:[#allocation2 + $0x15d4] sm:$0xf0] }
 0x29f   :  { %v5678_v27 = vadd.f32 %v5677_v50, %v5664_v52  ;;  %5966 = vmatpush.bf16.msra.mxu0 %v8070_v1  ;;  %v10834_v52 = vld [vmem:[#allocation2 + $0xd64] sm:$0xf0]  ;;  %v8709_v50 = vld [vmem:[#allocation2 + $0xcf0] sm:$0xf]  ;;  %v9830_v45 = vor.u32 %v11104_v24, %v9829_v18  ;;  %v10479_v18 = vld [vmem:[#allocation2 + $0x254] sm:$0xf] }
 0x2a0   :  { %v7351_v24 = vld [vmem:[#allocation2 + $0x278] sm:$0xf0]  ;;  %v9709_v48 = vld [vmem:[#allocation2 + $0x14c0] sm:$0xf] }
 0x2a1   :  { %5990 = vmatpush.bf16.msrb.mxu1 %v8870_v26  ;;  %v5703_v26 = vpop.f32.mrf.mxu1  ;;  %v10029_v15 = vld [vmem:[#allocation2 + $0x1740] sm:$0xf] }
 0x2a2   :  { %5980 = vmatpush.bf16.msrb.mxu3 %v8390_v0  ;;  %6004 = vmatpush.bf16.msrb.mxu2 %v9190_v63  ;;  %v5704_v0 = vadd.f32 %v5703_v26, %v5690_v17  ;;  %v5691_v63 = vpop.f32.mrf.mxu2  ;;  %v11024_v17 = vld [vmem:[#allocation2 + $0x1354] sm:$0xf0]  ;;  %v11014_v26 = vld [vmem:[#allocation2 + $0x1304] sm:$0xf0] }
 0x2a3   :  { %v5692_v1 = vadd.f32 %v5691_v63, %v5678_v27  ;;  %5967 = vmatpush.bf16.msra.mxu0 %v8030_v35  ;;  %v9510_v27 = vor.u32 %v11024_v17, %v9509_v22  ;;  %v11094_v35 = vld [vmem:[#allocation2 + $0x1584] sm:$0xf0]  ;;  %v9470_v10 = vor.u32 %v11014_v26, %v9469_v51  ;;  %v9429_v22 = vld [vmem:[#allocation2 + $0x1290] sm:$0xf]  ;;  %v11004_v17 = vld [vmem:[#allocation2 + $0x12b4] sm:$0xf0] }
 0x2a4   :  { %v10814_v63 = vld [vmem:[#allocation2 + $0xcc4] sm:$0xf0]  ;;  %v9389_v26 = vld [vmem:[#allocation2 + $0x1240] sm:$0xf] }
 0x2a5   :  { %5991 = vmatpush.bf16.msrb.mxu1 %v8830_v4  ;;  %v8750_v4 = vor.u32 %v10834_v52, %v8749_v28  ;;  %v10894_v28 = vld [vmem:[#allocation2 + $0xf44] sm:$0xf0] }
 0x2a6   :  { %5981 = vmatpush.bf16.msrb.mxu3 %v8350_v3  ;;  %6005 = vmatpush.bf16.msrb.mxu2 %v9150_v47  ;;  %v10824_v3 = vld [vmem:[#allocation2 + $0xd14] sm:$0xf0]  ;;  %v5717_v47 = vpop.f32.mrf.mxu3  ;;  %v11074_v51 = vld [vmem:[#allocation2 + $0x14e4] sm:$0xf0] }
 0x2a7   :  { %6016 = vmatpush.bf16.msrb.mxu0 %v9590_v46  ;;  %v5718_v13 = vadd.f32 %v5717_v47, %v5704_v0  ;;  %v8710_v43 = vor.u32 %v10824_v3, %v8709_v50  ;;  %v8669_v46 = vld [vmem:[#allocation2 + $0xca0] sm:$0xf]  ;;  %v10069_v0 = vld [vmem:[#allocation2 + $0x1790] sm:$0xf]  ;;  %v5731_v3 = vpop.f32.mrf.mxu0 }
 0x2a8   :  { %5968 = vmatmul.bf16.vlgmr.msra.gmra.mxu0 %v11516_v42 }
 0x2a9   :  { %5992 = vmatpush.bf16.msrb.mxu1 %v8790_v11  ;;  %5982 = vmatmul.bf16.vlgmr.msrb.gmra.mxu3 %v11539_v29  ;;  %v5705_v14 = vpop.f32.mrf.mxu1 }
 0x2aa   :  { %6030 = vmatpush.bf16.msra.mxu3 %v9910_v58  ;;  %6006 = vmatpush.bf16.msrb.mxu2 %v9110_v33  ;;  %v9789_v58 = vld [vmem:[#allocation2 + $0x1560] sm:$0xf]  ;;  %v5706_v11 = vadd.f32 %v5705_v14, %v5692_v1  ;;  %v9430_v14 = vor.u32 %v11004_v17, %v9429_v22 }
 0x2ab   :  { %6017 = vmatpush.bf16.msrb.mxu0 %v9550_v53  ;;  %v8989_v33 = vld [vmem:[#allocation2 + $0xf20] sm:$0xf]  ;;  %v9790_v52 = vor.u32 %v11094_v35, %v9789_v58  ;;  %v11084_v53 = vld [vmem:[#allocation2 + $0x1534] sm:$0xf0]  ;;  %v11154_v58 = vld [vmem:[#allocation2 + $0x1764] sm:$0xf0]  ;;  %v5732_v35 = vadd.f32 %v5731_v3, %v5718_v13 }
 0x2ac   :  { %v8990_v1 = vor.u32 %v10894_v28, %v8989_v33  ;;  %v9710_v33 = vor.u32 %v11074_v51, %v9709_v48  ;;  %v5745_v22 = vpop.f32.mrf.mxu2  ;;  %v9949_v3 = vld [vmem:[#allocation2 + $0x16a0] sm:$0xf]  ;;  %v10639_v51 = vld [vmem:[#allocation2 + $0x754] sm:$0xf] }
 0x2ad   :  { %5993 = vmatpush.bf16.msrb.mxu1 %v8750_v4  ;;  %v8670_v4 = vor.u32 %v10814_v63, %v8669_v46  ;;  %v7311_v46 = vld [vmem:[#allocation2 + $0x228] sm:$0xf0]  ;;  %v10030_v63 = vor.u32 %v11154_v58, %v10029_v15  ;;  %v10449_v58 = vld [vmem:[#allocation2 + $0x164] sm:$0xf] }
 0x2ae   :  { %6031 = vmatpush.bf16.msra.mxu3 %v9870_v16  ;;  %6007 = vmatpush.bf16.msrb.mxu2 %v9070_v49  ;;  %v9749_v16 = vld [vmem:[#allocation2 + $0x1510] sm:$0xf]  ;;  %v10070_v49 = vor.u32 %v11164_v37, %v10069_v0  ;;  %v5719_v50 = vpop.f32.mrf.mxu3  ;;  %v11144_v0 = vld [vmem:[#allocation2 + $0x1714] sm:$0xf0]  ;;  %v10459_v37 = vld [vmem:[#allocation2 + $0x1b4] sm:$0xf] }
 0x2af   :  { %6018 = vmatpush.bf16.msrb.mxu0 %v9510_v27  ;;  %v9750_v47 = vor.u32 %v11084_v53, %v9749_v16  ;;  %v5720_v27 = vadd.f32 %v5719_v50, %v5706_v11  ;;  %v9989_v16 = vld [vmem:[#allocation2 + $0x16f0] sm:$0xf]  ;;  %v11064_v11 = vld [vmem:[#allocation2 + $0x1494] sm:$0xf0]  ;;  %v5733_v17 = vpop.f32.mrf.mxu0  ;;  %v11054_v50 = vld [vmem:[#allocation2 + $0x1444] sm:$0xf0] }
 0x2b0   :  { %v9349_v53 = vld [vmem:[#allocation2 + $0x11f0] sm:$0xf] }
 0x2b1   :  { %5994 = vmatpush.bf16.msrb.mxu1 %v8710_v43  ;;  %v10469_v43 = vld [vmem:[#allocation2 + $0x204] sm:$0xf]  ;;  %v5734_v48 = vadd.f32 %v5733_v17, %v5720_v27  ;;  %v7671_v27 = vld [vmem:[#allocation2 + $0x4f8] sm:$0xf0]  ;;  %v8271_v17 = vld [vmem:[#allocation2 + $0x9a8] sm:$0xf0] }
 0x2b2   :  { %6032 = vmatpush.bf16.msra.mxu3 %v9830_v45  ;;  %6008 = vmatpush.bf16.msrb.mxu2 %v9030_v19  ;;  %v7354_v45 = vor.u32 %v10479_v18, %v7351_v24  ;;  %v10994_v19 = vld [vmem:[#allocation2 + $0x1264] sm:$0xf0]  ;;  %v7314_v28 = vor.u32 %v10469_v43, %v7311_v46  ;;  %v10984_v18 = vld [vmem:[#allocation2 + $0x1214] sm:$0xf0]  ;;  %v9990_v24 = vor.u32 %v11144_v0, %v9989_v16  ;;  %v7991_v43 = vld [vmem:[#allocation2 + $0x778] sm:$0xf0] }
 0x2b3   :  { %6019 = vmatpush.bf16.msrb.mxu0 %v9470_v10  ;;  %v9390_v13 = vor.u32 %v10994_v19, %v9389_v26  ;;  %v7271_v10 = vld [vmem:[#allocation2 + $0x1d8] sm:$0xf0]  ;;  %v9350_v15 = vor.u32 %v10984_v18, %v9349_v53  ;;  %v10719_v46 = vld [vmem:[#allocation2 + $0x9d4] sm:$0xf]  ;;  %v7951_v53 = vld [vmem:[#allocation2 + $0x728] sm:$0xf0] }
 0x2b4   :  { %v8311_v26 = vld [vmem:[#allocation2 + $0x9f8] sm:$0xf0]  ;;  %v10439_v0 = vld [vmem:[#allocation2 + $0x114] sm:$0xf] }
 0x2b5   :  { %5995 = vmatpush.bf16.msrb.mxu1 %v8670_v4  ;;  %v9629_v4 = vld [vmem:[#allocation2 + $0x1420] sm:$0xf]  ;;  %v5759_v18 = vpop.f32.mrf.mxu1 }
 0x2b6   :  { %6033 = vmatpush.bf16.msra.mxu3 %v9790_v52  ;;  %6009 = vmatpush.bf16.msrb.mxu2 %v8990_v1  ;;  %v9669_v52 = vld [vmem:[#allocation2 + $0x1470] sm:$0xf]  ;;  %v5773_v16 = vpop.f32.mrf.mxu3 }
 0x2b7   :  { %6020 = vmatpush.bf16.msrb.mxu0 %v9430_v14  ;;  %v9670_v1 = vor.u32 %v11064_v11, %v9669_v52  ;;  %v7231_v14 = vld [vmem:[#allocation2 + $0x188] sm:$0xf0]  ;;  %v8314_v11 = vor.u32 %v10719_v46, %v8311_v26  ;;  %v10619_v26 = vld [vmem:[#allocation2 + $0x6b4] sm:$0xf] }
 0x2b8   :  { %5996 = vmatmul.bf16.vlgmr.msrb.gmra.mxu1 %v11545_v39  ;;  %v7234_v52 = vor.u32 %v10449_v58, %v7231_v14  ;;  %v7631_v58 = vld [vmem:[#allocation2 + $0x4a8] sm:$0xf0] }
 0x2b9   :  { %6048 = vmatpush.bf16.msra.mxu1 %v10070_v49  ;;  %6010 = vmatmul.bf16.vlgmr.msrb.gmra.mxu2 %v11542_v30  ;;  %v7274_v49 = vor.u32 %v10459_v37, %v7271_v10  ;;  %v7191_v37 = vld [vmem:[#allocation2 + $0x138] sm:$0xf0]  ;;  %v10629_v10 = vld [vmem:[#allocation2 + $0x704] sm:$0xf]  ;;  %v7151_v46 = vld [vmem:[#allocation2 + $0xe8] sm:$0xf0] }
 0x2ba   :  { %6034 = vmatpush.bf16.msra.mxu3 %v9750_v47  ;;  %6058 = vmatpush.bf16.msra.mxu2 %v7354_v45  ;;  %v11134_v47 = vld [vmem:[#allocation2 + $0x16c4] sm:$0xf0]  ;;  %v5746_v45 = vadd.f32 %v5745_v22, %v5732_v35  ;;  %v10559_v35 = vld [vmem:[#allocation2 + $0x4d4] sm:$0xf] }
 0x2bb   :  { %6021 = vmatpush.bf16.msrb.mxu0 %v9390_v13  ;;  %v9950_v19 = vor.u32 %v11134_v47, %v9949_v3  ;;  %v7994_v13 = vor.u32 %v10639_v51, %v7991_v43  ;;  %v10549_v47 = vld [vmem:[#allocation2 + $0x484] sm:$0xf] }
 0x2bc   :  { %v5760_v3 = vadd.f32 %v5759_v18, %v5746_v45  ;;  %v10429_v43 = vld [vmem:[#allocation2 + $0xc4] sm:$0xf]  ;;  %v10699_v45 = vld [vmem:[#allocation2 + $0x934] sm:$0xf]  ;;  %v8191_v18 = vld [vmem:[#allocation2 + $0x908] sm:$0xf0] }
 0x2bd   :  { %6049 = vmatpush.bf16.msra.mxu1 %v10030_v63  ;;  %v9309_v63 = vld [vmem:[#allocation2 + $0x11a0] sm:$0xf] }
 0x2be   :  { %6035 = vmatpush.bf16.msra.mxu3 %v9710_v33  ;;  %6059 = vmatpush.bf16.msra.mxu2 %v7314_v28  ;;  %v10974_v33 = vld [vmem:[#allocation2 + $0x11c4] sm:$0xf0]  ;;  %v9630_v28 = vor.u32 %v11054_v50, %v9629_v4  ;;  %v7194_v4 = vor.u32 %v10439_v0, %v7191_v37  ;;  %v7954_v50 = vor.u32 %v10629_v10, %v7951_v53  ;;  %v7591_v0 = vld [vmem:[#allocation2 + $0x458] sm:$0xf0]  ;;  %v5775_v37 = vpop.f32.mrf.mxu3  ;;  %v7871_v10 = vld [vmem:[#allocation2 + $0x688] sm:$0xf0] }
 0x2bf   :  { %6022 = vmatpush.bf16.msrb.mxu0 %v9350_v15  ;;  %v9310_v22 = vor.u32 %v10974_v33, %v9309_v63  ;;  %v5774_v14 = vadd.f32 %v5773_v16, %v5760_v3  ;;  %v7911_v63 = vld [vmem:[#allocation2 + $0x6d8] sm:$0xf0]  ;;  %v7634_v33 = vor.u32 %v10549_v47, %v7631_v58  ;;  %v10689_v53 = vld [vmem:[#allocation2 + $0x8e4] sm:$0xf]  ;;  %v7071_v58 = vld [vmem:[#allocation2 + $0x48] sm:$0xf0] }
 0x2c0   :  { %v10529_v3 = vld [vmem:[#allocation2 + $0x3e4] sm:$0xf] }
 0x2c1   :  { %6050 = vmatpush.bf16.msra.mxu1 %v9990_v24  ;;  %v10709_v24 = vld [vmem:[#allocation2 + $0x984] sm:$0xf] }
 0x2c2   :  { %6036 = vmatpush.bf16.msra.mxu3 %v9670_v1  ;;  %6060 = vmatpush.bf16.msra.mxu2 %v7274_v49  ;;  %v7674_v1 = vor.u32 %v10559_v35, %v7671_v27  ;;  %v5747_v49 = vpop.f32.mrf.mxu2  ;;  %v8274_v51 = vor.u32 %v10709_v24, %v8271_v17  ;;  %v10419_v35 = vld [vmem:[#allocation2 + $0x74] sm:$0xf]  ;;  %v7111_v27 = vld [vmem:[#allocation2 + $0x98] sm:$0xf0]  ;;  %v10409_v47 = vld [vmem:[#allocation2 + $0x24] sm:$0xf] }
 0x2c3   :  { %v5748_v15 = vadd.f32 %v5747_v49, %v5734_v48  ;;  %6023 = vmatpush.bf16.msrb.mxu0 %v9310_v22  ;;  %v7914_v48 = vor.u32 %v10619_v26, %v7911_v63  ;;  %v7114_v17 = vor.u32 %v10419_v35, %v7111_v27  ;;  %v8151_v26 = vld [vmem:[#allocation2 + $0x8b8] sm:$0xf0]  ;;  %v6204_v63 = vmax.f32 %v5774_v14, 0.0  ;;  %v10589_v27 = vld [vmem:[#allocation2 + $0x5c4] sm:$0xf] }
 0x2c4   :  { %v8111_v14 = vld [vmem:[#allocation2 + $0x868] sm:$0xf0] }
 0x2c5   :  { %6051 = vmatpush.bf16.msra.mxu1 %v9950_v19  ;;  %v8231_v19 = vld [vmem:[#allocation2 + $0x958] sm:$0xf0] }
 0x2c6   :  { %6037 = vmatpush.bf16.msra.mxu3 %v9630_v28  ;;  %6061 = vmatpush.bf16.msra.mxu2 %v7234_v52  ;;  %v7154_v28 = vor.u32 %v10429_v43, %v7151_v46  ;;  %v10539_v52 = vld [vmem:[#allocation2 + $0x434] sm:$0xf]  ;;  %v8234_v16 = vor.u32 %v10699_v45, %v8231_v19  ;;  %v7831_v43 = vld [vmem:[#allocation2 + $0x638] sm:$0xf0] }
 0x2c7   :  { %6072 = vmatpush.bf16.msra.mxu0 %v7674_v1  ;;  %v7594_v24 = vor.u32 %v10539_v52, %v7591_v0  ;;  %v7551_v1 = vld [vmem:[#allocation2 + $0x408] sm:$0xf0]  ;;  %v10679_v46 = vld [vmem:[#allocation2 + $0x894] sm:$0xf]  ;;  %v7511_v0 = vld [vmem:[#allocation2 + $0x3b8] sm:$0xf0] }
 0x2c8   :  { %6024 = vmatmul.bf16.vlgmr.msrb.gmra.mxu0 %v11548_v40  ;;  %10083 = vmatmul.msk.bf16.vlgmr.msra.gmra.mxu1 %vm4794_vm0, %v11571_v6  ;;  %v10799_v19 = vld [vmem:[#allocation2 + $0xc54] sm:$0xf]  ;;  %v8154_v35 = vor.u32 %v10679_v46, %v8151_v26  ;;  %v7431_v26 = vld [vmem:[#allocation2 + $0x318] sm:$0xf0] }
 0x2c9   :  { %6086 = vmatpush.bf16.msrb.mxu1 %v7994_v13  ;;  %6038 = vmatmul.bf16.vlgmr.msra.gmra.mxu3 %v11568_v5  ;;  %v10609_v13 = vld [vmem:[#allocation2 + $0x664] sm:$0xf]  ;;  %v10519_v52 = vld [vmem:[#allocation2 + $0x394] sm:$0xf] }
 0x2ca   :  { %6100 = vmatpush.bf16.msrb.mxu3 %v8314_v11  ;;  %6062 = vmatpush.bf16.msra.mxu2 %v7194_v4  ;;  %v5761_v11 = vpop.f32.mrf.mxu1  ;;  %v7874_v4 = vor.u32 %v10609_v13, %v7871_v10  ;;  %v7514_v10 = vor.u32 %v10519_v52, %v7511_v0  ;;  %v10499_v46 = vld [vmem:[#allocation2 + $0x2f4] sm:$0xf]  ;;  %v8031_v52 = vld [vmem:[#allocation2 + $0x7c8] sm:$0xf0]  ;;  %v10769_v0 = vld [vmem:[#allocation2 + $0xb64] sm:$0xf] }
 0x2cb   :  { %v5762_v22 = vadd.f32 %v5761_v11, %v5748_v15  ;;  %6073 = vmatpush.bf16.msra.mxu0 %v7634_v33  ;;  %v7554_v15 = vor.u32 %v10529_v3, %v7551_v1  ;;  %v8631_v33 = vld [vmem:[#allocation2 + $0xc78] sm:$0xf0]  ;;  %v7791_v11 = vld [vmem:[#allocation2 + $0x5e8] sm:$0xf0]  ;;  %v10579_v1 = vld [vmem:[#allocation2 + $0x574] sm:$0xf] }
 0x2cc   :  { %v8634_v13 = vor.u32 %v10799_v19, %v8631_v33  ;;  %v7711_v19 = vld [vmem:[#allocation2 + $0x548] sm:$0xf0]  ;;  %v10649_v33 = vld [vmem:[#allocation2 + $0x7a4] sm:$0xf] }
 0x2cd   :  { %6087 = vmatpush.bf16.msrb.mxu1 %v7954_v50  ;;  %v5776_v49 = vadd.f32 %v5775_v37, %v5762_v22  ;;  %v8194_v50 = vor.u32 %v10689_v53, %v8191_v18  ;;  %v10669_v37 = vld [vmem:[#allocation2 + $0x844] sm:$0xf]  ;;  %v8591_v18 = vld [vmem:[#allocation2 + $0xc28] sm:$0xf0] }
 0x2ce   :  { %6101 = vmatpush.bf16.msrb.mxu3 %v8274_v51  ;;  %6063 = vmatpush.bf16.msra.mxu2 %v7154_v28  ;;  %v10599_v51 = vld [vmem:[#allocation2 + $0x614] sm:$0xf]  ;;  %v7074_v28 = vor.u32 %v10409_v47, %v7071_v58  ;;  %v10789_v53 = vld [vmem:[#allocation2 + $0xc04] sm:$0xf]  ;;  %v8114_v3 = vor.u32 %v10669_v37, %v8111_v14  ;;  %v8071_v47 = vld [vmem:[#allocation2 + $0x818] sm:$0xf0] }
 0x2cf   :  { %v6214_v45 = vmax.f32 %v5776_v49, 0.0  ;;  %6074 = vmatpush.bf16.msra.mxu0 %v7594_v24  ;;  %v10509_v22 = vld [vmem:[#allocation2 + $0x344] sm:$0xf]  ;;  %v7471_v24 = vld [vmem:[#allocation2 + $0x368] sm:$0xf0]  ;;  %v8594_v49 = vor.u32 %v10789_v53, %v8591_v18  ;;  %v8034_v53 = vor.u32 %v10649_v33, %v8031_v52 }
 0x2d0   :  { %v7474_v58 = vor.u32 %v10509_v22, %v7471_v24  ;;  %v10489_v37 = vld [vmem:[#allocation2 + $0x2a4] sm:$0xf]  ;;  %v7391_v14 = vld [vmem:[#allocation2 + $0x2c8] sm:$0xf0]  ;;  %v10879_v18 = vld [vmem:[#allocation2 + $0xed4] sm:$0xf] }
 0x2d1   :  { %6088 = vmatpush.bf16.msrb.mxu1 %v7914_v48  ;;  %v11841_v48 = vpack.c.bf16 %v6214_v45, %v6204_v63  ;;  %v8951_v22 = vld [vmem:[#allocation2 + $0xef8] sm:$0xf0]  ;;  %v8431_v33 = vld [vmem:[#allocation2 + $0xae8] sm:$0xf0] }
 0x2d2   :  { %6102 = vmatpush.bf16.msrb.mxu3 %v8234_v16  ;;  %6064 = vmatpush.bf16.msra.mxu2 %v7114_v17  ;;  %v7834_v16 = vor.u32 %v10599_v51, %v7831_v43  ;;  %v7794_v17 = vor.u32 %v10589_v27, %v7791_v11  ;;  %v10779_v51 = vld [vmem:[#allocation2 + $0xbb4] sm:$0xf]  ;;  %v8551_v43 = vld [vmem:[#allocation2 + $0xbd8] sm:$0xf0] }
 0x2d3   :  { %6075 = vmatpush.bf16.msra.mxu0 %v7554_v15  ;;  %v10569_v15 = vld [vmem:[#allocation2 + $0x524] sm:$0xf]  ;;  %v10959_v27 = vld [vmem:[#allocation2 + $0x1154] sm:$0xf]  ;;  %v9191_v52 = vld [vmem:[#allocation2 + $0x10d8] sm:$0xf0] }
 0x2d4   :  { %v11039_v11 = vld [vmem:[#allocation2 + $0x13d4] sm:$0xf] }
 0x2d5   :  { %6089 = vmatpush.bf16.msrb.mxu1 %v7874_v4  ;;  %v7751_v4 = vld [vmem:[#allocation2 + $0x598] sm:$0xf0] }
 0x2d6   :  { %6103 = vmatpush.bf16.msrb.mxu3 %v8194_v50  ;;  %6065 = vmatpush.bf16.msra.mxu2 %v7074_v28  ;;  %v10659_v50 = vld [vmem:[#allocation2 + $0x7f4] sm:$0xf]  ;;  %v7754_v63 = vor.u32 %v10579_v1, %v7751_v4  ;;  %v8554_v28 = vor.u32 %v10779_v51, %v8551_v43  ;;  %v8471_v4 = vld [vmem:[#allocation2 + $0xb38] sm:$0xf0]  ;;  %v11029_v51 = vld [vmem:[#allocation2 + $0x1384] sm:$0xf] }
 0x2d7   :  { %6076 = vmatpush.bf16.msra.mxu0 %v7514_v10  ;;  %v8074_v45 = vor.u32 %v10659_v50, %v8071_v47  ;;  %v7714_v10 = vor.u32 %v10569_v15, %v7711_v19  ;;  %v10949_v50 = vld [vmem:[#allocation2 + $0x1104] sm:$0xf]  ;;  %v9231_v47 = vld [vmem:[#allocation2 + $0x1128] sm:$0xf0] }
 0x2d8   :  { %v9551_v43 = vld [vmem:[#allocation2 + $0x13a8] sm:$0xf0]  ;;  %v10749_v15 = vld [vmem:[#allocation2 + $0xac4] sm:$0xf] }
 0x2d9   :  { %6090 = vmatpush.bf16.msrb.mxu1 %v7834_v16  ;;  %6066 = vmatmul.bf16.vlgmr.msra.gmra.mxu2 %v11507_v31  ;;  %v8511_v16 = vld [vmem:[#allocation2 + $0xb88] sm:$0xf0]  ;;  %v9591_v31 = vld [vmem:[#allocation2 + $0x13f8] sm:$0xf0]  ;;  %v9554_v19 = vor.u32 %v11029_v51, %v9551_v43  ;;  %v10999_v51 = vld [vmem:[#allocation2 + $0x1294] sm:$0xf] }
 0x2da   :  { %6104 = vmatpush.bf16.msrb.mxu3 %v8154_v35  ;;  %6114 = vmatpush.bf16.msrb.mxu2 %v8634_v13  ;;  %v7434_v35 = vor.u32 %v10499_v46, %v7431_v26  ;;  %v9271_v13 = vld [vmem:[#allocation2 + $0x1178] sm:$0xf0]  ;;  %v8514_v24 = vor.u32 %v10769_v0, %v8511_v16  ;;  %v9594_v1 = vor.u32 %v11039_v11, %v9591_v31  ;;  %v10869_v46 = vld [vmem:[#allocation2 + $0xe84] sm:$0xf]  ;;  %v8911_v26 = vld [vmem:[#allocation2 + $0xea8] sm:$0xf0] }
 0x2db   :  { %6077 = vmatpush.bf16.msra.mxu0 %v7474_v58  ;;  %v8954_v58 = vor.u32 %v10879_v18, %v8951_v22  ;;  %v8914_v0 = vor.u32 %v10869_v46, %v8911_v26  ;;  %v11019_v16 = vld [vmem:[#allocation2 + $0x1334] sm:$0xf]  ;;  %v8434_v11 = vor.u32 %v10749_v15, %v8431_v33  ;;  %v9151_v18 = vld [vmem:[#allocation2 + $0x1088] sm:$0xf0]  ;;  %v9911_v26 = vld [vmem:[#allocation2 + $0x1678] sm:$0xf0] }
 0x2dc   :  { %v11119_v46 = vld [vmem:[#allocation2 + $0x1654] sm:$0xf] }
 0x2dd   :  { %6091 = vmatpush.bf16.msrb.mxu1 %v7794_v17  ;;  %v9274_v17 = vor.u32 %v10959_v27, %v9271_v13  ;;  %v10859_v27 = vld [vmem:[#allocation2 + $0xe34] sm:$0xf]  ;;  %v8871_v13 = vld [vmem:[#allocation2 + $0xe58] sm:$0xf0] }
 0x2de   :  { %6105 = vmatpush.bf16.msrb.mxu3 %v8114_v3  ;;  %6115 = vmatpush.bf16.msrb.mxu2 %v8594_v49  ;;  %v10759_v3 = vld [vmem:[#allocation2 + $0xb14] sm:$0xf]  ;;  %v7394_v49 = vor.u32 %v10489_v37, %v7391_v14  ;;  %v8874_v22 = vor.u32 %v10859_v27, %v8871_v13  ;;  %v9391_v27 = vld [vmem:[#allocation2 + $0x1268] sm:$0xf0]  ;;  %v11109_v13 = vld [vmem:[#allocation2 + $0x1604] sm:$0xf] }
 0x2df   :  { %6078 = vmatpush.bf16.msra.mxu0 %v7434_v35  ;;  %v9511_v35 = vld [vmem:[#allocation2 + $0x1358] sm:$0xf0]  ;;  %v10739_v37 = vld [vmem:[#allocation2 + $0xa74] sm:$0xf] }
 0x2e0   :  { %v9514_v14 = vor.u32 %v11019_v16, %v9511_v35  ;;  %v10989_v16 = vld [vmem:[#allocation2 + $0x1244] sm:$0xf] }
 0x2e1   :  { %6092 = vmatpush.bf16.msrb.mxu1 %v7754_v63  ;;  %v8474_v63 = vor.u32 %v10759_v3, %v8471_v4  ;;  %v8831_v3 = vld [vmem:[#allocation2 + $0xe08] sm:$0xf0] }
 0x2e2   :  { %6106 = vmatpush.bf16.msrb.mxu3 %v8074_v45  ;;  %6116 = vmatpush.bf16.msrb.mxu2 %v8554_v28  ;;  %v9234_v45 = vor.u32 %v10949_v50, %v9231_v47  ;;  %v10939_v28 = vld [vmem:[#allocation2 + $0x10b4] sm:$0xf]  ;;  %v8351_v4 = vld [vmem:[#allocation2 + $0xa48] sm:$0xf0] }
 0x2e3   :  { %6079 = vmatpush.bf16.msra.mxu0 %v7394_v49  ;;  %v9194_v31 = vor.u32 %v10939_v28, %v9191_v52  ;;  %v10729_v49 = vld [vmem:[#allocation2 + $0xa24] sm:$0xf]  ;;  %v10919_v47 = vld [vmem:[#allocation2 + $0x1014] sm:$0xf]  ;;  %v9914_v28 = vor.u32 %v11119_v46, %v9911_v26  ;;  %v8991_v46 = vld [vmem:[#allocation2 + $0xf48] sm:$0xf0] }
 0x2e4   :  { %v8354_v15 = vor.u32 %v10729_v49, %v8351_v4  ;;  %v10909_v52 = vld [vmem:[#allocation2 + $0xfc4] sm:$0xf]  ;;  %v9831_v49 = vld [vmem:[#allocation2 + $0x15d8] sm:$0xf0]  ;;  %v11850_v4 = vpop.f32.mrf.mxu2 }
 0x2e5   :  { %6093 = vmatpush.bf16.msrb.mxu1 %v7714_v10  ;;  %v8391_v10 = vld [vmem:[#allocation2 + $0xa98] sm:$0xf0] }
 0x2e6   :  { %6107 = vmatpush.bf16.msrb.mxu3 %v8034_v53  ;;  %6117 = vmatpush.bf16.msrb.mxu2 %v8514_v24  ;;  %v10929_v53 = vld [vmem:[#allocation2 + $0x1064] sm:$0xf] }
 0x2e7   :  { %6128 = vmatpush.bf16.msrb.mxu0 %v8954_v58  ;;  %v11009_v24 = vld [vmem:[#allocation2 + $0x12e4] sm:$0xf]  ;;  %v9111_v58 = vld [vmem:[#allocation2 + $0x1038] sm:$0xf0] }
 0x2e8   :  { %6094 = vmatmul.bf16.vlgmr.msrb.gmra.mxu1 %v11510_v32  ;;  %6080 = vmatmul.bf16.vlgmr.msra.gmra.mxu0 %v11513_v41  ;;  %v8394_v32 = vor.u32 %v10739_v37, %v8391_v10  ;;  %v9431_v41 = vld [vmem:[#allocation2 + $0x12b8] sm:$0xf0]  ;;  %v8751_v37 = vld [vmem:[#allocation2 + $0xd68] sm:$0xf0]  ;;  %v9394_v10 = vor.u32 %v10989_v16, %v9391_v27  ;;  %v11172_v27 = vld [vmem:[#allocation7 + $0x38] sm:$0xff] }
 0x2e9   :  { %6142 = vmatpush.bf16.msra.mxu1 %v9274_v17  ;;  %6108 = vmatmul.bf16.vlgmr.msrb.gmra.mxu3 %v11516_v42  ;;  %v9471_v42 = vld [vmem:[#allocation2 + $0x1308] sm:$0xf0]  ;;  %v10849_v17 = vld [vmem:[#allocation2 + $0xde4] sm:$0xf]  ;;  %v9434_v33 = vor.u32 %v10999_v51, %v9431_v41 }
 0x2ea   :  { %6156 = vmatpush.bf16.msra.mxu3 %v9594_v1  ;;  %6118 = vmatpush.bf16.msrb.mxu2 %v8474_v63  ;;  %v9154_v1 = vor.u32 %v10929_v53, %v9151_v18  ;;  %v9474_v50 = vor.u32 %v11009_v24, %v9471_v42  ;;  %v8834_v43 = vor.u32 %v10849_v17, %v8831_v3  ;;  %v10839_v63 = vld [vmem:[#allocation2 + $0xd94] sm:$0xf]  ;;  %v12068_v42 = vperm.slane %v11588_v38, 0  ;;  %v10889_v41 = vld [vmem:[#allocation2 + $0xf24] sm:$0xf] }
 0x2eb   :  { %6129 = vmatpush.bf16.msrb.mxu0 %v8914_v0  ;;  %v9071_v0 = vld [vmem:[#allocation2 + $0xfe8] sm:$0xf0]  ;;  %v10899_v18 = vld [vmem:[#allocation2 + $0xf74] sm:$0xf] }
 0x2ec   :  { %v10979_v24 = vld [vmem:[#allocation2 + $0x11f4] sm:$0xf]  ;;  %v4810_v17 = vadd.f32 %v11595_v2, %v12068_v42  ;;  %v10969_v2 = vld [vmem:[#allocation2 + $0x11a4] sm:$0xf]  ;;  %v11171_v42 = vld [vmem:[#allocation7 + $0x30] sm:$0xff] }
 0x2ed   :  { %6143 = vmatpush.bf16.msra.mxu1 %v9234_v45  ;;  %v8791_v45 = vld [vmem:[#allocation2 + $0xdb8] sm:$0xf0] }
 0x2ee   :  { %6157 = vmatpush.bf16.msra.mxu3 %v9554_v19  ;;  %6119 = vmatpush.bf16.msrb.mxu2 %v8434_v11  ;;  %v9114_v19 = vor.u32 %v10919_v47, %v9111_v58  ;;  %v8794_v35 = vor.u32 %v10839_v63, %v8791_v45  ;;  %v9871_v11 = vld [vmem:[#allocation2 + $0x1628] sm:$0xf0]  ;;  %v8711_v47 = vld [vmem:[#allocation2 + $0xd18] sm:$0xf0]  ;;  %v4824_v26 = vadd.f32 %v11597_v9, %v4810_v17  ;;  %v11149_v17 = vld [vmem:[#allocation2 + $0x1744] sm:$0xf] }
 0x2ef   :  { %6130 = vmatpush.bf16.msrb.mxu0 %v8874_v22  ;;  %v9874_v53 = vor.u32 %v11109_v13, %v9871_v11  ;;  %v9031_v22 = vld [vmem:[#allocation2 + $0xf98] sm:$0xf0]  ;;  %v9311_v45 = vld [vmem:[#allocation2 + $0x11c8] sm:$0xf0]  ;;  %v11159_v13 = vld [vmem:[#allocation2 + $0x1794] sm:$0xf] }
 0x2f0   :  { %v9034_v58 = vor.u32 %v10899_v18, %v9031_v22  ;;  %v9314_v16 = vor.u32 %v10969_v2, %v9311_v45  ;;  %v10071_v9 = vld [vmem:[#allocation2 + $0x17b8] sm:$0xf0]  ;;  %v4838_v11 = vadd.f32 %v11599_v25, %v4824_v26  ;;  %v11863_v18 = vpop.f32.mrf.mxu3  ;;  %v11059_v2 = vld [vmem:[#allocation2 + $0x1474] sm:$0xf] }
 0x2f1   :  { %6144 = vmatpush.bf16.msra.mxu1 %v9194_v31  ;;  %v10829_v31 = vld [vmem:[#allocation2 + $0xd44] sm:$0xf]  ;;  %v10074_v22 = vor.u32 %v11159_v13, %v10071_v9  ;;  %v9671_v26 = vld [vmem:[#allocation2 + $0x1498] sm:$0xf0] }
 0x2f2   :  { %6158 = vmatpush.bf16.msra.mxu3 %v9514_v14  ;;  %6120 = vmatpush.bf16.msrb.mxu2 %v8394_v32  ;;  %v9074_v14 = vor.u32 %v10909_v52, %v9071_v0  ;;  %v8754_v3 = vor.u32 %v10829_v31, %v8751_v37  ;;  %v9351_v32 = vld [vmem:[#allocation2 + $0x1218] sm:$0xf0]  ;;  %v10809_v52 = vld [vmem:[#allocation2 + $0xca4] sm:$0xf]  ;;  %v8671_v0 = vld [vmem:[#allocation2 + $0xcc8] sm:$0xf0]  ;;  %v11858_v31 = vpop.f32.mrf.mxu1 }
 0x2f3   :  { %6131 = vmatpush.bf16.msrb.mxu0 %v8834_v43  ;;  %v9354_v51 = vor.u32 %v10979_v24, %v9351_v32  ;;  %v11180_v37 = vld [vmem:[#allocation7 + $0x78] sm:$0xff]  ;;  %v11865_v24 = vpop.f32.mrf.mxu2  ;;  %v4852_v32 = vadd.f32 %v11602_v36, %v4838_v11 }
 0x2f5   :  { %6145 = vmatpush.bf16.msra.mxu1 %v9154_v1  ;;  %v11099_v1 = vld [vmem:[#allocation2 + $0x15b4] sm:$0xf]  ;;  %v4866_v36 = vadd.f32 %v11609_v59, %v4852_v32 }
 0x2f6   :  { %6159 = vmatpush.bf16.msra.mxu3 %v9474_v50  ;;  %6121 = vmatpush.bf16.msrb.mxu2 %v8354_v15  ;;  %v10819_v50 = vld [vmem:[#allocation2 + $0xcf4] sm:$0xf]  ;;  %v9834_v43 = vor.u32 %v11099_v1, %v9831_v49  ;;  %v11089_v15 = vld [vmem:[#allocation2 + $0x1564] sm:$0xf]  ;;  %v9711_v49 = vld [vmem:[#allocation2 + $0x14e8] sm:$0xf0] }
 0x2f7   :  { %6132 = vmatpush.bf16.msrb.mxu0 %v8794_v35  ;;  %v8714_v63 = vor.u32 %v10819_v50, %v8711_v47  ;;  %v11069_v1 = vld [vmem:[#allocation2 + $0x14c4] sm:$0xf] }
 0x2f9   :  { %6146 = vmatpush.bf16.msra.mxu1 %v9114_v19  ;;  %6122 = vmatmul.bf16.vlgmr.msrb.gmra.mxu2 %v11539_v29  ;;  %v9791_v19 = vld [vmem:[#allocation2 + $0x1588] sm:$0xf0]  ;;  %v12069_v29 = vperm.slane %v11588_v38, 1  ;;  %v11079_v38 = vld [vmem:[#allocation2 + $0x1514] sm:$0xf] }
 0x2fa   :  { %6160 = vmatpush.bf16.msra.mxu3 %v9434_v33  ;;  %6170 = vmatpush.bf16.msra.mxu2 %v9914_v28  ;;  %v8994_v28 = vor.u32 %v10889_v41, %v8991_v46  ;;  %v9794_v35 = vor.u32 %v11089_v15, %v9791_v19  ;;  %v9991_v41 = vld [vmem:[#allocation2 + $0x1718] sm:$0xf0]  ;;  %v11178_v46 = vld [vmem:[#allocation7 + $0x68] sm:$0xff]  ;;  %v9674_v19 = vor.u32 %v11059_v2, %v9671_v26 }
 0x2fb   :  { %6133 = vmatpush.bf16.msrb.mxu0 %v8754_v3  ;;  %v4950_v33 = vadd.f32 %v11633_v54, %v12069_v29  ;;  %v10031_v3 = vld [vmem:[#allocation2 + $0x1768] sm:$0xf0] }
 0x2fc   :  { %v10034_v47 = vor.u32 %v11149_v17, %v10031_v3  ;;  %v11169_v29 = vld [vmem:[#allocation7 + $0x20] sm:$0xff]  ;;  %v12075_v17 = vld [vmem:[#allocation18_spill] sm:$0xff] }
 0x2fd   :  { %6147 = vmatpush.bf16.msra.mxu1 %v9074_v14  ;;  %v9751_v14 = vld [vmem:[#allocation2 + $0x1538] sm:$0xf0]  ;;  %v4964_v54 = vadd.f32 %v11635_v61, %v4950_v33  ;;  %v11129_v33 = vld [vmem:[#allocation2 + $0x16a4] sm:$0xf] }
 0x2fe   :  { %6161 = vmatpush.bf16.msra.mxu3 %v9394_v10  ;;  %6171 = vmatpush.bf16.msra.mxu2 %v9874_v53  ;;  %v11861_v10 = vpop.f32.mrf.mxu0  ;;  %v8674_v53 = vor.u32 %v10809_v52, %v8671_v0  ;;  %v9754_v25 = vor.u32 %v11079_v38, %v9751_v14  ;;  %v11179_v61 = vld [vmem:[#allocation7 + $0x70] sm:$0xff]  ;;  %v12071_v52 = vperm.slane %v11661_v34, 3  ;;  %v11177_v0 = vld [vmem:[#allocation7 + $0x60] sm:$0xff]  ;;  %v11176_v38 = vld [vmem:[#allocation7 + $0x58] sm:$0xff] }
 0x2ff   :  { %6134 = vmatpush.bf16.msrb.mxu0 %v8714_v63  ;;  %v4978_v50 = vadd.f32 %v11637_v20, %v4964_v54  ;;  %v11877_v63 = vpop.f32.mrf.mxu1 }
 0x301   :  { %6148 = vmatpush.bf16.msra.mxu1 %v9034_v58  ;;  %v9714_v58 = vor.u32 %v11069_v1, %v9711_v49  ;;  %v4992_v20 = vadd.f32 %v11643_v8, %v4978_v50  ;;  %v4880_v8 = vadd.f32 %v11611_v60, %v4866_v36  ;;  %v11175_v1 = vld [vmem:[#allocation7 + $0x50] sm:$0xff]  ;;  %v12080_v36 = vld [vmem:[#allocation41_spill] sm:$0xff] }
 0x302   :  { %6162 = vmatpush.bf16.msra.mxu3 %v9354_v51  ;;  %6172 = vmatpush.bf16.msra.mxu2 %v9834_v43  ;;  %v11170_v51 = vld [vmem:[#allocation7 + $0x28] sm:$0xff] }
 0x303   :  { %6135 = vmatpush.bf16.msrb.mxu0 %v8674_v53  ;;  %v11139_v43 = vld [vmem:[#allocation2 + $0x16f4] sm:$0xf]  ;;  %v5006_v15 = vadd.f32 %v11649_v55, %v4992_v20  ;;  %v9631_v55 = vld [vmem:[#allocation2 + $0x1448] sm:$0xf0]  ;;  %v4894_v13 = vadd.f32 %v11615_v12, %v4880_v8  ;;  %v11196_v53 = vld [vmem:[#allocation7 + $0xf8] sm:$0xff] }
 0x304   :  { %v9994_v45 = vor.u32 %v11139_v43, %v9991_v41  ;;  %v12077_v49 = vld [vmem:[#allocation22_spill] sm:$0xff]  ;;  %v12079_v41 = vperm.slane %v11739_v7, 4  ;;  %v12084_v8 = vld [vmem:[#allocation25_spill] sm:$0xff] }
 0x305   :  { %6149 = vmatpush.bf16.msra.mxu1 %v8994_v28  ;;  %v9951_v28 = vld [vmem:[#allocation2 + $0x16c8] sm:$0xf0]  ;;  %v5020_v60 = vadd.f32 %v11647_v21, %v5006_v15  ;;  %v11187_v21 = vld [vmem:[#allocation7 + $0xb0] sm:$0xff]  ;;  %v11186_v20 = vld [vmem:[#allocation7 + $0xa8] sm:$0xff] }
 0x306   :  { %6163 = vmatpush.bf16.msra.mxu3 %v9314_v16  ;;  %6173 = vmatpush.bf16.msra.mxu2 %v9794_v35  ;;  %v11880_v59 = vpop.f32.mrf.mxu0  ;;  %v11049_v16 = vld [vmem:[#allocation2 + $0x1424] sm:$0xf]  ;;  %v9954_v9 = vor.u32 %v11129_v33, %v9951_v28  ;;  %v11195_v43 = vld [vmem:[#allocation7 + $0xf0] sm:$0xff] }
 0x307   :  { %6188 = vmatpush.bf16.msra.mxu0 %v10074_v22  ;;  %v5034_v14 = vadd.f32 %v11653_v57, %v5020_v60  ;;  %v12073_v22 = vld [vmem:[#allocation15_spill] sm:$0xff]  ;;  %v12083_v33 = vld [vmem:[#allocation20_spill] sm:$0xff]  ;;  %v12088_v60 = vld [vmem:[#allocation34_spill] sm:$0xff] }
 0x308   :  { %6150 = vmatmul.bf16.vlgmr.msra.gmra.mxu1 %v11542_v30  ;;  %v12070_v30 = vperm.slane %v11661_v34, 2  ;;  %6136 = vmatmul.bf16.vlgmr.msrb.gmra.mxu0 %v11545_v39  ;;  %v11886_v39 = vpop.f32.mrf.mxu3  ;;  %v9634_v34 = vor.u32 %v11049_v16, %v9631_v55  ;;  %v4908_v12 = vadd.f32 %v12073_v22, %v4894_v13  ;;  %v11167_v57 = vld [vmem:[#allocation7 + $0x10] sm:$0xff]  ;;  %v11194_v16 = vld [vmem:[#allocation7 + $0xe8] sm:$0xff]  ;;  %v11185_v13 = vld [vmem:[#allocation7 + $0xa0] sm:$0xff] }
 0x309   :  { %6872 = vmatpush.bf16.msrb.mxu1 %v11172_v27  ;;  %6164 = vmatmul.bf16.vlgmr.msra.gmra.mxu3 %v11548_v40  ;;  %v11889_v27 = vpop.f32.mrf.mxu2  ;;  %v12087_v55 = vld [vmem:[#allocation42_spill] sm:$0xff] }
 0x30a   :  { %6886 = vmatpush.bf16.msrb.mxu3 %v11180_v37  ;;  %6174 = vmatpush.bf16.msra.mxu2 %v9754_v25  ;;  %v5090_v40 = vadd.f32 %v11672_v23, %v12070_v30  ;;  %v5230_v23 = vadd.f32 %v11710_v56, %v12071_v52  ;;  %v11188_v56 = vld [vmem:[#allocation7 + $0xb8] sm:$0xff]  ;;  %v12074_v25 = vld [vmem:[#allocation21_spill] sm:$0xff]  ;;  %v4922_v3 = vadd.f32 %v12075_v17, %v4908_v12 }
 0x30b   :  { %6189 = vmatpush.bf16.msra.mxu0 %v10034_v47  ;;  %v11168_v37 = vld [vmem:[#allocation7 + $0x18] sm:$0xff]  ;;  %v12081_v30 = vld [vmem:[#allocation17_spill] sm:$0xff] }
 0x30c   :  { %v5104_v35 = vadd.f32 %v11676_v62, %v5090_v40  ;;  %v5244_v11 = vadd.f32 %v11715_v44, %v5230_v23  ;;  %v12072_v62 = vld [vmem:[#allocation23_spill] sm:$0xff]  ;;  %v12076_v44 = vld [vmem:[#allocation32_spill] sm:$0xff]  ;;  %v4936_v40 = vadd.f32 %v12081_v30, %v4922_v3  ;;  %v12085_v23 = vperm.slane %v11739_v7, 5  ;;  %v12089_v7 = vld [vmem:[#allocation26_spill] sm:$0xff] }
 0x30d   :  { %6873 = vmatpush.bf16.msrb.mxu1 %v11171_v42  ;;  %v5048_v42 = vadd.f32 %v12074_v25, %v5034_v14  ;;  %v12078_v47 = vld [vmem:[#allocation24_spill] sm:$0xff]  ;;  %v12090_v14 = vld [vmem:[#allocation53_spill] sm:$0xff]  ;;  %v12092_v12 = vld [vmem:[#allocation35_spill] sm:$0xff] }
 0x30e   :  { %6887 = vmatpush.bf16.msrb.mxu3 %v11179_v61  ;;  %6175 = vmatpush.bf16.msra.mxu2 %v9714_v58  ;;  %v5118_v54 = vadd.f32 %v12072_v62, %v5104_v35  ;;  %v5258_v32 = vadd.f32 %v12076_v44, %v5244_v11  ;;  %v11900_v61 = vpop.f32.mrf.mxu1  ;;  %v11173_v11 = vld [vmem:[#allocation7 + $0x40] sm:$0xff]  ;;  %v11212_v3 = vld [vmem:[#allocation7 + $0x178] sm:$0xff]  ;;  %v11203_v30 = vld [vmem:[#allocation7 + $0x130] sm:$0xff] }
 0x30f   :  { %6190 = vmatpush.bf16.msra.mxu0 %v9994_v45  ;;  %v5062_v50 = vadd.f32 %v12077_v49, %v5048_v42  ;;  %v12082_v45 = vld [vmem:[#allocation33_spill] sm:$0xff]  ;;  %v12093_v42 = vld [vmem:[#allocation43_spill] sm:$0xff] }
 0x310   :  { %v5132_v58 = vadd.f32 %v12078_v47, %v5118_v54  ;;  %v11909_v2 = vpop.f32.mrf.mxu3  ;;  %v5272_v15 = vadd.f32 %v12082_v45, %v5258_v32  ;;  %v11193_v54 = vld [vmem:[#allocation7 + $0xe0] sm:$0xff]  ;;  %v12094_v44 = vld [vmem:[#allocation19_spill] sm:$0xff] }
 0x311   :  { %6874 = vmatpush.bf16.msrb.mxu1 %v11170_v51  ;;  %v11904_v51 = vpop.f32.mrf.mxu0  ;;  %v11912_v26 = vpop.f32.mrf.mxu2  ;;  %v5076_v28 = vadd.f32 %v12083_v33, %v5062_v50  ;;  %v6199_v32 = vmax.f32 %v12094_v44, 0.0  ;;  %v11184_v47 = vld [vmem:[#allocation7 + $0x98] sm:$0xff]  ;;  %v12099_v33 = vld [vmem:[#allocation29_spill] sm:$0xff] }
 0x312   :  { %6888 = vmatpush.bf16.msrb.mxu3 %v11178_v46  ;;  %6176 = vmatpush.bf16.msra.mxu2 %v9674_v19  ;;  %v5370_v46 = vadd.f32 %v12080_v36, %v12079_v41  ;;  %v11166_v19 = vld [vmem:[#allocation7 + $0x8] sm:$0xff]  ;;  %v5146_v52 = vadd.f32 %v12084_v8, %v5132_v58 }
 0x313   :  { %6191 = vmatpush.bf16.msra.mxu0 %v9954_v9  ;;  %v6208_v9 = vmax.f32 %v4936_v40, 0.0  ;;  %v12096_v36 = vld [vmem:[#allocation54_spill] sm:$0xff]  ;;  %v12097_v40 = vld [vmem:[#allocation36_spill] sm:$0xff] }
 0x314   :  { %v5384_v35 = vadd.f32 %v12087_v55, %v5370_v46  ;;  %v12100_v8 = vld [vmem:[#allocation38_spill] sm:$0xff] }
 0x315   :  { %6875 = vmatpush.bf16.msrb.mxu1 %v11169_v29  ;;  %v11174_v29 = vld [vmem:[#allocation7 + $0x48] sm:$0xff] }
 0x316   :  { %6889 = vmatpush.bf16.msrb.mxu3 %v11177_v0  ;;  %6177 = vmatpush.bf16.msra.mxu2 %v9634_v34  ;;  %v12086_v0 = vld [vmem:[#allocation52_spill] sm:$0xff]  ;;  %v5286_v34 = vadd.f32 %v12088_v60, %v5272_v15  ;;  %v11930_v17 = vpop.f32.mrf.mxu1  ;;  %v11202_v60 = vld [vmem:[#allocation7 + $0x128] sm:$0xff] }
 0x317   :  { %6900 = vmatpush.bf16.msrb.mxu0 %v11188_v56  ;;  %v11165_v56 = vld [vmem:[#allocation7] sm:$0xff]  ;;  %v11190_v44 = vld [vmem:[#allocation7 + $0xc8] sm:$0xff] }
 0x318   :  { %10084 = vmatmul.msk.bf16.vlgmr.msra.gmra.mxu0 %vm4794_vm0, %v11571_v6  ;;  %v11204_v6 = vld [vmem:[#allocation7 + $0x138] sm:$0xff]  ;;  %v5300_v25 = vadd.f32 %v12092_v12, %v5286_v34  ;;  %v11937_v50 = vpop.f32.mrf.mxu3  ;;  %v12106_v12 = vld [vmem:[#allocation30_spill] sm:$0xff] }
 0x319   :  { %6876 = vmatpush.bf16.msrb.mxu1 %v11168_v37  ;;  %6178 = vmatmul.bf16.vlgmr.msra.gmra.mxu2 %v11568_v5  ;;  %v5510_v5 = vadd.f32 %v12086_v0, %v12085_v23  ;;  %v6209_v37 = vmax.f32 %v5076_v28, 0.0  ;;  %v12098_v15 = vld [vmem:[#allocation44_spill] sm:$0xff] }
 0x31a   :  { %6890 = vmatpush.bf16.msrb.mxu3 %v11176_v38  ;;  %6914 = vmatpush.bf16.msrb.mxu2 %v11196_v53  ;;  %v5160_v38 = vadd.f32 %v12089_v7, %v5146_v52  ;;  %v12091_v53 = vld [vmem:[#allocation16_spill] sm:$0xff]  ;;  %v5314_v45 = vadd.f32 %v12097_v40, %v5300_v25  ;;  %v11210_v7 = vld [vmem:[#allocation7 + $0x168] sm:$0xff] }
 0x31b   :  { %6901 = vmatpush.bf16.msrb.mxu0 %v11187_v21  ;;  %v5524_v62 = vadd.f32 %v12090_v14, %v5510_v5  ;;  %v6198_v22 = vmax.f32 %v12091_v53, 0.0  ;;  %v5398_v21 = vadd.f32 %v12093_v42, %v5384_v35  ;;  %v6219_v58 = vpack.c.bf16 %v6209_v37, %v6199_v32  ;;  %v11260_v23 = vld [vmem:[#allocation5] sm:$0xff]  ;;  %v12107_v42 = vld [vmem:[#allocation57_spill] sm:$0xff] }
 0x31c   :  { %v5328_v52 = vadd.f32 %v12100_v8, %v5314_v45  ;;  %v981_v0 = vperm.slane %v11260_v23, 7  ;;  %v11183_v5 = vld [vmem:[#allocation7 + $0x90] sm:$0xff]  ;;  %v12103_v34 = vld [vmem:[#allocation40_spill] sm:$0xff] }
 0x31d   :  { %6877 = vmatpush.bf16.msrb.mxu1 %v11167_v57  ;;  %v11933_v57 = vpop.f32.mrf.mxu0  ;;  %v6218_v49 = vpack.c.bf16 %v6208_v9, %v6198_v22  ;;  %v5538_v46 = vadd.f32 %v12096_v36, %v5524_v62  ;;  %v12102_v35 = vld [vmem:[#allocation55_spill] sm:$0xff]  ;;  %v12105_v14 = vld [vmem:[#allocation56_spill] sm:$0xff]  ;;  %v11182_v22 = vld [vmem:[#allocation7 + $0x88] sm:$0xff] }
 0x31e   :  { %6891 = vmatpush.bf16.msrb.mxu3 %v11175_v1  ;;  %6915 = vmatpush.bf16.msrb.mxu2 %v11195_v43  ;;  %v11935_v1 = vpop.f32.mrf.mxu2  ;;  %v12095_v43 = vld [vmem:[#allocation28_spill] sm:$0xff]  ;;  %v11191_v9 = vld [vmem:[#allocation7 + $0xd0] sm:$0xff] }
 0x31f   :  { %6902 = vmatpush.bf16.msrb.mxu0 %v11186_v20  ;;  %v5174_v41 = vadd.f32 %v12095_v43, %v5160_v38  ;;  %v11192_v20 = vld [vmem:[#allocation7 + $0xd8] sm:$0xff]  ;;  %v11949_v38 = vpop.f32.mrf.mxu1  ;;  %v11201_v32 = vld [vmem:[#allocation7 + $0x120] sm:$0xff]  ;;  %v12111_v45 = vld [vmem:[#allocation58_spill] sm:$0xff] }
 0x320   :  { %v5927_v53 = vpop.f32.mrf.mxu3  ;;  %v12110_v36 = vld [vmem:[#allocation48_spill] sm:$0xff] }
 0x321   :  { %6878 = vmatpush.bf16.msrb.mxu1 %v11166_v19  ;;  %v5412_v19 = vadd.f32 %v12098_v15, %v5398_v21  ;;  %v5188_v28 = vadd.f32 %v12099_v33, %v5174_v41  ;;  %v5790_v41 = vadd.f32 %v11880_v59, %v981_v0  ;;  %v11208_v23 = vld [vmem:[#allocation7 + $0x158] sm:$0xff] }
 0x322   :  { %6892 = vmatpush.bf16.msrb.mxu3 %v11174_v29  ;;  %6916 = vmatpush.bf16.msrb.mxu2 %v11194_v16  ;;  %v11211_v29 = vld [vmem:[#allocation7 + $0x170] sm:$0xff] }
 0x323   :  { %6903 = vmatpush.bf16.msrb.mxu0 %v11185_v13  ;;  %v12101_v16 = vld [vmem:[#allocation31_spill] sm:$0xff]  ;;  %v5552_v13 = vadd.f32 %v12102_v35, %v5538_v46  ;;  %v5804_v59 = vadd.f32 %v11865_v24, %v5790_v41  ;;  %v11206_v41 = vld [vmem:[#allocation7 + $0x148] sm:$0xff] }
 0x324   :  { %v5202_v55 = vadd.f32 %v12101_v16, %v5188_v28  ;;  %v12112_v28 = vld [vmem:[#allocation49_spill] sm:$0xff]  ;;  %v11228_v16 = vld [vmem:[#allocation7 + $0x1f8] sm:$0xff] }
 0x325   :  { %6879 = vmatpush.bf16.msrb.mxu1 %v11165_v56  ;;  %v5342_v56 = vadd.f32 %v12103_v34, %v5328_v52  ;;  %v5566_v62 = vadd.f32 %v12105_v14, %v5552_v13  ;;  %v11967_v52 = vld [vmem:[#allocation5 + $0x8] sm:$0x3] }
 0x326   :  { %6893 = vmatpush.bf16.msrb.mxu3 %v11173_v11  ;;  %6917 = vmatpush.bf16.msrb.mxu2 %v11193_v54  ;;  %v12104_v11 = vld [vmem:[#allocation45_spill] sm:$0xff]  ;;  %v11952_v54 = vpop.f32.mrf.mxu0  ;;  %v5216_v25 = vadd.f32 %v12106_v12, %v5202_v55  ;;  %v12115_v34 = vld [vmem:[#allocation60_spill] sm:$0xff]  ;;  %v982_v24 = vperm.slane %v11967_v52, 0  ;;  %v11207_v12 = vld [vmem:[#allocation7 + $0x150] sm:$0xff] }
 0x327   :  { %6904 = vmatpush.bf16.msrb.mxu0 %v11184_v47  ;;  %v5426_v37 = vadd.f32 %v12104_v11, %v5412_v19  ;;  %v5580_v21 = vadd.f32 %v12107_v42, %v5566_v62  ;;  %v11189_v19 = vld [vmem:[#allocation7 + $0xc0] sm:$0xff]  ;;  %v12116_v62 = vld [vmem:[#allocation51_spill] sm:$0xff]  ;;  %v12117_v42 = vld [vmem:[#allocation62_spill] sm:$0xff] }
 0x328   :  { %6880 = vmatmul.bf16.vlgmr.msrb.gmra.mxu1 %v6218_v49  ;;  %v12108_v49 = vld [vmem:[#allocation39_spill] sm:$0xff]  ;;  %v6210_v40 = vmax.f32 %v5216_v25, 0.0  ;;  %v12114_v55 = vld [vmem:[#allocation37_spill] sm:$0xff] }
 0x329   :  { %6928 = vmatpush.bf16.msra.mxu1 %v11204_v6  ;;  %6894 = vmatmul.bf16.vlgmr.msrb.gmra.mxu3 %v6219_v58  ;;  %v5788_v6 = vadd.f32 %v11861_v10, %v981_v0  ;;  %v5356_v47 = vadd.f32 %v12108_v49, %v5342_v56  ;;  %v12109_v58 = vld [vmem:[#allocation46_spill] sm:$0xff]  ;;  %v11209_v10 = vld [vmem:[#allocation7 + $0x160] sm:$0xff]  ;;  %v5594_v15 = vadd.f32 %v12111_v45, %v5580_v21  ;;  %v11220_v0 = vld [vmem:[#allocation7 + $0x1b8] sm:$0xff]  ;;  %v6201_v35 = vmax.f32 %v12114_v55, 0.0 }
 0x32a   :  { %6942 = vmatpush.bf16.msra.mxu3 %v11212_v3  ;;  %6918 = vmatpush.bf16.msrb.mxu2 %v11192_v20  ;;  %v11957_v3 = vpop.f32.mrf.mxu2  ;;  %v5440_v43 = vadd.f32 %v12109_v58, %v5426_v37  ;;  %v11219_v25 = vld [vmem:[#allocation7 + $0x1b0] sm:$0xff]  ;;  %v5928_v49 = vadd.f32 %v5927_v53, %v982_v24 }
 0x32b   :  { %6905 = vmatpush.bf16.msrb.mxu0 %v11183_v5  ;;  %v5802_v20 = vadd.f32 %v11850_v4, %v5788_v6  ;;  %v6211_v33 = vmax.f32 %v5356_v47, 0.0  ;;  %v12113_v4 = vld [vmem:[#allocation27_spill] sm:$0xff]  ;;  %v5608_v56 = vadd.f32 %v12115_v34, %v5594_v15  ;;  %v11198_v47 = vld [vmem:[#allocation7 + $0x108] sm:$0xff] }
 0x32c   :  { %v5454_v46 = vadd.f32 %v12110_v36, %v5440_v43  ;;  %v6200_v5 = vmax.f32 %v12113_v4, 0.0  ;;  %v12118_v58 = vld [vmem:[#allocation50_spill] sm:$0xff]  ;;  %v12119_v36 = vld [vmem:[#allocation61_spill] sm:$0xff]  ;;  %v11224_v34 = vld [vmem:[#allocation7 + $0x1d8] sm:$0xff] }
 0x32d   :  { %6929 = vmatpush.bf16.msra.mxu1 %v11203_v30  ;;  %v11181_v30 = vld [vmem:[#allocation7 + $0x80] sm:$0xff]  ;;  %v5816_v13 = vadd.f32 %v11863_v18, %v5802_v20  ;;  %v6221_v14 = vpack.c.bf16 %v6211_v33, %v6201_v35  ;;  %v5929_v18 = vpop.f32.mrf.mxu3  ;;  %v5622_v21 = vadd.f32 %v12117_v42, %v5608_v56  ;;  %v11226_v20 = vld [vmem:[#allocation7 + $0x1e8] sm:$0xff]  ;;  %v11235_v56 = vld [vmem:[#allocation7 + $0x230] sm:$0xff] }
 0x32e   :  { %6943 = vmatpush.bf16.msra.mxu3 %v11211_v29  ;;  %6919 = vmatpush.bf16.msrb.mxu2 %v11191_v9  ;;  %v11200_v29 = vld [vmem:[#allocation7 + $0x118] sm:$0xff]  ;;  %v5468_v8 = vadd.f32 %v12112_v28, %v5454_v46  ;;  %v11972_v9 = vpop.f32.mrf.mxu1  ;;  %v11975_v11 = vpop.f32.mrf.mxu0  ;;  %v5930_v4 = vadd.f32 %v5929_v18, %v982_v24 }
 0x32f   :  { %6906 = vmatpush.bf16.msrb.mxu0 %v11182_v22  ;;  %v5818_v22 = vadd.f32 %v11886_v39, %v5804_v59  ;;  %v5636_v46 = vadd.f32 %v12119_v36, %v5622_v21  ;;  %v11236_v59 = vld [vmem:[#allocation7 + $0x238] sm:$0xff] }
 0x330   :  { %v5482_v6 = vadd.f32 %v12116_v62, %v5468_v8  ;;  %v11225_v8 = vld [vmem:[#allocation7 + $0x1e0] sm:$0xff] }
 0x331   :  { %6930 = vmatpush.bf16.msra.mxu1 %v11202_v60  ;;  %v6220_v60 = vpack.c.bf16 %v6210_v40, %v6200_v5  ;;  %v5832_v39 = vadd.f32 %v11877_v63, %v5818_v22  ;;  %v11197_v40 = vld [vmem:[#allocation7 + $0x100] sm:$0xff]  ;;  %v6213_v33 = vmax.f32 %v5636_v46, 0.0  ;;  %v11234_v22 = vld [vmem:[#allocation7 + $0x228] sm:$0xff] }
 0x332   :  { %6944 = vmatpush.bf16.msra.mxu3 %v11210_v7  ;;  %6920 = vmatpush.bf16.msrb.mxu2 %v11190_v44  ;;  %v5955_v37 = vpop.f32.mrf.mxu2  ;;  %v11199_v7 = vld [vmem:[#allocation7 + $0x110] sm:$0xff]  ;;  %v5496_v43 = vadd.f32 %v12118_v58, %v5482_v6  ;;  %v11205_v63 = vld [vmem:[#allocation7 + $0x140] sm:$0xff] }
 0x333   :  { %6907 = vmatpush.bf16.msrb.mxu0 %v11181_v30  ;;  %v11227_v44 = vld [vmem:[#allocation7 + $0x1f0] sm:$0xff]  ;;  %v5846_v15 = vadd.f32 %v11933_v57, %v5832_v39  ;;  %v11221_v39 = vld [vmem:[#allocation7 + $0x1c0] sm:$0xff] }
 0x334   :  { %v6212_v45 = vmax.f32 %v5496_v43, 0.0  ;;  %v11223_v6 = vld [vmem:[#allocation7 + $0x1d0] sm:$0xff] }
 0x335   :  { %6931 = vmatpush.bf16.msra.mxu1 %v11201_v32  ;;  %v5830_v32 = vadd.f32 %v11858_v31, %v5816_v13  ;;  %v5942_v31 = vadd.f32 %v11949_v38, %v5928_v49  ;;  %v5983_v5 = vpop.f32.mrf.mxu3  ;;  %v11216_v13 = vld [vmem:[#allocation7 + $0x198] sm:$0xff] }
 0x336   :  { %6945 = vmatpush.bf16.msra.mxu3 %v11209_v10  ;;  %6921 = vmatpush.bf16.msrb.mxu2 %v11189_v19  ;;  %v11218_v10 = vld [vmem:[#allocation7 + $0x1a8] sm:$0xff]  ;;  %v5969_v53 = vpop.f32.mrf.mxu0  ;;  %v11217_v19 = vld [vmem:[#allocation7 + $0x1a0] sm:$0xff] }
 0x337   :  { %6956 = vmatpush.bf16.msra.mxu0 %v11220_v0  ;;  %v5844_v30 = vadd.f32 %v11904_v51, %v5830_v32  ;;  %v5860_v0 = vadd.f32 %v11912_v26, %v5846_v15  ;;  %v5956_v55 = vadd.f32 %v5955_v37, %v5942_v31  ;;  %v5944_v26 = vadd.f32 %v11972_v9, %v5930_v4  ;;  %v11233_v32 = vld [vmem:[#allocation7 + $0x220] sm:$0xff] }
 0x338   :  { %6908 = vmatmul.bf16.vlgmr.msrb.gmra.mxu0 %v6220_v60 }
 0x339   :  { %6932 = vmatpush.bf16.msra.mxu1 %v11200_v29  ;;  %6922 = vmatmul.bf16.vlgmr.msrb.gmra.mxu2 %v6221_v14  ;;  %v5997_v29 = vpop.f32.mrf.mxu1  ;;  %v5858_v38 = vadd.f32 %v11889_v27, %v5844_v30  ;;  %v5874_v27 = vadd.f32 %v11937_v50, %v5860_v0  ;;  %v5970_v24 = vadd.f32 %v5969_v53, %v5956_v55  ;;  %v11215_v14 = vld [vmem:[#allocation7 + $0x190] sm:$0xff] }
 0x33a   :  { %6946 = vmatpush.bf16.msra.mxu3 %v11208_v23  ;;  %6970 = vmatpush.bf16.msra.mxu2 %v11228_v16  ;;  %v5957_v28 = vpop.f32.mrf.mxu2  ;;  %v12120_v23 = vld [vmem:[#allocation47_spill] sm:$0xff] }
 0x33b   :  { %6957 = vmatpush.bf16.msra.mxu0 %v11219_v25  ;;  %v6202_v51 = vmax.f32 %v12120_v23, 0.0  ;;  %v12121_v16 = vld [vmem:[#allocation59_spill] sm:$0xff]  ;;  %v5888_v37 = vadd.f32 %v11930_v17, %v5874_v27  ;;  %v5984_v25 = vadd.f32 %v5983_v5, %v5970_v24  ;;  %v11214_v17 = vld [vmem:[#allocation7 + $0x188] sm:$0xff]  ;;  %v11229_v23 = vld [vmem:[#allocation7 + $0x200] sm:$0xff] }
 0x33c   :  { %v6203_v57 = vmax.f32 %v12121_v16, 0.0  ;;  %v11231_v53 = vld [vmem:[#allocation7 + $0x210] sm:$0xff] }
 0x33d   :  { %6933 = vmatpush.bf16.msra.mxu1 %v11199_v7  ;;  %v6222_v35 = vpack.c.bf16 %v6212_v45, %v6202_v51  ;;  %v5872_v7 = vadd.f32 %v11909_v2, %v5858_v38  ;;  %v5902_v2 = vadd.f32 %v11975_v11, %v5888_v37  ;;  %v5985_v21 = vpop.f32.mrf.mxu3  ;;  %v5998_v58 = vadd.f32 %v5997_v29, %v5984_v25  ;;  %v11213_v11 = vld [vmem:[#allocation7 + $0x180] sm:$0xff]  ;;  %v11243_v5 = vld [vmem:[#allocation7 + $0x270] sm:$0xff]  ;;  %v11238_v37 = vld [vmem:[#allocation7 + $0x248] sm:$0xff] }
 0x33e   :  { %6947 = vmatpush.bf16.msra.mxu3 %v11207_v12  ;;  %6971 = vmatpush.bf16.msra.mxu2 %v11227_v44  ;;  %v6223_v60 = vpack.c.bf16 %v6213_v33, %v6203_v57  ;;  %v5971_v62 = vpop.f32.mrf.mxu0  ;;  %v5958_v12 = vadd.f32 %v5957_v28, %v5944_v26  ;;  %v11222_v44 = vld [vmem:[#allocation7 + $0x1c8] sm:$0xff]  ;;  %v11239_v27 = vld [vmem:[#allocation7 + $0x250] sm:$0xff] }
 0x33f   :  { %6958 = vmatpush.bf16.msra.mxu0 %v11218_v10  ;;  %v5886_v18 = vadd.f32 %v11900_v61, %v5872_v7  ;;  %v5916_v49 = vadd.f32 %v11957_v3, %v5902_v2  ;;  %v11242_v57 = vld [vmem:[#allocation7 + $0x268] sm:$0xff] }
 0x341   :  { %6934 = vmatpush.bf16.msra.mxu1 %v11198_v47  ;;  %v5999_v50 = vpop.f32.mrf.mxu1  ;;  %v5900_v42 = vadd.f32 %v11952_v54, %v5886_v18  ;;  %v5972_v47 = vadd.f32 %v5971_v62, %v5958_v12  ;;  %v11232_v54 = vld [vmem:[#allocation7 + $0x218] sm:$0xff]  ;;  %v11237_v18 = vld [vmem:[#allocation7 + $0x240] sm:$0xff] }
 0x342   :  { %6948 = vmatpush.bf16.msra.mxu3 %v11206_v41  ;;  %6972 = vmatpush.bf16.msra.mxu2 %v11226_v20  ;;  %v6011_v9 = vpop.f32.mrf.mxu2  ;;  %v6215_v41 = vmax.f32 %v5916_v49, 0.0 }
 0x343   :  { %6959 = vmatpush.bf16.msra.mxu0 %v11217_v19  ;;  %v5914_v61 = vadd.f32 %v11935_v1, %v5900_v42  ;;  %v5986_v10 = vadd.f32 %v5985_v21, %v5972_v47  ;;  %v6012_v46 = vadd.f32 %v6011_v9, %v5998_v58  ;;  %v11230_v19 = vld [vmem:[#allocation7 + $0x208] sm:$0xff] }
 0x345   :  { %6935 = vmatpush.bf16.msra.mxu1 %v11197_v40  ;;  %v6205_v20 = vmax.f32 %v5914_v61, 0.0  ;;  %v6000_v40 = vadd.f32 %v5999_v50, %v5986_v10 }
 0x346   :  { %6949 = vmatpush.bf16.msra.mxu3 %v11205_v63  ;;  %6973 = vmatpush.bf16.msra.mxu2 %v11225_v8  ;;  %v6025_v43 = vpop.f32.mrf.mxu0 }
 0x347   :  { %6960 = vmatpush.bf16.msra.mxu0 %v11216_v13  ;;  %v6026_v3 = vadd.f32 %v6025_v43, %v6012_v46  ;;  %v6225_v1 = vpack.c.bf16 %v6215_v41, %v6205_v20  ;;  %v11240_v13 = vld [vmem:[#allocation7 + $0x258] sm:$0xff] }
 0x348   :  { %6936 = vmatmul.bf16.vlgmr.msra.gmra.mxu1 %v6222_v35  ;;  %v11241_v35 = vld [vmem:[#allocation7 + $0x260] sm:$0xff] }
 0x349   :  { %6984 = vmatpush.bf16.msrb.mxu1 %v11236_v59  ;;  %6950 = vmatmul.bf16.vlgmr.msra.gmra.mxu3 %v6223_v60  ;;  %v6053_v36 = vpop.f32.mrf.mxu1 }
 0x34a   :  { %6974 = vmatpush.bf16.msra.mxu2 %v11224_v34  ;;  %v6013_v31 = vpop.f32.mrf.mxu2 }
 0x34b   :  { %6961 = vmatpush.bf16.msra.mxu0 %v11215_v14  ;;  %v6014_v45 = vadd.f32 %v6013_v31, %v6000_v40 }
 0x34c   :  { %v6039_v30 = vpop.f32.mrf.mxu3 }
 0x34d   :  { %6985 = vmatpush.bf16.msrb.mxu1 %v11235_v56  ;;  %v6040_v15 = vadd.f32 %v6039_v30, %v6026_v3  ;;  %v983_v56 = vperm.slane %v11967_v52, 1 }
 0x34e   :  { %6975 = vmatpush.bf16.msra.mxu2 %v11223_v6  ;;  %v6027_v63 = vpop.f32.mrf.mxu0 }
 0x34f   :  { %6962 = vmatpush.bf16.msra.mxu0 %v11214_v17  ;;  %v6028_v29 = vadd.f32 %v6027_v63, %v6014_v45  ;;  %v6054_v8 = vadd.f32 %v6053_v36, %v6040_v15 }
 0x351   :  { %6986 = vmatpush.bf16.msrb.mxu1 %v11234_v22  ;;  %v6055_v28 = vpop.f32.mrf.mxu1  ;;  %v6206_v38 = vmax.f32 %v6054_v8, 0.0 }
 0x352   :  { %6976 = vmatpush.bf16.msra.mxu2 %v11222_v44 }
 0x353   :  { %6963 = vmatpush.bf16.msra.mxu0 %v11213_v11 }
 0x354   :  { %v6041_v33 = vpop.f32.mrf.mxu3 }
 0x355   :  { %6987 = vmatpush.bf16.msrb.mxu1 %v11233_v32  ;;  %v6042_v59 = vadd.f32 %v6041_v33, %v6028_v29 }
 0x356   :  { %6977 = vmatpush.bf16.msra.mxu2 %v11221_v39  ;;  %6964 = vmatmul.bf16.vlgmr.msra.gmra.mxu0 %v11841_v48  ;;  %v11244_v48 = vld [vmem:[#allocation7 + $0x278] sm:$0xff] }
 0x357   :  { %v6056_v51 = vadd.f32 %v6055_v28, %v6042_v59  ;;  %6998 = vmatpush.bf16.msrb.mxu3 %v11244_v48 }
 0x359   :  { %6988 = vmatpush.bf16.msrb.mxu1 %v11232_v54  ;;  %6978 = vmatmul.bf16.vlgmr.msra.gmra.mxu2 %v6225_v1  ;;  %v6216_v0 = vmax.f32 %v6056_v51, 0.0 }
 0x35b   :  { %v6226_v4 = vpack.c.bf16 %v6216_v0, %v6206_v38  ;;  %6999 = vmatpush.bf16.msrb.mxu3 %v11243_v5 }
 0x35c   :  { %v6067_v16 = vpop.f32.mrf.mxu2 }
 0x35d   :  { %6989 = vmatpush.bf16.msrb.mxu1 %v11231_v53  ;;  %v6068_v24 = vadd.f32 %v6067_v16, %v983_v56 }
 0x35f   :  { %7000 = vmatpush.bf16.msrb.mxu3 %v11242_v57 }
 0x361   :  { %6990 = vmatpush.bf16.msrb.mxu1 %v11230_v19 }
 0x363   :  { %7001 = vmatpush.bf16.msrb.mxu3 %v11241_v35 }
 0x364   :  { %v6069_v34 = vpop.f32.mrf.mxu2 }
 0x365   :  { %6991 = vmatpush.bf16.msrb.mxu1 %v11229_v23  ;;  %v6081_v55 = vpop.f32.mrf.mxu0  ;;  %v6095_v60 = vpop.f32.mrf.mxu1  ;;  %v6070_v2 = vadd.f32 %v6069_v34, %v983_v56  ;;  %v11256_v23 = vld [vmem:[#allocation8] ss:$0 sm:$0xff] }
 0x366   :  { %v6082_v14 = vadd.f32 %v6081_v55, %v6068_v24 }
 0x367   :  { %7002 = vmatpush.bf16.msrb.mxu3 %v11240_v13 }
 0x368   :  { %6992 = vmatmul.bf16.vlgmr.msrb.gmra.mxu1 %v6226_v4  ;;  %v6096_v12 = vadd.f32 %v6095_v60, %v6082_v14 }
 0x36b   :  { %7003 = vmatpush.bf16.msrb.mxu3 %v11239_v27 }
 0x36c   :  { %v6109_v26 = vpop.f32.mrf.mxu3 }
 0x36d   :  { %v6083_v7 = vpop.f32.mrf.mxu0  ;;  %v6097_v62 = vpop.f32.mrf.mxu1  ;;  %v6110_v9 = vadd.f32 %v6109_v26, %v6096_v12 }
 0x36e   :  { %v6084_v25 = vadd.f32 %v6083_v7, %v6070_v2 }
 0x36f   :  { %7004 = vmatpush.bf16.msrb.mxu3 %v11238_v37 }
 0x370   :  { %v6098_v21 = vadd.f32 %v6097_v62, %v6084_v25 }
 0x373   :  { %7005 = vmatpush.bf16.msrb.mxu3 %v11237_v18 }
 0x374   :  { %v6111_v50 = vpop.f32.mrf.mxu3 }
 0x375   :  { %v6112_v49 = vadd.f32 %v6111_v50, %v6098_v21 }
 0x37c   :  { %v6123_v22 = vpop.f32.mrf.mxu2 }
 0x37d   :  { %v6124_v44 = vadd.f32 %v6123_v22, %v6110_v9 }
 0x384   :  { %v6125_v17 = vpop.f32.mrf.mxu2 }
 0x385   :  { %v6137_v6 = vpop.f32.mrf.mxu0  ;;  %v6151_v42 = vpop.f32.mrf.mxu1  ;;  %v6126_v58 = vadd.f32 %v6125_v17, %v6112_v49 }
 0x386   :  { %v6138_v47 = vadd.f32 %v6137_v6, %v6124_v44 }
 0x388   :  { %v6152_v61 = vadd.f32 %v6151_v42, %v6138_v47 }
 0x38c   :  { %v6165_v32 = vpop.f32.mrf.mxu3 }
 0x38d   :  { %v6139_v52 = vpop.f32.mrf.mxu0  ;;  %v6153_v43 = vpop.f32.mrf.mxu1  ;;  %v6166_v41 = vadd.f32 %v6165_v32, %v6152_v61 }
 0x38e   :  { %v6140_v11 = vadd.f32 %v6139_v52, %v6126_v58 }
 0x390   :  { %v6154_v10 = vadd.f32 %v6153_v43, %v6140_v11 }
 0x394   :  { %v6167_v36 = vpop.f32.mrf.mxu3 }
 0x395   :  { %v6193_v39 = vpop.f32.mrf.mxu0  ;;  %v6168_v20 = vadd.f32 %v6167_v36, %v6154_v10 }
 0x39c   :  { %v6179_v54 = vpop.f32.mrf.mxu2 }
 0x39d   :  { %v6180_v46 = vadd.f32 %v6179_v54, %v6166_v41  ;;  %v6195_v53 = vpop.f32.mrf.mxu0 }
 0x39f   :  { %v6194_v31 = vadd.f32 %v6193_v39, %v6180_v46 }
 0x3a1   :  { %v6207_v40 = vmax.f32 %v6194_v31, 0.0 }
 0x3a4   :  { %v6181_v30 = vpop.f32.mrf.mxu2 }
 0x3a5   :  { %v6182_v3 = vadd.f32 %v6181_v30, %v6168_v20  ;;  %v6881_v63 = vpop.f32.mrf.mxu1 }
 0x3a6   :  { %v6882_v0 = vadd.f32 %v11256_v23, %v6881_v63 }
 0x3a7   :  { %v6196_v1 = vadd.f32 %v6195_v53, %v6182_v3 }
 0x3a9   :  { %v6217_v45 = vmax.f32 %v6196_v1, 0.0 }
 0x3ab   :  { %v6227_v15 = vpack.c.bf16 %v6217_v45, %v6207_v40 }
 0x3ac   :  { %v6895_v19 = vpop.f32.mrf.mxu3 }
 0x3ad   :  { %7006 = vmatmul.bf16.vlgmr.msrb.gmra.mxu3 %v6227_v15  ;;  %v6883_v29 = vpop.f32.mrf.mxu1  ;;  %v6896_v48 = vadd.f32 %v6895_v19, %v6882_v0 }
 0x3ae   :  { %v6884_v35 = vadd.f32 %v11256_v23, %v6883_v29 }
 0x3b4   :  { %v6897_v28 = vpop.f32.mrf.mxu3 }
 0x3b5   :  { %v6909_v33 = vpop.f32.mrf.mxu0  ;;  %v6898_v56 = vadd.f32 %v6897_v28, %v6884_v35 }
 0x3b6   :  { %v6910_v16 = vadd.f32 %v6909_v33, %v6896_v48 }
 0x3bc   :  { %v6923_v8 = vpop.f32.mrf.mxu2 }
 0x3bd   :  { %v6911_v51 = vpop.f32.mrf.mxu0  ;;  %v6924_v57 = vadd.f32 %v6923_v8, %v6910_v16 }
 0x3be   :  { %v6912_v26 = vadd.f32 %v6911_v51, %v6898_v56 }
 0x3c4   :  { %v6925_v4 = vpop.f32.mrf.mxu2 }
 0x3c5   :  { %v6937_v59 = vpop.f32.mrf.mxu1  ;;  %v6926_v37 = vadd.f32 %v6925_v4, %v6912_v26 }
 0x3c6   :  { %v6938_v13 = vadd.f32 %v6937_v59, %v6924_v57 }
 0x3cc   :  { %v6951_v38 = vpop.f32.mrf.mxu3 }
 0x3cd   :  { %v6939_v5 = vpop.f32.mrf.mxu1  ;;  %v6952_v7 = vadd.f32 %v6951_v38, %v6938_v13 }
 0x3ce   :  { %v6940_v62 = vadd.f32 %v6939_v5, %v6926_v37 }
 0x3d3   :  { %v6965_v55 = vpop.f32.mrf.mxu0 }
 0x3d4   :  { %v6953_v60 = vpop.f32.mrf.mxu3  ;;  %v6966_v24 = vadd.f32 %v6965_v55, %v6952_v7 }
 0x3d5   :  { %v6954_v2 = vadd.f32 %v6953_v60, %v6940_v62 }
 0x3db   :  { %v6967_v22 = vpop.f32.mrf.mxu0 }
 0x3dc   :  { %v6979_v34 = vpop.f32.mrf.mxu2  ;;  %v6968_v25 = vadd.f32 %v6967_v22, %v6954_v2 }
 0x3dd   :  { %v6980_v14 = vadd.f32 %v6979_v34, %v6966_v24 }
 0x3e4   :  { %v6981_v50 = vpop.f32.mrf.mxu2 }
 0x3e5   :  { %v6993_v27 = vpop.f32.mrf.mxu1  ;;  %v6982_v42 = vadd.f32 %v6981_v50, %v6968_v25 }
 0x3e6   :  { %v6994_v6 = vadd.f32 %v6993_v27, %v6980_v14 }
 0x3ed   :  { %v6995_v9 = vpop.f32.mrf.mxu1 }
 0x3ee   :  { %v6996_v52 = vadd.f32 %v6995_v9, %v6982_v42 }
 0x430   :  { %v7007_v18 = vpop.f32.mrf.mxu3 }
 0x431   :  { %v7008_v12 = vadd.f32 %v7007_v18, %v6994_v6 }
 0x433   :  { %7012 = vst [vmem:[#allocation10] sm:$0xff] %v7008_v12 }
 0x438   :  { %v7009_v21 = vpop.f32.mrf.mxu3 }
 0x439   :  { %v7010_v17 = vadd.f32 %v7009_v21, %v6996_v52 }
 0x43b   :  { %7013 = vst [vmem:[#allocation10 + $0x8] sm:$0xff] %v7010_v17 }
 0x43c   :  { %7017 = vsyncadd [#allocation4], 224  ;;  %s7020_s7 = sshll.u32 %s12011_s5, 4  ;;  %s11397_s8 = smov [#allocation10]   ;;  %s7021_s7 = int_to_ptr.hbm [resolvable:$true] %s7020_s7 }
 0x43d   :  { %s7018_s9 = sshll.u32 %s11397_s8, 4  ;;  %s11398_s10 = smov 32   ;;  %s7019_s9 = int_to_ptr.vmem [resolvable:$true] %s7018_s9 }
 0x43e   :  { %s11399_s1 = smov 2  }
 0x43f   :  { %7026 = dma.vmem_to_hbm [thread:$0]  %s7019_s9, 32, %s7021_s7, [#allocation4], %s11398_s10, %s11398_s10, %s11399_s1  }
 0x440   :  { %11387 = dma.done.wait [#allocation4], 256  }
 0x441   :  { %11388 = vsyncadd [#allocation4], 4294967040 }
 0x442   :  { %7031 = vsyncpa [#allocation3], 1 }
 0x443   :  { %7032 = vsyncpa [#allocation6], 1 }
 0x444   :  { %7033 = vsyncpa [#allocation9], 1 }
 0x445   :  { %7034 = vsyncpa [#allocation4], 1 }

</bundles_post_ra>
